<compile_context>
chip_gen: v6e
topology: v6e:2x2x1
jax: 0.10.0
libtpu: 0.0.40
codegen_flags: <defaults>
</compile_context>

<pallas_src>
import functools

import jax
import jax.numpy as jnp
from jax import lax
from jax.experimental import pallas as pl
from jax.experimental.pallas import tpu as pltpu

EPS = 1e-5                      # nn.BatchNorm2d default
_MXU_DTYPE = jnp.bfloat16       # MXU operand dtype (f32 accumulation)
_ACT_DTYPE = jnp.bfloat16       # storage dtype for activations (in/out of kernels)


def _vmem_limit_bytes():
    """Per-generation scoped-VMEM budget (leave headroom for compiler scratch)."""
    try:
        cap = pltpu.get_tpu_info().vmem_capacity_bytes
    except Exception:                       # query unavailable -> safe default
        return 32 * 1024 * 1024
    # 128 MiB chips (v5e/v6e) -> ~112 MiB; 64 MiB chips (v7x) -> ~48 MiB.
    return max(32 * 1024 * 1024, min(cap - 16 * 1024 * 1024, 112 * 1024 * 1024))


_VMEM_LIMIT = _vmem_limit_bytes()


def _pick_tile(m, preferred=1024):
    """Largest row tile <= preferred that divides m (multiples of 16 for bf16)."""
    for t in (preferred, 1024, 512, 256, 128, 64, 32, 16):
        if t <= m and m % t == 0:
            return t
    return m


def bn_scale_shift(stats, gamma, beta, count):
    """Fold batch stats + affine params into per-channel scale/shift (tiny JAX)."""
    mean = stats[0] / count
    var = jnp.maximum(stats[1] / count - mean * mean, 0.0)  # guard cancellation
    inv = lax.rsqrt(var + EPS)
    scale = (gamma * inv).astype(jnp.float32)
    shift = (beta - mean * scale).astype(jnp.float32)
    c = scale.shape[0]
    return scale.reshape(1, c), shift.reshape(1, c)


# ----------------------------------------------------------------------------
# Fused 1x1 conv: [optional BN(prev)+ReLU prologue] -> matmul -> partial-stats
# epilogue (one (1,2,C) block per grid step; reduced in JAX).
# ----------------------------------------------------------------------------
def _pw_conv_kernel(*refs, apply_bn_relu):
    if apply_bn_relu:
        x_ref, scale_ref, shift_ref, w_ref, y_ref, stats_ref = refs
        x = jnp.maximum(
            x_ref[...].astype(jnp.float32) * scale_ref[...] + shift_ref[...], 0.0)
        x = x.astype(_MXU_DTYPE)
    else:
        x_ref, w_ref, y_ref, stats_ref = refs
        x = x_ref[...].astype(_MXU_DTYPE)

    y = jnp.dot(x, w_ref[...], preferred_element_type=jnp.float32)  # (tm, cout) f32
    y_ref[...] = y.astype(y_ref.dtype)
    stats_ref[0] = jnp.concatenate(
        [jnp.sum(y, axis=0, keepdims=True),
         jnp.sum(y * y, axis=0, keepdims=True)], axis=0)


def pointwise_conv_fused(x, w, scale=None, shift=None, out_dtype=_ACT_DTYPE,
                         tm=1024):
    m, cin = x.shape
    cout = w.shape[1]
    tm = _pick_tile(m, tm)
    nt = m // tm
    apply_bn_relu = scale is not None

    kernel = functools.partial(_pw_conv_kernel, apply_bn_relu=apply_bn_relu)
    in_specs = [pl.BlockSpec((tm, cin), lambda i: (i, 0))]
    args = [x]
    if apply_bn_relu:
        in_specs += [pl.BlockSpec((1, cin), lambda i: (0, 0)),
                     pl.BlockSpec((1, cin), lambda i: (0, 0))]
        args += [scale, shift]
    in_specs.append(pl.BlockSpec((cin, cout), lambda i: (0, 0)))
    args.append(w.astype(_MXU_DTYPE))

    y, stats = pl.pallas_call(
        kernel,
        out_shape=(jax.ShapeDtypeStruct((m, cout), out_dtype),
                   jax.ShapeDtypeStruct((nt, 2, cout), jnp.float32)),
        grid=(nt,),
        in_specs=in_specs,
        out_specs=(pl.BlockSpec((tm, cout), lambda i: (i, 0)),
                   pl.BlockSpec((1, 2, cout), lambda i: (i, 0, 0))),
        compiler_params=pltpu.CompilerParams(
            dimension_semantics=("parallel",),
            vmem_limit_bytes=_VMEM_LIMIT),
    )(*args)
    return y, jnp.sum(stats, axis=0)


# ----------------------------------------------------------------------------
# Fused conv1 + downsample-conv (stride==1): one x read feeds two matmuls,
# two outputs and two partial-stats blocks.
# ----------------------------------------------------------------------------
def _pw_dual_kernel(x_ref, w1_ref, wd_ref, y1_ref, yd_ref, s1_ref, sd_ref):
    x = x_ref[...].astype(_MXU_DTYPE)
    y1 = jnp.dot(x, w1_ref[...], preferred_element_type=jnp.float32)
    yd = jnp.dot(x, wd_ref[...], preferred_element_type=jnp.float32)
    y1_ref[...] = y1.astype(y1_ref.dtype)
    yd_ref[...] = yd.astype(yd_ref.dtype)
    s1_ref[0] = jnp.concatenate(
        [jnp.sum(y1, axis=0, keepdims=True),
         jnp.sum(y1 * y1, axis=0, keepdims=True)], axis=0)
    sd_ref[0] = jnp.concatenate(
        [jnp.sum(yd, axis=0, keepdims=True),
         jnp.sum(yd * yd, axis=0, keepdims=True)], axis=0)


def pointwise_conv_dual(x, w1, wd, out_dtype=_ACT_DTYPE, tm=1024):
    m, cin = x.shape
    c1, cd = w1.shape[1], wd.shape[1]
    tm = _pick_tile(m, tm)
    nt = m // tm
    y1, yd, s1, sd = pl.pallas_call(
        _pw_dual_kernel,
        out_shape=(jax.ShapeDtypeStruct((m, c1), out_dtype),
                   jax.ShapeDtypeStruct((m, cd), out_dtype),
                   jax.ShapeDtypeStruct((nt, 2, c1), jnp.float32),
                   jax.ShapeDtypeStruct((nt, 2, cd), jnp.float32)),
        grid=(nt,),
        in_specs=[pl.BlockSpec((tm, cin), lambda i: (i, 0)),
                  pl.BlockSpec((cin, c1), lambda i: (0, 0)),
                  pl.BlockSpec((cin, cd), lambda i: (0, 0))],
        out_specs=(pl.BlockSpec((tm, c1), lambda i: (i, 0)),
                   pl.BlockSpec((tm, cd), lambda i: (i, 0)),
                   pl.BlockSpec((1, 2, c1), lambda i: (i, 0, 0)),
                   pl.BlockSpec((1, 2, cd), lambda i: (i, 0, 0))),
        compiler_params=pltpu.CompilerParams(
            dimension_semantics=("parallel",),
            vmem_limit_bytes=_VMEM_LIMIT),
    )(x, w1.astype(_MXU_DTYPE), wd.astype(_MXU_DTYPE))
    return y1, yd, jnp.sum(s1, axis=0), jnp.sum(sd, axis=0)


# ----------------------------------------------------------------------------
# Fused 3x3 conv: BN1+ReLU prologue -> bf16 zero-padded VMEM tile -> im2col
# pack (bf16) -> single K=9*Cin MXU matmul -> partial-stats epilogue.
# ----------------------------------------------------------------------------
def _conv3x3_kernel(x_ref, scale_ref, shift_ref, w_ref, y_ref, stats_ref,
                    xpad_ref, col_ref, *, stride, dilation, pad):
    _, h, w, cin = x_ref.shape
    _, ho, wo, cout = y_ref.shape

    # Zero the padded scratch every step (safe under "parallel" grid semantics).
    xpad_ref[...] = jnp.zeros_like(xpad_ref)

    # BN(prev) + ReLU prologue, stored as bf16 into the padded interior so the
    # conv zero-padding never sees BN/ReLU.
    a = jnp.maximum(
        x_ref[0].astype(jnp.float32) * scale_ref[...] + shift_ref[...], 0.0)
    xpad_ref[pad:pad + h, pad:pad + w, :] = a.astype(xpad_ref.dtype)

    # im2col: pack the 9 shifted taps into a (ho*wo, 9*cin) bf16 column buffer.
    xp = xpad_ref[...]
    for t in range(9):                       # unrolled
        kh, kw = t // 3, t % 3
        h0, w0 = kh * dilation, kw * dilation
        # TODO(synk): for stride > 1 move the subsampling to DMA time
        # (strided BlockSpec / pre-strided layout); demo uses stride == 1.
        tap = lax.slice(
            xp, (h0, w0, 0),
            (h0 + (ho - 1) * stride + 1, w0 + (wo - 1) * stride + 1, cin),
            (stride, stride, 1))             # (ho, wo, cin) bf16
        col_ref[:, t * cin:(t + 1) * cin] = tap.reshape(ho * wo, cin)

    # One large-K matmul; result stays register-resident f32 (no VMEM RMW acc).
    y = jnp.dot(col_ref[...], w_ref[...], preferred_element_type=jnp.float32)
    y_ref[0] = y.reshape(ho, wo, cout).astype(y_ref.dtype)
    stats_ref[0] = jnp.concatenate(
        [jnp.sum(y, axis=0, keepdims=True),
         jnp.sum(y * y, axis=0, keepdims=True)], axis=0)


def conv3x3_fused(x_nhwc, w_flat, scale, shift, stride=1, dilation=1,
                  out_dtype=_ACT_DTYPE):
    n, h, width, cin = x_nhwc.shape
    cout = w_flat.shape[-1]
    pad = dilation
    ho = (h + 2 * pad - (2 * dilation + 1)) // stride + 1
    wo = (width + 2 * pad - (2 * dilation + 1)) // stride + 1
    hp, wp = h + 2 * pad, width + 2 * pad

    kernel = functools.partial(_conv3x3_kernel, stride=stride,
                               dilation=dilation, pad=pad)
    # TODO(synk): for very large spatial sizes, tile over output-row blocks
    # with a halo instead of one whole image per grid step.
    y, stats = pl.pallas_call(
        kernel,
        out_shape=(jax.ShapeDtypeStruct((n, ho, wo, cout), out_dtype),
                   jax.ShapeDtypeStruct((n, 2, cout), jnp.float32)),
        grid=(n,),
        in_specs=[pl.BlockSpec((1, h, width, cin), lambda i: (i, 0, 0, 0)),
                  pl.BlockSpec((1, cin), lambda i: (0, 0)),
                  pl.BlockSpec((1, cin), lambda i: (0, 0)),
                  pl.BlockSpec((9 * cin, cout), lambda i: (0, 0))],
        out_specs=(pl.BlockSpec((1, ho, wo, cout), lambda i: (i, 0, 0, 0)),
                   pl.BlockSpec((1, 2, cout), lambda i: (i, 0, 0))),
        scratch_shapes=[pltpu.VMEM((hp, wp, cin), _ACT_DTYPE),
                        pltpu.VMEM((ho * wo, 9 * cin), _MXU_DTYPE)],
        compiler_params=pltpu.CompilerParams(
            dimension_semantics=("parallel",),
            vmem_limit_bytes=_VMEM_LIMIT),
    )(x_nhwc, scale, shift, w_flat.astype(_MXU_DTYPE))
    return y, jnp.sum(stats, axis=0)


# ----------------------------------------------------------------------------
# Final fused elementwise pass: bn3(y3) + [bn_d(downsample) | identity] + ReLU
# ----------------------------------------------------------------------------
def _residual_bn_relu_kernel(*refs, with_ds_bn):
    if with_ds_bn:
        y3_ref, s3_ref, b3_ref, id_ref, sd_ref, bd_ref, out_ref = refs
        idn = id_ref[...].astype(jnp.float32) * sd_ref[...] + bd_ref[...]
    else:
        y3_ref, s3_ref, b3_ref, id_ref, out_ref = refs
        idn = id_ref[...].astype(jnp.float32)
    out = y3_ref[...].astype(jnp.float32) * s3_ref[...] + b3_ref[...] + idn
    out_ref[...] = jnp.maximum(out, 0.0).astype(out_ref.dtype)


def residual_bn_relu(y3, scale3, shift3, identity, scaled=None, shiftd=None,
                     out_dtype=_ACT_DTYPE, tm=1024):
    m, c = y3.shape
    tm = _pick_tile(m, tm)
    with_ds_bn = scaled is not None
    kernel = functools.partial(_residual_bn_relu_kernel, with_ds_bn=with_ds_bn)
    in_specs = [pl.BlockSpec((tm, c), lambda i: (i, 0)),
                pl.BlockSpec((1, c), lambda i: (0, 0)),
                pl.BlockSpec((1, c), lambda i: (0, 0)),
                pl.BlockSpec((tm, c), lambda i: (i, 0))]
    args = [y3, scale3, shift3, identity]
    if with_ds_bn:
        in_specs += [pl.BlockSpec((1, c), lambda i: (0, 0)),
                     pl.BlockSpec((1, c), lambda i: (0, 0))]
        args += [scaled, shiftd]
    return pl.pallas_call(
        kernel,
        out_shape=jax.ShapeDtypeStruct((m, c), out_dtype),
        grid=(m // tm,),
        in_specs=in_specs,
        out_specs=pl.BlockSpec((tm, c), lambda i: (i, 0)),
        compiler_params=pltpu.CompilerParams(
            dimension_semantics=("parallel",),
            vmem_limit_bytes=_VMEM_LIMIT),
    )(*args)


# ----------------------------------------------------------------------------
# Bottleneck forward (NCHW in / NCHW out, like the PyTorch module).
# ----------------------------------------------------------------------------
def bottleneck_forward(x_nchw, params, *, stride=1, dilation=1,
                       need_downsample=False):
    n, cin, h, width = x_nchw.shape
    planes = params["w1"].shape[1]
    cout = params["w3"].shape[1]
    if not need_downsample:
        assert stride == 1 and cin == cout, (
            "identity path requires stride == 1 and inplanes == planes * expansion")

    # NHWC, bf16 feed: the 1x1 convs are memory-bound and the MXU consumes bf16.
    x = jnp.transpose(x_nchw, (0, 2, 3, 1)).astype(_ACT_DTYPE)
    m_in = n * h * width
    x_flat = x.reshape(m_in, cin)

    w1 = params["w1"].astype(_MXU_DTYPE)
    w2 = params["w2"].reshape(9 * planes, planes).astype(_MXU_DTYPE)  # HWIO flat
    w3 = params["w3"].astype(_MXU_DTYPE)

    yd = statsd = None
    if need_downsample and stride == 1:
        # conv1 and downsample-conv share one HBM read of x.
        wd = params["wd"].astype(_MXU_DTYPE)
        y1, yd, stats1, statsd = pointwise_conv_dual(x_flat, w1, wd)
    else:
        y1, stats1 = pointwise_conv_fused(x_flat, w1)
        if need_downsample:
            wd = params["wd"].astype(_MXU_DTYPE)
            # TODO(synk): move this spatial subsample to DMA time (BlockSpec
            # index_map) to avoid the extra HBM pass when stride > 1.
            x_ds = x[:, ::stride, ::stride, :].reshape(-1, cin)
            yd, statsd = pointwise_conv_fused(x_ds, wd)

    s1, b1 = bn_scale_shift(stats1, params["g1"], params["b1"], float(m_in))

    # conv2 (3x3, stride, dilation, padding=dilation) with fused BN1+ReLU
    # prologue and BN2 partial-stats epilogue.
    y2, stats2 = conv3x3_fused(y1.reshape(n, h, width, planes), w2, s1, b1,
                               stride=stride, dilation=dilation)
    _, ho, wo, _ = y2.shape
    m_out = n * ho * wo
    s2, b2 = bn_scale_shift(stats2, params["g2"], params["b2"], float(m_out))

    # conv3 (1x1) with fused BN2-apply+ReLU prologue and BN3 stats epilogue.
    y3, stats3 = pointwise_conv_fused(y2.reshape(m_out, planes), w3,
                                      scale=s2, shift=b2)
    s3, b3 = bn_scale_shift(stats3, params["g3"], params["b3"], float(m_out))

    if need_downsample:
        sd, bd = bn_scale_shift(statsd, params["gd"], params["bd"], float(m_out))
        out = residual_bn_relu(y3, s3, b3, yd, sd, bd)
    else:
        out = residual_bn_relu(y3, s3, b3, x_flat)

    # TODO(synk): keep NHWC/bf16 if the downstream consumer allows; the module
    # contract is NCHW float32, so transpose + upcast here.
    return jnp.transpose(out.reshape(n, ho, wo, cout),
                         (0, 3, 1, 2)).astype(jnp.float32)


# ----------------------------------------------------------------------------
# Pure-JAX f32 reference (same training-mode BN semantics) for validation.
# ----------------------------------------------------------------------------
def ref_bottleneck(x_nchw, params, stride, dilation, need_downsample):
    hi = lax.Precision.HIGHEST
    x = jnp.transpose(x_nchw, (0, 2, 3, 1))

    def conv1x1(z, w):
        return jnp.einsum("nhwc,cd->nhwd", z, w, precision=hi)

    def bn(y, g, b):
        m = jnp.mean(y, axis=(0, 1, 2), keepdims=True)
        msq = jnp.mean(y * y, axis=(0, 1, 2), keepdims=True)
        var = msq - m * m
        return (y - m) * lax.rsqrt(var + EPS) * g + b

    out = jax.nn.relu(bn(conv1x1(x, params["w1"]), params["g1"], params["b1"]))
    out = lax.conv_general_dilated(
        out, params["w2"], window_strides=(stride, stride),
        padding=[(dilation, dilation), (dilation, dilation)],
        rhs_dilation=(dilation, dilation),
        dimension_numbers=("NHWC", "HWIO", "NHWC"), precision=hi)
    out = jax.nn.relu(bn(out, params["g2"], params["b2"]))
    out = bn(conv1x1(out, params["w3"]), params["g3"], params["b3"])
    if need_downsample:
        idn = bn(conv1x1(x[:, ::stride, ::stride, :], params["wd"]),
                 params["gd"], params["bd"])
    else:
        idn = x
    out = jax.nn.relu(out + idn)
    return jnp.transpose(out, (0, 3, 1, 2))


if __name__ == "__main__":
    # Small, module-consistent shapes.
    N, inplanes, H, W = 2, 8, 16, 16
    planes, stride, dilation = 4, 1, 1
    expansion = 4
    need_downsample = True  # inplanes != planes * expansion

    key = jax.random.PRNGKey(0)
    ks = jax.random.split(key, 13)
    params = {
        "w1": 0.1 * jax.random.normal(ks[0], (inplanes, planes), jnp.float32),
        "w2": 0.1 * jax.random.normal(ks[1], (3, 3, planes, planes),
                                      jnp.float32),
        "w3": 0.1 * jax.random.normal(ks[2], (planes, planes * expansion),
                                      jnp.float32),
        "wd": 0.1 * jax.random.normal(ks[3], (inplanes, planes * expansion),
                                      jnp.float32),
        "g1": 1.0 + 0.1 * jax.random.normal(ks[4], (planes,), jnp.float32),
        "b1": 0.1 * jax.random.normal(ks[5], (planes,), jnp.float32),
        "g2": 1.0 + 0.1 * jax.random.normal(ks[6], (planes,), jnp.float32),
        "b2": 0.1 * jax.random.normal(ks[7], (planes,), jnp.float32),
        "g3": 1.0 + 0.1 * jax.random.normal(ks[8], (planes * expansion,),
                                            jnp.float32),
        "b3": 0.1 * jax.random.normal(ks[9], (planes * expansion,),
                                      jnp.float32),
        "gd": 1.0 + 0.1 * jax.random.normal(ks[10], (planes * expansion,),
                                            jnp.float32),
        "bd": 0.1 * jax.random.normal(ks[11], (planes * expansion,),
                                      jnp.float32),
    }
    x = jax.random.normal(ks[12], (N, inplanes, H, W), jnp.float32)

    fwd = jax.jit(functools.partial(bottleneck_forward, stride=stride,
                                    dilation=dilation,
                                    need_downsample=need_downsample))
    out = jax.block_until_ready(fwd(x, params))

    assert out.shape == (N, planes * expansion, H, W), out.shape
    ref = ref_bottleneck(x, params, stride, dilation, need_downsample)
    # Tolerance accounts for bf16 MXU operands / bf16 activation storage
    # (f32 accumulation) versus the f32-HIGHEST reference.
    if not bool(jnp.allclose(out, ref, atol=5e-2, rtol=5e-2)):
        raise AssertionError(
            f"mismatch vs reference, max abs err = {jnp.max(jnp.abs(out - ref))}")
    print("KERNEL_OK")
</pallas_src>

<mosaic_0001>
module attributes {stable_mosaic.version = 11 : i64} {
  func.func @_pw_dual_kernel(%arg0: i32, %arg1: memref<512x8xbf16, #tpu.memory_space<vmem>>, %arg2: memref<8x4xbf16, #tpu.memory_space<vmem>>, %arg3: memref<8x16xbf16, #tpu.memory_space<vmem>>, %arg4: memref<512x4xbf16, #tpu.memory_space<vmem>>, %arg5: memref<512x16xbf16, #tpu.memory_space<vmem>>, %arg6: memref<1x2x4xf32, #tpu.memory_space<vmem>>, %arg7: memref<1x2x16xf32, #tpu.memory_space<vmem>>) attributes {dimension_semantics = [#tpu.dimension_semantics<parallel>], iteration_bounds = array<i64: 1>, scalar_prefetch = 0 : i64, scratch_operands = 0 : i64, tpu.core_type = #tpu.core_type<tc>, window_params = [{transform_indices = @transform_0, window_bounds = array<i64: 512, 8>}, {pipeline_mode = #tpu.pipeline_mode<synchronous>, transform_indices = @transform_1, window_bounds = array<i64: 8, 4>}, {pipeline_mode = #tpu.pipeline_mode<synchronous>, transform_indices = @transform_2, window_bounds = array<i64: 8, 16>}, {transform_indices = @transform_3, window_bounds = array<i64: 512, 4>}, {transform_indices = @transform_4, window_bounds = array<i64: 512, 16>}, {transform_indices = @transform_5, window_bounds = array<i64: 1, 2, 4>}, {transform_indices = @transform_6, window_bounds = array<i64: 1, 2, 16>}]} {
    %c0 = arith.constant 0 : index
    %c0_0 = arith.constant 0 : index
    %0 = vector.load %arg1[%c0, %c0_0] : memref<512x8xbf16, #tpu.memory_space<vmem>>, vector<512x8xbf16>
    %c0_1 = arith.constant 0 : index
    %c0_2 = arith.constant 0 : index
    %1 = vector.load %arg2[%c0_1, %c0_2] : memref<8x4xbf16, #tpu.memory_space<vmem>>, vector<8x4xbf16>
    %cst = arith.constant dense<0.000000e+00> : vector<512x4xf32>
    %2 = tpu.matmul %0, %1, %cst {dimension_numbers = #tpu.dot_dimension_numbers<[1], [0], [0], [1], [0, 0, 1, 1], [], []>} : vector<512x8xbf16>, vector<8x4xbf16>, vector<512x4xf32> -> vector<512x4xf32>
    %c0_3 = arith.constant 0 : index
    %c0_4 = arith.constant 0 : index
    %3 = vector.load %arg3[%c0_3, %c0_4] : memref<8x16xbf16, #tpu.memory_space<vmem>>, vector<8x16xbf16>
    %cst_5 = arith.constant dense<0.000000e+00> : vector<512x16xf32>
    %4 = tpu.matmul %0, %3, %cst_5 {dimension_numbers = #tpu.dot_dimension_numbers<[1], [0], [0], [1], [0, 0, 1, 1], [], []>} : vector<512x8xbf16>, vector<8x16xbf16>, vector<512x16xf32> -> vector<512x16xf32>
    %5 = arith.truncf %2 : vector<512x4xf32> to vector<512x4xbf16>
    %c0_6 = arith.constant 0 : index
    %c0_7 = arith.constant 0 : index
    %6 = vector.load %arg4[%c0_6, %c0_7] : memref<512x4xbf16, #tpu.memory_space<vmem>>, vector<512x4xbf16>
    tpu.vector_store %arg4[%c0_6, %c0_7], %5 {strides = array<i32>} : memref<512x4xbf16, #tpu.memory_space<vmem>>, vector<512x4xbf16>,
    %7 = arith.truncf %4 : vector<512x16xf32> to vector<512x16xbf16>
    %c0_8 = arith.constant 0 : index
    %c0_9 = arith.constant 0 : index
    %8 = vector.load %arg5[%c0_8, %c0_9] : memref<512x16xbf16, #tpu.memory_space<vmem>>, vector<512x16xbf16>
    tpu.vector_store %arg5[%c0_8, %c0_9], %7 {strides = array<i32>} : memref<512x16xbf16, #tpu.memory_space<vmem>>, vector<512x16xbf16>,
    %cst_10 = arith.constant dense<0.000000e+00> : vector<4xf32>
    %9 = vector.multi_reduction <add>, %2, %cst_10 [0] : vector<512x4xf32> to vector<4xf32>
    %10 = vector.shape_cast %9 : vector<4xf32> to vector<1x4xf32>
    %11 = arith.mulf %2, %2 : vector<512x4xf32>
    %cst_11 = arith.constant dense<0.000000e+00> : vector<4xf32>
    %12 = vector.multi_reduction <add>, %11, %cst_11 [0] : vector<512x4xf32> to vector<4xf32>
    %13 = vector.shape_cast %12 : vector<4xf32> to vector<1x4xf32>
    %14 = tpu.concatenate %10, %13 in 0 : vector<1x4xf32>, vector<1x4xf32> -> vector<2x4xf32>
    %c0_12 = arith.constant 0 : index
    %c0_13 = arith.constant 0 : index
    %c0_14 = arith.constant 0 : index
    %15 = vector.load %arg6[%c0_12, %c0_13, %c0_14] : memref<1x2x4xf32, #tpu.memory_space<vmem>>, vector<1x2x4xf32>
    %16 = vector.shape_cast %15 : vector<1x2x4xf32> to vector<2x4xf32>
    %17 = vector.shape_cast %14 : vector<2x4xf32> to vector<1x2x4xf32>
    tpu.vector_store %arg6[%c0_12, %c0_13, %c0_14], %17 {strides = array<i32>} : memref<1x2x4xf32, #tpu.memory_space<vmem>>, vector<1x2x4xf32>,
    %cst_15 = arith.constant dense<0.000000e+00> : vector<16xf32>
    %18 = vector.multi_reduction <add>, %4, %cst_15 [0] : vector<512x16xf32> to vector<16xf32>
    %19 = vector.shape_cast %18 : vector<16xf32> to vector<1x16xf32>
    %20 = arith.mulf %4, %4 : vector<512x16xf32>
    %cst_16 = arith.constant dense<0.000000e+00> : vector<16xf32>
    %21 = vector.multi_reduction <add>, %20, %cst_16 [0] : vector<512x16xf32> to vector<16xf32>
    %22 = vector.shape_cast %21 : vector<16xf32> to vector<1x16xf32>
    %23 = tpu.concatenate %19, %22 in 0 : vector<1x16xf32>, vector<1x16xf32> -> vector<2x16xf32>
    %c0_17 = arith.constant 0 : index
    %c0_18 = arith.constant 0 : index
    %c0_19 = arith.constant 0 : index
    %24 = vector.load %arg7[%c0_17, %c0_18, %c0_19] : memref<1x2x16xf32, #tpu.memory_space<vmem>>, vector<1x2x16xf32>
    %25 = vector.shape_cast %24 : vector<1x2x16xf32> to vector<2x16xf32>
    %26 = vector.shape_cast %23 : vector<2x16xf32> to vector<1x2x16xf32>
    tpu.vector_store %arg7[%c0_17, %c0_18, %c0_19], %26 {strides = array<i32>} : memref<1x2x16xf32, #tpu.memory_space<vmem>>, vector<1x2x16xf32>,
    return
  }
  func.func @transform_0(%arg0: i32) -> (i32, i32) {
    %c0_i32 = arith.constant 0 : i32
    %c0_i32_0 = arith.constant 0 : i32
    return %arg0, %c0_i32 : i32, i32
  }
  func.func @transform_1(%arg0: i32) -> (i32, i32) {
    %c0_i32 = arith.constant 0 : i32
    %c0_i32_0 = arith.constant 0 : i32
    %c0_i32_1 = arith.constant 0 : i32
    return %c0_i32, %c0_i32_0 : i32, i32
  }
  func.func @transform_2(%arg0: i32) -> (i32, i32) {
    %c0_i32 = arith.constant 0 : i32
    %c0_i32_0 = arith.constant 0 : i32
    %c0_i32_1 = arith.constant 0 : i32
    return %c0_i32, %c0_i32_0 : i32, i32
  }
  func.func @transform_3(%arg0: i32) -> (i32, i32) {
    %c0_i32 = arith.constant 0 : i32
    %c0_i32_0 = arith.constant 0 : i32
    return %arg0, %c0_i32 : i32, i32
  }
  func.func @transform_4(%arg0: i32) -> (i32, i32) {
    %c0_i32 = arith.constant 0 : i32
    %c0_i32_0 = arith.constant 0 : i32
    return %arg0, %c0_i32 : i32, i32
  }
  func.func @transform_5(%arg0: i32) -> (i32, i32, i32) {
    %c0_i32 = arith.constant 0 : i32
    %c0_i32_0 = arith.constant 0 : i32
    %c0_i32_1 = arith.constant 0 : i32
    return %arg0, %c0_i32, %c0_i32_0 : i32, i32, i32
  }
  func.func @transform_6(%arg0: i32) -> (i32, i32, i32) {
    %c0_i32 = arith.constant 0 : i32
    %c0_i32_0 = arith.constant 0 : i32
    %c0_i32_1 = arith.constant 0 : i32
    return %arg0, %c0_i32, %c0_i32_0 : i32, i32, i32
  }
}

module attributes {stable_mosaic.version = 11 : i64} {
  func.func @_conv3x3_kernel(%arg0: i32, %arg1: memref<1x16x16x4xbf16, #tpu.memory_space<vmem>>, %arg2: memref<1x4xf32, #tpu.memory_space<vmem>>, %arg3: memref<1x4xf32, #tpu.memory_space<vmem>>, %arg4: memref<36x4xbf16, #tpu.memory_space<vmem>>, %arg5: memref<1x16x16x4xbf16, #tpu.memory_space<vmem>>, %arg6: memref<1x2x4xf32, #tpu.memory_space<vmem>>, %arg7: memref<18x18x4xbf16, #tpu.memory_space<vmem>>, %arg8: memref<256x36xbf16, #tpu.memory_space<vmem>>) attributes {dimension_semantics = [#tpu.dimension_semantics<parallel>], iteration_bounds = array<i64: 2>, scalar_prefetch = 0 : i64, scratch_operands = 2 : i64, tpu.core_type = #tpu.core_type<tc>, window_params = [{transform_indices = @transform_0, window_bounds = array<i64: 1, 16, 16, 4>}, {pipeline_mode = #tpu.pipeline_mode<synchronous>, transform_indices = @transform_1, window_bounds = array<i64: 1, 4>}, {pipeline_mode = #tpu.pipeline_mode<synchronous>, transform_indices = @transform_2, window_bounds = array<i64: 1, 4>}, {pipeline_mode = #tpu.pipeline_mode<synchronous>, transform_indices = @transform_3, window_bounds = array<i64: 36, 4>}, {transform_indices = @transform_4, window_bounds = array<i64: 1, 16, 16, 4>}, {transform_indices = @transform_5, window_bounds = array<i64: 1, 2, 4>}]} {
    %cst = arith.constant 0.000000e+00 : bf16
    %0 = vector.broadcast %cst : bf16 to vector<18x18x4xbf16>
    %c0 = arith.constant 0 : index
    %c0_0 = arith.constant 0 : index
    %c0_1 = arith.constant 0 : index
    %1 = vector.load %arg7[%c0, %c0_0, %c0_1] : memref<18x18x4xbf16, #tpu.memory_space<vmem>>, vector<18x18x4xbf16>
    tpu.vector_store %arg7[%c0, %c0_0, %c0_1], %0 {strides = array<i32>} : memref<18x18x4xbf16, #tpu.memory_space<vmem>>, vector<18x18x4xbf16>,
    %c0_2 = arith.constant 0 : index
    %c0_3 = arith.constant 0 : index
    %c0_4 = arith.constant 0 : index
    %c0_5 = arith.constant 0 : index
    %2 = vector.load %arg1[%c0_2, %c0_3, %c0_4, %c0_5] : memref<1x16x16x4xbf16, #tpu.memory_space<vmem>>, vector<1x16x16x4xbf16>
    %3 = vector.shape_cast %2 : vector<1x16x16x4xbf16> to vector<16x16x4xbf16>
    %4 = arith.extf %3 : vector<16x16x4xbf16> to vector<16x16x4xf32>
    %c0_6 = arith.constant 0 : index
    %c0_7 = arith.constant 0 : index
    %5 = vector.load %arg2[%c0_6, %c0_7] : memref<1x4xf32, #tpu.memory_space<vmem>>, vector<1x4xf32>
    %6 = vector.shape_cast %5 : vector<1x4xf32> to vector<1x1x4xf32>
    %7 = vector.broadcast %6 : vector<1x1x4xf32> to vector<16x16x4xf32>
    %8 = arith.mulf %4, %7 : vector<16x16x4xf32>
    %c0_8 = arith.constant 0 : index
    %c0_9 = arith.constant 0 : index
    %9 = vector.load %arg3[%c0_8, %c0_9] : memref<1x4xf32, #tpu.memory_space<vmem>>, vector<1x4xf32>
    %10 = vector.shape_cast %9 : vector<1x4xf32> to vector<1x1x4xf32>
    %11 = vector.broadcast %10 : vector<1x1x4xf32> to vector<16x16x4xf32>
    %12 = arith.addf %8, %11 : vector<16x16x4xf32>
    %cst_10 = arith.constant 0.000000e+00 : f32
    %13 = vector.broadcast %cst_10 : f32 to vector<16x16x4xf32>
    %14 = arith.maximumf %12, %13 : vector<16x16x4xf32>
    %15 = arith.truncf %14 : vector<16x16x4xf32> to vector<16x16x4xbf16>
    %c1 = arith.constant 1 : index
    %c1_11 = arith.constant 1 : index
    %c0_12 = arith.constant 0 : index
    %16 = vector.load %arg7[%c1, %c1_11, %c0_12] : memref<18x18x4xbf16, #tpu.memory_space<vmem>>, vector<16x16x4xbf16>
    tpu.vector_store %arg7[%c1, %c1_11, %c0_12], %15 {strides = array<i32>} : memref<18x18x4xbf16, #tpu.memory_space<vmem>>, vector<16x16x4xbf16>,
    %c0_13 = arith.constant 0 : index
    %c0_14 = arith.constant 0 : index
    %c0_15 = arith.constant 0 : index
    %17 = vector.load %arg7[%c0_13, %c0_14, %c0_15] : memref<18x18x4xbf16, #tpu.memory_space<vmem>>, vector<18x18x4xbf16>
    %18 = vector.extract_strided_slice %17 {offsets = [0, 0, 0], sizes = [16, 16, 4], strides = [1, 1, 1]} : vector<18x18x4xbf16> to vector<16x16x4xbf16>
    %19 = vector.shape_cast %18 : vector<16x16x4xbf16> to vector<256x4xbf16>
    %c0_16 = arith.constant 0 : index
    %c0_17 = arith.constant 0 : index
    %20 = vector.load %arg8[%c0_16, %c0_17] : memref<256x36xbf16, #tpu.memory_space<vmem>>, vector<256x4xbf16>
    tpu.vector_store %arg8[%c0_16, %c0_17], %19 {strides = array<i32>} : memref<256x36xbf16, #tpu.memory_space<vmem>>, vector<256x4xbf16>,
    %21 = vector.extract_strided_slice %17 {offsets = [0, 1, 0], sizes = [16, 16, 4], strides = [1, 1, 1]} : vector<18x18x4xbf16> to vector<16x16x4xbf16>
    %22 = vector.shape_cast %21 : vector<16x16x4xbf16> to vector<256x4xbf16>
    %c0_18 = arith.constant 0 : index
    %c4 = arith.constant 4 : index
    %23 = vector.load %arg8[%c0_18, %c4] : memref<256x36xbf16, #tpu.memory_space<vmem>>, vector<256x4xbf16>
    tpu.vector_store %arg8[%c0_18, %c4], %22 {strides = array<i32>} : memref<256x36xbf16, #tpu.memory_space<vmem>>, vector<256x4xbf16>,
    %24 = vector.extract_strided_slice %17 {offsets = [0, 2, 0], sizes = [16, 16, 4], strides = [1, 1, 1]} : vector<18x18x4xbf16> to vector<16x16x4xbf16>
    %25 = vector.shape_cast %24 : vector<16x16x4xbf16> to vector<256x4xbf16>
    %c0_19 = arith.constant 0 : index
    %c8 = arith.constant 8 : index
    %26 = vector.load %arg8[%c0_19, %c8] : memref<256x36xbf16, #tpu.memory_space<vmem>>, vector<256x4xbf16>
    tpu.vector_store %arg8[%c0_19, %c8], %25 {strides = array<i32>} : memref<256x36xbf16, #tpu.memory_space<vmem>>, vector<256x4xbf16>,
    %27 = vector.extract_strided_slice %17 {offsets = [1, 0, 0], sizes = [16, 16, 4], strides = [1, 1, 1]} : vector<18x18x4xbf16> to vector<16x16x4xbf16>
    %28 = vector.shape_cast %27 : vector<16x16x4xbf16> to vector<256x4xbf16>
    %c0_20 = arith.constant 0 : index
    %c12 = arith.constant 12 : index
    %29 = vector.load %arg8[%c0_20, %c12] : memref<256x36xbf16, #tpu.memory_space<vmem>>, vector<256x4xbf16>
    tpu.vector_store %arg8[%c0_20, %c12], %28 {strides = array<i32>} : memref<256x36xbf16, #tpu.memory_space<vmem>>, vector<256x4xbf16>,
    %30 = vector.extract_strided_slice %17 {offsets = [1, 1, 0], sizes = [16, 16, 4], strides = [1, 1, 1]} : vector<18x18x4xbf16> to vector<16x16x4xbf16>
    %31 = vector.shape_cast %30 : vector<16x16x4xbf16> to vector<256x4xbf16>
    %c0_21 = arith.constant 0 : index
    %c16 = arith.constant 16 : index
    %32 = vector.load %arg8[%c0_21, %c16] : memref<256x36xbf16, #tpu.memory_space<vmem>>, vector<256x4xbf16>
    tpu.vector_store %arg8[%c0_21, %c16], %31 {strides = array<i32>} : memref<256x36xbf16, #tpu.memory_space<vmem>>, vector<256x4xbf16>,
    %33 = vector.extract_strided_slice %17 {offsets = [1, 2, 0], sizes = [16, 16, 4], strides = [1, 1, 1]} : vector<18x18x4xbf16> to vector<16x16x4xbf16>
    %34 = vector.shape_cast %33 : vector<16x16x4xbf16> to vector<256x4xbf16>
    %c0_22 = arith.constant 0 : index
    %c20 = arith.constant 20 : index
    %35 = vector.load %arg8[%c0_22, %c20] : memref<256x36xbf16, #tpu.memory_space<vmem>>, vector<256x4xbf16>
    tpu.vector_store %arg8[%c0_22, %c20], %34 {strides = array<i32>} : memref<256x36xbf16, #tpu.memory_space<vmem>>, vector<256x4xbf16>,
    %36 = vector.extract_strided_slice %17 {offsets = [2, 0, 0], sizes = [16, 16, 4], strides = [1, 1, 1]} : vector<18x18x4xbf16> to vector<16x16x4xbf16>
    %37 = vector.shape_cast %36 : vector<16x16x4xbf16> to vector<256x4xbf16>
    %c0_23 = arith.constant 0 : index
    %c24 = arith.constant 24 : index
    %38 = vector.load %arg8[%c0_23, %c24] : memref<256x36xbf16, #tpu.memory_space<vmem>>, vector<256x4xbf16>
    tpu.vector_store %arg8[%c0_23, %c24], %37 {strides = array<i32>} : memref<256x36xbf16, #tpu.memory_space<vmem>>, vector<256x4xbf16>,
    %39 = vector.extract_strided_slice %17 {offsets = [2, 1, 0], sizes = [16, 16, 4], strides = [1, 1, 1]} : vector<18x18x4xbf16> to vector<16x16x4xbf16>
    %40 = vector.shape_cast %39 : vector<16x16x4xbf16> to vector<256x4xbf16>
    %c0_24 = arith.constant 0 : index
    %c28 = arith.constant 28 : index
    %41 = vector.load %arg8[%c0_24, %c28] : memref<256x36xbf16, #tpu.memory_space<vmem>>, vector<256x4xbf16>
    tpu.vector_store %arg8[%c0_24, %c28], %40 {strides = array<i32>} : memref<256x36xbf16, #tpu.memory_space<vmem>>, vector<256x4xbf16>,
    %42 = vector.extract_strided_slice %17 {offsets = [2, 2, 0], sizes = [16, 16, 4], strides = [1, 1, 1]} : vector<18x18x4xbf16> to vector<16x16x4xbf16>
    %43 = vector.shape_cast %42 : vector<16x16x4xbf16> to vector<256x4xbf16>
    %c0_25 = arith.constant 0 : index
    %c32 = arith.constant 32 : index
    %44 = vector.load %arg8[%c0_25, %c32] : memref<256x36xbf16, #tpu.memory_space<vmem>>, vector<256x4xbf16>
    tpu.vector_store %arg8[%c0_25, %c32], %43 {strides = array<i32>} : memref<256x36xbf16, #tpu.memory_space<vmem>>, vector<256x4xbf16>,
    %c0_26 = arith.constant 0 : index
    %c0_27 = arith.constant 0 : index
    %45 = vector.load %arg8[%c0_26, %c0_27] : memref<256x36xbf16, #tpu.memory_space<vmem>>, vector<256x36xbf16>
    %c0_28 = arith.constant 0 : index
    %c0_29 = arith.constant 0 : index
    %46 = vector.load %arg4[%c0_28, %c0_29] : memref<36x4xbf16, #tpu.memory_space<vmem>>, vector<36x4xbf16>
    %cst_30 = arith.constant dense<0.000000e+00> : vector<256x4xf32>
    %47 = tpu.matmul %45, %46, %cst_30 {dimension_numbers = #tpu.dot_dimension_numbers<[1], [0], [0], [1], [0, 0, 1, 1], [], []>} : vector<256x36xbf16>, vector<36x4xbf16>, vector<256x4xf32> -> vector<256x4xf32>
    %48 = vector.shape_cast %47 : vector<256x4xf32> to vector<16x16x4xf32>
    %49 = arith.truncf %48 : vector<16x16x4xf32> to vector<16x16x4xbf16>
    %c0_31 = arith.constant 0 : index
    %c0_32 = arith.constant 0 : index
    %c0_33 = arith.constant 0 : index
    %c0_34 = arith.constant 0 : index
    %50 = vector.load %arg5[%c0_31, %c0_32, %c0_33, %c0_34] : memref<1x16x16x4xbf16, #tpu.memory_space<vmem>>, vector<1x16x16x4xbf16>
    %51 = vector.shape_cast %50 : vector<1x16x16x4xbf16> to vector<16x16x4xbf16>
    %52 = vector.shape_cast %49 : vector<16x16x4xbf16> to vector<1x16x16x4xbf16>
    tpu.vector_store %arg5[%c0_31, %c0_32, %c0_33, %c0_34], %52 {strides = array<i32>} : memref<1x16x16x4xbf16, #tpu.memory_space<vmem>>, vector<1x16x16x4xbf16>,
    %cst_35 = arith.constant dense<0.000000e+00> : vector<4xf32>
    %53 = vector.multi_reduction <add>, %47, %cst_35 [0] : vector<256x4xf32> to vector<4xf32>
    %54 = vector.shape_cast %53 : vector<4xf32> to vector<1x4xf32>
    %55 = arith.mulf %47, %47 : vector<256x4xf32>
    %cst_36 = arith.constant dense<0.000000e+00> : vector<4xf32>
    %56 = vector.multi_reduction <add>, %55, %cst_36 [0] : vector<256x4xf32> to vector<4xf32>
    %57 = vector.shape_cast %56 : vector<4xf32> to vector<1x4xf32>
    %58 = tpu.concatenate %54, %57 in 0 : vector<1x4xf32>, vector<1x4xf32> -> vector<2x4xf32>
    %c0_37 = arith.constant 0 : index
    %c0_38 = arith.constant 0 : index
    %c0_39 = arith.constant 0 : index
    %59 = vector.load %arg6[%c0_37, %c0_38, %c0_39] : memref<1x2x4xf32, #tpu.memory_space<vmem>>, vector<1x2x4xf32>
    %60 = vector.shape_cast %59 : vector<1x2x4xf32> to vector<2x4xf32>
    %61 = vector.shape_cast %58 : vector<2x4xf32> to vector<1x2x4xf32>
    tpu.vector_store %arg6[%c0_37, %c0_38, %c0_39], %61 {strides = array<i32>} : memref<1x2x4xf32, #tpu.memory_space<vmem>>, vector<1x2x4xf32>,
    return
  }
  func.func @transform_0(%arg0: i32) -> (i32, i32, i32, i32) {
    %c0_i32 = arith.constant 0 : i32
    %c0_i32_0 = arith.constant 0 : i32
    %c0_i32_1 = arith.constant 0 : i32
    %c0_i32_2 = arith.constant 0 : i32
    return %arg0, %c0_i32, %c0_i32_0, %c0_i32_1 : i32, i32, i32, i32
  }
  func.func @transform_1(%arg0: i32) -> (i32, i32) {
    %c0_i32 = arith.constant 0 : i32
    %c0_i32_0 = arith.constant 0 : i32
    %c0_i32_1 = arith.constant 0 : i32
    return %c0_i32, %c0_i32_0 : i32, i32
  }
  func.func @transform_2(%arg0: i32) -> (i32, i32) {
    %c0_i32 = arith.constant 0 : i32
    %c0_i32_0 = arith.constant 0 : i32
    %c0_i32_1 = arith.constant 0 : i32
    return %c0_i32, %c0_i32_0 : i32, i32
  }
  func.func @transform_3(%arg0: i32) -> (i32, i32) {
    %c0_i32 = arith.constant 0 : i32
    %c0_i32_0 = arith.constant 0 : i32
    %c0_i32_1 = arith.constant 0 : i32
    return %c0_i32, %c0_i32_0 : i32, i32
  }
  func.func @transform_4(%arg0: i32) -> (i32, i32, i32, i32) {
    %c0_i32 = arith.constant 0 : i32
    %c0_i32_0 = arith.constant 0 : i32
    %c0_i32_1 = arith.constant 0 : i32
    %c0_i32_2 = arith.constant 0 : i32
    return %arg0, %c0_i32, %c0_i32_0, %c0_i32_1 : i32, i32, i32, i32
  }
  func.func @transform_5(%arg0: i32) -> (i32, i32, i32) {
    %c0_i32 = arith.constant 0 : i32
    %c0_i32_0 = arith.constant 0 : i32
    %c0_i32_1 = arith.constant 0 : i32
    return %arg0, %c0_i32, %c0_i32_0 : i32, i32, i32
  }
}

module attributes {stable_mosaic.version = 11 : i64} {
  func.func @_pw_conv_kernel(%arg0: i32, %arg1: memref<512x4xbf16, #tpu.memory_space<vmem>>, %arg2: memref<1x4xf32, #tpu.memory_space<vmem>>, %arg3: memref<1x4xf32, #tpu.memory_space<vmem>>, %arg4: memref<4x16xbf16, #tpu.memory_space<vmem>>, %arg5: memref<512x16xbf16, #tpu.memory_space<vmem>>, %arg6: memref<1x2x16xf32, #tpu.memory_space<vmem>>) attributes {dimension_semantics = [#tpu.dimension_semantics<parallel>], iteration_bounds = array<i64: 1>, scalar_prefetch = 0 : i64, scratch_operands = 0 : i64, tpu.core_type = #tpu.core_type<tc>, window_params = [{transform_indices = @transform_0, window_bounds = array<i64: 512, 4>}, {pipeline_mode = #tpu.pipeline_mode<synchronous>, transform_indices = @transform_1, window_bounds = array<i64: 1, 4>}, {pipeline_mode = #tpu.pipeline_mode<synchronous>, transform_indices = @transform_2, window_bounds = array<i64: 1, 4>}, {pipeline_mode = #tpu.pipeline_mode<synchronous>, transform_indices = @transform_3, window_bounds = array<i64: 4, 16>}, {transform_indices = @transform_4, window_bounds = array<i64: 512, 16>}, {transform_indices = @transform_5, window_bounds = array<i64: 1, 2, 16>}]} {
    %c0 = arith.constant 0 : index
    %c0_0 = arith.constant 0 : index
    %0 = vector.load %arg1[%c0, %c0_0] : memref<512x4xbf16, #tpu.memory_space<vmem>>, vector<512x4xbf16>
    %1 = arith.extf %0 : vector<512x4xbf16> to vector<512x4xf32>
    %c0_1 = arith.constant 0 : index
    %c0_2 = arith.constant 0 : index
    %2 = vector.load %arg2[%c0_1, %c0_2] : memref<1x4xf32, #tpu.memory_space<vmem>>, vector<1x4xf32>
    %3 = vector.broadcast %2 : vector<1x4xf32> to vector<512x4xf32>
    %4 = arith.mulf %1, %3 : vector<512x4xf32>
    %c0_3 = arith.constant 0 : index
    %c0_4 = arith.constant 0 : index
    %5 = vector.load %arg3[%c0_3, %c0_4] : memref<1x4xf32, #tpu.memory_space<vmem>>, vector<1x4xf32>
    %6 = vector.broadcast %5 : vector<1x4xf32> to vector<512x4xf32>
    %7 = arith.addf %4, %6 : vector<512x4xf32>
    %cst = arith.constant 0.000000e+00 : f32
    %8 = vector.broadcast %cst : f32 to vector<512x4xf32>
    %9 = arith.maximumf %7, %8 : vector<512x4xf32>
    %10 = arith.truncf %9 : vector<512x4xf32> to vector<512x4xbf16>
    %c0_5 = arith.constant 0 : index
    %c0_6 = arith.constant 0 : index
    %11 = vector.load %arg4[%c0_5, %c0_6] : memref<4x16xbf16, #tpu.memory_space<vmem>>, vector<4x16xbf16>
    %cst_7 = arith.constant dense<0.000000e+00> : vector<512x16xf32>
    %12 = tpu.matmul %10, %11, %cst_7 {dimension_numbers = #tpu.dot_dimension_numbers<[1], [0], [0], [1], [0, 0, 1, 1], [], []>} : vector<512x4xbf16>, vector<4x16xbf16>, vector<512x16xf32> -> vector<512x16xf32>
    %13 = arith.truncf %12 : vector<512x16xf32> to vector<512x16xbf16>
    %c0_8 = arith.constant 0 : index
    %c0_9 = arith.constant 0 : index
    %14 = vector.load %arg5[%c0_8, %c0_9] : memref<512x16xbf16, #tpu.memory_space<vmem>>, vector<512x16xbf16>
    tpu.vector_store %arg5[%c0_8, %c0_9], %13 {strides = array<i32>} : memref<512x16xbf16, #tpu.memory_space<vmem>>, vector<512x16xbf16>,
    %cst_10 = arith.constant dense<0.000000e+00> : vector<16xf32>
    %15 = vector.multi_reduction <add>, %12, %cst_10 [0] : vector<512x16xf32> to vector<16xf32>
    %16 = vector.shape_cast %15 : vector<16xf32> to vector<1x16xf32>
    %17 = arith.mulf %12, %12 : vector<512x16xf32>
    %cst_11 = arith.constant dense<0.000000e+00> : vector<16xf32>
    %18 = vector.multi_reduction <add>, %17, %cst_11 [0] : vector<512x16xf32> to vector<16xf32>
    %19 = vector.shape_cast %18 : vector<16xf32> to vector<1x16xf32>
    %20 = tpu.concatenate %16, %19 in 0 : vector<1x16xf32>, vector<1x16xf32> -> vector<2x16xf32>
    %c0_12 = arith.constant 0 : index
    %c0_13 = arith.constant 0 : index
    %c0_14 = arith.constant 0 : index
    %21 = vector.load %arg6[%c0_12, %c0_13, %c0_14] : memref<1x2x16xf32, #tpu.memory_space<vmem>>, vector<1x2x16xf32>
    %22 = vector.shape_cast %21 : vector<1x2x16xf32> to vector<2x16xf32>
    %23 = vector.shape_cast %20 : vector<2x16xf32> to vector<1x2x16xf32>
    tpu.vector_store %arg6[%c0_12, %c0_13, %c0_14], %23 {strides = array<i32>} : memref<1x2x16xf32, #tpu.memory_space<vmem>>, vector<1x2x16xf32>,
    return
  }
  func.func @transform_0(%arg0: i32) -> (i32, i32) {
    %c0_i32 = arith.constant 0 : i32
    %c0_i32_0 = arith.constant 0 : i32
    return %arg0, %c0_i32 : i32, i32
  }
  func.func @transform_1(%arg0: i32) -> (i32, i32) {
    %c0_i32 = arith.constant 0 : i32
    %c0_i32_0 = arith.constant 0 : i32
    %c0_i32_1 = arith.constant 0 : i32
    return %c0_i32, %c0_i32_0 : i32, i32
  }
  func.func @transform_2(%arg0: i32) -> (i32, i32) {
    %c0_i32 = arith.constant 0 : i32
    %c0_i32_0 = arith.constant 0 : i32
    %c0_i32_1 = arith.constant 0 : i32
    return %c0_i32, %c0_i32_0 : i32, i32
  }
  func.func @transform_3(%arg0: i32) -> (i32, i32) {
    %c0_i32 = arith.constant 0 : i32
    %c0_i32_0 = arith.constant 0 : i32
    %c0_i32_1 = arith.constant 0 : i32
    return %c0_i32, %c0_i32_0 : i32, i32
  }
  func.func @transform_4(%arg0: i32) -> (i32, i32) {
    %c0_i32 = arith.constant 0 : i32
    %c0_i32_0 = arith.constant 0 : i32
    return %arg0, %c0_i32 : i32, i32
  }
  func.func @transform_5(%arg0: i32) -> (i32, i32, i32) {
    %c0_i32 = arith.constant 0 : i32
    %c0_i32_0 = arith.constant 0 : i32
    %c0_i32_1 = arith.constant 0 : i32
    return %arg0, %c0_i32, %c0_i32_0 : i32, i32, i32
  }
}

module attributes {stable_mosaic.version = 11 : i64} {
  func.func @_residual_bn_relu_kernel(%arg0: i32, %arg1: memref<512x16xbf16, #tpu.memory_space<vmem>>, %arg2: memref<1x16xf32, #tpu.memory_space<vmem>>, %arg3: memref<1x16xf32, #tpu.memory_space<vmem>>, %arg4: memref<512x16xbf16, #tpu.memory_space<vmem>>, %arg5: memref<1x16xf32, #tpu.memory_space<vmem>>, %arg6: memref<1x16xf32, #tpu.memory_space<vmem>>, %arg7: memref<512x16xbf16, #tpu.memory_space<vmem>>) attributes {dimension_semantics = [#tpu.dimension_semantics<parallel>], iteration_bounds = array<i64: 1>, scalar_prefetch = 0 : i64, scratch_operands = 0 : i64, tpu.core_type = #tpu.core_type<tc>, window_params = [{transform_indices = @transform_0, window_bounds = array<i64: 512, 16>}, {pipeline_mode = #tpu.pipeline_mode<synchronous>, transform_indices = @transform_1, window_bounds = array<i64: 1, 16>}, {pipeline_mode = #tpu.pipeline_mode<synchronous>, transform_indices = @transform_2, window_bounds = array<i64: 1, 16>}, {transform_indices = @transform_3, window_bounds = array<i64: 512, 16>}, {pipeline_mode = #tpu.pipeline_mode<synchronous>, transform_indices = @transform_4, window_bounds = array<i64: 1, 16>}, {pipeline_mode = #tpu.pipeline_mode<synchronous>, transform_indices = @transform_5, window_bounds = array<i64: 1, 16>}, {transform_indices = @transform_6, window_bounds = array<i64: 512, 16>}]} {
    %c0 = arith.constant 0 : index
    %c0_0 = arith.constant 0 : index
    %0 = vector.load %arg4[%c0, %c0_0] : memref<512x16xbf16, #tpu.memory_space<vmem>>, vector<512x16xbf16>
    %1 = arith.extf %0 : vector<512x16xbf16> to vector<512x16xf32>
    %c0_1 = arith.constant 0 : index
    %c0_2 = arith.constant 0 : index
    %2 = vector.load %arg5[%c0_1, %c0_2] : memref<1x16xf32, #tpu.memory_space<vmem>>, vector<1x16xf32>
    %3 = vector.broadcast %2 : vector<1x16xf32> to vector<512x16xf32>
    %4 = arith.mulf %1, %3 : vector<512x16xf32>
    %c0_3 = arith.constant 0 : index
    %c0_4 = arith.constant 0 : index
    %5 = vector.load %arg6[%c0_3, %c0_4] : memref<1x16xf32, #tpu.memory_space<vmem>>, vector<1x16xf32>
    %6 = vector.broadcast %5 : vector<1x16xf32> to vector<512x16xf32>
    %7 = arith.addf %4, %6 : vector<512x16xf32>
    %c0_5 = arith.constant 0 : index
    %c0_6 = arith.constant 0 : index
    %8 = vector.load %arg1[%c0_5, %c0_6] : memref<512x16xbf16, #tpu.memory_space<vmem>>, vector<512x16xbf16>
    %9 = arith.extf %8 : vector<512x16xbf16> to vector<512x16xf32>
    %c0_7 = arith.constant 0 : index
    %c0_8 = arith.constant 0 : index
    %10 = vector.load %arg2[%c0_7, %c0_8] : memref<1x16xf32, #tpu.memory_space<vmem>>, vector<1x16xf32>
    %11 = vector.broadcast %10 : vector<1x16xf32> to vector<512x16xf32>
    %12 = arith.mulf %9, %11 : vector<512x16xf32>
    %c0_9 = arith.constant 0 : index
    %c0_10 = arith.constant 0 : index
    %13 = vector.load %arg3[%c0_9, %c0_10] : memref<1x16xf32, #tpu.memory_space<vmem>>, vector<1x16xf32>
    %14 = vector.broadcast %13 : vector<1x16xf32> to vector<512x16xf32>
    %15 = arith.addf %12, %14 : vector<512x16xf32>
    %16 = arith.addf %15, %7 : vector<512x16xf32>
    %cst = arith.constant 0.000000e+00 : f32
    %17 = vector.broadcast %cst : f32 to vector<512x16xf32>
    %18 = arith.maximumf %16, %17 : vector<512x16xf32>
    %19 = arith.truncf %18 : vector<512x16xf32> to vector<512x16xbf16>
    %c0_11 = arith.constant 0 : index
    %c0_12 = arith.constant 0 : index
    %20 = vector.load %arg7[%c0_11, %c0_12] : memref<512x16xbf16, #tpu.memory_space<vmem>>, vector<512x16xbf16>
    tpu.vector_store %arg7[%c0_11, %c0_12], %19 {strides = array<i32>} : memref<512x16xbf16, #tpu.memory_space<vmem>>, vector<512x16xbf16>,
    return
  }
  func.func @transform_0(%arg0: i32) -> (i32, i32) {
    %c0_i32 = arith.constant 0 : i32
    %c0_i32_0 = arith.constant 0 : i32
    return %arg0, %c0_i32 : i32, i32
  }
  func.func @transform_1(%arg0: i32) -> (i32, i32) {
    %c0_i32 = arith.constant 0 : i32
    %c0_i32_0 = arith.constant 0 : i32
    %c0_i32_1 = arith.constant 0 : i32
    return %c0_i32, %c0_i32_0 : i32, i32
  }
  func.func @transform_2(%arg0: i32) -> (i32, i32) {
    %c0_i32 = arith.constant 0 : i32
    %c0_i32_0 = arith.constant 0 : i32
    %c0_i32_1 = arith.constant 0 : i32
    return %c0_i32, %c0_i32_0 : i32, i32
  }
  func.func @transform_3(%arg0: i32) -> (i32, i32) {
    %c0_i32 = arith.constant 0 : i32
    %c0_i32_0 = arith.constant 0 : i32
    return %arg0, %c0_i32 : i32, i32
  }
  func.func @transform_4(%arg0: i32) -> (i32, i32) {
    %c0_i32 = arith.constant 0 : i32
    %c0_i32_0 = arith.constant 0 : i32
    %c0_i32_1 = arith.constant 0 : i32
    return %c0_i32, %c0_i32_0 : i32, i32
  }
  func.func @transform_5(%arg0: i32) -> (i32, i32) {
    %c0_i32 = arith.constant 0 : i32
    %c0_i32_0 = arith.constant 0 : i32
    %c0_i32_1 = arith.constant 0 : i32
    return %c0_i32, %c0_i32_0 : i32, i32
  }
  func.func @transform_6(%arg0: i32) -> (i32, i32) {
    %c0_i32 = arith.constant 0 : i32
    %c0_i32_0 = arith.constant 0 : i32
    return %arg0, %c0_i32 : i32, i32
  }
}

</mosaic_0001>

<bundles_post_ra>
// kernel: bottleneck_forward.6
= control target key start
LH: loop header
LB: loop body
LE: loop exit
PB: predicated region body
PF: predicated region fallthrough
CT: control target
= control target key end

     0   :  { %vm484_vm0 = vcmask 1041408   ;;  %vm387_vm1 = vcmask 31744   ;;  %vm1033_vm2 = vcmask 125952   ;;  %vm1098_vm3 = vcmask 130048   ;;  %s2809_s3 = inlined_call_operand.vmem [shape: bf16[4,16], index: 3, kind: input, shape index: {}]   ;;  %s2810_s0 = inlined_call_operand.vmem [shape: bf16[512,4], index: 0, kind: input, shape index: {}]   ;;  %s2811_s1 = inlined_call_operand.vmem [shape: f32[1,4], index: 1, kind: input, shape index: {}]   ;;  %s2812_s2 = inlined_call_operand.vmem [shape: f32[1,4], index: 2, kind: input, shape index: {}]   ;;  %s2813_s4 = inlined_call_operand.vmem [shape: bf16[512,16], index: 4, kind: output, shape index: {0}]   ;;  %s2814_s5 = inlined_call_operand.vmem [shape: f32[1,2,16], index: 5, kind: output, shape index: {1}]  }
   0x1   :  { %v386_v0 = vld [vmem:[%s2809_s3] sm:$0x3]  ;;  %v1731_v6 = vld [vmem:[%s2810_s0 + $0x8] sm:$0xff]   ;;  %v1732_v7 = vld [vmem:[%s2810_s0 + $0x10] sm:$0xff]   ;;  %vm1429_vm4 = vcmask 1040384   ;;  %vm1431_vm5 = vcmask 123904  }
   0x2   :  { %v1604_v1 = vld [vmem:[%s2810_s0] sm:$0xff]   ;;  %1863 = vmatprep.subr.msk.bf16.mxu0 %vm484_vm0, %v386_v0  ;;  %v486_v3 = vsel %vm484_vm0, %v386_v0, 0  ;;  %1864 = vmatprep.subr.msk.bf16.mxu1 %vm484_vm0, %v386_v0  ;;  %v1609_v9 = vunpack.c.l.bf16 %v1731_v6  ;;  %v1610_v10 = vunpack.c.h.bf16 %v1731_v6  ;;  %v1613_v11 = vunpack.c.l.bf16 %v1732_v7  ;;  %v1733_v13 = vld [vmem:[%s2810_s0 + $0x18] sm:$0xff]   ;;  %v1735_v35 = vld [vmem:[%s2810_s0 + $0x28] sm:$0xff]  }
   0x3   :  { %v1904_v2 = vld [vmem:[%s2811_s1] ss:$0 sm:$0xff]  ;;  %v1605_v4 = vunpack.c.l.bf16 %v1604_v1  ;;  %v1606_v5 = vunpack.c.h.bf16 %v1604_v1  ;;  %1796 = vmatpush3.bf16.msra.mxu0 %v486_v3  ;;  %v1614_v12 = vunpack.c.h.bf16 %v1732_v7  ;;  %1862 = vmatpush3.bf16.msra.mxu1 %v486_v3  ;;  %v1617_v16 = vunpack.c.l.bf16 %v1733_v13  ;;  %v1736_v40 = vld [vmem:[%s2810_s0 + $0x30] sm:$0xff]   ;;  %v1737_v51 = vld [vmem:[%s2810_s0 + $0x38] sm:$0xff]  }
   0x4   :  { %v1915_v8 = vld [vmem:[%s2812_s2] ss:$0 sm:$0xff]  ;;  %v1618_v17 = vunpack.c.h.bf16 %v1733_v13  ;;  %v157_v18 = vmul.f32 %v1609_v9, %v1904_v2  ;;  %v158_v19 = vmul.f32 %v1610_v10, %v1904_v2  ;;  %v159_v20 = vmul.f32 %v1613_v11, %v1904_v2  ;;  %v1739_v9 = vld [vmem:[%s2810_s0 + $0x48] sm:$0xff]   ;;  %v1740_v11 = vld [vmem:[%s2810_s0 + $0x50] sm:$0xff]  }
   0x5   :  { %v155_v14 = vmul.f32 %v1605_v4, %v1904_v2  ;;  %v156_v15 = vmul.f32 %v1606_v5, %v1904_v2  ;;  %v160_v21 = vmul.f32 %v1614_v12, %v1904_v2  ;;  %v161_v24 = vmul.f32 %v1617_v16, %v1904_v2  ;;  %v1734_v30 = vld [vmem:[%s2810_s0 + $0x20] sm:$0xff]  }
   0x6   :  { %v162_v25 = vmul.f32 %v1618_v17, %v1904_v2  ;;  %v228_v26 = vadd.f32 %v1915_v8, %v157_v18  ;;  %v229_v27 = vadd.f32 %v1915_v8, %v158_v19  ;;  %v230_v28 = vadd.f32 %v1915_v8, %v159_v20  ;;  %v1738_v63 = vld [vmem:[%s2810_s0 + $0x40] sm:$0xff]   ;;  %v1741_v20 = vld [vmem:[%s2810_s0 + $0x58] sm:$0xff]  }
   0x7   :  { %v226_v22 = vadd.f32 %v1915_v8, %v155_v14  ;;  %v227_v23 = vadd.f32 %v1915_v8, %v156_v15  ;;  %v231_v29 = vadd.f32 %v1915_v8, %v160_v21  ;;  %v232_v33 = vadd.f32 %v1915_v8, %v161_v24 }
   0x8   :  { %v233_v34 = vadd.f32 %v1915_v8, %v162_v25  ;;  %v292_v36 = vmax.f32 %v228_v26, 0.0  ;;  %v293_v37 = vmax.f32 %v229_v27, 0.0  ;;  %v294_v38 = vmax.f32 %v230_v28, 0.0 }
   0x9   :  { %v290_v31 = vmax.f32 %v226_v22, 0.0  ;;  %v291_v32 = vmax.f32 %v227_v23, 0.0  ;;  %v295_v39 = vmax.f32 %v231_v29, 0.0  ;;  %v1621_v42 = vunpack.c.l.bf16 %v1734_v30 }
   0xa   :  { %v355_v43 = vpack.c.bf16 %v293_v37, %v292_v36  ;;  %v1622_v45 = vunpack.c.h.bf16 %v1734_v30  ;;  %v1625_v46 = vunpack.c.l.bf16 %v1735_v35  ;;  %v296_v47 = vmax.f32 %v232_v33, 0.0 }
   0xb   :  { %v354_v41 = vpack.c.bf16 %v291_v32, %v290_v31  ;;  %v356_v44 = vpack.c.bf16 %v295_v39, %v294_v38  ;;  %v163_v48 = vmul.f32 %v1621_v42, %v1904_v2  ;;  %v1626_v49 = vunpack.c.h.bf16 %v1735_v35  ;;  %v1742_v31 = vld [vmem:[%s2810_s0 + $0x60] sm:$0xff]  }
   0xc   :  { %v1629_v50 = vunpack.c.l.bf16 %v1736_v40  ;;  %v297_v52 = vmax.f32 %v233_v34, 0.0  ;;  %v164_v53 = vmul.f32 %v1622_v45, %v1904_v2  ;;  %v165_v54 = vmul.f32 %v1625_v46, %v1904_v2 }
   0xd   :  { %1797 = vmatprep.mubr.msk.bf16.mxu0 %vm387_vm1, %v354_v41  ;;  %v1630_v55 = vunpack.c.h.bf16 %v1736_v40  ;;  %v234_v56 = vadd.f32 %v1915_v8, %v163_v48  ;;  %v166_v57 = vmul.f32 %v1626_v49, %v1904_v2  ;;  %v1633_v61 = vunpack.c.l.bf16 %v1737_v51 }
   0xe   :  { %1798 = vmatmul.mubr.msk.bf16.vlgmr.msra.gmra.mxu0 %vm387_vm1, %v355_v43  ;;  %v167_v58 = vmul.f32 %v1629_v50, %v1904_v2  ;;  %v235_v59 = vadd.f32 %v1915_v8, %v164_v53  ;;  %v1634_v62 = vunpack.c.h.bf16 %v1737_v51  ;;  %v236_v1 = vadd.f32 %v1915_v8, %v165_v54 }
   0xf   :  { %1801 = vmatprep.mubr.msk.bf16.mxu0 %vm387_vm1, %v356_v44  ;;  %v168_v60 = vmul.f32 %v1630_v55, %v1904_v2  ;;  %v298_v0 = vmax.f32 %v234_v56, 0.0  ;;  %v237_v3 = vadd.f32 %v1915_v8, %v166_v57  ;;  %v357_v5 = vpack.c.bf16 %v297_v52, %v296_v47  ;;  %v1743_v44 = vld [vmem:[%s2810_s0 + $0x68] sm:$0xff]   ;;  %v1744_v56 = vld [vmem:[%s2810_s0 + $0x70] sm:$0xff]  }
  0x10   :  { %v238_v4 = vadd.f32 %v1915_v8, %v167_v58  ;;  %v299_v6 = vmax.f32 %v235_v59, 0.0  ;;  %v1637_v10 = vunpack.c.l.bf16 %v1738_v63  ;;  %v169_v13 = vmul.f32 %v1633_v61, %v1904_v2 }
  0x11   :  { %v239_v7 = vadd.f32 %v1915_v8, %v168_v60  ;;  %v170_v14 = vmul.f32 %v1634_v62, %v1904_v2  ;;  %v1638_v15 = vunpack.c.h.bf16 %v1738_v63  ;;  %v300_v16 = vmax.f32 %v236_v1, 0.0  ;;  %v2014_v1 = vld [vmem:[%s2810_s0 + $0x78] sm:$0xff]  }
  0x12   :  { %v358_v12 = vpack.c.bf16 %v299_v6, %v298_v0  ;;  %v301_v17 = vmax.f32 %v237_v3, 0.0  ;;  %v302_v18 = vmax.f32 %v238_v4, 0.0  ;;  %v1641_v19 = vunpack.c.l.bf16 %v1739_v9  ;;  %v1746_v3 = vld [vmem:[%s2810_s0 + $0x80] sm:$0xff]  }
  0x13   :  { %v303_v21 = vmax.f32 %v239_v7, 0.0  ;;  %v171_v22 = vmul.f32 %v1637_v10, %v1904_v2  ;;  %v1642_v23 = vunpack.c.h.bf16 %v1739_v9  ;;  %v1645_v24 = vunpack.c.l.bf16 %v1740_v11 }
  0x14   :  { %v172_v25 = vmul.f32 %v1638_v15, %v1904_v2  ;;  %v173_v26 = vmul.f32 %v1641_v19, %v1904_v2  ;;  %v1646_v27 = vunpack.c.h.bf16 %v1740_v11  ;;  %v1649_v30 = vunpack.c.l.bf16 %v1741_v20  ;;  %v1747_v19 = vld [vmem:[%s2810_s0 + $0x88] sm:$0xff]  }
  0x15   :  { %v174_v28 = vmul.f32 %v1642_v23, %v1904_v2  ;;  %v175_v29 = vmul.f32 %v1645_v24, %v1904_v2  ;;  %v240_v32 = vadd.f32 %v1915_v8, %v169_v13  ;;  %v241_v33 = vadd.f32 %v1915_v8, %v170_v14  ;;  %v1748_v24 = vld [vmem:[%s2810_s0 + $0x90] sm:$0xff]  }
  0x16   :  { %1802 = vmatmul.mubr.msk.bf16.gmra.mxu0 %vm387_vm1, %v357_v5  ;;  %v176_v34 = vmul.f32 %v1646_v27, %v1904_v2  ;;  %v1650_v35 = vunpack.c.h.bf16 %v1741_v20  ;;  %v359_v36 = vpack.c.bf16 %v301_v17, %v300_v16  ;;  %v360_v37 = vpack.c.bf16 %v303_v21, %v302_v18 }
  0x17   :  { %1805 = vmatprep.mubr.msk.bf16.mxu0 %vm387_vm1, %v358_v12  ;;  %v242_v38 = vadd.f32 %v1915_v8, %v171_v22  ;;  %v177_v39 = vmul.f32 %v1649_v30, %v1904_v2  ;;  %v243_v40 = vadd.f32 %v1915_v8, %v172_v25  ;;  %v244_v41 = vadd.f32 %v1915_v8, %v173_v26 }
  0x18   :  { %v178_v42 = vmul.f32 %v1650_v35, %v1904_v2  ;;  %v1653_v43 = vunpack.c.l.bf16 %v1742_v31  ;;  %v245_v45 = vadd.f32 %v1915_v8, %v174_v28  ;;  %v246_v46 = vadd.f32 %v1915_v8, %v175_v29 }
  0x19   :  { %v247_v47 = vadd.f32 %v1915_v8, %v176_v34  ;;  %v248_v48 = vadd.f32 %v1915_v8, %v177_v39  ;;  %v1654_v50 = vunpack.c.h.bf16 %v1742_v31  ;;  %v304_v52 = vmax.f32 %v240_v32, 0.0 }
  0x1a   :  { %v249_v49 = vadd.f32 %v1915_v8, %v178_v42  ;;  %v179_v51 = vmul.f32 %v1653_v43, %v1904_v2  ;;  %v305_v53 = vmax.f32 %v241_v33, 0.0  ;;  %v1657_v54 = vunpack.c.l.bf16 %v1743_v44  ;;  %v1749_v33 = vld [vmem:[%s2810_s0 + $0x98] sm:$0xff]  }
  0x1b   :  { %v1658_v55 = vunpack.c.h.bf16 %v1743_v44  ;;  %v306_v57 = vmax.f32 %v242_v38, 0.0  ;;  %v307_v58 = vmax.f32 %v243_v40, 0.0  ;;  %v308_v59 = vmax.f32 %v244_v41, 0.0 }
  0x1c   :  { %v180_v60 = vmul.f32 %v1654_v50, %v1904_v2  ;;  %v309_v61 = vmax.f32 %v245_v45, 0.0  ;;  %v310_v62 = vmax.f32 %v246_v46, 0.0  ;;  %v311_v63 = vmax.f32 %v247_v47, 0.0  ;;  %v1750_v46 = vld [vmem:[%s2810_s0 + $0xa0] sm:$0xff]  }
  0x1d   :  { %v181_v0 = vmul.f32 %v1657_v54, %v1904_v2  ;;  %v312_v4 = vmax.f32 %v248_v48, 0.0  ;;  %v313_v5 = vmax.f32 %v249_v49, 0.0  ;;  %v2020_v6 = vadd.f32 %v1915_v8, %v179_v51 }
  0x1e   :  { %1806 = vmatmul.mubr.msk.bf16.gmra.mxu0 %vm387_vm1, %v359_v36  ;;  %v1661_v7 = vunpack.c.l.bf16 %v1744_v56  ;;  %v361_v9 = vpack.c.bf16 %v305_v53, %v304_v52  ;;  %v2023_v10 = vadd.f32 %v1915_v8, %v180_v60  ;;  %v182_v11 = vmul.f32 %v1658_v55, %v1904_v2  ;;  %v1751_v55 = vld [vmem:[%s2810_s0 + $0xa8] sm:$0xff]  }
  0x1f   :  { %1809 = vmatprep.mubr.msk.bf16.mxu0 %vm387_vm1, %v360_v37  ;;  %v1662_v12 = vunpack.c.h.bf16 %v1744_v56  ;;  %v362_v13 = vpack.c.bf16 %v307_v58, %v306_v57  ;;  %v1665_v14 = vunpack.c.l.bf16 %v2014_v1  ;;  %v1669_v15 = vunpack.c.l.bf16 %v1746_v3 }
  0x20   :  { %v363_v16 = vpack.c.bf16 %v309_v61, %v308_v59  ;;  %v364_v17 = vpack.c.bf16 %v311_v63, %v310_v62  ;;  %v2028_v18 = vadd.f32 %v1915_v8, %v181_v0  ;;  %v2033_v20 = vpack.c.bf16 %v313_v5, %v312_v4 }
  0x21   :  { %v314_v21 = vmax.f32 %v2020_v6, 0.0  ;;  %v183_v22 = vmul.f32 %v1661_v7, %v1904_v2  ;;  %v1670_v23 = vunpack.c.h.bf16 %v1746_v3  ;;  %v315_v25 = vmax.f32 %v2023_v10, 0.0  ;;  %v1752_v7 = vld [vmem:[%s2810_s0 + $0xb0] sm:$0xff]   ;;  %v1754_v6 = vld [vmem:[%s2810_s0 + $0xc0] sm:$0xff]  }
  0x22   :  { %v2043_v26 = vadd.f32 %v1915_v8, %v182_v11  ;;  %v184_v27 = vmul.f32 %v1662_v12, %v1904_v2  ;;  %v187_v28 = vmul.f32 %v1669_v15, %v1904_v2  ;;  %v1666_v29 = vunpack.c.h.bf16 %v2014_v1 }
  0x23   :  { %v2050_v30 = vmul.f32 %v1665_v14, %v1904_v2  ;;  %v188_v31 = vmul.f32 %v1670_v23, %v1904_v2  ;;  %v1673_v32 = vunpack.c.l.bf16 %v1747_v19  ;;  %v316_v34 = vmax.f32 %v2028_v18, 0.0  ;;  %v1756_v18 = vld [vmem:[%s2810_s0 + $0xd0] sm:$0xff]  }
  0x24   :  { %v258_v35 = vadd.f32 %v1915_v8, %v187_v28  ;;  %v1674_v36 = vunpack.c.h.bf16 %v1747_v19  ;;  %v1677_v37 = vunpack.c.l.bf16 %v1748_v24  ;;  %v2059_v38 = vadd.f32 %v1915_v8, %v183_v22 }
  0x25   :  { %v259_v39 = vadd.f32 %v1915_v8, %v188_v31  ;;  %v189_v40 = vmul.f32 %v1673_v32, %v1904_v2  ;;  %v1678_v41 = vunpack.c.h.bf16 %v1748_v24  ;;  %v1681_v45 = vunpack.c.l.bf16 %v1749_v33  ;;  %v1753_v24 = vld [vmem:[%s2810_s0 + $0xb8] sm:$0xff]  }
  0x26   :  { %1810 = vmatmul.mubr.msk.bf16.gmra.mxu0 %vm387_vm1, %v361_v9  ;;  %v322_v42 = vmax.f32 %v258_v35, 0.0  ;;  %v190_v43 = vmul.f32 %v1674_v36, %v1904_v2  ;;  %v191_v44 = vmul.f32 %v1677_v37, %v1904_v2  ;;  %v2069_v47 = vadd.f32 %v1915_v8, %v184_v27 }
  0x27   :  { %1813 = vmatprep.mubr.msk.bf16.mxu0 %vm387_vm1, %v362_v13  ;;  %v323_v48 = vmax.f32 %v259_v39, 0.0  ;;  %v260_v49 = vadd.f32 %v1915_v8, %v189_v40  ;;  %v192_v50 = vmul.f32 %v1678_v41, %v1904_v2  ;;  %v1682_v53 = vunpack.c.h.bf16 %v1749_v33 }
  0x28   :  { %v261_v51 = vadd.f32 %v1915_v8, %v190_v43  ;;  %v262_v52 = vadd.f32 %v1915_v8, %v191_v44  ;;  %v193_v54 = vmul.f32 %v1681_v45, %v1904_v2  ;;  %v1685_v59 = vunpack.c.l.bf16 %v1750_v46 }
  0x29   :  { %v370_v56 = vpack.c.bf16 %v323_v48, %v322_v42  ;;  %v324_v57 = vmax.f32 %v260_v49, 0.0  ;;  %v263_v58 = vadd.f32 %v1915_v8, %v192_v50  ;;  %v194_v62 = vmul.f32 %v1682_v53, %v1904_v2 }
  0x2a   :  { %v325_v60 = vmax.f32 %v261_v51, 0.0  ;;  %v326_v61 = vmax.f32 %v262_v52, 0.0  ;;  %v264_v63 = vadd.f32 %v1915_v8, %v193_v54  ;;  %v1686_v3 = vunpack.c.h.bf16 %v1750_v46  ;;  %v1755_v52 = vld [vmem:[%s2810_s0 + $0xc8] sm:$0xff]  }
  0x2b   :  { %1829 = vmatprep.mubr.msk.bf16.mxu1 %vm387_vm1, %v370_v56  ;;  %v327_v0 = vmax.f32 %v263_v58, 0.0  ;;  %v195_v4 = vmul.f32 %v1685_v59, %v1904_v2  ;;  %v1689_v5 = vunpack.c.l.bf16 %v1751_v55  ;;  %v265_v10 = vadd.f32 %v1915_v8, %v194_v62 }
  0x2c   :  { %v371_v9 = vpack.c.bf16 %v325_v60, %v324_v57  ;;  %v328_v11 = vmax.f32 %v264_v63, 0.0  ;;  %v1690_v12 = vunpack.c.h.bf16 %v1751_v55  ;;  %v196_v14 = vmul.f32 %v1686_v3, %v1904_v2 }
  0x2d   :  { %v372_v13 = vpack.c.bf16 %v327_v0, %v326_v61  ;;  %v266_v15 = vadd.f32 %v1915_v8, %v195_v4  ;;  %v1693_v22 = vunpack.c.l.bf16 %v1752_v7  ;;  %v1694_v23 = vunpack.c.h.bf16 %v1752_v7 }
  0x2e   :  { %1814 = vmatmul.mubr.msk.bf16.gmra.mxu0 %vm387_vm1, %v363_v16  ;;  %v197_v16 = vmul.f32 %v1689_v5, %v1904_v2  ;;  %1830 = vmatmul.mubr.msk.bf16.vlgmr.msra.gmra.mxu1 %vm387_vm1, %v371_v9  ;;  %v198_v19 = vmul.f32 %v1690_v12, %v1904_v2  ;;  %v366_v27 = vpack.c.bf16 %v315_v25, %v314_v21  ;;  %v317_v28 = vmax.f32 %v2043_v26, 0.0 }
  0x2f   :  { %1817 = vmatprep.mubr.msk.bf16.mxu0 %vm387_vm1, %v364_v17  ;;  %v329_v17 = vmax.f32 %v265_v10, 0.0  ;;  %1833 = vmatprep.mubr.msk.bf16.mxu1 %vm387_vm1, %v372_v13  ;;  %v267_v31 = vadd.f32 %v1915_v8, %v196_v14  ;;  %v330_v32 = vmax.f32 %v266_v15, 0.0  ;;  %v318_v33 = vmax.f32 %v2059_v38, 0.0  ;;  %v1757_v14 = vld [vmem:[%s2810_s0 + $0xd8] sm:$0xff]  }
  0x30   :  { %v186_v35 = vmul.f32 %v1666_v29, %v1904_v2  ;;  %v199_v36 = vmul.f32 %v1693_v22, %v1904_v2  ;;  %v200_v37 = vmul.f32 %v1694_v23, %v1904_v2  ;;  %v319_v21 = vmax.f32 %v2069_v47, 0.0 }
  0x31   :  { %v331_v25 = vmax.f32 %v267_v31, 0.0  ;;  %v1697_v26 = vunpack.c.l.bf16 %v1753_v24  ;;  %v1698_v39 = vunpack.c.h.bf16 %v1753_v24  ;;  %v373_v38 = vpack.c.bf16 %v329_v17, %v328_v11  ;;  %v1758_v17 = vld [vmem:[%s2810_s0 + $0xe0] sm:$0xff]  }
  0x32   :  { %v268_v1 = vadd.f32 %v1915_v8, %v197_v16  ;;  %v269_v29 = vadd.f32 %v1915_v8, %v198_v19  ;;  %v270_v40 = vadd.f32 %v1915_v8, %v199_v36  ;;  %v271_v42 = vadd.f32 %v1915_v8, %v200_v37 }
  0x33   :  { %v374_v41 = vpack.c.bf16 %v331_v25, %v330_v32  ;;  %v1701_v43 = vunpack.c.l.bf16 %v1754_v6  ;;  %v1702_v44 = vunpack.c.h.bf16 %v1754_v6  ;;  %v256_v45 = vadd.f32 %v1915_v8, %v2050_v30 }
  0x34   :  { %v257_v46 = vadd.f32 %v1915_v8, %v186_v35  ;;  %v202_v47 = vmul.f32 %v1698_v39, %v1904_v2  ;;  %v367_v48 = vpack.c.bf16 %v317_v28, %v316_v34  ;;  %v368_v49 = vpack.c.bf16 %v319_v21, %v318_v33  ;;  %v1759_v39 = vld [vmem:[%s2810_s0 + $0xe8] sm:$0xff]  }
  0x35   :  { %v332_v50 = vmax.f32 %v268_v1, 0.0  ;;  %v333_v51 = vmax.f32 %v269_v29, 0.0  ;;  %v334_v30 = vmax.f32 %v270_v40, 0.0  ;;  %v335_v53 = vmax.f32 %v271_v42, 0.0  ;;  %v1760_v29 = vld [vmem:[%s2810_s0 + $0xf0] sm:$0xff]  }
  0x36   :  { %1818 = vmatmul.mubr.msk.bf16.gmra.mxu0 %vm387_vm1, %v2033_v20  ;;  %v201_v20 = vmul.f32 %v1697_v26, %v1904_v2  ;;  %1834 = vmatmul.mubr.msk.bf16.gmra.mxu1 %vm387_vm1, %v373_v38  ;;  %v203_v54 = vmul.f32 %v1701_v43, %v1904_v2  ;;  %v204_v55 = vmul.f32 %v1702_v44, %v1904_v2  ;;  %v320_v34 = vmax.f32 %v256_v45, 0.0 }
  0x37   :  { %1821 = vmatprep.mubr.msk.bf16.mxu0 %vm387_vm1, %v366_v27  ;;  %1837 = vmatprep.mubr.msk.bf16.mxu1 %vm387_vm1, %v374_v41  ;;  %v321_v56 = vmax.f32 %v257_v46, 0.0  ;;  %v273_v58 = vadd.f32 %v1915_v8, %v202_v47  ;;  %v1705_v59 = vunpack.c.l.bf16 %v1755_v52  ;;  %v375_v60 = vpack.c.bf16 %v333_v51, %v332_v50 }
  0x38   :  { %v272_v57 = vadd.f32 %v1915_v8, %v201_v20  ;;  %v1706_v61 = vunpack.c.h.bf16 %v1755_v52  ;;  %v1709_v62 = vunpack.c.l.bf16 %v1756_v18  ;;  %v1710_v63 = vunpack.c.h.bf16 %v1756_v18  ;;  %v1761_v18 = vld [vmem:[%s2810_s0 + $0xf8] sm:$0xff]  }
  0x39   :  { %v376_v0 = vpack.c.bf16 %v335_v53, %v334_v30  ;;  %v274_v3 = vadd.f32 %v1915_v8, %v203_v54  ;;  %v275_v4 = vadd.f32 %v1915_v8, %v204_v55  ;;  %v337_v7 = vmax.f32 %v273_v58, 0.0 }
  0x3a   :  { %v336_v5 = vmax.f32 %v272_v57, 0.0  ;;  %v205_v9 = vmul.f32 %v1705_v59, %v1904_v2  ;;  %v369_v10 = vpack.c.bf16 %v321_v56, %v320_v34  ;;  %v206_v11 = vmul.f32 %v1706_v61, %v1904_v2 }
  0x3b   :  { %v207_v12 = vmul.f32 %v1709_v62, %v1904_v2  ;;  %v208_v13 = vmul.f32 %v1710_v63, %v1904_v2  ;;  %v338_v15 = vmax.f32 %v274_v3, 0.0  ;;  %v339_v16 = vmax.f32 %v275_v4, 0.0 }
  0x3c   :  { %v377_v19 = vpack.c.bf16 %v337_v7, %v336_v5  ;;  %v276_v22 = vadd.f32 %v1915_v8, %v205_v9  ;;  %v1713_v23 = vunpack.c.l.bf16 %v1757_v14  ;;  %v277_v24 = vadd.f32 %v1915_v8, %v206_v11 }
  0x3d   :  { %v278_v27 = vadd.f32 %v1915_v8, %v207_v12  ;;  %v279_v28 = vadd.f32 %v1915_v8, %v208_v13  ;;  %v1714_v31 = vunpack.c.h.bf16 %v1757_v14  ;;  %v378_v32 = vpack.c.bf16 %v339_v16, %v338_v15 }
  0x3e   :  { %1822 = vmatmul.mubr.msk.bf16.gmra.mxu0 %vm387_vm1, %v367_v48  ;;  %1838 = vmatmul.mubr.msk.bf16.gmra.mxu1 %vm387_vm1, %v375_v60  ;;  %v1717_v33 = vunpack.c.l.bf16 %v1758_v17  ;;  %v1718_v35 = vunpack.c.h.bf16 %v1758_v17  ;;  %v340_v36 = vmax.f32 %v276_v22, 0.0  ;;  %v209_v37 = vmul.f32 %v1713_v23, %v1904_v2 }
  0x3f   :  { %1825 = vmatprep.mubr.msk.bf16.mxu0 %vm387_vm1, %v368_v49  ;;  %1841 = vmatprep.mubr.msk.bf16.mxu1 %vm387_vm1, %v376_v0  ;;  %v341_v6 = vmax.f32 %v277_v24, 0.0  ;;  %v342_v21 = vmax.f32 %v278_v27, 0.0  ;;  %v343_v25 = vmax.f32 %v279_v28, 0.0  ;;  %v210_v26 = vmul.f32 %v1714_v31, %v1904_v2 }
  0x40   :  { %v211_v38 = vmul.f32 %v1717_v33, %v1904_v2  ;;  %v212_v1 = vmul.f32 %v1718_v35, %v1904_v2  ;;  %v280_v40 = vadd.f32 %v1915_v8, %v209_v37  ;;  %v1721_v41 = vunpack.c.l.bf16 %v1759_v39 }
  0x41   :  { %v379_v42 = vpack.c.bf16 %v341_v6, %v340_v36  ;;  %v380_v43 = vpack.c.bf16 %v343_v25, %v342_v21  ;;  %v281_v44 = vadd.f32 %v1915_v8, %v210_v26  ;;  %v1722_v45 = vunpack.c.h.bf16 %v1759_v39 }
  0x42   :  { %v282_v46 = vadd.f32 %v1915_v8, %v211_v38  ;;  %v283_v20 = vadd.f32 %v1915_v8, %v212_v1  ;;  %v1725_v47 = vunpack.c.l.bf16 %v1760_v29  ;;  %v1726_v48 = vunpack.c.h.bf16 %v1760_v29 }
  0x43   :  { %v213_v49 = vmul.f32 %v1721_v41, %v1904_v2  ;;  %v344_v50 = vmax.f32 %v280_v40, 0.0  ;;  %v345_v51 = vmax.f32 %v281_v44, 0.0  ;;  %v214_v52 = vmul.f32 %v1722_v45, %v1904_v2 }
  0x44   :  { %v346_v30 = vmax.f32 %v282_v46, 0.0  ;;  %v347_v53 = vmax.f32 %v283_v20, 0.0  ;;  %v215_v54 = vmul.f32 %v1725_v47, %v1904_v2  ;;  %v216_v55 = vmul.f32 %v1726_v48, %v1904_v2 }
  0x45   :  { %v284_v34 = vadd.f32 %v1915_v8, %v213_v49  ;;  %v381_v56 = vpack.c.bf16 %v345_v51, %v344_v50  ;;  %v285_v57 = vadd.f32 %v1915_v8, %v214_v52  ;;  %v1729_v58 = vunpack.c.l.bf16 %v1761_v18 }
  0x46   :  { %1826 = vmatmul.mubr.msk.bf16.gmra.mxu0 %vm387_vm1, %v369_v10  ;;  %1842 = vmatmul.mubr.msk.bf16.gmra.mxu1 %vm387_vm1, %v377_v19  ;;  %v1730_v59 = vunpack.c.h.bf16 %v1761_v18  ;;  %v382_v60 = vpack.c.bf16 %v347_v53, %v346_v30  ;;  %v286_v61 = vadd.f32 %v1915_v8, %v215_v54  ;;  %v287_v62 = vadd.f32 %v1915_v8, %v216_v55 }
  0x47   :  { %1845 = vmatprep.mubr.msk.bf16.mxu1 %vm387_vm1, %v378_v32  ;;  %v348_v63 = vmax.f32 %v284_v34, 0.0  ;;  %v349_v0 = vmax.f32 %v285_v57, 0.0  ;;  %v217_v3 = vmul.f32 %v1729_v58, %v1904_v2 }
  0x48   :  { %v218_v4 = vmul.f32 %v1730_v59, %v1904_v2  ;;  %v350_v5 = vmax.f32 %v286_v61, 0.0  ;;  %v351_v7 = vmax.f32 %v287_v62, 0.0 }
  0x49   :  { %v383_v9 = vpack.c.bf16 %v349_v0, %v348_v63  ;;  %v288_v10 = vadd.f32 %v1915_v8, %v217_v3 }
  0x4a   :  { %v289_v11 = vadd.f32 %v1915_v8, %v218_v4  ;;  %v384_v12 = vpack.c.bf16 %v351_v7, %v350_v5 }
  0x4b   :  { %v352_v13 = vmax.f32 %v288_v10, 0.0 }
  0x4c   :  { %v353_v14 = vmax.f32 %v289_v11, 0.0 }
  0x4e   :  { %1846 = vmatmul.mubr.msk.bf16.gmra.mxu1 %vm387_vm1, %v379_v42  ;;  %v385_v15 = vpack.c.bf16 %v353_v14, %v352_v13 }
  0x4f   :  { %1849 = vmatprep.mubr.msk.bf16.mxu1 %vm387_vm1, %v380_v43 }
  0x56   :  { %1850 = vmatmul.mubr.msk.bf16.gmra.mxu1 %vm387_vm1, %v381_v56 }
  0x57   :  { %1853 = vmatprep.mubr.msk.bf16.mxu1 %vm387_vm1, %v382_v60 }
  0x5e   :  { %1854 = vmatmul.mubr.msk.bf16.gmra.mxu1 %vm387_vm1, %v383_v9 }
  0x5f   :  { %1857 = vmatprep.mubr.msk.bf16.mxu1 %vm387_vm1, %v384_v12 }
  0x66   :  { %1858 = vmatmul.mubr.msk.bf16.gmra.mxu1 %vm387_vm1, %v385_v15 }
  0xce   :  { %v1799_v2 = vpop.f32.mrf.mxu0 }
  0xcf   :  { %v1541_v16 = vpack.c.bf16 %v1799_v2, %v1799_v2  ;;  %v1234_v24 = vmul.f32 %v1799_v2, %v1799_v2  ;;  %v1102_v35 = vsel %vm1098_vm3, %v1799_v2, 0.0 }
  0xd0   :  { %v522_v17 = vpop.f32.mrf.mxu0 }
  0xd1   :  { %1036 = vst.msk [vmem:[%s2813_s4 + $0x8] sm:$0xf] %vm1033_vm2, %v1541_v16  ;;  %v1539_v8 = vpack.c.bf16 %v522_v17, %v522_v17  ;;  %v1232_v22 = vmul.f32 %v522_v17, %v522_v17  ;;  %v1099_v28 = vsel %vm1098_vm3, %v522_v17, 0.0  ;;  %v1299_v29 = vsel %vm1098_vm3, %v1234_v24, 0.0 }
  0xd2   :  { %v1800_v19 = vpop.f32.mrf.mxu0 }
  0xd3   :  { %1034 = vst.msk [vmem:[%s2813_s4] sm:$0xf] %vm1033_vm2, %v1539_v8  ;;  %v1542_v23 = vpack.c.bf16 %v1800_v19, %v1800_v19  ;;  %v1296_v6 = vsel %vm1098_vm3, %v1232_v22, 0.0  ;;  %v1235_v21 = vmul.f32 %v1800_v19, %v1800_v19  ;;  %v1104_v40 = vsel %vm1098_vm3, %v1800_v19, 0.0 }
  0xd4   :  { %v525_v27 = vpop.f32.mrf.mxu0 }
  0xd5   :  { %1037 = vst.msk [vmem:[%s2813_s4 + $0xc] sm:$0xf] %vm1033_vm2, %v1542_v23  ;;  %v1540_v31 = vpack.c.bf16 %v525_v27, %v525_v27  ;;  %v1100_v32 = vsel %vm1098_vm3, %v525_v27, 0.0  ;;  %v1233_v33 = vmul.f32 %v525_v27, %v525_v27  ;;  %v1301_v46 = vsel %vm1098_vm3, %v1235_v21, 0.0 }
  0xd6   :  { %v1101_v36 = vadd.f32 %v1100_v32, %v1099_v28  ;;  %v1803_v37 = vpop.f32.mrf.mxu0 }
  0xd7   :  { %1035 = vst.msk [vmem:[%s2813_s4 + $0x4] sm:$0xf] %vm1033_vm2, %v1540_v31  ;;  %v1297_v25 = vsel %vm1098_vm3, %v1233_v33, 0.0  ;;  %v1545_v26 = vpack.c.bf16 %v1803_v37, %v1803_v37  ;;  %v1238_v48 = vmul.f32 %v1803_v37, %v1803_v37  ;;  %v1110_v56 = vsel %vm1098_vm3, %v1803_v37, 0.0 }
  0xd8   :  { %v1103_v39 = vadd.f32 %v1102_v35, %v1101_v36  ;;  %v1298_v38 = vadd.f32 %v1297_v25, %v1296_v6  ;;  %v538_v1 = vpop.f32.mrf.mxu0 }
  0xd9   :  { %1040 = vst.msk [vmem:[%s2813_s4 + $0x18] sm:$0xf] %vm1033_vm2, %v1545_v26  ;;  %v1543_v41 = vpack.c.bf16 %v538_v1, %v538_v1  ;;  %v1236_v42 = vmul.f32 %v538_v1, %v538_v1  ;;  %v1106_v20 = vsel %vm1098_vm3, %v538_v1, 0.0  ;;  %v1307_v63 = vsel %vm1098_vm3, %v1238_v48, 0.0 }
  0xda   :  { %v1300_v43 = vadd.f32 %v1299_v29, %v1298_v38  ;;  %v1105_v44 = vadd.f32 %v1104_v40, %v1103_v39  ;;  %v1804_v45 = vpop.f32.mrf.mxu0 }
  0xdb   :  { %1038 = vst.msk [vmem:[%s2813_s4 + $0x10] sm:$0xf] %vm1033_vm2, %v1543_v41  ;;  %v1546_v47 = vpack.c.bf16 %v1804_v45, %v1804_v45  ;;  %v1303_v52 = vsel %vm1098_vm3, %v1236_v42, 0.0  ;;  %v1239_v57 = vmul.f32 %v1804_v45, %v1804_v45  ;;  %v1112_v0 = vsel %vm1098_vm3, %v1804_v45, 0.0 }
  0xdc   :  { %v1107_v49 = vadd.f32 %v1106_v20, %v1105_v44  ;;  %v1302_v50 = vadd.f32 %v1301_v46, %v1300_v43  ;;  %v541_v51 = vpop.f32.mrf.mxu0 }
  0xdd   :  { %1041 = vst.msk [vmem:[%s2813_s4 + $0x1c] sm:$0xf] %vm1033_vm2, %v1546_v47  ;;  %v1544_v30 = vpack.c.bf16 %v541_v51, %v541_v51  ;;  %v1108_v53 = vsel %vm1098_vm3, %v541_v51, 0.0  ;;  %v1237_v54 = vmul.f32 %v541_v51, %v541_v51  ;;  %v1309_v10 = vsel %vm1098_vm3, %v1239_v57, 0.0 }
  0xde   :  { %v1304_v55 = vadd.f32 %v1303_v52, %v1302_v50  ;;  %v1109_v18 = vadd.f32 %v1108_v53, %v1107_v49  ;;  %v1807_v34 = vpop.f32.mrf.mxu0 }
  0xdf   :  { %1039 = vst.msk [vmem:[%s2813_s4 + $0x14] sm:$0xf] %vm1033_vm2, %v1544_v30  ;;  %v1305_v58 = vsel %vm1098_vm3, %v1237_v54, 0.0  ;;  %v1549_v59 = vpack.c.bf16 %v1807_v34, %v1807_v34  ;;  %v1242_v13 = vmul.f32 %v1807_v34, %v1807_v34  ;;  %v1118_v27 = vsel %vm1098_vm3, %v1807_v34, 0.0 }
  0xe0   :  { %v1111_v60 = vadd.f32 %v1110_v56, %v1109_v18  ;;  %v1306_v61 = vadd.f32 %v1305_v58, %v1304_v55  ;;  %v554_v62 = vpop.f32.mrf.mxu0 }
  0xe1   :  { %1044 = vst.msk [vmem:[%s2813_s4 + $0x28] sm:$0xf] %vm1033_vm2, %v1549_v59  ;;  %v1547_v3 = vpack.c.bf16 %v554_v62, %v554_v62  ;;  %v1240_v4 = vmul.f32 %v554_v62, %v554_v62  ;;  %v1114_v11 = vsel %vm1098_vm3, %v554_v62, 0.0  ;;  %v1315_v37 = vsel %vm1098_vm3, %v1242_v13, 0.0 }
  0xe2   :  { %v1308_v5 = vadd.f32 %v1307_v63, %v1306_v61  ;;  %v1113_v7 = vadd.f32 %v1112_v0, %v1111_v60  ;;  %v1808_v9 = vpop.f32.mrf.mxu0 }
  0xe3   :  { %1042 = vst.msk [vmem:[%s2813_s4 + $0x20] sm:$0xf] %vm1033_vm2, %v1547_v3  ;;  %v1550_v12 = vpack.c.bf16 %v1808_v9, %v1808_v9  ;;  %v1311_v16 = vsel %vm1098_vm3, %v1240_v4, 0.0  ;;  %v1243_v28 = vmul.f32 %v1808_v9, %v1808_v9  ;;  %v1120_v6 = vsel %vm1098_vm3, %v1808_v9, 0.0 }
  0xe4   :  { %v1115_v14 = vadd.f32 %v1114_v11, %v1113_v7  ;;  %v1310_v15 = vadd.f32 %v1309_v10, %v1308_v5  ;;  %v557_v2 = vpop.f32.mrf.mxu0 }
  0xe5   :  { %1045 = vst.msk [vmem:[%s2813_s4 + $0x2c] sm:$0xf] %vm1033_vm2, %v1550_v12  ;;  %v1548_v17 = vpack.c.bf16 %v557_v2, %v557_v2  ;;  %v1116_v8 = vsel %vm1098_vm3, %v557_v2, 0.0  ;;  %v1241_v19 = vmul.f32 %v557_v2, %v557_v2  ;;  %v1317_v1 = vsel %vm1098_vm3, %v1243_v28, 0.0 }
  0xe6   :  { %v1312_v22 = vadd.f32 %v1311_v16, %v1310_v15  ;;  %v1117_v23 = vadd.f32 %v1116_v8, %v1115_v14  ;;  %v1811_v24 = vpop.f32.mrf.mxu0 }
  0xe7   :  { %1043 = vst.msk [vmem:[%s2813_s4 + $0x24] sm:$0xf] %vm1033_vm2, %v1548_v17  ;;  %v1313_v31 = vsel %vm1098_vm3, %v1241_v19, 0.0  ;;  %v1553_v32 = vpack.c.bf16 %v1811_v24, %v1811_v24  ;;  %v1246_v41 = vmul.f32 %v1811_v24, %v1811_v24  ;;  %v1126_v51 = vsel %vm1098_vm3, %v1811_v24, 0.0 }
  0xe8   :  { %v1119_v33 = vadd.f32 %v1118_v27, %v1117_v23  ;;  %v1314_v35 = vadd.f32 %v1313_v31, %v1312_v22  ;;  %v570_v36 = vpop.f32.mrf.mxu0 }
  0xe9   :  { %1048 = vst.msk [vmem:[%s2813_s4 + $0x38] sm:$0xf] %vm1033_vm2, %v1553_v32  ;;  %v1551_v21 = vpack.c.bf16 %v570_v36, %v570_v36  ;;  %v1244_v25 = vmul.f32 %v570_v36, %v570_v36  ;;  %v1122_v29 = vsel %vm1098_vm3, %v570_v36, 0.0  ;;  %v1323_v34 = vsel %vm1098_vm3, %v1246_v41, 0.0 }
  0xea   :  { %v1316_v26 = vadd.f32 %v1315_v37, %v1314_v35  ;;  %v1121_v39 = vadd.f32 %v1120_v6, %v1119_v33  ;;  %v1812_v38 = vpop.f32.mrf.mxu0 }
  0xeb   :  { %1046 = vst.msk [vmem:[%s2813_s4 + $0x30] sm:$0xf] %vm1033_vm2, %v1551_v21  ;;  %v1554_v40 = vpack.c.bf16 %v1812_v38, %v1812_v38  ;;  %v1319_v45 = vsel %vm1098_vm3, %v1244_v25, 0.0  ;;  %v1247_v52 = vmul.f32 %v1812_v38, %v1812_v38  ;;  %v1128_v56 = vsel %vm1098_vm3, %v1812_v38, 0.0 }
  0xec   :  { %v1123_v42 = vadd.f32 %v1122_v29, %v1121_v39  ;;  %v1318_v43 = vadd.f32 %v1317_v1, %v1316_v26  ;;  %v573_v44 = vpop.f32.mrf.mxu0 }
  0xed   :  { %1049 = vst.msk [vmem:[%s2813_s4 + $0x3c] sm:$0xf] %vm1033_vm2, %v1554_v40  ;;  %v1552_v46 = vpack.c.bf16 %v573_v44, %v573_v44  ;;  %v1124_v20 = vsel %vm1098_vm3, %v573_v44, 0.0  ;;  %v1245_v47 = vmul.f32 %v573_v44, %v573_v44  ;;  %v1325_v63 = vsel %vm1098_vm3, %v1247_v52, 0.0 }
  0xee   :  { %v1320_v48 = vadd.f32 %v1319_v45, %v1318_v43  ;;  %v1125_v49 = vadd.f32 %v1124_v20, %v1123_v42  ;;  %v1815_v50 = vpop.f32.mrf.mxu0  ;;  %v2297_v62 = vpop.f32.mrf.mxu1 }
  0xef   :  { %1047 = vst.msk [vmem:[%s2813_s4 + $0x34] sm:$0xf] %vm1033_vm2, %v1552_v46  ;;  %v1321_v30 = vsel %vm1098_vm3, %v1245_v47, 0.0  ;;  %v1557_v53 = vpack.c.bf16 %v1815_v50, %v1815_v50  ;;  %v1250_v4 = vmul.f32 %v1815_v50, %v1815_v50  ;;  %v1573_v10 = vpack.c.bf16 %v2297_v62, %v2297_v62 }
  0xf0   :  { %v1127_v54 = vadd.f32 %v1126_v51, %v1125_v49  ;;  %v1322_v55 = vadd.f32 %v1321_v30, %v1320_v48  ;;  %v586_v18 = vpop.f32.mrf.mxu0  ;;  %v2307_v11 = vpop.f32.mrf.mxu1  ;;  %v1134_v22 = vsel %vm1098_vm3, %v1815_v50, 0.0 }
  0xf1   :  { %1052 = vst.msk [vmem:[%s2813_s4 + $0x48] sm:$0xf] %vm1033_vm2, %v1557_v53  ;;  %v1555_v57 = vpack.c.bf16 %v586_v18, %v586_v18  ;;  %v1248_v58 = vmul.f32 %v586_v18, %v586_v18  ;;  %v1130_v0 = vsel %vm1098_vm3, %v586_v18, 0.0  ;;  %1068 = vst.msk [vmem:[%s2813_s4 + $0x88] sm:$0xf] %vm1033_vm2, %v1573_v10  ;;  %v1571_v8 = vpack.c.bf16 %v2307_v11, %v2307_v11 }
  0xf2   :  { %v1324_v59 = vadd.f32 %v1323_v34, %v1322_v55  ;;  %v1129_v60 = vadd.f32 %v1128_v56, %v1127_v54  ;;  %v1816_v61 = vpop.f32.mrf.mxu0  ;;  %v2321_v19 = vpop.f32.mrf.mxu1  ;;  %v1331_v35 = vsel %vm1098_vm3, %v1250_v4, 0.0 }
  0xf3   :  { %1050 = vst.msk [vmem:[%s2813_s4 + $0x40] sm:$0xf] %vm1033_vm2, %v1555_v57  ;;  %v1558_v3 = vpack.c.bf16 %v1816_v61, %v1816_v61  ;;  %v1327_v12 = vsel %vm1098_vm3, %v1248_v58, 0.0  ;;  %v1251_v23 = vmul.f32 %v1816_v61, %v1816_v61  ;;  %1066 = vst.msk [vmem:[%s2813_s4 + $0x80] sm:$0xf] %vm1033_vm2, %v1571_v8  ;;  %v1136_v36 = vsel %vm1098_vm3, %v1816_v61, 0.0 }
  0xf4   :  { %v1131_v5 = vadd.f32 %v1130_v0, %v1129_v60  ;;  %v1326_v7 = vadd.f32 %v1325_v63, %v1324_v59  ;;  %v589_v9 = vpop.f32.mrf.mxu0  ;;  %v2333_v33 = vpop.f32.mrf.mxu1  ;;  %v1574_v39 = vpack.c.bf16 %v2321_v19, %v2321_v19 }
  0xf5   :  { %1053 = vst.msk [vmem:[%s2813_s4 + $0x4c] sm:$0xf] %vm1033_vm2, %v1558_v3  ;;  %v1556_v13 = vpack.c.bf16 %v589_v9, %v589_v9  ;;  %v1132_v14 = vsel %vm1098_vm3, %v589_v9, 0.0  ;;  %v1249_v15 = vmul.f32 %v589_v9, %v589_v9  ;;  %v1333_v1 = vsel %vm1098_vm3, %v1251_v23, 0.0 }
  0xf6   :  { %v1328_v2 = vadd.f32 %v1327_v12, %v1326_v7  ;;  %v1133_v16 = vadd.f32 %v1132_v14, %v1131_v5  ;;  %v1819_v17 = vpop.f32.mrf.mxu0  ;;  %v2343_v38 = vpop.f32.mrf.mxu1  ;;  %1069 = vst.msk [vmem:[%s2813_s4 + $0x8c] sm:$0xf] %vm1033_vm2, %v1574_v39  ;;  %v1572_v52 = vpack.c.bf16 %v2333_v33, %v2333_v33 }
  0xf7   :  { %1051 = vst.msk [vmem:[%s2813_s4 + $0x44] sm:$0xf] %vm1033_vm2, %v1556_v13  ;;  %v1329_v24 = vsel %vm1098_vm3, %v1249_v15, 0.0  ;;  %v1561_v27 = vpack.c.bf16 %v1819_v17, %v1819_v17  ;;  %v1254_v41 = vmul.f32 %v1819_v17, %v1819_v17  ;;  %v1142_v53 = vsel %vm1098_vm3, %v1819_v17, 0.0 }
  0xf8   :  { %v1135_v28 = vadd.f32 %v1134_v22, %v1133_v16  ;;  %v1330_v31 = vadd.f32 %v1329_v24, %v1328_v2  ;;  %v602_v32 = vpop.f32.mrf.mxu0  ;;  %v2355_v45 = vpop.f32.mrf.mxu1  ;;  %1067 = vst.msk [vmem:[%s2813_s4 + $0x84] sm:$0xf] %vm1033_vm2, %v1572_v52  ;;  %v1577_v5 = vpack.c.bf16 %v2343_v38, %v2343_v38 }
  0xf9   :  { %1056 = vst.msk [vmem:[%s2813_s4 + $0x58] sm:$0xf] %vm1033_vm2, %v1561_v27  ;;  %v1559_v37 = vpack.c.bf16 %v602_v32, %v602_v32  ;;  %v1252_v6 = vmul.f32 %v602_v32, %v602_v32  ;;  %v1138_v29 = vsel %vm1098_vm3, %v602_v32, 0.0  ;;  %v1339_v59 = vsel %vm1098_vm3, %v1254_v41, 0.0 }
  0xfa   :  { %v1332_v21 = vadd.f32 %v1331_v35, %v1330_v31  ;;  %v1137_v25 = vadd.f32 %v1136_v36, %v1135_v28  ;;  %v1820_v26 = vpop.f32.mrf.mxu0  ;;  %v2365_v30 = vpop.f32.mrf.mxu1  ;;  %1072 = vst.msk [vmem:[%s2813_s4 + $0x98] sm:$0xf] %vm1033_vm2, %v1577_v5  ;;  %v1575_v31 = vpack.c.bf16 %v2355_v45, %v2355_v45 }
  0xfb   :  { %1054 = vst.msk [vmem:[%s2813_s4 + $0x50] sm:$0xf] %vm1033_vm2, %v1559_v37  ;;  %v1562_v40 = vpack.c.bf16 %v1820_v26, %v1820_v26  ;;  %v1335_v46 = vsel %vm1098_vm3, %v1252_v6, 0.0  ;;  %v1255_v54 = vmul.f32 %v1820_v26, %v1820_v26  ;;  %v1144_v60 = vsel %vm1098_vm3, %v1820_v26, 0.0 }
  0xfc   :  { %v1139_v42 = vadd.f32 %v1138_v29, %v1137_v25  ;;  %v1334_v43 = vadd.f32 %v1333_v1, %v1332_v21  ;;  %v605_v44 = vpop.f32.mrf.mxu0  ;;  %v2377_v58 = vpop.f32.mrf.mxu1  ;;  %1070 = vst.msk [vmem:[%s2813_s4 + $0x90] sm:$0xf] %vm1033_vm2, %v1575_v31 }
  0xfd   :  { %1057 = vst.msk [vmem:[%s2813_s4 + $0x5c] sm:$0xf] %vm1033_vm2, %v1562_v40  ;;  %v1560_v20 = vpack.c.bf16 %v605_v44, %v605_v44  ;;  %v1140_v47 = vsel %vm1098_vm3, %v605_v44, 0.0  ;;  %v1253_v48 = vmul.f32 %v605_v44, %v605_v44  ;;  %v1341_v9 = vsel %vm1098_vm3, %v1255_v54, 0.0 }
  0xfe   :  { %v1336_v49 = vadd.f32 %v1335_v46, %v1334_v43  ;;  %v1141_v50 = vadd.f32 %v1140_v47, %v1139_v42  ;;  %v1823_v51 = vpop.f32.mrf.mxu0  ;;  %v2387_v7 = vpop.f32.mrf.mxu1  ;;  %v1578_v46 = vpack.c.bf16 %v2365_v30, %v2365_v30 }
  0xff   :  { %1055 = vst.msk [vmem:[%s2813_s4 + $0x54] sm:$0xf] %vm1033_vm2, %v1560_v20  ;;  %v1337_v55 = vsel %vm1098_vm3, %v1253_v48, 0.0  ;;  %v1565_v18 = vpack.c.bf16 %v1823_v51, %v1823_v51  ;;  %v1258_v13 = vmul.f32 %v1823_v51, %v1823_v51  ;;  %v1150_v35 = vsel %vm1098_vm3, %v1823_v51, 0.0 }
 0x100   :  { %v1143_v34 = vadd.f32 %v1142_v53, %v1141_v50  ;;  %v1338_v56 = vadd.f32 %v1337_v55, %v1336_v49  ;;  %v618_v57 = vpop.f32.mrf.mxu0  ;;  %v2399_v16 = vpop.f32.mrf.mxu1  ;;  %1073 = vst.msk [vmem:[%s2813_s4 + $0x9c] sm:$0xf] %vm1033_vm2, %v1578_v46 }
 0x101   :  { %1060 = vst.msk [vmem:[%s2813_s4 + $0x68] sm:$0xf] %vm1033_vm2, %v1565_v18  ;;  %v1563_v61 = vpack.c.bf16 %v618_v57, %v618_v57  ;;  %v1256_v63 = vmul.f32 %v618_v57, %v618_v57  ;;  %v1146_v10 = vsel %vm1098_vm3, %v618_v57, 0.0  ;;  %v1347_v1 = vsel %vm1098_vm3, %v1258_v13, 0.0 }
 0x102   :  { %v1340_v0 = vadd.f32 %v1339_v59, %v1338_v56  ;;  %v1145_v3 = vadd.f32 %v1144_v60, %v1143_v34  ;;  %v1824_v4 = vpop.f32.mrf.mxu0  ;;  %v2409_v32 = vpop.f32.mrf.mxu1  ;;  %v1576_v60 = vpack.c.bf16 %v2377_v58, %v2377_v58 }
 0x103   :  { %1058 = vst.msk [vmem:[%s2813_s4 + $0x60] sm:$0xf] %vm1033_vm2, %v1563_v61  ;;  %v1566_v12 = vpack.c.bf16 %v1824_v4, %v1824_v4  ;;  %v1343_v17 = vsel %vm1098_vm3, %v1256_v63, 0.0  ;;  %v1259_v36 = vmul.f32 %v1824_v4, %v1824_v4  ;;  %v1152_v29 = vsel %vm1098_vm3, %v1824_v4, 0.0 }
 0x104   :  { %v1147_v14 = vadd.f32 %v1146_v10, %v1145_v3  ;;  %v1342_v15 = vadd.f32 %v1341_v9, %v1340_v0  ;;  %v621_v2 = vpop.f32.mrf.mxu0  ;;  %v2421_v39 = vpop.f32.mrf.mxu1  ;;  %v1581_v4 = vpack.c.bf16 %v2387_v7, %v2387_v7  ;;  %1071 = vst.msk [vmem:[%s2813_s4 + $0x94] sm:$0xf] %vm1033_vm2, %v1576_v60 }
 0x105   :  { %1061 = vst.msk [vmem:[%s2813_s4 + $0x6c] sm:$0xf] %vm1033_vm2, %v1566_v12  ;;  %v1564_v8 = vpack.c.bf16 %v621_v2, %v621_v2  ;;  %v1148_v22 = vsel %vm1098_vm3, %v621_v2, 0.0  ;;  %v1257_v23 = vmul.f32 %v621_v2, %v621_v2  ;;  %v1349_v47 = vsel %vm1098_vm3, %v1259_v36, 0.0 }
 0x106   :  { %v1344_v24 = vadd.f32 %v1343_v17, %v1342_v15  ;;  %v1149_v27 = vadd.f32 %v1148_v22, %v1147_v14  ;;  %v1827_v28 = vpop.f32.mrf.mxu0  ;;  %v2431_v20 = vpop.f32.mrf.mxu1  ;;  %v1264_v14 = vmul.f32 %v2307_v11, %v2307_v11  ;;  %1076 = vst.msk [vmem:[%s2813_s4 + $0xa8] sm:$0xf] %vm1033_vm2, %v1581_v4  ;;  %v1579_v15 = vpack.c.bf16 %v2399_v16, %v2399_v16 }
 0x107   :  { %1059 = vst.msk [vmem:[%s2813_s4 + $0x64] sm:$0xf] %vm1033_vm2, %v1564_v8  ;;  %v1345_v37 = vsel %vm1098_vm3, %v1257_v23, 0.0  ;;  %v1569_v6 = vpack.c.bf16 %v1827_v28, %v1827_v28  ;;  %v1262_v50 = vmul.f32 %v1827_v28, %v1827_v28  ;;  %v1158_v63 = vsel %vm1098_vm3, %v1827_v28, 0.0 }
 0x108   :  { %v1151_v21 = vadd.f32 %v1150_v35, %v1149_v27  ;;  %v1346_v25 = vadd.f32 %v1345_v37, %v1344_v24  ;;  %v634_v26 = vpop.f32.mrf.mxu0  ;;  %v2443_v54 = vpop.f32.mrf.mxu1  ;;  %v1582_v8 = vpack.c.bf16 %v2409_v32, %v2409_v32  ;;  %v1162_v24 = vsel %vm1098_vm3, %v2307_v11, 0.0  ;;  %1074 = vst.msk [vmem:[%s2813_s4 + $0xa0] sm:$0xf] %vm1033_vm2, %v1579_v15 }
 0x109   :  { %1064 = vst.msk [vmem:[%s2813_s4 + $0x78] sm:$0xf] %vm1033_vm2, %v1569_v6  ;;  %v1567_v40 = vpack.c.bf16 %v634_v26, %v634_v26  ;;  %v1260_v41 = vmul.f32 %v634_v26, %v634_v26  ;;  %v1154_v48 = vsel %vm1098_vm3, %v634_v26, 0.0  ;;  %v1355_v12 = vsel %vm1098_vm3, %v1262_v50, 0.0 }
 0x10a   :  { %v1348_v42 = vadd.f32 %v1347_v1, %v1346_v25  ;;  %v1153_v43 = vadd.f32 %v1152_v29, %v1151_v21  ;;  %v1828_v44 = vpop.f32.mrf.mxu0  ;;  %v2453_v61 = vpop.f32.mrf.mxu1  ;;  %v1265_v27 = vmul.f32 %v2333_v33, %v2333_v33  ;;  %v1580_v28 = vpack.c.bf16 %v2421_v39, %v2421_v39  ;;  %1077 = vst.msk [vmem:[%s2813_s4 + $0xac] sm:$0xf] %vm1033_vm2, %v1582_v8 }
 0x10b   :  { %1062 = vst.msk [vmem:[%s2813_s4 + $0x70] sm:$0xf] %vm1033_vm2, %v1567_v40  ;;  %v1570_v49 = vpack.c.bf16 %v1828_v44, %v1828_v44  ;;  %v1351_v55 = vsel %vm1098_vm3, %v1260_v41, 0.0  ;;  %v1263_v0 = vmul.f32 %v1828_v44, %v1828_v44  ;;  %v1160_v13 = vsel %vm1098_vm3, %v1828_v44, 0.0 }
 0x10c   :  { %v1155_v51 = vadd.f32 %v1154_v48, %v1153_v43  ;;  %v1350_v52 = vadd.f32 %v1349_v47, %v1348_v42  ;;  %v637_v53 = vpop.f32.mrf.mxu0  ;;  %v2467_v10 = vpop.f32.mrf.mxu1  ;;  %v1266_v11 = vmul.f32 %v2297_v62, %v2297_v62  ;;  %v1359_v37 = vsel %vm1098_vm3, %v1264_v14, 0.0  ;;  %1075 = vst.msk [vmem:[%s2813_s4 + $0xa4] sm:$0xf] %vm1033_vm2, %v1580_v28 }
 0x10d   :  { %1065 = vst.msk [vmem:[%s2813_s4 + $0x7c] sm:$0xf] %vm1033_vm2, %v1570_v49  ;;  %v1568_v18 = vpack.c.bf16 %v637_v53, %v637_v53  ;;  %v1156_v34 = vsel %vm1098_vm3, %v637_v53, 0.0  ;;  %v1261_v56 = vmul.f32 %v637_v53, %v637_v53  ;;  %v1357_v23 = vsel %vm1098_vm3, %v1263_v0, 0.0 }
 0x10e   :  { %v1352_v57 = vadd.f32 %v1351_v55, %v1350_v52  ;;  %v1157_v59 = vadd.f32 %v1156_v34, %v1155_v51  ;;  %v2481_v22 = vpop.f32.mrf.mxu1  ;;  %v1164_v6 = vsel %vm1098_vm3, %v2333_v33, 0.0  ;;  %v1585_v21 = vpack.c.bf16 %v2431_v20, %v2431_v20 }
 0x10f   :  { %1063 = vst.msk [vmem:[%s2813_s4 + $0x74] sm:$0xf] %vm1033_vm2, %v1568_v18  ;;  %v1353_v3 = vsel %vm1098_vm3, %v1261_v56, 0.0  ;;  %v1583_v1 = vpack.c.bf16 %v2443_v54, %v2443_v54  ;;  %v1166_v40 = vsel %vm1098_vm3, %v2297_v62, 0.0  ;;  %v1267_v33 = vmul.f32 %v2321_v19, %v2321_v19 }
 0x110   :  { %v1159_v5 = vadd.f32 %v1158_v63, %v1157_v59  ;;  %v1354_v9 = vadd.f32 %v1353_v3, %v1352_v57  ;;  %v2498_v36 = vpop.f32.mrf.mxu1  ;;  %v1361_v41 = vsel %vm1098_vm3, %v1265_v27, 0.0  ;;  %1080 = vst.msk [vmem:[%s2813_s4 + $0xb8] sm:$0xf] %vm1033_vm2, %v1585_v21  ;;  %v1586_v42 = vpack.c.bf16 %v2453_v61, %v2453_v61 }
 0x111   :  { %1078 = vst.msk [vmem:[%s2813_s4 + $0xb0] sm:$0xf] %vm1033_vm2, %v1583_v1  ;;  %v1363_v46 = vsel %vm1098_vm3, %v1266_v11, 0.0  ;;  %v1168_v47 = vsel %vm1098_vm3, %v2321_v19, 0.0  ;;  %v1268_v48 = vmul.f32 %v2355_v45, %v2355_v45  ;;  %v1584_v49 = vpack.c.bf16 %v2467_v10, %v2467_v10 }
 0x112   :  { %v1161_v2 = vadd.f32 %v1160_v13, %v1159_v5  ;;  %v1356_v17 = vadd.f32 %v1355_v12, %v1354_v9  ;;  %v2513_v29 = vpop.f32.mrf.mxu1  ;;  %1081 = vst.msk [vmem:[%s2813_s4 + $0xbc] sm:$0xf] %vm1033_vm2, %v1586_v42  ;;  %v1589_v52 = vpack.c.bf16 %v2481_v22, %v2481_v22  ;;  %v1365_v19 = vsel %vm1098_vm3, %v1267_v33, 0.0 }
 0x113   :  { %v1170_v55 = vsel %vm1098_vm3, %v2355_v45, 0.0  ;;  %v1269_v18 = vmul.f32 %v2377_v58, %v2377_v58  ;;  %1079 = vst.msk [vmem:[%s2813_s4 + $0xb4] sm:$0xf] %vm1033_vm2, %v1584_v49  ;;  %v1587_v34 = vpack.c.bf16 %v2498_v36, %v2498_v36  ;;  %v1270_v45 = vmul.f32 %v2343_v38, %v2343_v38 }
 0x114   :  { %v1358_v31 = vadd.f32 %v1357_v23, %v1356_v17  ;;  %v1163_v35 = vadd.f32 %v1162_v24, %v1161_v2  ;;  %v2530_v62 = vpop.f32.mrf.mxu1  ;;  %1084 = vst.msk [vmem:[%s2813_s4 + $0xc8] sm:$0xf] %vm1033_vm2, %v1589_v52  ;;  %v1367_v60 = vsel %vm1098_vm3, %v1268_v48, 0.0  ;;  %v1172_v63 = vsel %vm1098_vm3, %v2377_v58, 0.0 }
 0x115   :  { %1082 = vst.msk [vmem:[%s2813_s4 + $0xc0] sm:$0xf] %vm1033_vm2, %v1587_v34  ;;  %v1590_v0 = vpack.c.bf16 %v2513_v29, %v2513_v29  ;;  %v1588_v5 = vpack.c.bf16 %v2530_v62, %v2530_v62  ;;  %v1174_v12 = vsel %vm1098_vm3, %v2343_v38, 0.0  ;;  %v1271_v58 = vmul.f32 %v2365_v30, %v2365_v30 }
 0x116   :  { %v1165_v25 = vadd.f32 %v1164_v6, %v1163_v35  ;;  %v1360_v26 = vadd.f32 %v1359_v37, %v1358_v31  ;;  %v2545_v53 = vpop.f32.mrf.mxu1  ;;  %v1369_v13 = vsel %vm1098_vm3, %v1269_v18, 0.0  ;;  %v1371_v17 = vsel %vm1098_vm3, %v1270_v45, 0.0 }
 0x117   :  { %1085 = vst.msk [vmem:[%s2813_s4 + $0xcc] sm:$0xf] %vm1033_vm2, %v1590_v0  ;;  %v1593_v14 = vpack.c.bf16 %v2545_v53, %v2545_v53  ;;  %1083 = vst.msk [vmem:[%s2813_s4 + $0xc4] sm:$0xf] %vm1033_vm2, %v1588_v5  ;;  %v1176_v8 = vsel %vm1098_vm3, %v2365_v30, 0.0  ;;  %v1272_v23 = vmul.f32 %v2399_v16, %v2399_v16  ;;  %v1373_v30 = vsel %vm1098_vm3, %v1271_v58, 0.0 }
 0x118   :  { %v1167_v43 = vadd.f32 %v1166_v40, %v1165_v25  ;;  %v1362_v44 = vadd.f32 %v1361_v41, %v1360_v26  ;;  %v2562_v59 = vpop.f32.mrf.mxu1  ;;  %v1178_v11 = vsel %vm1098_vm3, %v2399_v16, 0.0  ;;  %v1273_v37 = vmul.f32 %v2421_v39, %v2421_v39 }
 0x119   :  { %1088 = vst.msk [vmem:[%s2813_s4 + $0xd8] sm:$0xf] %vm1033_vm2, %v1593_v14  ;;  %v1591_v24 = vpack.c.bf16 %v2562_v59, %v2562_v59  ;;  %v1274_v16 = vmul.f32 %v2387_v7, %v2387_v7  ;;  %v1375_v1 = vsel %vm1098_vm3, %v1272_v23, 0.0  ;;  %v1180_v40 = vsel %vm1098_vm3, %v2421_v39, 0.0 }
 0x11a   :  { %v1364_v50 = vadd.f32 %v1363_v46, %v1362_v44  ;;  %v1169_v51 = vadd.f32 %v1168_v47, %v1167_v43  ;;  %v2577_v9 = vpop.f32.mrf.mxu1  ;;  %v1182_v46 = vsel %vm1098_vm3, %v2387_v7, 0.0  ;;  %v1275_v39 = vmul.f32 %v2409_v32, %v2409_v32 }
 0x11b   :  { %v1594_v31 = vpack.c.bf16 %v2577_v9, %v2577_v9  ;;  %1086 = vst.msk [vmem:[%s2813_s4 + $0xd0] sm:$0xf] %vm1033_vm2, %v1591_v24  ;;  %v1377_v47 = vsel %vm1098_vm3, %v1273_v37, 0.0  ;;  %v1184_v52 = vsel %vm1098_vm3, %v2409_v32, 0.0  ;;  %v1186_v32 = vsel %vm1098_vm3, %v2443_v54, 0.0 }
 0x11c   :  { %v1171_v56 = vadd.f32 %v1170_v55, %v1169_v51  ;;  %v1366_v57 = vadd.f32 %v1365_v19, %v1364_v50  ;;  %v2594_v38 = vpop.f32.mrf.mxu1  ;;  %v1379_v51 = vsel %vm1098_vm3, %v1274_v16, 0.0  ;;  %v1276_v19 = vmul.f32 %v2443_v54, %v2443_v54 }
 0x11d   :  { %v1592_v6 = vpack.c.bf16 %v2594_v38, %v2594_v38  ;;  %1089 = vst.msk [vmem:[%s2813_s4 + $0xdc] sm:$0xf] %vm1033_vm2, %v1594_v31  ;;  %v1277_v45 = vmul.f32 %v2467_v10, %v2467_v10  ;;  %v1188_v5 = vsel %vm1098_vm3, %v2467_v10, 0.0  ;;  %v1282_v16 = vmul.f32 %v2481_v22, %v2481_v22 }
 0x11e   :  { %v1368_v3 = vadd.f32 %v1367_v60, %v1366_v57  ;;  %v1173_v4 = vadd.f32 %v1172_v63, %v1171_v56  ;;  %v2609_v35 = vpop.f32.mrf.mxu1  ;;  %v1381_v57 = vsel %vm1098_vm3, %v1275_v39, 0.0  ;;  %v1383_v54 = vsel %vm1098_vm3, %v1276_v19, 0.0 }
 0x11f   :  { %1087 = vst.msk [vmem:[%s2813_s4 + $0xd4] sm:$0xf] %vm1033_vm2, %v1592_v6  ;;  %v1597_v33 = vpack.c.bf16 %v2609_v35, %v2609_v35  ;;  %v1385_v10 = vsel %vm1098_vm3, %v1277_v45, 0.0  ;;  %v1194_v6 = vsel %vm1098_vm3, %v2498_v36, 0.0  ;;  %v1206_v45 = vsel %vm1098_vm3, %v2545_v53, 0.0 }
 0x120   :  { %v1175_v15 = vadd.f32 %v1174_v12, %v1173_v4  ;;  %v1370_v2 = vadd.f32 %v1369_v13, %v1368_v3  ;;  %v2626_v26 = vpop.f32.mrf.mxu1  ;;  %v1278_v4 = vmul.f32 %v2431_v20, %v2431_v20 }
 0x121   :  { %v1595_v43 = vpack.c.bf16 %v2626_v26, %v2626_v26  ;;  %1092 = vst.msk [vmem:[%s2813_s4 + $0xe8] sm:$0xf] %vm1033_vm2, %v1597_v33 }
 0x122   :  { %v1372_v27 = vadd.f32 %v1371_v17, %v1370_v2  ;;  %v1177_v28 = vadd.f32 %v1176_v8, %v1175_v15  ;;  %v2641_v44 = vpop.f32.mrf.mxu1  ;;  %v1190_v15 = vsel %vm1098_vm3, %v2431_v20, 0.0  ;;  %v1279_v2 = vmul.f32 %v2453_v61, %v2453_v61 }
 0x123   :  { %v1598_v48 = vpack.c.bf16 %v2641_v44, %v2641_v44  ;;  %1090 = vst.msk [vmem:[%s2813_s4 + $0xe0] sm:$0xf] %vm1033_vm2, %v1595_v43  ;;  %v1192_v20 = vsel %vm1098_vm3, %v2453_v61, 0.0  ;;  %v1281_v61 = vmul.f32 %v2530_v62, %v2530_v62 }
 0x124   :  { %v1179_v21 = vadd.f32 %v1178_v11, %v1177_v28  ;;  %v1374_v25 = vadd.f32 %v1373_v30, %v1372_v27  ;;  %v2658_v7 = vpop.f32.mrf.mxu1  ;;  %v1387_v27 = vsel %vm1098_vm3, %v1278_v4, 0.0  ;;  %v1280_v28 = vmul.f32 %v2498_v36, %v2498_v36 }
 0x125   :  { %1093 = vst.msk [vmem:[%s2813_s4 + $0xec] sm:$0xf] %vm1033_vm2, %v1598_v48  ;;  %v1596_v55 = vpack.c.bf16 %v2658_v7, %v2658_v7  ;;  %v1389_v37 = vsel %vm1098_vm3, %v1279_v2, 0.0  ;;  %v1393_v43 = vsel %vm1098_vm3, %v1281_v61, 0.0  ;;  %v1200_v48 = vsel %vm1098_vm3, %v2513_v29, 0.0 }
 0x126   :  { %v1376_v41 = vadd.f32 %v1375_v1, %v1374_v25  ;;  %v1181_v42 = vadd.f32 %v1180_v40, %v1179_v21  ;;  %v2671_v56 = vpop.f32.mrf.mxu1  ;;  %v1391_v1 = vsel %vm1098_vm3, %v1280_v28, 0.0  ;;  %v1196_v40 = vsel %vm1098_vm3, %v2530_v62, 0.0 }
 0x127   :  { %1091 = vst.msk [vmem:[%s2813_s4 + $0xe4] sm:$0xf] %vm1033_vm2, %v1596_v55  ;;  %v1601_v60 = vpack.c.bf16 %v2671_v56, %v2671_v56  ;;  %v1284_v62 = vmul.f32 %v2562_v59, %v2562_v59 }
 0x128   :  { %v1183_v49 = vadd.f32 %v1182_v46, %v1181_v42  ;;  %v1378_v50 = vadd.f32 %v1377_v47, %v1376_v41  ;;  %v2684_v3 = vpop.f32.mrf.mxu1  ;;  %v1198_v41 = vsel %vm1098_vm3, %v2481_v22, 0.0  ;;  %v1283_v42 = vmul.f32 %v2513_v29, %v2513_v29 }
 0x129   :  { %1096 = vst.msk [vmem:[%s2813_s4 + $0xf8] sm:$0xf] %vm1033_vm2, %v1601_v60  ;;  %v1599_v12 = vpack.c.bf16 %v2684_v3, %v2684_v3  ;;  %v1395_v47 = vsel %vm1098_vm3, %v1282_v16, 0.0  ;;  %v1202_v22 = vsel %vm1098_vm3, %v2562_v59, 0.0  ;;  %v1399_v29 = vsel %vm1098_vm3, %v1284_v62, 0.0 }
 0x12a   :  { %v1380_v18 = vadd.f32 %v1379_v51, %v1378_v50  ;;  %v1185_v34 = vadd.f32 %v1184_v52, %v1183_v49  ;;  %v2697_v14 = vpop.f32.mrf.mxu1  ;;  %v1397_v51 = vsel %vm1098_vm3, %v1283_v42, 0.0  ;;  %v1285_v52 = vmul.f32 %v2594_v38, %v2594_v38 }
 0x12b   :  { %1094 = vst.msk [vmem:[%s2813_s4 + $0xf0] sm:$0xf] %vm1033_vm2, %v1599_v12  ;;  %v1602_v17 = vpack.c.bf16 %v2697_v14, %v2697_v14  ;;  %v1287_v59 = vmul.f32 %v2577_v9, %v2577_v9 }
 0x12c   :  { %v1187_v63 = vadd.f32 %v1186_v32, %v1185_v34  ;;  %v1382_v0 = vadd.f32 %v1381_v57, %v1380_v18  ;;  %v2710_v24 = vpop.f32.mrf.mxu1  ;;  %v1286_v18 = vmul.f32 %v2545_v53, %v2545_v53  ;;  %v1204_v34 = vsel %vm1098_vm3, %v2594_v38, 0.0 }
 0x12d   :  { %1097 = vst.msk [vmem:[%s2813_s4 + $0xfc] sm:$0xf] %vm1033_vm2, %v1602_v17  ;;  %v1600_v31 = vpack.c.bf16 %v2710_v24, %v2710_v24  ;;  %v1401_v60 = vsel %vm1098_vm3, %v1285_v52, 0.0  ;;  %v1288_v38 = vmul.f32 %v2626_v26, %v2626_v26  ;;  %v1210_v53 = vsel %vm1098_vm3, %v2626_v26, 0.0 }
 0x12e   :  { %v1384_v58 = vadd.f32 %v1383_v54, %v1382_v0  ;;  %v1189_v13 = vadd.f32 %v1188_v5, %v1187_v63  ;;  %v1403_v4 = vsel %vm1098_vm3, %v1286_v18, 0.0  ;;  %v1208_v54 = vsel %vm1098_vm3, %v2577_v9, 0.0 }
 0x12f   :  { %1095 = vst.msk [vmem:[%s2813_s4 + $0xf4] sm:$0xf] %vm1033_vm2, %v1600_v31  ;;  %v1407_v9 = vsel %vm1098_vm3, %v1288_v38, 0.0  ;;  %v1212_v17 = vsel %vm1098_vm3, %v2658_v7, 0.0  ;;  %v1291_v26 = vmul.f32 %v2641_v44, %v2641_v44 }
 0x130   :  { %v1191_v8 = vadd.f32 %v1190_v15, %v1189_v13  ;;  %v1386_v23 = vadd.f32 %v1385_v10, %v1384_v58  ;;  %v1405_v58 = vsel %vm1098_vm3, %v1287_v59, 0.0  ;;  %v1289_v13 = vmul.f32 %v2658_v7, %v2658_v7 }
 0x131   :  { %v1290_v10 = vmul.f32 %v2609_v35, %v2609_v35  ;;  %v1292_v7 = vmul.f32 %v2684_v3, %v2684_v3  ;;  %v1413_v61 = vsel %vm1098_vm3, %v1291_v26, 0.0 }
 0x132   :  { %v1388_v30 = vadd.f32 %v1387_v27, %v1386_v23  ;;  %v1193_v11 = vadd.f32 %v1192_v20, %v1191_v8  ;;  %v1214_v27 = vsel %vm1098_vm3, %v2609_v35, 0.0  ;;  %v1409_v20 = vsel %vm1098_vm3, %v1289_v13, 0.0 }
 0x133   :  { %v1218_v35 = vsel %vm1098_vm3, %v2684_v3, 0.0  ;;  %v1295_v3 = vmul.f32 %v2697_v14, %v2697_v14 }
 0x134   :  { %v1195_v21 = vadd.f32 %v1194_v6, %v1193_v11  ;;  %v1390_v25 = vadd.f32 %v1389_v37, %v1388_v30  ;;  %v1411_v30 = vsel %vm1098_vm3, %v1290_v10, 0.0  ;;  %v1216_v11 = vsel %vm1098_vm3, %v2641_v44, 0.0 }
 0x135   :  { %v1415_v44 = vsel %vm1098_vm3, %v1292_v7, 0.0 }
 0x136   :  { %v1392_v33 = vadd.f32 %v1391_v1, %v1390_v25  ;;  %v1197_v36 = vadd.f32 %v1196_v40, %v1195_v21  ;;  %v1293_v21 = vmul.f32 %v2710_v24, %v2710_v24  ;;  %v1294_v1 = vmul.f32 %v2671_v56, %v2671_v56 }
 0x137   :  { %v1220_v40 = vsel %vm1098_vm3, %v2710_v24, 0.0  ;;  %v1421_v24 = vsel %vm1098_vm3, %v1295_v3, 0.0 }
 0x138   :  { %v1199_v46 = vadd.f32 %v1198_v41, %v1197_v36  ;;  %v1394_v39 = vadd.f32 %v1393_v43, %v1392_v33  ;;  %v1222_v41 = vsel %vm1098_vm3, %v2671_v56, 0.0  ;;  %v1417_v42 = vsel %vm1098_vm3, %v1293_v21, 0.0 }
 0x13a   :  { %v1396_v49 = vadd.f32 %v1395_v47, %v1394_v39  ;;  %v1201_v50 = vadd.f32 %v1200_v48, %v1199_v46  ;;  %v1419_v39 = vsel %vm1098_vm3, %v1294_v1, 0.0  ;;  %v1224_v47 = vsel %vm1098_vm3, %v2697_v14, 0.0 }
 0x13c   :  { %v1203_v19 = vadd.f32 %v1202_v22, %v1201_v50  ;;  %v1398_v55 = vadd.f32 %v1397_v51, %v1396_v49 }
 0x13e   :  { %v1400_v57 = vadd.f32 %v1399_v29, %v1398_v55  ;;  %v1205_v32 = vadd.f32 %v1204_v34, %v1203_v19 }
 0x140   :  { %v1207_v63 = vadd.f32 %v1206_v45, %v1205_v32  ;;  %v1402_v0 = vadd.f32 %v1401_v60, %v1400_v57 }
 0x142   :  { %v1404_v5 = vadd.f32 %v1403_v4, %v1402_v0  ;;  %v1209_v12 = vadd.f32 %v1208_v54, %v1207_v63 }
 0x144   :  { %v1211_v15 = vadd.f32 %v1210_v53, %v1209_v12  ;;  %v1406_v2 = vadd.f32 %v1405_v58, %v1404_v5 }
 0x146   :  { %v1408_v8 = vadd.f32 %v1407_v9, %v1406_v2  ;;  %v1213_v23 = vadd.f32 %v1212_v17, %v1211_v15 }
 0x148   :  { %v1215_v28 = vadd.f32 %v1214_v27, %v1213_v23  ;;  %v1410_v31 = vadd.f32 %v1409_v20, %v1408_v8 }
 0x14a   :  { %v1412_v37 = vadd.f32 %v1411_v30, %v1410_v31  ;;  %v1217_v6 = vadd.f32 %v1216_v11, %v1215_v28 }
 0x14c   :  { %v1219_v25 = vadd.f32 %v1218_v35, %v1217_v6  ;;  %v1414_v16 = vadd.f32 %v1413_v61, %v1412_v37 }
 0x14e   :  { %v1416_v33 = vadd.f32 %v1415_v44, %v1414_v16  ;;  %v1221_v36 = vadd.f32 %v1220_v40, %v1219_v25 }
 0x150   :  { %v1223_v43 = vadd.f32 %v1222_v41, %v1221_v36  ;;  %v1418_v46 = vadd.f32 %v1417_v42, %v1416_v33 }
 0x152   :  { %v1225_v48 = vadd.f32 %v1224_v47, %v1223_v43  ;;  %v1420_v62 = vadd.f32 %v1419_v39, %v1418_v46 }
 0x154   :  { %v1226_v49 = vrot.slane %v1225_v48, 4  ;;  %v1422_v50 = vadd.f32 %v1421_v24, %v1420_v62 }
 0x156   :  { %v1227_v51 = vadd.f32 %v1226_v49, %v1225_v48  ;;  %v1423_v56 = vrot.slane %v1422_v50, 4 }
 0x158   :  { %v1228_v22 = vrot.slane %v1227_v51, 2  ;;  %v1424_v52 = vadd.f32 %v1423_v56, %v1422_v50 }
 0x15a   :  { %v1229_v19 = vadd.f32 %v1228_v22, %v1227_v51  ;;  %v1425_v55 = vrot.slane %v1424_v52, 2 }
 0x15c   :  { %v1230_v18 = vrot.slane %v1229_v19, 1  ;;  %v1426_v29 = vadd.f32 %v1425_v55, %v1424_v52 }
 0x15e   :  { %v1427_v34 = vrot.slane %v1426_v29, 1  ;;  %v1231_v57 = vadd.f32 %v1230_v18, %v1229_v19 }
 0x160   :  { %v1428_v32 = vadd.f32 %v1427_v34, %v1426_v29 }
 0x162   :  { %v1430_v14 = vsel %vm1429_vm4, %v1231_v57, %v1428_v32 }
 0x163   :  { %1432 = vst.msk [vmem:[%s2814_s5] sm:$0x3] %vm1431_vm5, %v1430_v14 }

// kernel: bottleneck_forward.4
= control target key start
LH: loop header
LB: loop body
LE: loop exit
PB: predicated region body
PF: predicated region fallthrough
CT: control target
= control target key end

     0   :  { %vm341_vm0 = vcmask 1043456   ;;  %vm244_vm1 = vcmask 64512   ;;  %vm1183_vm2 = vcmask 27648   ;;  %vm1504_vm3 = vcmask 125952   ;;  %s4513_s1 = inlined_call_operand.vmem [shape: bf16[8,4], index: 1, kind: input, shape index: {}]   ;;  %s4514_s2 = inlined_call_operand.vmem [shape: bf16[8,16], index: 2, kind: input, shape index: {}]   ;;  %s4515_s0 = inlined_call_operand.vmem [shape: bf16[512,8], index: 0, kind: input, shape index: {}]   ;;  %s4516_s3 = inlined_call_operand.vmem [shape: bf16[512,4], index: 3, kind: output, shape index: {0}]   ;;  %s4517_s4 = inlined_call_operand.vmem [shape: bf16[512,16], index: 4, kind: output, shape index: {1}]   ;;  %s4518_s5 = inlined_call_operand.vmem [shape: f32[1,2,4], index: 5, kind: output, shape index: {2}]   ;;  %s4519_s6 = inlined_call_operand.vmem [shape: f32[1,2,16], index: 6, kind: output, shape index: {3}]  }
   0x1   :  { %v83_v0 = vld [vmem:[%s4513_s1] sm:$0xf]  ;;  %v2807_v5 = vld [vmem:[%s4515_s0 + $0x8] sm:$0xff]   ;;  %v2808_v6 = vld [vmem:[%s4515_s0 + $0x10] sm:$0xff]   ;;  %vm1569_vm4 = vcmask 31744   ;;  %vm1904_vm5 = vcmask 130048  }
   0x2   :  { %v634_v1 = vld [vmem:[%s4514_s2] sm:$0xf]  ;;  %2804 = vmatprep.subr.msk.bf16.mxu0 %vm341_vm0, %v83_v0  ;;  %v343_v2 = vsel %vm341_vm0, %v83_v0, 0  ;;  %v2809_v7 = vld [vmem:[%s4515_s0 + $0x18] sm:$0xff]   ;;  %v2811_v9 = vld [vmem:[%s4515_s0 + $0x28] sm:$0xff]   ;;  %vm1900_vm6 = vcmask 1040384  }
   0x3   :  { %2805 = vmatprep.subr.msk.bf16.mxu1 %vm341_vm0, %v634_v1  ;;  %v636_v3 = vsel %vm341_vm0, %v634_v1, 0  ;;  %v2806_v4 = vld [vmem:[%s4515_s0] sm:$0xff]   ;;  %2673 = vmatpush3.bf16.msra.mxu0 %v343_v2  ;;  %v2812_v10 = vld [vmem:[%s4515_s0 + $0x30] sm:$0xff]   ;;  %v2813_v11 = vld [vmem:[%s4515_s0 + $0x38] sm:$0xff]   ;;  %vm1902_vm7 = vcmask 25600   ;;  %vm2236_vm8 = vcmask 123904  }
   0x4   :  { %2739 = vmatpush3.bf16.msra.mxu1 %v636_v3  ;;  %2674 = vmatprep.mubr.msk.bf16.mxu0 %vm244_vm1, %v2806_v4  ;;  %v2810_v8 = vld [vmem:[%s4515_s0 + $0x20] sm:$0xff]   ;;  %v2815_v13 = vld [vmem:[%s4515_s0 + $0x48] sm:$0xff]   ;;  %v2816_v14 = vld [vmem:[%s4515_s0 + $0x50] sm:$0xff]  }
   0x5   :  { %2740 = vmatprep.mubr.msk.bf16.mxu1 %vm244_vm1, %v2806_v4  ;;  %v2814_v12 = vld [vmem:[%s4515_s0 + $0x40] sm:$0xff]   ;;  %v2817_v15 = vld [vmem:[%s4515_s0 + $0x58] sm:$0xff]   ;;  %v2819_v17 = vld [vmem:[%s4515_s0 + $0x68] sm:$0xff]  }
   0x6   :  { %2675 = vmatmul.mubr.msk.bf16.vlgmr.msra.gmra.mxu0 %vm244_vm1, %v2807_v5  ;;  %v2818_v16 = vld [vmem:[%s4515_s0 + $0x60] sm:$0xff]   ;;  %v2820_v18 = vld [vmem:[%s4515_s0 + $0x70] sm:$0xff]   ;;  %v2821_v19 = vld [vmem:[%s4515_s0 + $0x78] sm:$0xff]  }
   0x7   :  { %2741 = vmatmul.mubr.msk.bf16.vlgmr.msra.gmra.mxu1 %vm244_vm1, %v2807_v5  ;;  %2678 = vmatprep.mubr.msk.bf16.mxu0 %vm244_vm1, %v2808_v6  ;;  %v2822_v20 = vld [vmem:[%s4515_s0 + $0x80] sm:$0xff]   ;;  %v2823_v21 = vld [vmem:[%s4515_s0 + $0x88] sm:$0xff]   ;;  %v2824_v22 = vld [vmem:[%s4515_s0 + $0x90] sm:$0xff]  }
   0x8   :  { %2744 = vmatprep.mubr.msk.bf16.mxu1 %vm244_vm1, %v2808_v6  ;;  %v2825_v23 = vld [vmem:[%s4515_s0 + $0x98] sm:$0xff]   ;;  %v2826_v24 = vld [vmem:[%s4515_s0 + $0xa0] sm:$0xff]   ;;  %v2827_v25 = vld [vmem:[%s4515_s0 + $0xa8] sm:$0xff]  }
   0x9   :  { %v2828_v26 = vld [vmem:[%s4515_s0 + $0xb0] sm:$0xff]   ;;  %v2829_v27 = vld [vmem:[%s4515_s0 + $0xb8] sm:$0xff]   ;;  %v2830_v28 = vld [vmem:[%s4515_s0 + $0xc0] sm:$0xff]  }
   0xa   :  { %v2831_v29 = vld [vmem:[%s4515_s0 + $0xc8] sm:$0xff]   ;;  %v2832_v30 = vld [vmem:[%s4515_s0 + $0xd0] sm:$0xff]   ;;  %v2833_v31 = vld [vmem:[%s4515_s0 + $0xd8] sm:$0xff]  }
   0xb   :  { %v2834_v32 = vld [vmem:[%s4515_s0 + $0xe0] sm:$0xff]   ;;  %v2835_v33 = vld [vmem:[%s4515_s0 + $0xe8] sm:$0xff]   ;;  %v2836_v34 = vld [vmem:[%s4515_s0 + $0xf0] sm:$0xff]  }
   0xc   :  { %v2837_v35 = vld [vmem:[%s4515_s0 + $0xf8] sm:$0xff]  }
   0xe   :  { %2679 = vmatmul.mubr.msk.bf16.gmra.mxu0 %vm244_vm1, %v2809_v7 }
   0xf   :  { %2745 = vmatmul.mubr.msk.bf16.gmra.mxu1 %vm244_vm1, %v2809_v7  ;;  %2682 = vmatprep.mubr.msk.bf16.mxu0 %vm244_vm1, %v2810_v8 }
  0x10   :  { %2748 = vmatprep.mubr.msk.bf16.mxu1 %vm244_vm1, %v2810_v8 }
  0x16   :  { %2683 = vmatmul.mubr.msk.bf16.gmra.mxu0 %vm244_vm1, %v2811_v9 }
  0x17   :  { %2749 = vmatmul.mubr.msk.bf16.gmra.mxu1 %vm244_vm1, %v2811_v9  ;;  %2686 = vmatprep.mubr.msk.bf16.mxu0 %vm244_vm1, %v2812_v10 }
  0x18   :  { %2752 = vmatprep.mubr.msk.bf16.mxu1 %vm244_vm1, %v2812_v10 }
  0x1e   :  { %2687 = vmatmul.mubr.msk.bf16.gmra.mxu0 %vm244_vm1, %v2813_v11 }
  0x1f   :  { %2753 = vmatmul.mubr.msk.bf16.gmra.mxu1 %vm244_vm1, %v2813_v11  ;;  %2690 = vmatprep.mubr.msk.bf16.mxu0 %vm244_vm1, %v2814_v12 }
  0x20   :  { %2756 = vmatprep.mubr.msk.bf16.mxu1 %vm244_vm1, %v2814_v12 }
  0x26   :  { %2691 = vmatmul.mubr.msk.bf16.gmra.mxu0 %vm244_vm1, %v2815_v13 }
  0x27   :  { %2757 = vmatmul.mubr.msk.bf16.gmra.mxu1 %vm244_vm1, %v2815_v13  ;;  %2694 = vmatprep.mubr.msk.bf16.mxu0 %vm244_vm1, %v2816_v14 }
  0x28   :  { %2760 = vmatprep.mubr.msk.bf16.mxu1 %vm244_vm1, %v2816_v14 }
  0x2e   :  { %2695 = vmatmul.mubr.msk.bf16.gmra.mxu0 %vm244_vm1, %v2817_v15 }
  0x2f   :  { %2761 = vmatmul.mubr.msk.bf16.gmra.mxu1 %vm244_vm1, %v2817_v15  ;;  %2698 = vmatprep.mubr.msk.bf16.mxu0 %vm244_vm1, %v2818_v16 }
  0x30   :  { %2764 = vmatprep.mubr.msk.bf16.mxu1 %vm244_vm1, %v2818_v16 }
  0x36   :  { %2699 = vmatmul.mubr.msk.bf16.gmra.mxu0 %vm244_vm1, %v2819_v17 }
  0x37   :  { %2765 = vmatmul.mubr.msk.bf16.gmra.mxu1 %vm244_vm1, %v2819_v17  ;;  %2702 = vmatprep.mubr.msk.bf16.mxu0 %vm244_vm1, %v2820_v18 }
  0x38   :  { %2768 = vmatprep.mubr.msk.bf16.mxu1 %vm244_vm1, %v2820_v18 }
  0x3e   :  { %2703 = vmatmul.mubr.msk.bf16.gmra.mxu0 %vm244_vm1, %v2821_v19 }
  0x3f   :  { %2769 = vmatmul.mubr.msk.bf16.gmra.mxu1 %vm244_vm1, %v2821_v19  ;;  %2706 = vmatprep.mubr.msk.bf16.mxu0 %vm244_vm1, %v2822_v20 }
  0x40   :  { %2772 = vmatprep.mubr.msk.bf16.mxu1 %vm244_vm1, %v2822_v20 }
  0x46   :  { %2707 = vmatmul.mubr.msk.bf16.gmra.mxu0 %vm244_vm1, %v2823_v21 }
  0x47   :  { %2773 = vmatmul.mubr.msk.bf16.gmra.mxu1 %vm244_vm1, %v2823_v21  ;;  %2710 = vmatprep.mubr.msk.bf16.mxu0 %vm244_vm1, %v2824_v22 }
  0x48   :  { %2776 = vmatprep.mubr.msk.bf16.mxu1 %vm244_vm1, %v2824_v22 }
  0x4e   :  { %2711 = vmatmul.mubr.msk.bf16.gmra.mxu0 %vm244_vm1, %v2825_v23 }
  0x4f   :  { %2777 = vmatmul.mubr.msk.bf16.gmra.mxu1 %vm244_vm1, %v2825_v23  ;;  %2714 = vmatprep.mubr.msk.bf16.mxu0 %vm244_vm1, %v2826_v24 }
  0x50   :  { %2780 = vmatprep.mubr.msk.bf16.mxu1 %vm244_vm1, %v2826_v24 }
  0x56   :  { %2715 = vmatmul.mubr.msk.bf16.gmra.mxu0 %vm244_vm1, %v2827_v25 }
  0x57   :  { %2781 = vmatmul.mubr.msk.bf16.gmra.mxu1 %vm244_vm1, %v2827_v25  ;;  %2718 = vmatprep.mubr.msk.bf16.mxu0 %vm244_vm1, %v2828_v26 }
  0x58   :  { %2784 = vmatprep.mubr.msk.bf16.mxu1 %vm244_vm1, %v2828_v26 }
  0x5e   :  { %2719 = vmatmul.mubr.msk.bf16.gmra.mxu0 %vm244_vm1, %v2829_v27 }
  0x5f   :  { %2785 = vmatmul.mubr.msk.bf16.gmra.mxu1 %vm244_vm1, %v2829_v27  ;;  %2722 = vmatprep.mubr.msk.bf16.mxu0 %vm244_vm1, %v2830_v28 }
  0x60   :  { %2788 = vmatprep.mubr.msk.bf16.mxu1 %vm244_vm1, %v2830_v28 }
  0x66   :  { %2723 = vmatmul.mubr.msk.bf16.gmra.mxu0 %vm244_vm1, %v2831_v29 }
  0x67   :  { %2789 = vmatmul.mubr.msk.bf16.gmra.mxu1 %vm244_vm1, %v2831_v29  ;;  %2726 = vmatprep.mubr.msk.bf16.mxu0 %vm244_vm1, %v2832_v30 }
  0x68   :  { %2792 = vmatprep.mubr.msk.bf16.mxu1 %vm244_vm1, %v2832_v30 }
  0x6e   :  { %2727 = vmatmul.mubr.msk.bf16.gmra.mxu0 %vm244_vm1, %v2833_v31 }
  0x6f   :  { %2793 = vmatmul.mubr.msk.bf16.gmra.mxu1 %vm244_vm1, %v2833_v31  ;;  %2730 = vmatprep.mubr.msk.bf16.mxu0 %vm244_vm1, %v2834_v32 }
  0x70   :  { %2796 = vmatprep.mubr.msk.bf16.mxu1 %vm244_vm1, %v2834_v32 }
  0x76   :  { %2731 = vmatmul.mubr.msk.bf16.gmra.mxu0 %vm244_vm1, %v2835_v33 }
  0x77   :  { %2797 = vmatmul.mubr.msk.bf16.gmra.mxu1 %vm244_vm1, %v2835_v33  ;;  %2734 = vmatprep.mubr.msk.bf16.mxu0 %vm244_vm1, %v2836_v34 }
  0x78   :  { %2800 = vmatprep.mubr.msk.bf16.mxu1 %vm244_vm1, %v2836_v34 }
  0x7e   :  { %2735 = vmatmul.mubr.msk.bf16.gmra.mxu0 %vm244_vm1, %v2837_v35 }
  0x7f   :  { %2801 = vmatmul.mubr.msk.bf16.gmra.mxu1 %vm244_vm1, %v2837_v35 }
  0xc6   :  { %v2676_v36 = vpop.f32.mrf.mxu0 }
  0xc7   :  { %v2742_v37 = vpop.f32.mrf.mxu1  ;;  %v2480_v38 = vpack.c.bf16 %v2676_v36, %v2676_v36  ;;  %v1705_v39 = vmul.f32 %v2676_v36, %v2676_v36  ;;  %v1573_v45 = vsel %vm1569_vm4, %v2676_v36, 0.0 }
  0xc8   :  { %v2544_v40 = vpack.c.bf16 %v2742_v37, %v2742_v37  ;;  %v379_v41 = vpop.f32.mrf.mxu0  ;;  %v1908_v50 = vsel %vm1904_vm5, %v2742_v37, 0.0  ;;  %v2040_v51 = vmul.f32 %v2742_v37, %v2742_v37 }
  0xc9   :  { %v672_v42 = vpop.f32.mrf.mxu1  ;;  %1186 = vst.msk [vmem:[%s4516_s3 + $0x8] sm:$0xf] %vm1183_vm2, %v2480_v38  ;;  %v2478_v43 = vpack.c.bf16 %v379_v41, %v379_v41  ;;  %v1703_v44 = vmul.f32 %v379_v41, %v379_v41  ;;  %v1770_v49 = vsel %vm1569_vm4, %v1705_v39, 0.0  ;;  %v1570_v53 = vsel %vm1569_vm4, %v379_v41, 0.0 }
  0xca   :  { %1507 = vst.msk [vmem:[%s4517_s4 + $0x8] sm:$0xf] %vm1504_vm3, %v2544_v40  ;;  %v2542_v46 = vpack.c.bf16 %v672_v42, %v672_v42  ;;  %v2677_v47 = vpop.f32.mrf.mxu0  ;;  %v1905_v54 = vsel %vm1904_vm5, %v672_v42, 0.0  ;;  %v2038_v55 = vmul.f32 %v672_v42, %v672_v42  ;;  %v2105_v9 = vsel %vm1904_vm5, %v2040_v51, 0.0 }
  0xcb   :  { %v2743_v48 = vpop.f32.mrf.mxu1  ;;  %1184 = vst.msk [vmem:[%s4516_s3] sm:$0xf] %vm1183_vm2, %v2478_v43  ;;  %v2481_v52 = vpack.c.bf16 %v2677_v47, %v2677_v47  ;;  %v1767_v59 = vsel %vm1569_vm4, %v1703_v44, 0.0  ;;  %v1706_v63 = vmul.f32 %v2677_v47, %v2677_v47  ;;  %v1575_v19 = vsel %vm1569_vm4, %v2677_v47, 0.0 }
  0xcc   :  { %1505 = vst.msk [vmem:[%s4517_s4] sm:$0xf] %vm1504_vm3, %v2542_v46  ;;  %v2545_v56 = vpack.c.bf16 %v2743_v48, %v2743_v48  ;;  %v382_v57 = vpop.f32.mrf.mxu0  ;;  %v2102_v10 = vsel %vm1904_vm5, %v2038_v55, 0.0  ;;  %v2041_v15 = vmul.f32 %v2743_v48, %v2743_v48  ;;  %v1910_v20 = vsel %vm1904_vm5, %v2743_v48, 0.0 }
  0xcd   :  { %v675_v58 = vpop.f32.mrf.mxu1  ;;  %1187 = vst.msk [vmem:[%s4516_s3 + $0xc] sm:$0xf] %vm1183_vm2, %v2481_v52  ;;  %v2479_v60 = vpack.c.bf16 %v382_v57, %v382_v57  ;;  %v1571_v61 = vsel %vm1569_vm4, %v382_v57, 0.0  ;;  %v1704_v62 = vmul.f32 %v382_v57, %v382_v57  ;;  %v1772_v25 = vsel %vm1569_vm4, %v1706_v63, 0.0 }
  0xce   :  { %1508 = vst.msk [vmem:[%s4517_s4 + $0xc] sm:$0xf] %vm1504_vm3, %v2545_v56  ;;  %v1572_v0 = vadd.f32 %v1571_v61, %v1570_v53  ;;  %v2543_v1 = vpack.c.bf16 %v675_v58, %v675_v58  ;;  %v1906_v2 = vsel %vm1904_vm5, %v675_v58, 0.0  ;;  %v2680_v3 = vpop.f32.mrf.mxu0  ;;  %v2039_v7 = vmul.f32 %v675_v58, %v675_v58 }
  0xcf   :  { %v2746_v4 = vpop.f32.mrf.mxu1  ;;  %1185 = vst.msk [vmem:[%s4516_s3 + $0x4] sm:$0xf] %vm1183_vm2, %v2479_v60  ;;  %v1768_v5 = vsel %vm1569_vm4, %v1704_v62, 0.0  ;;  %v1907_v6 = vadd.f32 %v1906_v2, %v1905_v54  ;;  %v2484_v8 = vpack.c.bf16 %v2680_v3, %v2680_v3  ;;  %v2107_v35 = vsel %vm1904_vm5, %v2041_v15, 0.0 }
  0xd0   :  { %v1574_v11 = vadd.f32 %v1573_v45, %v1572_v0  ;;  %v1769_v12 = vadd.f32 %v1768_v5, %v1767_v59  ;;  %1506 = vst.msk [vmem:[%s4517_s4 + $0x4] sm:$0xf] %vm1504_vm3, %v2543_v1  ;;  %v395_v13 = vpop.f32.mrf.mxu0  ;;  %v2103_v17 = vsel %vm1904_vm5, %v2039_v7, 0.0  ;;  %v2548_v18 = vpack.c.bf16 %v2746_v4, %v2746_v4 }
  0xd1   :  { %v688_v14 = vpop.f32.mrf.mxu1  ;;  %v1909_v16 = vadd.f32 %v1908_v50, %v1907_v6  ;;  %1190 = vst.msk [vmem:[%s4516_s3 + $0x18] sm:$0xf] %vm1183_vm2, %v2484_v8  ;;  %v2104_v22 = vadd.f32 %v2103_v17, %v2102_v10  ;;  %v2482_v26 = vpack.c.bf16 %v395_v13, %v395_v13  ;;  %v1707_v28 = vmul.f32 %v395_v13, %v395_v13 }
  0xd2   :  { %v1771_v21 = vadd.f32 %v1770_v49, %v1769_v12  ;;  %v3089_v23 = vpop.f32.mrf.mxu0  ;;  %1511 = vst.msk [vmem:[%s4517_s4 + $0x18] sm:$0xf] %vm1504_vm3, %v2548_v18  ;;  %v1576_v27 = vadd.f32 %v1575_v19, %v1574_v11  ;;  %v1577_v30 = vsel %vm1569_vm4, %v395_v13, 0.0  ;;  %v2546_v32 = vpack.c.bf16 %v688_v14, %v688_v14 }
  0xd3   :  { %v3091_v24 = vpop.f32.mrf.mxu1  ;;  %v2106_v29 = vadd.f32 %v2105_v9, %v2104_v22  ;;  %v1581_v36 = vsel %vm1569_vm4, %v2680_v3, 0.0  ;;  %1188 = vst.msk [vmem:[%s4516_s3 + $0x10] sm:$0xf] %vm1183_vm2, %v2482_v26  ;;  %v1911_v38 = vadd.f32 %v1910_v20, %v1909_v16  ;;  %v1912_v39 = vsel %vm1904_vm5, %v688_v14, 0.0 }
  0xd4   :  { %v1773_v31 = vadd.f32 %v1772_v25, %v1771_v21  ;;  %v398_v33 = vpop.f32.mrf.mxu0  ;;  %v1578_v37 = vadd.f32 %v1577_v30, %v1576_v27  ;;  %1509 = vst.msk [vmem:[%s4517_s4 + $0x10] sm:$0xf] %vm1504_vm3, %v2546_v32  ;;  %v2042_v40 = vmul.f32 %v688_v14, %v688_v14  ;;  %v2485_v42 = vpack.c.bf16 %v3089_v23, %v3089_v23 }
  0xd5   :  { %v691_v34 = vpop.f32.mrf.mxu1  ;;  %v2108_v41 = vadd.f32 %v2107_v35, %v2106_v29  ;;  %v1709_v45 = vmul.f32 %v2680_v3, %v2680_v3  ;;  %v1774_v46 = vsel %vm1569_vm4, %v1707_v28, 0.0  ;;  %v1913_v47 = vadd.f32 %v1912_v39, %v1911_v38 }
  0xd6   :  { %v3112_v43 = vpop.f32.mrf.mxu0  ;;  %v2549_v48 = vpack.c.bf16 %v3091_v24, %v3091_v24  ;;  %v1916_v49 = vsel %vm1904_vm5, %v2746_v4, 0.0  ;;  %v2044_v50 = vmul.f32 %v2746_v4, %v2746_v4  ;;  %v1775_v51 = vadd.f32 %v1774_v46, %v1773_v31  ;;  %1191 = vst.msk [vmem:[%s4516_s3 + $0x1c] sm:$0xf] %vm1183_vm2, %v2485_v42 }
  0xd7   :  { %v3114_v44 = vpop.f32.mrf.mxu1  ;;  %v2483_v52 = vpack.c.bf16 %v398_v33, %v398_v33  ;;  %v2109_v55 = vsel %vm1904_vm5, %v2042_v40, 0.0  ;;  %v1710_v56 = vmul.f32 %v3089_v23, %v3089_v23  ;;  %v1579_v57 = vsel %vm1569_vm4, %v398_v33, 0.0 }
  0xd8   :  { %v411_v53 = vpop.f32.mrf.mxu0  ;;  %1512 = vst.msk [vmem:[%s4517_s4 + $0x1c] sm:$0xf] %vm1504_vm3, %v2549_v48  ;;  %v1708_v58 = vmul.f32 %v398_v33, %v398_v33  ;;  %v2110_v59 = vadd.f32 %v2109_v55, %v2108_v41  ;;  %v1580_v60 = vadd.f32 %v1579_v57, %v1578_v37  ;;  %v2547_v61 = vpack.c.bf16 %v691_v34, %v691_v34 }
  0xd9   :  { %v704_v54 = vpop.f32.mrf.mxu1  ;;  %1189 = vst.msk [vmem:[%s4516_s3 + $0x14] sm:$0xf] %vm1183_vm2, %v2483_v52  ;;  %v1914_v62 = vsel %vm1904_vm5, %v691_v34, 0.0  ;;  %v2043_v3 = vmul.f32 %v691_v34, %v691_v34  ;;  %v2488_v4 = vpack.c.bf16 %v3112_v43, %v3112_v43  ;;  %v1778_v5 = vsel %vm1569_vm4, %v1709_v45, 0.0 }
  0xda   :  { %v3137_v63 = vpop.f32.mrf.mxu0  ;;  %v1776_v1 = vsel %vm1569_vm4, %v1708_v58, 0.0  ;;  %v1915_v2 = vadd.f32 %v1914_v62, %v1913_v47  ;;  %v2113_v6 = vsel %vm1904_vm5, %v2044_v50, 0.0  ;;  %v1582_v7 = vadd.f32 %v1581_v36, %v1580_v60  ;;  %1510 = vst.msk [vmem:[%s4517_s4 + $0x14] sm:$0xf] %vm1504_vm3, %v2547_v61 }
  0xdb   :  { %v3139_v0 = vpop.f32.mrf.mxu1  ;;  %v1777_v8 = vadd.f32 %v1776_v1, %v1775_v51  ;;  %v2045_v11 = vmul.f32 %v3091_v24, %v3091_v24  ;;  %v2111_v13 = vsel %vm1904_vm5, %v2043_v3, 0.0  ;;  %1194 = vst.msk [vmem:[%s4516_s3 + $0x28] sm:$0xf] %vm1183_vm2, %v2488_v4  ;;  %v2552_v14 = vpack.c.bf16 %v3114_v44, %v3114_v44 }
  0xdc   :  { %v414_v9 = vpop.f32.mrf.mxu0  ;;  %v1917_v12 = vadd.f32 %v1916_v49, %v1915_v2  ;;  %v1583_v15 = vsel %vm1569_vm4, %v3089_v23, 0.0  ;;  %v1918_v16 = vsel %vm1904_vm5, %v3091_v24, 0.0  ;;  %v2112_v18 = vadd.f32 %v2111_v13, %v2110_v59 }
  0xdd   :  { %v3150_v10 = vpop.f32.mrf.mxu1  ;;  %v1779_v17 = vadd.f32 %v1778_v5, %v1777_v8  ;;  %v1780_v21 = vsel %vm1569_vm4, %v1710_v56, 0.0  ;;  %1515 = vst.msk [vmem:[%s4517_s4 + $0x28] sm:$0xf] %vm1504_vm3, %v2552_v14  ;;  %v2486_v22 = vpack.c.bf16 %v411_v53, %v411_v53  ;;  %v1584_v25 = vadd.f32 %v1583_v15, %v1582_v7 }
  0xde   :  { %v3165_v19 = vpop.f32.mrf.mxu0  ;;  %v1711_v26 = vmul.f32 %v411_v53, %v411_v53  ;;  %v2114_v23 = vadd.f32 %v2113_v6, %v2112_v18  ;;  %v1585_v27 = vsel %vm1569_vm4, %v411_v53, 0.0  ;;  %v2550_v28 = vpack.c.bf16 %v704_v54, %v704_v54 }
  0xdf   :  { %v3167_v20 = vpop.f32.mrf.mxu1  ;;  %v1781_v24 = vadd.f32 %v1780_v21, %v1779_v17  ;;  %v2115_v31 = vsel %vm1904_vm5, %v2045_v11, 0.0  ;;  %v1589_v32 = vsel %vm1569_vm4, %v3112_v43, 0.0  ;;  %1192 = vst.msk [vmem:[%s4516_s3 + $0x20] sm:$0xf] %vm1183_vm2, %v2486_v22  ;;  %v1586_v33 = vadd.f32 %v1585_v27, %v1584_v25 }
  0xe0   :  { %v3175_v29 = vpop.f32.mrf.mxu0  ;;  %v1919_v34 = vadd.f32 %v1918_v16, %v1917_v12  ;;  %1513 = vst.msk [vmem:[%s4517_s4 + $0x20] sm:$0xf] %vm1504_vm3, %v2550_v28  ;;  %v1920_v35 = vsel %vm1904_vm5, %v704_v54, 0.0  ;;  %v2046_v36 = vmul.f32 %v704_v54, %v704_v54  ;;  %v2116_v37 = vadd.f32 %v2115_v31, %v2114_v23 }
  0xe1   :  { %v3177_v30 = vpop.f32.mrf.mxu1  ;;  %v2489_v38 = vpack.c.bf16 %v3137_v63, %v3137_v63  ;;  %v1713_v41 = vmul.f32 %v3112_v43, %v3112_v43  ;;  %v1782_v42 = vsel %vm1569_vm4, %v1711_v26, 0.0  ;;  %v2553_v46 = vpack.c.bf16 %v3139_v0, %v3139_v0 }
  0xe2   :  { %v3193_v39 = vpop.f32.mrf.mxu0  ;;  %v1921_v45 = vadd.f32 %v1920_v35, %v1919_v34  ;;  %v1924_v47 = vsel %vm1904_vm5, %v3114_v44, 0.0  ;;  %v2048_v48 = vmul.f32 %v3114_v44, %v3114_v44  ;;  %v1783_v49 = vadd.f32 %v1782_v42, %v1781_v24 }
  0xe3   :  { %v3195_v40 = vpop.f32.mrf.mxu1  ;;  %1195 = vst.msk [vmem:[%s4516_s3 + $0x2c] sm:$0xf] %vm1183_vm2, %v2489_v38  ;;  %v2487_v50 = vpack.c.bf16 %v414_v9, %v414_v9  ;;  %v2117_v52 = vsel %vm1904_vm5, %v2046_v36, 0.0  ;;  %v1714_v53 = vmul.f32 %v3137_v63, %v3137_v63  ;;  %v1587_v44 = vsel %vm1569_vm4, %v414_v9, 0.0 }
  0xe4   :  { %v3210_v43 = vpop.f32.mrf.mxu0  ;;  %1516 = vst.msk [vmem:[%s4517_s4 + $0x2c] sm:$0xf] %vm1504_vm3, %v2553_v46  ;;  %v1712_v54 = vmul.f32 %v414_v9, %v414_v9  ;;  %v2118_v55 = vadd.f32 %v2117_v52, %v2116_v37  ;;  %v1588_v56 = vadd.f32 %v1587_v44, %v1586_v33  ;;  %v2551_v57 = vpack.c.bf16 %v3150_v10, %v3150_v10 }
  0xe5   :  { %v3212_v51 = vpop.f32.mrf.mxu1  ;;  %1193 = vst.msk [vmem:[%s4516_s3 + $0x24] sm:$0xf] %vm1183_vm2, %v2487_v50  ;;  %v1922_v58 = vsel %vm1904_vm5, %v3150_v10, 0.0  ;;  %v2047_v1 = vmul.f32 %v3150_v10, %v3150_v10  ;;  %v2492_v2 = vpack.c.bf16 %v3165_v19, %v3165_v19  ;;  %v1786_v3 = vsel %vm1569_vm4, %v1713_v41, 0.0 }
  0xe6   :  { %v3230_v59 = vpop.f32.mrf.mxu0  ;;  %v1784_v61 = vsel %vm1569_vm4, %v1712_v54, 0.0  ;;  %v1923_v62 = vadd.f32 %v1922_v58, %v1921_v45  ;;  %v2121_v4 = vsel %vm1904_vm5, %v2048_v48, 0.0  ;;  %v1590_v5 = vadd.f32 %v1589_v32, %v1588_v56  ;;  %1514 = vst.msk [vmem:[%s4517_s4 + $0x24] sm:$0xf] %vm1504_vm3, %v2551_v57 }
  0xe7   :  { %v3232_v60 = vpop.f32.mrf.mxu1  ;;  %v1785_v6 = vadd.f32 %v1784_v61, %v1783_v49  ;;  %v2049_v9 = vmul.f32 %v3139_v0, %v3139_v0  ;;  %v2119_v11 = vsel %vm1904_vm5, %v2047_v1, 0.0  ;;  %1198 = vst.msk [vmem:[%s4516_s3 + $0x38] sm:$0xf] %vm1183_vm2, %v2492_v2  ;;  %v2556_v12 = vpack.c.bf16 %v3167_v20, %v3167_v20 }
  0xe8   :  { %v3245_v7 = vpop.f32.mrf.mxu0  ;;  %v1925_v10 = vadd.f32 %v1924_v47, %v1923_v62  ;;  %v1591_v13 = vsel %vm1569_vm4, %v3137_v63, 0.0  ;;  %v1926_v14 = vsel %vm1904_vm5, %v3139_v0, 0.0  ;;  %v2120_v16 = vadd.f32 %v2119_v11, %v2118_v55 }
  0xe9   :  { %v3247_v8 = vpop.f32.mrf.mxu1  ;;  %v1787_v15 = vadd.f32 %v1786_v3, %v1785_v6  ;;  %v1788_v21 = vsel %vm1569_vm4, %v1714_v53, 0.0  ;;  %1519 = vst.msk [vmem:[%s4517_s4 + $0x38] sm:$0xf] %vm1504_vm3, %v2556_v12  ;;  %v2490_v22 = vpack.c.bf16 %v3175_v29, %v3175_v29  ;;  %v1592_v63 = vadd.f32 %v1591_v13, %v1590_v5 }
  0xea   :  { %v3262_v17 = vpop.f32.mrf.mxu0  ;;  %v1715_v0 = vmul.f32 %v3175_v29, %v3175_v29  ;;  %v2122_v25 = vadd.f32 %v2121_v4, %v2120_v16  ;;  %v1593_v26 = vsel %vm1569_vm4, %v3175_v29, 0.0  ;;  %v2554_v27 = vpack.c.bf16 %v3177_v30, %v3177_v30 }
  0xeb   :  { %v3264_v18 = vpop.f32.mrf.mxu1  ;;  %v1789_v23 = vadd.f32 %v1788_v21, %v1787_v15  ;;  %v2123_v31 = vsel %vm1904_vm5, %v2049_v9, 0.0  ;;  %v1597_v32 = vsel %vm1569_vm4, %v3165_v19, 0.0  ;;  %1196 = vst.msk [vmem:[%s4516_s3 + $0x30] sm:$0xf] %vm1183_vm2, %v2490_v22  ;;  %v1594_v33 = vadd.f32 %v1593_v26, %v1592_v63 }
  0xec   :  { %v3279_v24 = vpop.f32.mrf.mxu0  ;;  %v1927_v29 = vadd.f32 %v1926_v14, %v1925_v10  ;;  %1517 = vst.msk [vmem:[%s4517_s4 + $0x30] sm:$0xf] %vm1504_vm3, %v2554_v27  ;;  %v1928_v34 = vsel %vm1904_vm5, %v3177_v30, 0.0  ;;  %v2050_v35 = vmul.f32 %v3177_v30, %v3177_v30  ;;  %v2124_v36 = vadd.f32 %v2123_v31, %v2122_v25 }
  0xed   :  { %v3281_v28 = vpop.f32.mrf.mxu1  ;;  %v2493_v37 = vpack.c.bf16 %v3193_v39, %v3193_v39  ;;  %v1717_v42 = vmul.f32 %v3165_v19, %v3165_v19  ;;  %v1790_v45 = vsel %vm1569_vm4, %v1715_v0, 0.0  ;;  %v2557_v47 = vpack.c.bf16 %v3195_v40, %v3195_v40 }
  0xee   :  { %v3300_v38 = vpop.f32.mrf.mxu0  ;;  %v1929_v46 = vadd.f32 %v1928_v34, %v1927_v29  ;;  %v1932_v30 = vsel %vm1904_vm5, %v3167_v20, 0.0  ;;  %v2052_v48 = vmul.f32 %v3167_v20, %v3167_v20  ;;  %v1791_v49 = vadd.f32 %v1790_v45, %v1789_v23 }
  0xef   :  { %v3302_v41 = vpop.f32.mrf.mxu1  ;;  %1199 = vst.msk [vmem:[%s4516_s3 + $0x3c] sm:$0xf] %vm1183_vm2, %v2493_v37  ;;  %v2491_v19 = vpack.c.bf16 %v3210_v43, %v3210_v43  ;;  %v2125_v53 = vsel %vm1904_vm5, %v2050_v35, 0.0  ;;  %v1718_v44 = vmul.f32 %v3193_v39, %v3193_v39  ;;  %v1595_v20 = vsel %vm1569_vm4, %v3210_v43, 0.0 }
  0xf0   :  { %v3319_v50 = vpop.f32.mrf.mxu0  ;;  %1520 = vst.msk [vmem:[%s4517_s4 + $0x3c] sm:$0xf] %vm1504_vm3, %v2557_v47  ;;  %v1716_v54 = vmul.f32 %v3210_v43, %v3210_v43  ;;  %v2126_v55 = vadd.f32 %v2125_v53, %v2124_v36  ;;  %v1596_v56 = vadd.f32 %v1595_v20, %v1594_v33  ;;  %v2555_v57 = vpack.c.bf16 %v3212_v51, %v3212_v51 }
  0xf1   :  { %v3321_v52 = vpop.f32.mrf.mxu1  ;;  %1197 = vst.msk [vmem:[%s4516_s3 + $0x34] sm:$0xf] %vm1183_vm2, %v2491_v19  ;;  %v1930_v58 = vsel %vm1904_vm5, %v3212_v51, 0.0  ;;  %v2051_v2 = vmul.f32 %v3212_v51, %v3212_v51  ;;  %v2496_v3 = vpack.c.bf16 %v3230_v59, %v3230_v59  ;;  %v1794_v4 = vsel %vm1569_vm4, %v1717_v42, 0.0 }
  0xf2   :  { %v3342_v61 = vpop.f32.mrf.mxu0  ;;  %v1792_v1 = vsel %vm1569_vm4, %v1716_v54, 0.0  ;;  %v1931_v43 = vadd.f32 %v1930_v58, %v1929_v46  ;;  %v2129_v5 = vsel %vm1904_vm5, %v2052_v48, 0.0  ;;  %v1598_v6 = vadd.f32 %v1597_v32, %v1596_v56  ;;  %1518 = vst.msk [vmem:[%s4517_s4 + $0x34] sm:$0xf] %vm1504_vm3, %v2555_v57 }
  0xf3   :  { %v3344_v62 = vpop.f32.mrf.mxu1  ;;  %v1793_v9 = vadd.f32 %v1792_v1, %v1791_v49  ;;  %v2053_v51 = vmul.f32 %v3195_v40, %v3195_v40  ;;  %v2127_v13 = vsel %vm1904_vm5, %v2051_v2, 0.0  ;;  %1202 = vst.msk [vmem:[%s4516_s3 + $0x48] sm:$0xf] %vm1183_vm2, %v2496_v3  ;;  %v2560_v14 = vpack.c.bf16 %v3232_v60, %v3232_v60 }
  0xf4   :  { %v3357_v10 = vpop.f32.mrf.mxu0  ;;  %v1933_v12 = vadd.f32 %v1932_v30, %v1931_v43  ;;  %v1599_v15 = vsel %vm1569_vm4, %v3193_v39, 0.0  ;;  %v1934_v16 = vsel %vm1904_vm5, %v3195_v40, 0.0  ;;  %v2128_v22 = vadd.f32 %v2127_v13, %v2126_v55 }
  0xf5   :  { %v3359_v11 = vpop.f32.mrf.mxu1  ;;  %v1795_v21 = vadd.f32 %v1794_v4, %v1793_v9  ;;  %v1796_v25 = vsel %vm1569_vm4, %v1718_v44, 0.0  ;;  %1523 = vst.msk [vmem:[%s4517_s4 + $0x48] sm:$0xf] %vm1504_vm3, %v2560_v14  ;;  %v2494_v26 = vpack.c.bf16 %v3245_v7, %v3245_v7  ;;  %v1600_v39 = vadd.f32 %v1599_v15, %v1598_v6 }
  0xf6   :  { %v3374_v63 = vpop.f32.mrf.mxu0  ;;  %v1719_v40 = vmul.f32 %v3245_v7, %v3245_v7  ;;  %v2130_v23 = vadd.f32 %v2129_v5, %v2128_v22  ;;  %v1601_v27 = vsel %vm1569_vm4, %v3245_v7, 0.0  ;;  %v2558_v32 = vpack.c.bf16 %v3247_v8, %v3247_v8 }
  0xf7   :  { %v3376_v0 = vpop.f32.mrf.mxu1  ;;  %v1797_v31 = vadd.f32 %v1796_v25, %v1795_v21  ;;  %v2131_v34 = vsel %vm1904_vm5, %v2053_v51, 0.0  ;;  %v1605_v35 = vsel %vm1569_vm4, %v3230_v59, 0.0  ;;  %1200 = vst.msk [vmem:[%s4516_s3 + $0x40] sm:$0xf] %vm1183_vm2, %v2494_v26  ;;  %v1602_v36 = vadd.f32 %v1601_v27, %v1600_v39 }
  0xf8   :  { %v3391_v33 = vpop.f32.mrf.mxu0  ;;  %v1935_v7 = vadd.f32 %v1934_v16, %v1933_v12  ;;  %1521 = vst.msk [vmem:[%s4517_s4 + $0x40] sm:$0xf] %vm1504_vm3, %v2558_v32  ;;  %v1936_v37 = vsel %vm1904_vm5, %v3247_v8, 0.0  ;;  %v2054_v42 = vmul.f32 %v3247_v8, %v3247_v8  ;;  %v2132_v45 = vadd.f32 %v2131_v34, %v2130_v23 }
  0xf9   :  { %v3393_v29 = vpop.f32.mrf.mxu1  ;;  %v2497_v46 = vpack.c.bf16 %v3262_v17, %v3262_v17  ;;  %v1721_v48 = vmul.f32 %v3230_v59, %v3230_v59  ;;  %v1798_v49 = vsel %vm1569_vm4, %v1719_v40, 0.0  ;;  %v2561_v53 = vpack.c.bf16 %v3264_v18, %v3264_v18 }
  0xfa   :  { %v3412_v47 = vpop.f32.mrf.mxu0  ;;  %v1937_v19 = vadd.f32 %v1936_v37, %v1935_v7  ;;  %v1940_v8 = vsel %vm1904_vm5, %v3232_v60, 0.0  ;;  %v2056_v44 = vmul.f32 %v3232_v60, %v3232_v60  ;;  %v1799_v20 = vadd.f32 %v1798_v49, %v1797_v31 }
  0xfb   :  { %v3414_v30 = vpop.f32.mrf.mxu1  ;;  %1203 = vst.msk [vmem:[%s4516_s3 + $0x4c] sm:$0xf] %vm1183_vm2, %v2497_v46  ;;  %v2495_v59 = vpack.c.bf16 %v3279_v24, %v3279_v24  ;;  %v2133_v56 = vsel %vm1904_vm5, %v2054_v42, 0.0  ;;  %v1722_v57 = vmul.f32 %v3262_v17, %v3262_v17  ;;  %v1603_v60 = vsel %vm1569_vm4, %v3279_v24, 0.0 }
  0xfc   :  { %v3431_v54 = vpop.f32.mrf.mxu0  ;;  %1524 = vst.msk [vmem:[%s4517_s4 + $0x4c] sm:$0xf] %vm1504_vm3, %v2561_v53  ;;  %v1720_v58 = vmul.f32 %v3279_v24, %v3279_v24  ;;  %v2134_v1 = vadd.f32 %v2133_v56, %v2132_v45  ;;  %v1604_v43 = vadd.f32 %v1603_v60, %v1602_v36  ;;  %v2559_v2 = vpack.c.bf16 %v3281_v28, %v3281_v28 }
  0xfd   :  { %v3433_v55 = vpop.f32.mrf.mxu1  ;;  %1201 = vst.msk [vmem:[%s4516_s3 + $0x44] sm:$0xf] %vm1183_vm2, %v2495_v59  ;;  %v1938_v3 = vsel %vm1904_vm5, %v3281_v28, 0.0  ;;  %v2055_v9 = vmul.f32 %v3281_v28, %v3281_v28  ;;  %v2500_v51 = vpack.c.bf16 %v3300_v38, %v3300_v38  ;;  %v1802_v12 = vsel %vm1569_vm4, %v1721_v48, 0.0 }
  0xfe   :  { %v3454_v4 = vpop.f32.mrf.mxu0  ;;  %v1800_v6 = vsel %vm1569_vm4, %v1720_v58, 0.0  ;;  %v1939_v24 = vadd.f32 %v1938_v3, %v1937_v19  ;;  %v2137_v13 = vsel %vm1904_vm5, %v2056_v44, 0.0  ;;  %v1606_v14 = vadd.f32 %v1605_v35, %v1604_v43  ;;  %1522 = vst.msk [vmem:[%s4517_s4 + $0x44] sm:$0xf] %vm1504_vm3, %v2559_v2 }
  0xff   :  { %v3456_v5 = vpop.f32.mrf.mxu1  ;;  %v1801_v15 = vadd.f32 %v1800_v6, %v1799_v20  ;;  %v2057_v28 = vmul.f32 %v3264_v18, %v3264_v18  ;;  %v2135_v25 = vsel %vm1904_vm5, %v2055_v9, 0.0  ;;  %1206 = vst.msk [vmem:[%s4516_s3 + $0x58] sm:$0xf] %vm1183_vm2, %v2500_v51  ;;  %v2564_v26 = vpack.c.bf16 %v3302_v41, %v3302_v41 }
 0x100   :  { %v3469_v16 = vpop.f32.mrf.mxu0  ;;  %v1941_v22 = vadd.f32 %v1940_v8, %v1939_v24  ;;  %v1607_v39 = vsel %vm1569_vm4, %v3262_v17, 0.0  ;;  %v1942_v40 = vsel %vm1904_vm5, %v3264_v18, 0.0  ;;  %v2136_v27 = vadd.f32 %v2135_v25, %v2134_v1 }
 0x101   :  { %v3471_v21 = vpop.f32.mrf.mxu1  ;;  %v1803_v23 = vadd.f32 %v1802_v12, %v1801_v15  ;;  %v1804_v34 = vsel %vm1569_vm4, %v1722_v57, 0.0  ;;  %1527 = vst.msk [vmem:[%s4517_s4 + $0x58] sm:$0xf] %vm1504_vm3, %v2564_v26  ;;  %v2498_v35 = vpack.c.bf16 %v3319_v50, %v3319_v50  ;;  %v1608_v17 = vadd.f32 %v1607_v39, %v1606_v14 }
 0x102   :  { %v3486_v31 = vpop.f32.mrf.mxu0  ;;  %v1723_v18 = vmul.f32 %v3319_v50, %v3319_v50  ;;  %v2138_v36 = vadd.f32 %v2137_v13, %v2136_v27  ;;  %v1609_v7 = vsel %vm1569_vm4, %v3319_v50, 0.0  ;;  %v2562_v42 = vpack.c.bf16 %v3321_v52, %v3321_v52 }
 0x103   :  { %v3488_v32 = vpop.f32.mrf.mxu1  ;;  %v1805_v37 = vadd.f32 %v1804_v34, %v1803_v23  ;;  %v2139_v48 = vsel %vm1904_vm5, %v2057_v28, 0.0  ;;  %v1613_v49 = vsel %vm1569_vm4, %v3300_v38, 0.0  ;;  %1204 = vst.msk [vmem:[%s4516_s3 + $0x50] sm:$0xf] %vm1183_vm2, %v2498_v35  ;;  %v1610_v19 = vadd.f32 %v1609_v7, %v1608_v17 }
 0x104   :  { %v3503_v45 = vpop.f32.mrf.mxu0  ;;  %v1943_v50 = vadd.f32 %v1942_v40, %v1941_v22  ;;  %1525 = vst.msk [vmem:[%s4517_s4 + $0x50] sm:$0xf] %vm1504_vm3, %v2562_v42  ;;  %v1944_v53 = vsel %vm1904_vm5, %v3321_v52, 0.0  ;;  %v2058_v8 = vmul.f32 %v3321_v52, %v3321_v52  ;;  %v2140_v44 = vadd.f32 %v2139_v48, %v2138_v36 }
 0x105   :  { %v3505_v46 = vpop.f32.mrf.mxu1  ;;  %v2501_v20 = vpack.c.bf16 %v3342_v61, %v3342_v61  ;;  %v1725_v57 = vmul.f32 %v3300_v38, %v3300_v38  ;;  %v1806_v60 = vsel %vm1569_vm4, %v1723_v18, 0.0  ;;  %v2565_v1 = vpack.c.bf16 %v3344_v62, %v3344_v62 }
 0x106   :  { %v3524_v59 = vpop.f32.mrf.mxu0  ;;  %v1945_v58 = vadd.f32 %v1944_v53, %v1943_v50  ;;  %v1948_v52 = vsel %vm1904_vm5, %v3302_v41, 0.0  ;;  %v2060_v43 = vmul.f32 %v3302_v41, %v3302_v41  ;;  %v1807_v2 = vadd.f32 %v1806_v60, %v1805_v37 }
 0x107   :  { %v3526_v56 = vpop.f32.mrf.mxu1  ;;  %1207 = vst.msk [vmem:[%s4516_s3 + $0x5c] sm:$0xf] %vm1183_vm2, %v2501_v20  ;;  %v2499_v38 = vpack.c.bf16 %v3357_v10, %v3357_v10  ;;  %v2141_v24 = vsel %vm1904_vm5, %v2058_v8, 0.0  ;;  %v1726_v9 = vmul.f32 %v3342_v61, %v3342_v61  ;;  %v1611_v41 = vsel %vm1569_vm4, %v3357_v10, 0.0 }
 0x108   :  { %v3543_v3 = vpop.f32.mrf.mxu0  ;;  %1528 = vst.msk [vmem:[%s4517_s4 + $0x5c] sm:$0xf] %vm1504_vm3, %v2565_v1  ;;  %v1724_v51 = vmul.f32 %v3357_v10, %v3357_v10  ;;  %v2142_v12 = vadd.f32 %v2141_v24, %v2140_v44  ;;  %v1612_v13 = vadd.f32 %v1611_v41, %v1610_v19  ;;  %v2563_v14 = vpack.c.bf16 %v3359_v11, %v3359_v11 }
 0x109   :  { %v3545_v6 = vpop.f32.mrf.mxu1  ;;  %1205 = vst.msk [vmem:[%s4516_s3 + $0x54] sm:$0xf] %vm1183_vm2, %v2499_v38  ;;  %v1946_v15 = vsel %vm1904_vm5, %v3359_v11, 0.0  ;;  %v2059_v10 = vmul.f32 %v3359_v11, %v3359_v11  ;;  %v2504_v26 = vpack.c.bf16 %v3374_v63, %v3374_v63  ;;  %v1810_v39 = vsel %vm1569_vm4, %v1725_v57, 0.0 }
 0x10a   :  { %v3566_v28 = vpop.f32.mrf.mxu0  ;;  %v1808_v22 = vsel %vm1569_vm4, %v1724_v51, 0.0  ;;  %v1947_v25 = vadd.f32 %v1946_v15, %v1945_v58  ;;  %v2145_v40 = vsel %vm1904_vm5, %v2060_v43, 0.0  ;;  %v1614_v23 = vadd.f32 %v1613_v49, %v1612_v13  ;;  %1526 = vst.msk [vmem:[%s4517_s4 + $0x54] sm:$0xf] %vm1504_vm3, %v2563_v14 }
 0x10b   :  { %v1809_v27 = vadd.f32 %v1808_v22, %v1807_v2  ;;  %v3579_v34 = vpop.f32.mrf.mxu1  ;;  %v2061_v35 = vmul.f32 %v3344_v62, %v3344_v62  ;;  %v2143_v17 = vsel %vm1904_vm5, %v2059_v10, 0.0  ;;  %1210 = vst.msk [vmem:[%s4516_s3 + $0x68] sm:$0xf] %vm1183_vm2, %v2504_v26  ;;  %v2568_v18 = vpack.c.bf16 %v3376_v0, %v3376_v0 }
 0x10c   :  { %v1949_v11 = vadd.f32 %v1948_v52, %v1947_v25  ;;  %v3590_v36 = vpop.f32.mrf.mxu0  ;;  %v1615_v7 = vsel %vm1569_vm4, %v3342_v61, 0.0  ;;  %v1950_v37 = vsel %vm1904_vm5, %v3344_v62, 0.0  ;;  %v2144_v48 = vadd.f32 %v2143_v17, %v2142_v12 }
 0x10d   :  { %v1811_v42 = vadd.f32 %v1810_v39, %v1809_v27  ;;  %v1812_v49 = vsel %vm1569_vm4, %v1726_v9, 0.0  ;;  %1531 = vst.msk [vmem:[%s4517_s4 + $0x68] sm:$0xf] %vm1504_vm3, %v2568_v18  ;;  %v2502_v19 = vpack.c.bf16 %v3391_v33, %v3391_v33  ;;  %v1616_v50 = vadd.f32 %v1615_v7, %v1614_v23  ;;  %v3609_v20 = vpop.f32.mrf.mxu1 }
 0x10e   :  { %v1727_v53 = vmul.f32 %v3391_v33, %v3391_v33  ;;  %v2146_v61 = vadd.f32 %v2145_v40, %v2144_v48  ;;  %v1617_v62 = vsel %vm1569_vm4, %v3391_v33, 0.0  ;;  %v2566_v44 = vpack.c.bf16 %v3393_v29, %v3393_v29  ;;  %v3618_v52 = vpop.f32.mrf.mxu0 }
 0x10f   :  { %v1813_v8 = vadd.f32 %v1812_v49, %v1811_v42  ;;  %v2147_v57 = vsel %vm1904_vm5, %v2061_v35, 0.0  ;;  %v1621_v60 = vsel %vm1569_vm4, %v3374_v63, 0.0  ;;  %1208 = vst.msk [vmem:[%s4516_s3 + $0x60] sm:$0xf] %vm1183_vm2, %v2502_v19  ;;  %v1618_v58 = vadd.f32 %v1617_v62, %v1616_v50  ;;  %v3645_v14 = vpop.f32.mrf.mxu1 }
 0x110   :  { %v1951_v1 = vadd.f32 %v1950_v37, %v1949_v11  ;;  %1529 = vst.msk [vmem:[%s4517_s4 + $0x60] sm:$0xf] %vm1504_vm3, %v2566_v44  ;;  %v1952_v33 = vsel %vm1904_vm5, %v3393_v29, 0.0  ;;  %v2062_v43 = vmul.f32 %v3393_v29, %v3393_v29  ;;  %v2148_v2 = vadd.f32 %v2147_v57, %v2146_v61  ;;  %v3658_v10 = vpop.f32.mrf.mxu0 }
 0x111   :  { %v2505_v38 = vpack.c.bf16 %v3412_v47, %v3412_v47  ;;  %v1729_v24 = vmul.f32 %v3374_v63, %v3374_v63  ;;  %v1814_v9 = vsel %vm1569_vm4, %v1727_v53, 0.0  ;;  %v2569_v51 = vpack.c.bf16 %v3414_v30, %v3414_v30  ;;  %v3679_v42 = vpop.f32.mrf.mxu1 }
 0x112   :  { %v1953_v41 = vadd.f32 %v1952_v33, %v1951_v1  ;;  %v1956_v12 = vsel %vm1904_vm5, %v3376_v0, 0.0  ;;  %v2064_v13 = vmul.f32 %v3376_v0, %v3376_v0  ;;  %v1815_v29 = vadd.f32 %v1814_v9, %v1813_v8  ;;  %v3690_v50 = vpop.f32.mrf.mxu0 }
 0x113   :  { %1211 = vst.msk [vmem:[%s4516_s3 + $0x6c] sm:$0xf] %vm1183_vm2, %v2505_v38  ;;  %v2503_v63 = vpack.c.bf16 %v3431_v54, %v3431_v54  ;;  %v2149_v15 = vsel %vm1904_vm5, %v2062_v43, 0.0  ;;  %v1730_v22 = vmul.f32 %v3412_v47, %v3412_v47  ;;  %v1619_v0 = vsel %vm1569_vm4, %v3431_v54, 0.0  ;;  %v3709_v43 = vpop.f32.mrf.mxu1 }
 0x114   :  { %1532 = vst.msk [vmem:[%s4517_s4 + $0x6c] sm:$0xf] %vm1504_vm3, %v2569_v51  ;;  %v1728_v25 = vmul.f32 %v3431_v54, %v3431_v54  ;;  %v2150_v26 = vadd.f32 %v2149_v15, %v2148_v2  ;;  %v1620_v39 = vadd.f32 %v1619_v0, %v1618_v58  ;;  %v2567_v40 = vpack.c.bf16 %v3433_v55, %v3433_v55 }
 0x115   :  { %1209 = vst.msk [vmem:[%s4516_s3 + $0x64] sm:$0xf] %vm1183_vm2, %v2503_v63  ;;  %v1954_v23 = vsel %vm1904_vm5, %v3433_v55, 0.0  ;;  %v2063_v54 = vmul.f32 %v3433_v55, %v3433_v55  ;;  %v2508_v11 = vpack.c.bf16 %v3454_v4, %v3454_v4  ;;  %v1818_v17 = vsel %vm1569_vm4, %v1729_v24, 0.0 }
 0x116   :  { %v1816_v27 = vsel %vm1569_vm4, %v1728_v25, 0.0  ;;  %v1955_v35 = vadd.f32 %v1954_v23, %v1953_v41  ;;  %v2153_v18 = vsel %vm1904_vm5, %v2064_v13, 0.0  ;;  %v1622_v7 = vadd.f32 %v1621_v60, %v1620_v39  ;;  %1530 = vst.msk [vmem:[%s4517_s4 + $0x64] sm:$0xf] %vm1504_vm3, %v2567_v40  ;;  %v3718_v41 = vpop.f32.mrf.mxu0 }
 0x117   :  { %v1817_v37 = vadd.f32 %v1816_v27, %v1815_v29  ;;  %v2065_v48 = vmul.f32 %v3414_v30, %v3414_v30  ;;  %v2151_v49 = vsel %vm1904_vm5, %v2063_v54, 0.0  ;;  %1214 = vst.msk [vmem:[%s4516_s3 + $0x78] sm:$0xf] %vm1183_vm2, %v2508_v11  ;;  %v2572_v19 = vpack.c.bf16 %v3456_v5, %v3456_v5 }
 0x118   :  { %v1957_v55 = vadd.f32 %v1956_v12, %v1955_v35  ;;  %v1623_v53 = vsel %vm1569_vm4, %v3412_v47, 0.0  ;;  %v1958_v61 = vsel %vm1904_vm5, %v3414_v30, 0.0  ;;  %v2152_v8 = vadd.f32 %v2151_v49, %v2150_v26  ;;  %v3745_v26 = vpop.f32.mrf.mxu1  ;;  %v3758_v27 = vpop.f32.mrf.mxu0 }
 0x119   :  { %v1819_v62 = vadd.f32 %v1818_v17, %v1817_v37  ;;  %v1820_v44 = vsel %vm1569_vm4, %v1730_v22, 0.0  ;;  %1535 = vst.msk [vmem:[%s4517_s4 + $0x78] sm:$0xf] %vm1504_vm3, %v2572_v19  ;;  %v2506_v57 = vpack.c.bf16 %v3469_v16, %v3469_v16  ;;  %v1624_v60 = vadd.f32 %v1623_v53, %v1622_v7 }
 0x11a   :  { %v1731_v58 = vmul.f32 %v3469_v16, %v3469_v16  ;;  %v2154_v47 = vadd.f32 %v2153_v18, %v2152_v8  ;;  %v1625_v30 = vsel %vm1569_vm4, %v3469_v16, 0.0  ;;  %v2570_v33 = vpack.c.bf16 %v3471_v21, %v3471_v21  ;;  %v3779_v53 = vpop.f32.mrf.mxu1 }
 0x11b   :  { %v1821_v1 = vadd.f32 %v1820_v44, %v1819_v62  ;;  %v2155_v2 = vsel %vm1904_vm5, %v2065_v48, 0.0  ;;  %v1629_v38 = vsel %vm1569_vm4, %v3454_v4, 0.0  ;;  %1212 = vst.msk [vmem:[%s4516_s3 + $0x70] sm:$0xf] %vm1183_vm2, %v2506_v57  ;;  %v1626_v24 = vadd.f32 %v1625_v30, %v1624_v60  ;;  %v3790_v44 = vpop.f32.mrf.mxu0 }
 0x11c   :  { %v1959_v9 = vadd.f32 %v1958_v61, %v1957_v55  ;;  %1533 = vst.msk [vmem:[%s4517_s4 + $0x70] sm:$0xf] %vm1504_vm3, %v2570_v33  ;;  %v1960_v16 = vsel %vm1904_vm5, %v3471_v21, 0.0  ;;  %v2066_v51 = vmul.f32 %v3471_v21, %v3471_v21  ;;  %v2156_v12 = vadd.f32 %v2155_v2, %v2154_v47 }
 0x11d   :  { %v2509_v13 = vpack.c.bf16 %v3486_v31, %v3486_v31  ;;  %v1733_v29 = vmul.f32 %v3454_v4, %v3454_v4  ;;  %v1822_v63 = vsel %vm1569_vm4, %v1731_v58, 0.0  ;;  %v2573_v22 = vpack.c.bf16 %v3488_v32, %v3488_v32 }
 0x11e   :  { %v1961_v15 = vadd.f32 %v1960_v16, %v1959_v9  ;;  %v1964_v0 = vsel %vm1904_vm5, %v3456_v5, 0.0  ;;  %v2068_v25 = vmul.f32 %v3456_v5, %v3456_v5  ;;  %v1823_v21 = vadd.f32 %v1822_v63, %v1821_v1  ;;  %v3809_v9 = vpop.f32.mrf.mxu1 }
 0x11f   :  { %1215 = vst.msk [vmem:[%s4516_s3 + $0x7c] sm:$0xf] %vm1183_vm2, %v2509_v13  ;;  %v2507_v4 = vpack.c.bf16 %v3503_v45, %v3503_v45  ;;  %v2157_v39 = vsel %vm1904_vm5, %v2066_v51, 0.0  ;;  %v1734_v40 = vmul.f32 %v3486_v31, %v3486_v31  ;;  %v1627_v5 = vsel %vm1569_vm4, %v3503_v45, 0.0 }
 0x120   :  { %1536 = vst.msk [vmem:[%s4517_s4 + $0x7c] sm:$0xf] %vm1504_vm3, %v2573_v22  ;;  %v1732_v23 = vmul.f32 %v3503_v45, %v3503_v45  ;;  %v2158_v35 = vadd.f32 %v2157_v39, %v2156_v12  ;;  %v1628_v54 = vadd.f32 %v1627_v5, %v1626_v24  ;;  %v2571_v11 = vpack.c.bf16 %v3505_v46, %v3505_v46  ;;  %v3845_v5 = vpop.f32.mrf.mxu1 }
 0x121   :  { %1213 = vst.msk [vmem:[%s4516_s3 + $0x74] sm:$0xf] %vm1183_vm2, %v2507_v4  ;;  %v1962_v17 = vsel %vm1904_vm5, %v3505_v46, 0.0  ;;  %v2067_v45 = vmul.f32 %v3505_v46, %v3505_v46  ;;  %v2512_v37 = vpack.c.bf16 %v3524_v59, %v3524_v59  ;;  %v1826_v48 = vsel %vm1569_vm4, %v1733_v29, 0.0  ;;  %v3818_v29 = vpop.f32.mrf.mxu0 }
 0x122   :  { %v1824_v18 = vsel %vm1569_vm4, %v1732_v23, 0.0  ;;  %v1963_v7 = vadd.f32 %v1962_v17, %v1961_v15  ;;  %v2161_v55 = vsel %vm1904_vm5, %v2068_v25, 0.0  ;;  %v1630_v49 = vadd.f32 %v1629_v38, %v1628_v54  ;;  %1534 = vst.msk [vmem:[%s4517_s4 + $0x74] sm:$0xf] %vm1504_vm3, %v2571_v11 }
 0x123   :  { %v1825_v19 = vadd.f32 %v1824_v18, %v1823_v21  ;;  %v2069_v61 = vmul.f32 %v3488_v32, %v3488_v32  ;;  %v2159_v62 = vsel %vm1904_vm5, %v2067_v45, 0.0  ;;  %1218 = vst.msk [vmem:[%s4516_s3 + $0x88] sm:$0xf] %vm1183_vm2, %v2512_v37  ;;  %v2576_v8 = vpack.c.bf16 %v3526_v56, %v3526_v56  ;;  %v3858_v11 = vpop.f32.mrf.mxu0 }
 0x124   :  { %v1965_v46 = vadd.f32 %v1964_v0, %v1963_v7  ;;  %v1631_v57 = vsel %vm1569_vm4, %v3486_v31, 0.0  ;;  %v1966_v60 = vsel %vm1904_vm5, %v3488_v32, 0.0  ;;  %v2160_v47 = vadd.f32 %v2159_v62, %v2158_v35  ;;  %v3879_v62 = vpop.f32.mrf.mxu1 }
 0x125   :  { %v1827_v58 = vadd.f32 %v1826_v48, %v1825_v19  ;;  %v1828_v30 = vsel %vm1569_vm4, %v1734_v40, 0.0  ;;  %1539 = vst.msk [vmem:[%s4517_s4 + $0x88] sm:$0xf] %vm1504_vm3, %v2576_v8  ;;  %v2510_v1 = vpack.c.bf16 %v3543_v3, %v3543_v3  ;;  %v1632_v33 = vadd.f32 %v1631_v57, %v1630_v49 }
 0x126   :  { %v1735_v2 = vmul.f32 %v3543_v3, %v3543_v3  ;;  %v2162_v31 = vadd.f32 %v2161_v55, %v2160_v47  ;;  %v1633_v32 = vsel %vm1569_vm4, %v3543_v3, 0.0  ;;  %v2574_v24 = vpack.c.bf16 %v3545_v6, %v3545_v6 }
 0x127   :  { %v1829_v38 = vadd.f32 %v1828_v30, %v1827_v58  ;;  %v2163_v16 = vsel %vm1904_vm5, %v2069_v61, 0.0  ;;  %v1637_v51 = vsel %vm1569_vm4, %v3524_v59, 0.0  ;;  %1216 = vst.msk [vmem:[%s4516_s3 + $0x80] sm:$0xf] %vm1183_vm2, %v2510_v1  ;;  %v1634_v12 = vadd.f32 %v1633_v32, %v1632_v33  ;;  %v3890_v58 = vpop.f32.mrf.mxu0 }
 0x128   :  { %v1967_v13 = vadd.f32 %v1966_v60, %v1965_v46  ;;  %1537 = vst.msk [vmem:[%s4517_s4 + $0x80] sm:$0xf] %vm1504_vm3, %v2574_v24  ;;  %v1968_v3 = vsel %vm1904_vm5, %v3545_v6, 0.0  ;;  %v2070_v63 = vmul.f32 %v3545_v6, %v3545_v6  ;;  %v2164_v15 = vadd.f32 %v2163_v16, %v2162_v31 }
 0x129   :  { %v2513_v22 = vpack.c.bf16 %v3566_v28, %v3566_v28  ;;  %v1737_v0 = vmul.f32 %v3524_v59, %v3524_v59  ;;  %v1830_v25 = vsel %vm1569_vm4, %v1735_v2, 0.0  ;;  %v2577_v4 = vpack.c.bf16 %v3579_v34, %v3579_v34 }
 0x12a   :  { %v1969_v21 = vadd.f32 %v1968_v3, %v1967_v13  ;;  %v1972_v39 = vsel %vm1904_vm5, %v3526_v56, 0.0  ;;  %v2072_v40 = vmul.f32 %v3526_v56, %v3526_v56  ;;  %v1831_v6 = vadd.f32 %v1830_v25, %v1829_v38 }
 0x12b   :  { %1219 = vst.msk [vmem:[%s4516_s3 + $0x8c] sm:$0xf] %vm1183_vm2, %v2513_v22  ;;  %v2511_v59 = vpack.c.bf16 %v3590_v36, %v3590_v36  ;;  %v2165_v23 = vsel %vm1904_vm5, %v2070_v63, 0.0  ;;  %v1738_v35 = vmul.f32 %v3566_v28, %v3566_v28  ;;  %v1635_v56 = vsel %vm1569_vm4, %v3590_v36, 0.0 }
 0x12c   :  { %1540 = vst.msk [vmem:[%s4517_s4 + $0x8c] sm:$0xf] %vm1504_vm3, %v2577_v4  ;;  %v1736_v54 = vmul.f32 %v3590_v36, %v3590_v36  ;;  %v2166_v17 = vadd.f32 %v2165_v23, %v2164_v15  ;;  %v1636_v18 = vadd.f32 %v1635_v56, %v1634_v12  ;;  %v2575_v7 = vpack.c.bf16 %v3609_v20, %v3609_v20  ;;  %v3918_v15 = vpop.f32.mrf.mxu0 }
 0x12d   :  { %1217 = vst.msk [vmem:[%s4516_s3 + $0x84] sm:$0xf] %vm1183_vm2, %v2511_v59  ;;  %v1970_v45 = vsel %vm1904_vm5, %v3609_v20, 0.0  ;;  %v2071_v36 = vmul.f32 %v3609_v20, %v3609_v20  ;;  %v2516_v55 = vpack.c.bf16 %v3618_v52, %v3618_v52  ;;  %v1834_v49 = vsel %vm1569_vm4, %v1737_v0, 0.0 }
 0x12e   :  { %v1832_v37 = vsel %vm1569_vm4, %v1736_v54, 0.0  ;;  %v1971_v48 = vadd.f32 %v1970_v45, %v1969_v21  ;;  %v2169_v19 = vsel %vm1904_vm5, %v2072_v40, 0.0  ;;  %v1638_v61 = vadd.f32 %v1637_v51, %v1636_v18  ;;  %1538 = vst.msk [vmem:[%s4517_s4 + $0x84] sm:$0xf] %vm1504_vm3, %v2575_v7  ;;  %v3909_v51 = vpop.f32.mrf.mxu1 }
 0x12f   :  { %v1833_v46 = vadd.f32 %v1832_v37, %v1831_v6  ;;  %v2073_v8 = vmul.f32 %v3579_v34, %v3579_v34  ;;  %v2167_v57 = vsel %vm1904_vm5, %v2071_v36, 0.0  ;;  %1222 = vst.msk [vmem:[%s4516_s3 + $0x98] sm:$0xf] %vm1183_vm2, %v2516_v55  ;;  %v2580_v60 = vpack.c.bf16 %v3645_v14, %v3645_v14 }
 0x130   :  { %v1973_v20 = vadd.f32 %v1972_v39, %v1971_v48  ;;  %v1639_v47 = vsel %vm1569_vm4, %v3566_v28, 0.0  ;;  %v1974_v30 = vsel %vm1904_vm5, %v3579_v34, 0.0  ;;  %v2168_v33 = vadd.f32 %v2167_v57, %v2166_v17  ;;  %v3945_v23 = vpop.f32.mrf.mxu1  ;;  %v3958_v17 = vpop.f32.mrf.mxu0 }
 0x131   :  { %v1835_v1 = vadd.f32 %v1834_v49, %v1833_v46  ;;  %v1836_v2 = vsel %vm1569_vm4, %v1738_v35, 0.0  ;;  %1543 = vst.msk [vmem:[%s4517_s4 + $0x98] sm:$0xf] %vm1504_vm3, %v2580_v60  ;;  %v2514_v31 = vpack.c.bf16 %v3658_v10, %v3658_v10  ;;  %v1640_v32 = vadd.f32 %v1639_v47, %v1638_v61 }
 0x132   :  { %v1739_v38 = vmul.f32 %v3658_v10, %v3658_v10  ;;  %v2170_v28 = vadd.f32 %v2169_v19, %v2168_v33  ;;  %v1641_v34 = vsel %vm1569_vm4, %v3658_v10, 0.0  ;;  %v2578_v16 = vpack.c.bf16 %v3679_v42, %v3679_v42  ;;  %v3990_v47 = vpop.f32.mrf.mxu0 }
 0x133   :  { %v1837_v24 = vadd.f32 %v1836_v2, %v1835_v1  ;;  %v2171_v12 = vsel %vm1904_vm5, %v2073_v8, 0.0  ;;  %v1645_v13 = vsel %vm1569_vm4, %v3618_v52, 0.0  ;;  %1220 = vst.msk [vmem:[%s4516_s3 + $0x90] sm:$0xf] %vm1183_vm2, %v2514_v31  ;;  %v1642_v3 = vadd.f32 %v1641_v34, %v1640_v32  ;;  %v3979_v8 = vpop.f32.mrf.mxu1 }
 0x134   :  { %v1975_v63 = vadd.f32 %v1974_v30, %v1973_v20  ;;  %1541 = vst.msk [vmem:[%s4517_s4 + $0x90] sm:$0xf] %vm1504_vm3, %v2578_v16  ;;  %v1976_v10 = vsel %vm1904_vm5, %v3679_v42, 0.0  ;;  %v2074_v22 = vmul.f32 %v3679_v42, %v3679_v42  ;;  %v2172_v0 = vadd.f32 %v2171_v12, %v2170_v28 }
 0x135   :  { %v2517_v25 = vpack.c.bf16 %v3690_v50, %v3690_v50  ;;  %v1741_v21 = vmul.f32 %v3618_v52, %v3618_v52  ;;  %v1838_v4 = vsel %vm1569_vm4, %v1739_v38, 0.0  ;;  %v2581_v40 = vpack.c.bf16 %v3709_v43, %v3709_v43  ;;  %v4009_v16 = vpop.f32.mrf.mxu1 }
 0x136   :  { %v1977_v39 = vadd.f32 %v1976_v10, %v1975_v63  ;;  %v1980_v6 = vsel %vm1904_vm5, %v3645_v14, 0.0  ;;  %v2076_v59 = vmul.f32 %v3645_v14, %v3645_v14  ;;  %v1839_v42 = vadd.f32 %v1838_v4, %v1837_v24  ;;  %v4018_v10 = vpop.f32.mrf.mxu0 }
 0x137   :  { %1223 = vst.msk [vmem:[%s4516_s3 + $0x9c] sm:$0xf] %vm1183_vm2, %v2517_v25  ;;  %v2515_v52 = vpack.c.bf16 %v3718_v41, %v3718_v41  ;;  %v2173_v35 = vsel %vm1904_vm5, %v2074_v22, 0.0  ;;  %v1742_v56 = vmul.f32 %v3690_v50, %v3690_v50  ;;  %v1643_v14 = vsel %vm1569_vm4, %v3718_v41, 0.0 }
 0x138   :  { %1544 = vst.msk [vmem:[%s4517_s4 + $0x9c] sm:$0xf] %vm1504_vm3, %v2581_v40  ;;  %v1740_v54 = vmul.f32 %v3718_v41, %v3718_v41  ;;  %v2174_v18 = vadd.f32 %v2173_v35, %v2172_v0  ;;  %v1644_v7 = vadd.f32 %v1643_v14, %v1642_v3  ;;  %v2579_v45 = vpack.c.bf16 %v3745_v26, %v3745_v26  ;;  %v4058_v14 = vpop.f32.mrf.mxu0 }
 0x139   :  { %1221 = vst.msk [vmem:[%s4516_s3 + $0x94] sm:$0xf] %vm1183_vm2, %v2515_v52  ;;  %v1978_v37 = vsel %vm1904_vm5, %v3745_v26, 0.0  ;;  %v2075_v41 = vmul.f32 %v3745_v26, %v3745_v26  ;;  %v2520_v55 = vpack.c.bf16 %v3758_v27, %v3758_v27  ;;  %v1842_v49 = vsel %vm1569_vm4, %v1741_v21, 0.0 }
 0x13a   :  { %v1840_v48 = vsel %vm1569_vm4, %v1740_v54, 0.0  ;;  %v1979_v36 = vadd.f32 %v1978_v37, %v1977_v39  ;;  %v2177_v19 = vsel %vm1904_vm5, %v2076_v59, 0.0  ;;  %v1646_v61 = vadd.f32 %v1645_v13, %v1644_v7  ;;  %1542 = vst.msk [vmem:[%s4517_s4 + $0x94] sm:$0xf] %vm1504_vm3, %v2579_v45 }
 0x13b   :  { %v1841_v46 = vadd.f32 %v1840_v48, %v1839_v42  ;;  %v2077_v20 = vmul.f32 %v3709_v43, %v3709_v43  ;;  %v2175_v57 = vsel %vm1904_vm5, %v2075_v41, 0.0  ;;  %1226 = vst.msk [vmem:[%s4516_s3 + $0xa8] sm:$0xf] %vm1183_vm2, %v2520_v55  ;;  %v2584_v60 = vpack.c.bf16 %v3779_v53, %v3779_v53  ;;  %v4045_v42 = vpop.f32.mrf.mxu1 }
 0x13c   :  { %v1981_v26 = vadd.f32 %v1980_v6, %v1979_v36  ;;  %v1647_v30 = vsel %vm1569_vm4, %v3690_v50, 0.0  ;;  %v1982_v1 = vsel %vm1904_vm5, %v3709_v43, 0.0  ;;  %v2176_v2 = vadd.f32 %v2175_v57, %v2174_v18  ;;  %v4090_v57 = vpop.f32.mrf.mxu0 }
 0x13d   :  { %v1843_v33 = vadd.f32 %v1842_v49, %v1841_v46  ;;  %v1844_v31 = vsel %vm1569_vm4, %v1742_v56, 0.0  ;;  %1547 = vst.msk [vmem:[%s4517_s4 + $0xa8] sm:$0xf] %vm1504_vm3, %v2584_v60  ;;  %v2518_v32 = vpack.c.bf16 %v3790_v44, %v3790_v44  ;;  %v1648_v38 = vadd.f32 %v1647_v30, %v1646_v61  ;;  %v4079_v61 = vpop.f32.mrf.mxu1 }
 0x13e   :  { %v1743_v28 = vmul.f32 %v3790_v44, %v3790_v44  ;;  %v2178_v50 = vadd.f32 %v2177_v19, %v2176_v2  ;;  %v1649_v43 = vsel %vm1569_vm4, %v3790_v44, 0.0  ;;  %v2582_v24 = vpack.c.bf16 %v3809_v9, %v3809_v9 }
 0x13f   :  { %v1845_v34 = vadd.f32 %v1844_v31, %v1843_v33  ;;  %v2179_v12 = vsel %vm1904_vm5, %v2077_v20, 0.0  ;;  %v1653_v13 = vsel %vm1569_vm4, %v3758_v27, 0.0  ;;  %1224 = vst.msk [vmem:[%s4516_s3 + $0xa0] sm:$0xf] %vm1183_vm2, %v2518_v32  ;;  %v1650_v3 = vadd.f32 %v1649_v43, %v1648_v38  ;;  %v4109_v43 = vpop.f32.mrf.mxu1 }
 0x140   :  { %v1983_v63 = vadd.f32 %v1982_v1, %v1981_v26  ;;  %1545 = vst.msk [vmem:[%s4517_s4 + $0xa0] sm:$0xf] %vm1504_vm3, %v2582_v24  ;;  %v1984_v44 = vsel %vm1904_vm5, %v3809_v9, 0.0  ;;  %v2078_v22 = vmul.f32 %v3809_v9, %v3809_v9  ;;  %v2180_v0 = vadd.f32 %v2179_v12, %v2178_v50 }
 0x141   :  { %v2521_v25 = vpack.c.bf16 %v3818_v29, %v3818_v29  ;;  %v1745_v21 = vmul.f32 %v3758_v27, %v3758_v27  ;;  %v1846_v4 = vsel %vm1569_vm4, %v1743_v28, 0.0  ;;  %v2585_v40 = vpack.c.bf16 %v3845_v5, %v3845_v5 }
 0x142   :  { %v1985_v39 = vadd.f32 %v1984_v44, %v1983_v63  ;;  %v1988_v6 = vsel %vm1904_vm5, %v3779_v53, 0.0  ;;  %v2080_v59 = vmul.f32 %v3779_v53, %v3779_v53  ;;  %v1847_v9 = vadd.f32 %v1846_v4, %v1845_v34 }
 0x143   :  { %1227 = vst.msk [vmem:[%s4516_s3 + $0xac] sm:$0xf] %vm1183_vm2, %v2521_v25  ;;  %v2519_v27 = vpack.c.bf16 %v3858_v11, %v3858_v11  ;;  %v2181_v52 = vsel %vm1904_vm5, %v2078_v22, 0.0  ;;  %v1746_v35 = vmul.f32 %v3818_v29, %v3818_v29  ;;  %v1651_v53 = vsel %vm1569_vm4, %v3858_v11, 0.0 }
 0x144   :  { %1548 = vst.msk [vmem:[%s4517_s4 + $0xac] sm:$0xf] %vm1504_vm3, %v2585_v40  ;;  %v1744_v56 = vmul.f32 %v3858_v11, %v3858_v11  ;;  %v2182_v54 = vadd.f32 %v2181_v52, %v2180_v0  ;;  %v1652_v18 = vadd.f32 %v1651_v53, %v1650_v3  ;;  %v2583_v7 = vpack.c.bf16 %v3879_v62, %v3879_v62  ;;  %v4118_v3 = vpop.f32.mrf.mxu0 }
 0x145   :  { %1225 = vst.msk [vmem:[%s4516_s3 + $0xa4] sm:$0xf] %vm1183_vm2, %v2519_v27  ;;  %v1986_v45 = vsel %vm1904_vm5, %v3879_v62, 0.0  ;;  %v2079_v11 = vmul.f32 %v3879_v62, %v3879_v62  ;;  %v2524_v36 = vpack.c.bf16 %v3890_v58, %v3890_v58  ;;  %v1850_v41 = vsel %vm1569_vm4, %v1745_v21, 0.0 }
 0x146   :  { %v1848_v37 = vsel %vm1569_vm4, %v1744_v56, 0.0  ;;  %v1987_v48 = vadd.f32 %v1986_v45, %v1985_v39  ;;  %v2185_v55 = vsel %vm1904_vm5, %v2080_v59, 0.0  ;;  %v1654_v49 = vadd.f32 %v1653_v13, %v1652_v18  ;;  %1546 = vst.msk [vmem:[%s4517_s4 + $0xa4] sm:$0xf] %vm1504_vm3, %v2583_v7  ;;  %v4158_v52 = vpop.f32.mrf.mxu0 }
 0x147   :  { %v1849_v19 = vadd.f32 %v1848_v37, %v1847_v9  ;;  %v2081_v46 = vmul.f32 %v3845_v5, %v3845_v5  ;;  %v2183_v20 = vsel %vm1904_vm5, %v2079_v11, 0.0  ;;  %1230 = vst.msk [vmem:[%s4516_s3 + $0xb8] sm:$0xf] %vm1183_vm2, %v2524_v36  ;;  %v2588_v26 = vpack.c.bf16 %v3909_v51, %v3909_v51 }
 0x148   :  { %v1989_v62 = vadd.f32 %v1988_v6, %v1987_v48  ;;  %v1655_v60 = vsel %vm1569_vm4, %v3818_v29, 0.0  ;;  %v1990_v30 = vsel %vm1904_vm5, %v3845_v5, 0.0  ;;  %v2184_v33 = vadd.f32 %v2183_v20, %v2182_v54  ;;  %v4145_v6 = vpop.f32.mrf.mxu1 }
 0x149   :  { %v1851_v1 = vadd.f32 %v1850_v41, %v1849_v19  ;;  %v1852_v2 = vsel %vm1569_vm4, %v1746_v35, 0.0  ;;  %1551 = vst.msk [vmem:[%s4517_s4 + $0xb8] sm:$0xf] %vm1504_vm3, %v2588_v26  ;;  %v2522_v31 = vpack.c.bf16 %v3918_v15, %v3918_v15  ;;  %v1656_v32 = vadd.f32 %v1655_v60, %v1654_v49 }
 0x14a   :  { %v1747_v38 = vmul.f32 %v3918_v15, %v3918_v15  ;;  %v2186_v29 = vadd.f32 %v2185_v55, %v2184_v33  ;;  %v1657_v5 = vsel %vm1569_vm4, %v3918_v15, 0.0  ;;  %v2586_v50 = vpack.c.bf16 %v3945_v23, %v3945_v23  ;;  %v4179_v41 = vpop.f32.mrf.mxu1 }
 0x14b   :  { %v1853_v28 = vadd.f32 %v1852_v2, %v1851_v1  ;;  %v2187_v34 = vsel %vm1904_vm5, %v2081_v46, 0.0  ;;  %v1661_v24 = vsel %vm1569_vm4, %v3890_v58, 0.0  ;;  %1228 = vst.msk [vmem:[%s4516_s3 + $0xb0] sm:$0xf] %vm1183_vm2, %v2522_v31  ;;  %v1658_v12 = vadd.f32 %v1657_v5, %v1656_v32  ;;  %v4190_v46 = vpop.f32.mrf.mxu0 }
 0x14c   :  { %v1991_v13 = vadd.f32 %v1990_v30, %v1989_v62  ;;  %1549 = vst.msk [vmem:[%s4517_s4 + $0xb0] sm:$0xf] %vm1504_vm3, %v2586_v50  ;;  %v1992_v15 = vsel %vm1904_vm5, %v3945_v23, 0.0  ;;  %v2082_v63 = vmul.f32 %v3945_v23, %v3945_v23  ;;  %v2188_v44 = vadd.f32 %v2187_v34, %v2186_v29 }
 0x14d   :  { %v2525_v22 = vpack.c.bf16 %v3958_v17, %v3958_v17  ;;  %v1749_v0 = vmul.f32 %v3890_v58, %v3890_v58  ;;  %v1854_v25 = vsel %vm1569_vm4, %v1747_v38, 0.0  ;;  %v2589_v4 = vpack.c.bf16 %v3979_v8, %v3979_v8  ;;  %v4209_v38 = vpop.f32.mrf.mxu1  ;;  %v4218_v34 = vpop.f32.mrf.mxu0 }
 0x14e   :  { %v1993_v21 = vadd.f32 %v1992_v15, %v1991_v13  ;;  %v1996_v39 = vsel %vm1904_vm5, %v3909_v51, 0.0  ;;  %v2084_v40 = vmul.f32 %v3909_v51, %v3909_v51  ;;  %v1855_v23 = vadd.f32 %v1854_v25, %v1853_v28 }
 0x14f   :  { %1231 = vst.msk [vmem:[%s4516_s3 + $0xbc] sm:$0xf] %vm1183_vm2, %v2525_v22  ;;  %v2523_v58 = vpack.c.bf16 %v3990_v47, %v3990_v47  ;;  %v2189_v59 = vsel %vm1904_vm5, %v2082_v63, 0.0  ;;  %v1750_v9 = vmul.f32 %v3958_v17, %v3958_v17  ;;  %v1659_v51 = vsel %vm1569_vm4, %v3990_v47, 0.0 }
 0x150   :  { %1552 = vst.msk [vmem:[%s4517_s4 + $0xbc] sm:$0xf] %vm1504_vm3, %v2589_v4  ;;  %v1748_v27 = vmul.f32 %v3990_v47, %v3990_v47  ;;  %v2190_v35 = vadd.f32 %v2189_v59, %v2188_v44  ;;  %v1660_v53 = vadd.f32 %v1659_v51, %v1658_v12  ;;  %v2587_v56 = vpack.c.bf16 %v4009_v16, %v4009_v16 }
 0x151   :  { %1229 = vst.msk [vmem:[%s4516_s3 + $0xb4] sm:$0xf] %vm1183_vm2, %v2523_v58  ;;  %v1994_v54 = vsel %vm1904_vm5, %v4009_v16, 0.0  ;;  %v2083_v47 = vmul.f32 %v4009_v16, %v4009_v16  ;;  %v2528_v45 = vpack.c.bf16 %v4018_v10, %v4018_v10  ;;  %v1858_v37 = vsel %vm1569_vm4, %v1749_v0, 0.0 }
 0x152   :  { %v1856_v18 = vsel %vm1569_vm4, %v1748_v27, 0.0  ;;  %v1995_v7 = vadd.f32 %v1994_v54, %v1993_v21  ;;  %v2193_v48 = vsel %vm1904_vm5, %v2084_v40, 0.0  ;;  %v1662_v11 = vadd.f32 %v1661_v24, %v1660_v53  ;;  %1550 = vst.msk [vmem:[%s4517_s4 + $0xb4] sm:$0xf] %vm1504_vm3, %v2587_v56  ;;  %v4245_v21 = vpop.f32.mrf.mxu1 }
 0x153   :  { %v1857_v36 = vadd.f32 %v1856_v18, %v1855_v23  ;;  %v2085_v55 = vmul.f32 %v3979_v8, %v3979_v8  ;;  %v2191_v49 = vsel %vm1904_vm5, %v2083_v47, 0.0  ;;  %1234 = vst.msk [vmem:[%s4516_s3 + $0xc8] sm:$0xf] %vm1183_vm2, %v2528_v45  ;;  %v2592_v19 = vpack.c.bf16 %v4045_v42, %v4045_v42  ;;  %v4258_v23 = vpop.f32.mrf.mxu0 }
 0x154   :  { %v1997_v16 = vadd.f32 %v1996_v39, %v1995_v7  ;;  %v1663_v62 = vsel %vm1569_vm4, %v3958_v17, 0.0  ;;  %v1998_v20 = vsel %vm1904_vm5, %v3979_v8, 0.0  ;;  %v2192_v60 = vadd.f32 %v2191_v49, %v2190_v35  ;;  %v883_v47 = vpop.f32.mrf.mxu1 }
 0x155   :  { %v1859_v26 = vadd.f32 %v1858_v37, %v1857_v36  ;;  %v1860_v30 = vsel %vm1569_vm4, %v1750_v9, 0.0  ;;  %1555 = vst.msk [vmem:[%s4517_s4 + $0xc8] sm:$0xf] %vm1504_vm3, %v2592_v19  ;;  %v2526_v1 = vpack.c.bf16 %v4058_v14, %v4058_v14  ;;  %v1664_v33 = vadd.f32 %v1663_v62, %v1662_v11  ;;  %v4288_v11 = vpop.f32.mrf.mxu0 }
 0x156   :  { %v1751_v2 = vmul.f32 %v4058_v14, %v4058_v14  ;;  %v2194_v17 = vadd.f32 %v2193_v48, %v2192_v60  ;;  %v1665_v8 = vsel %vm1569_vm4, %v4058_v14, 0.0  ;;  %v2590_v32 = vpack.c.bf16 %v4079_v61, %v4079_v61 }
 0x157   :  { %v1861_v31 = vadd.f32 %v1860_v30, %v1859_v26  ;;  %v2195_v29 = vsel %vm1904_vm5, %v2085_v55, 0.0  ;;  %v1669_v5 = vsel %vm1569_vm4, %v4018_v10, 0.0  ;;  %1232 = vst.msk [vmem:[%s4516_s3 + $0xc0] sm:$0xf] %vm1183_vm2, %v2526_v1  ;;  %v1666_v28 = vadd.f32 %v1665_v8, %v1664_v33  ;;  %v4307_v1 = vpop.f32.mrf.mxu1 }
 0x158   :  { %v1999_v50 = vadd.f32 %v1998_v20, %v1997_v16  ;;  %1553 = vst.msk [vmem:[%s4517_s4 + $0xc0] sm:$0xf] %vm1504_vm3, %v2590_v32  ;;  %v2000_v14 = vsel %vm1904_vm5, %v4079_v61, 0.0  ;;  %v2086_v24 = vmul.f32 %v4079_v61, %v4079_v61  ;;  %v2196_v12 = vadd.f32 %v2195_v29, %v2194_v17 }
 0x159   :  { %v2529_v13 = vpack.c.bf16 %v4090_v57, %v4090_v57  ;;  %v1753_v15 = vmul.f32 %v4018_v10, %v4018_v10  ;;  %v1862_v63 = vsel %vm1569_vm4, %v1751_v2, 0.0  ;;  %v2593_v22 = vpack.c.bf16 %v4109_v43, %v4109_v43 }
 0x15a   :  { %v2001_v44 = vadd.f32 %v2000_v14, %v1999_v50  ;;  %v2004_v0 = vsel %vm1904_vm5, %v4045_v42, 0.0  ;;  %v2088_v25 = vmul.f32 %v4045_v42, %v4045_v42  ;;  %v1863_v61 = vadd.f32 %v1862_v63, %v1861_v31  ;;  %v603_v31 = vpop.f32.mrf.mxu0 }
 0x15b   :  { %1235 = vst.msk [vmem:[%s4516_s3 + $0xcc] sm:$0xf] %vm1183_vm2, %v2529_v13  ;;  %v2527_v10 = vpack.c.bf16 %v4118_v3, %v4118_v3  ;;  %v2197_v4 = vsel %vm1904_vm5, %v2086_v24, 0.0  ;;  %v1754_v39 = vmul.f32 %v4090_v57, %v4090_v57  ;;  %v1667_v42 = vsel %vm1569_vm4, %v4118_v3, 0.0 }
 0x15c   :  { %1556 = vst.msk [vmem:[%s4517_s4 + $0xcc] sm:$0xf] %vm1504_vm3, %v2593_v22  ;;  %v1752_v40 = vmul.f32 %v4118_v3, %v4118_v3  ;;  %v2198_v58 = vadd.f32 %v2197_v4, %v2196_v12  ;;  %v1668_v59 = vadd.f32 %v1667_v42, %v1666_v28  ;;  %v2591_v9 = vpack.c.bf16 %v4145_v6, %v4145_v6 }
 0x15d   :  { %1233 = vst.msk [vmem:[%s4516_s3 + $0xc4] sm:$0xf] %vm1183_vm2, %v2527_v10  ;;  %v2002_v51 = vsel %vm1904_vm5, %v4145_v6, 0.0  ;;  %v2087_v3 = vmul.f32 %v4145_v6, %v4145_v6  ;;  %v2532_v53 = vpack.c.bf16 %v4158_v52, %v4158_v52  ;;  %v1866_v56 = vsel %vm1569_vm4, %v1753_v15, 0.0  ;;  %v896_v15 = vpop.f32.mrf.mxu1 }
 0x15e   :  { %v1864_v27 = vsel %vm1569_vm4, %v1752_v40, 0.0  ;;  %v2003_v35 = vadd.f32 %v2002_v51, %v2001_v44  ;;  %v2201_v54 = vsel %vm1904_vm5, %v2088_v25, 0.0  ;;  %v1670_v18 = vadd.f32 %v1669_v5, %v1668_v59  ;;  %1554 = vst.msk [vmem:[%s4517_s4 + $0xc4] sm:$0xf] %vm1504_vm3, %v2591_v9 }
 0x15f   :  { %v1865_v7 = vadd.f32 %v1864_v27, %v1863_v61  ;;  %v2089_v45 = vmul.f32 %v4109_v43, %v4109_v43  ;;  %v2199_v6 = vsel %vm1904_vm5, %v2087_v3, 0.0  ;;  %1238 = vst.msk [vmem:[%s4516_s3 + $0xd8] sm:$0xf] %vm1183_vm2, %v2532_v53  ;;  %v2596_v48 = vpack.c.bf16 %v4179_v41, %v4179_v41  ;;  %v4368_v27 = vpop.f32.mrf.mxu1 }
 0x160   :  { %v2005_v37 = vadd.f32 %v2004_v0, %v2003_v35  ;;  %v1671_v36 = vsel %vm1569_vm4, %v4090_v57, 0.0  ;;  %v2006_v55 = vsel %vm1904_vm5, %v4109_v43, 0.0  ;;  %v2200_v49 = vadd.f32 %v2199_v6, %v2198_v58  ;;  %v4352_v0 = vpop.f32.mrf.mxu0 }
 0x161   :  { %v1867_v16 = vadd.f32 %v1866_v56, %v1865_v7  ;;  %v1868_v19 = vsel %vm1569_vm4, %v1754_v39, 0.0  ;;  %1559 = vst.msk [vmem:[%s4517_s4 + $0xd8] sm:$0xf] %vm1504_vm3, %v2596_v48  ;;  %v2530_v62 = vpack.c.bf16 %v4190_v46, %v4190_v46  ;;  %v1672_v20 = vadd.f32 %v1671_v36, %v1670_v18 }
 0x162   :  { %v1755_v26 = vmul.f32 %v4190_v46, %v4190_v46  ;;  %v2202_v57 = vadd.f32 %v2201_v54, %v2200_v49  ;;  %v1673_v43 = vsel %vm1569_vm4, %v4190_v46, 0.0  ;;  %v2594_v30 = vpack.c.bf16 %v4209_v38, %v4209_v38  ;;  %v606_v54 = vpop.f32.mrf.mxu0 }
 0x163   :  { %v1869_v60 = vadd.f32 %v1868_v19, %v1867_v16  ;;  %v2203_v33 = vsel %vm1904_vm5, %v2089_v45, 0.0  ;;  %v1677_v2 = vsel %vm1569_vm4, %v4158_v52, 0.0  ;;  %1236 = vst.msk [vmem:[%s4516_s3 + $0xd0] sm:$0xf] %vm1183_vm2, %v2530_v62  ;;  %v1674_v17 = vadd.f32 %v1673_v43, %v1672_v20  ;;  %v899_v19 = vpop.f32.mrf.mxu1 }
 0x164   :  { %v2007_v8 = vadd.f32 %v2006_v55, %v2005_v37  ;;  %1557 = vst.msk [vmem:[%s4517_s4 + $0xd0] sm:$0xf] %vm1504_vm3, %v2594_v30  ;;  %v2008_v46 = vsel %vm1904_vm5, %v4209_v38, 0.0  ;;  %v2090_v32 = vmul.f32 %v4209_v38, %v4209_v38  ;;  %v2204_v29 = vadd.f32 %v2203_v33, %v2202_v57 }
 0x165   :  { %v2533_v5 = vpack.c.bf16 %v4218_v34, %v4218_v34  ;;  %v1757_v28 = vmul.f32 %v4158_v52, %v4158_v52  ;;  %v1870_v50 = vsel %vm1569_vm4, %v1755_v26, 0.0  ;;  %v2597_v24 = vpack.c.bf16 %v4245_v21, %v4245_v21  ;;  %v4394_v26 = vpop.f32.mrf.mxu0 }
 0x166   :  { %v2009_v14 = vadd.f32 %v2008_v46, %v2007_v8  ;;  %v2012_v12 = vsel %vm1904_vm5, %v4179_v41, 0.0  ;;  %v2092_v13 = vmul.f32 %v4179_v41, %v4179_v41  ;;  %v1871_v38 = vadd.f32 %v1870_v50, %v1869_v60 }
 0x167   :  { %1239 = vst.msk [vmem:[%s4516_s3 + $0xdc] sm:$0xf] %vm1183_vm2, %v2533_v5  ;;  %v2531_v52 = vpack.c.bf16 %v4258_v23, %v4258_v23  ;;  %v2205_v63 = vsel %vm1904_vm5, %v2090_v32, 0.0  ;;  %v1758_v44 = vmul.f32 %v4218_v34, %v4218_v34  ;;  %v1675_v41 = vsel %vm1569_vm4, %v4258_v23, 0.0  ;;  %v4416_v5 = vpop.f32.mrf.mxu1 }
 0x168   :  { %1560 = vst.msk [vmem:[%s4517_s4 + $0xdc] sm:$0xf] %vm1504_vm3, %v2597_v24  ;;  %v1756_v22 = vmul.f32 %v4258_v23, %v4258_v23  ;;  %v2206_v25 = vadd.f32 %v2205_v63, %v2204_v29  ;;  %v1676_v61 = vadd.f32 %v1675_v41, %v1674_v17  ;;  %v2595_v10 = vpack.c.bf16 %v883_v47, %v883_v47  ;;  %v619_v24 = vpop.f32.mrf.mxu0 }
 0x169   :  { %1237 = vst.msk [vmem:[%s4516_s3 + $0xd4] sm:$0xf] %vm1183_vm2, %v2531_v52  ;;  %v2010_v4 = vsel %vm1904_vm5, %v883_v47, 0.0  ;;  %v2091_v40 = vmul.f32 %v883_v47, %v883_v47  ;;  %v2536_v58 = vpack.c.bf16 %v4288_v11, %v4288_v11  ;;  %v1874_v23 = vsel %vm1569_vm4, %v1757_v28, 0.0 }
 0x16a   :  { %v1872_v39 = vsel %vm1569_vm4, %v1756_v22, 0.0  ;;  %v2011_v42 = vadd.f32 %v2010_v4, %v2009_v14  ;;  %v2209_v59 = vsel %vm1904_vm5, %v2092_v13, 0.0  ;;  %v1678_v9 = vadd.f32 %v1677_v2, %v1676_v61  ;;  %1558 = vst.msk [vmem:[%s4517_s4 + $0xd4] sm:$0xf] %vm1504_vm3, %v2595_v10  ;;  %v912_v4 = vpop.f32.mrf.mxu1 }
 0x16b   :  { %v1873_v51 = vadd.f32 %v1872_v39, %v1871_v38  ;;  %v2093_v35 = vmul.f32 %v4245_v21, %v4245_v21  ;;  %v2207_v53 = vsel %vm1904_vm5, %v2091_v40, 0.0  ;;  %1242 = vst.msk [vmem:[%s4516_s3 + $0xe8] sm:$0xf] %vm1183_vm2, %v2536_v58  ;;  %v2600_v56 = vpack.c.bf16 %v4307_v1, %v4307_v1  ;;  %v2737_v58 = vpop.f32.mrf.mxu0 }
 0x16c   :  { %v2013_v3 = vadd.f32 %v2012_v12, %v2011_v42  ;;  %v1679_v18 = vsel %vm1569_vm4, %v4218_v34, 0.0  ;;  %v2014_v7 = vsel %vm1904_vm5, %v4245_v21, 0.0  ;;  %v2208_v45 = vadd.f32 %v2207_v53, %v2206_v25 }
 0x16d   :  { %v1875_v47 = vadd.f32 %v1874_v23, %v1873_v51  ;;  %v1876_v37 = vsel %vm1569_vm4, %v1758_v44, 0.0  ;;  %1563 = vst.msk [vmem:[%s4517_s4 + $0xe8] sm:$0xf] %vm1504_vm3, %v2600_v56  ;;  %v2534_v6 = vpack.c.bf16 %v603_v31, %v603_v31  ;;  %v1680_v48 = vadd.f32 %v1679_v18, %v1678_v9 }
 0x16e   :  { %v1759_v36 = vmul.f32 %v603_v31, %v603_v31  ;;  %v2210_v55 = vadd.f32 %v2209_v59, %v2208_v45  ;;  %v1681_v16 = vsel %vm1569_vm4, %v603_v31, 0.0  ;;  %v2598_v34 = vpack.c.bf16 %v896_v15, %v896_v15  ;;  %v2803_v45 = vpop.f32.mrf.mxu1 }
 0x16f   :  { %v1877_v49 = vadd.f32 %v1876_v37, %v1875_v47  ;;  %v2211_v21 = vsel %vm1904_vm5, %v2093_v35, 0.0  ;;  %1240 = vst.msk [vmem:[%s4516_s3 + $0xe0] sm:$0xf] %vm1183_vm2, %v2534_v6  ;;  %v1682_v62 = vadd.f32 %v1681_v16, %v1680_v48  ;;  %v2015_v20 = vadd.f32 %v2014_v7, %v2013_v3  ;;  %v622_v48 = vpop.f32.mrf.mxu0 }
 0x170   :  { %1561 = vst.msk [vmem:[%s4517_s4 + $0xe0] sm:$0xf] %vm1504_vm3, %v2598_v34  ;;  %v2016_v57 = vsel %vm1904_vm5, %v896_v15, 0.0  ;;  %v2094_v43 = vmul.f32 %v896_v15, %v896_v15  ;;  %v2212_v60 = vadd.f32 %v2211_v21, %v2210_v55  ;;  %v2537_v30 = vpack.c.bf16 %v4352_v0, %v4352_v0 }
 0x171   :  { %v1685_v33 = vsel %vm1569_vm4, %v4288_v11, 0.0  ;;  %v1878_v2 = vsel %vm1569_vm4, %v1759_v36, 0.0  ;;  %v2017_v17 = vadd.f32 %v2016_v57, %v2015_v20  ;;  %v2601_v8 = vpack.c.bf16 %v4368_v27, %v4368_v27 }
 0x172   :  { %v1761_v31 = vmul.f32 %v4288_v11, %v4288_v11  ;;  %v2096_v46 = vmul.f32 %v4307_v1, %v4307_v1  ;;  %v1879_v32 = vadd.f32 %v1878_v2, %v1877_v49  ;;  %1243 = vst.msk [vmem:[%s4516_s3 + $0xec] sm:$0xf] %vm1183_vm2, %v2537_v30  ;;  %v2535_v29 = vpack.c.bf16 %v606_v54, %v606_v54 }
 0x173   :  { %v2213_v28 = vsel %vm1904_vm5, %v2094_v43, 0.0  ;;  %v1762_v50 = vmul.f32 %v4352_v0, %v4352_v0  ;;  %1564 = vst.msk [vmem:[%s4517_s4 + $0xec] sm:$0xf] %vm1504_vm3, %v2601_v8  ;;  %v1683_v11 = vsel %vm1569_vm4, %v606_v54, 0.0  ;;  %v1760_v14 = vmul.f32 %v606_v54, %v606_v54  ;;  %v915_v43 = vpop.f32.mrf.mxu1 }
 0x174   :  { %v2214_v12 = vadd.f32 %v2213_v28, %v2212_v60  ;;  %1241 = vst.msk [vmem:[%s4516_s3 + $0xe4] sm:$0xf] %vm1183_vm2, %v2535_v29  ;;  %v1684_v13 = vadd.f32 %v1683_v11, %v1682_v62  ;;  %v2599_v38 = vpack.c.bf16 %v899_v19, %v899_v19  ;;  %v2018_v52 = vsel %vm1904_vm5, %v899_v19, 0.0 }
 0x175   :  { %v1880_v15 = vsel %vm1569_vm4, %v1760_v14, 0.0  ;;  %v2019_v63 = vadd.f32 %v2018_v52, %v2017_v17  ;;  %v2095_v44 = vmul.f32 %v899_v19, %v899_v19  ;;  %v2540_v41 = vpack.c.bf16 %v4394_v26, %v4394_v26 }
 0x176   :  { %v1882_v22 = vsel %vm1569_vm4, %v1761_v31, 0.0  ;;  %v2020_v25 = vsel %vm1904_vm5, %v4307_v1, 0.0  ;;  %v1686_v61 = vadd.f32 %v1685_v33, %v1684_v13  ;;  %v1881_v10 = vadd.f32 %v1880_v15, %v1879_v32  ;;  %1562 = vst.msk [vmem:[%s4517_s4 + $0xe4] sm:$0xf] %vm1504_vm3, %v2599_v38 }
 0x177   :  { %v2097_v39 = vmul.f32 %v4368_v27, %v4368_v27  ;;  %v2021_v42 = vadd.f32 %v2020_v25, %v2019_v63  ;;  %v2215_v40 = vsel %vm1904_vm5, %v2095_v44, 0.0  ;;  %1246 = vst.msk [vmem:[%s4516_s3 + $0xf8] sm:$0xf] %vm1183_vm2, %v2540_v41  ;;  %v2604_v1 = vpack.c.bf16 %v4416_v5, %v4416_v5 }
 0x178   :  { %v2217_v23 = vsel %vm1904_vm5, %v2096_v46, 0.0  ;;  %v1687_v59 = vsel %vm1569_vm4, %v4352_v0, 0.0  ;;  %v1883_v9 = vadd.f32 %v1882_v22, %v1881_v10  ;;  %v2216_v51 = vadd.f32 %v2215_v40, %v2214_v12 }
 0x179   :  { %v1884_v35 = vsel %vm1569_vm4, %v1762_v50, 0.0  ;;  %1567 = vst.msk [vmem:[%s4517_s4 + $0xf8] sm:$0xf] %vm1504_vm3, %v2604_v1  ;;  %v2538_v3 = vpack.c.bf16 %v619_v24, %v619_v24  ;;  %v1688_v53 = vadd.f32 %v1687_v59, %v1686_v61  ;;  %v1763_v56 = vmul.f32 %v619_v24, %v619_v24 }
 0x17a   :  { %v2022_v54 = vsel %vm1904_vm5, %v4368_v27, 0.0  ;;  %v2218_v18 = vadd.f32 %v2217_v23, %v2216_v51  ;;  %v1885_v7 = vadd.f32 %v1884_v35, %v1883_v9  ;;  %v2602_v47 = vpack.c.bf16 %v912_v4, %v912_v4 }
 0x17b   :  { %v2219_v0 = vsel %vm1904_vm5, %v2097_v39, 0.0  ;;  %1244 = vst.msk [vmem:[%s4516_s3 + $0xf0] sm:$0xf] %vm1183_vm2, %v2538_v3  ;;  %v1689_v37 = vsel %vm1569_vm4, %v619_v24, 0.0  ;;  %v2023_v6 = vadd.f32 %v2022_v54, %v2021_v42  ;;  %v2098_v27 = vmul.f32 %v912_v4, %v912_v4 }
 0x17c   :  { %v1690_v36 = vadd.f32 %v1689_v37, %v1688_v53  ;;  %1565 = vst.msk [vmem:[%s4517_s4 + $0xf0] sm:$0xf] %vm1504_vm3, %v2602_v47  ;;  %v2220_v55 = vadd.f32 %v2219_v0, %v2218_v18  ;;  %v2541_v16 = vpack.c.bf16 %v2737_v58, %v2737_v58  ;;  %v1886_v49 = vsel %vm1569_vm4, %v1763_v56, 0.0 }
 0x17d   :  { %v2024_v34 = vsel %vm1904_vm5, %v912_v4, 0.0  ;;  %v2605_v19 = vpack.c.bf16 %v2803_v45, %v2803_v45  ;;  %v1693_v21 = vsel %vm1569_vm4, %v4394_v26, 0.0  ;;  %v1887_v62 = vadd.f32 %v1886_v49, %v1885_v7 }
 0x17e   :  { %v2025_v20 = vadd.f32 %v2024_v34, %v2023_v6  ;;  %1247 = vst.msk [vmem:[%s4516_s3 + $0xfc] sm:$0xf] %vm1183_vm2, %v2541_v16  ;;  %v2539_v57 = vpack.c.bf16 %v622_v48, %v622_v48  ;;  %v1765_v60 = vmul.f32 %v4394_v26, %v4394_v26  ;;  %v2221_v30 = vsel %vm1904_vm5, %v2098_v27, 0.0 }
 0x17f   :  { %1568 = vst.msk [vmem:[%s4517_s4 + $0xfc] sm:$0xf] %vm1504_vm3, %v2605_v19  ;;  %v1691_v33 = vsel %vm1569_vm4, %v622_v48, 0.0  ;;  %v1764_v2 = vmul.f32 %v622_v48, %v622_v48  ;;  %v2100_v17 = vmul.f32 %v4416_v5, %v4416_v5  ;;  %v2222_v8 = vadd.f32 %v2221_v30, %v2220_v55 }
 0x180   :  { %v1766_v31 = vmul.f32 %v2737_v58, %v2737_v58  ;;  %1245 = vst.msk [vmem:[%s4516_s3 + $0xf4] sm:$0xf] %vm1183_vm2, %v2539_v57  ;;  %v1692_v26 = vadd.f32 %v1691_v33, %v1690_v36  ;;  %v2603_v32 = vpack.c.bf16 %v915_v43, %v915_v43  ;;  %v2026_v29 = vsel %vm1904_vm5, %v915_v43, 0.0 }
 0x181   :  { %v1888_v46 = vsel %vm1569_vm4, %v1764_v2, 0.0  ;;  %v2099_v28 = vmul.f32 %v915_v43, %v915_v43  ;;  %v2028_v50 = vsel %vm1904_vm5, %v4416_v5, 0.0  ;;  %v2027_v24 = vadd.f32 %v2026_v29, %v2025_v20 }
 0x182   :  { %v1694_v11 = vadd.f32 %v1693_v21, %v1692_v26  ;;  %v1889_v14 = vadd.f32 %v1888_v46, %v1887_v62  ;;  %v1890_v12 = vsel %vm1569_vm4, %v1765_v60, 0.0  ;;  %v1695_v13 = vsel %vm1569_vm4, %v2737_v58, 0.0  ;;  %1566 = vst.msk [vmem:[%s4517_s4 + $0xf4] sm:$0xf] %vm1504_vm3, %v2603_v32 }
 0x183   :  { %v2101_v38 = vmul.f32 %v2803_v45, %v2803_v45  ;;  %v2223_v52 = vsel %vm1904_vm5, %v2099_v28, 0.0  ;;  %v2029_v44 = vadd.f32 %v2028_v50, %v2027_v24  ;;  %v2225_v5 = vsel %vm1904_vm5, %v2100_v17, 0.0 }
 0x184   :  { %v1696_v15 = vadd.f32 %v1695_v13, %v1694_v11  ;;  %v1891_v63 = vadd.f32 %v1890_v12, %v1889_v14  ;;  %v2224_v41 = vadd.f32 %v2223_v52, %v2222_v8  ;;  %v1892_v22 = vsel %vm1569_vm4, %v1766_v31, 0.0 }
 0x185   :  { %v2030_v25 = vsel %vm1904_vm5, %v2803_v45, 0.0  ;;  %v2227_v42 = vsel %vm1904_vm5, %v2101_v38, 0.0 }
 0x186   :  { %v1697_v61 = vrot.slane %v1696_v15, 4  ;;  %v1893_v10 = vadd.f32 %v1892_v22, %v1891_v63  ;;  %v2031_v4 = vadd.f32 %v2030_v25, %v2029_v44  ;;  %v2226_v39 = vadd.f32 %v2225_v5, %v2224_v41 }
 0x188   :  { %v1698_v40 = vadd.f32 %v1697_v61, %v1696_v15  ;;  %v1894_v1 = vrot.slane %v1893_v10, 4  ;;  %v2032_v58 = vrot.slane %v2031_v4, 4  ;;  %v2228_v23 = vadd.f32 %v2227_v42, %v2226_v39 }
 0x18a   :  { %v1699_v59 = vrot.slane %v1698_v40, 2  ;;  %v1895_v9 = vadd.f32 %v1894_v1, %v1893_v10  ;;  %v2033_v51 = vadd.f32 %v2032_v58, %v2031_v4  ;;  %v2229_v35 = vrot.slane %v2228_v23, 4 }
 0x18c   :  { %v1700_v3 = vadd.f32 %v1699_v59, %v1698_v40  ;;  %v1896_v53 = vrot.slane %v1895_v9, 2  ;;  %v2034_v56 = vrot.slane %v2033_v51, 2  ;;  %v2230_v54 = vadd.f32 %v2229_v35, %v2228_v23 }
 0x18e   :  { %v1701_v18 = vrot.slane %v1700_v3, 1  ;;  %v1897_v7 = vadd.f32 %v1896_v53, %v1895_v9  ;;  %v2035_v47 = vadd.f32 %v2034_v56, %v2033_v51  ;;  %v2231_v45 = vrot.slane %v2230_v54, 2 }
 0x190   :  { %v1898_v0 = vrot.slane %v1897_v7, 1  ;;  %v2036_v37 = vrot.slane %v2035_v47, 1  ;;  %v2232_v6 = vadd.f32 %v2231_v45, %v2230_v54  ;;  %v1702_v48 = vadd.f32 %v1701_v18, %v1700_v3 }
 0x192   :  { %v1899_v36 = vadd.f32 %v1898_v0, %v1897_v7  ;;  %v2233_v27 = vrot.slane %v2232_v6, 1  ;;  %v2037_v16 = vadd.f32 %v2036_v37, %v2035_v47 }
 0x194   :  { %v1901_v55 = vsel %vm1900_vm6, %v1702_v48, %v1899_v36  ;;  %v2234_v49 = vadd.f32 %v2233_v27, %v2232_v6 }
 0x195   :  { %1903 = vst.msk [vmem:[%s4518_s5] sm:$0x3] %vm1902_vm7, %v1901_v55 }
 0x196   :  { %v2235_v34 = vsel %vm1900_vm6, %v2037_v16, %v2234_v49 }
 0x197   :  { %2237 = vst.msk [vmem:[%s4519_s6] sm:$0x3] %vm2236_vm8, %v2235_v34 }

// kernel: bottleneck_forward.7
= control target key start
LH: loop header
LB: loop body
LE: loop exit
PB: predicated region body
PF: predicated region fallthrough
CT: control target
= control target key end

     0   :  { %vm947_vm0 = vcmask 125952   ;;  %s2249_s0 = inlined_call_operand.vmem [shape: bf16[512,16], index: 0, kind: input, shape index: {}]   ;;  %s2250_s1 = inlined_call_operand.vmem [shape: f32[1,16], index: 1, kind: input, shape index: {}]   ;;  %s2251_s3 = inlined_call_operand.vmem [shape: bf16[512,16], index: 3, kind: input, shape index: {}]   ;;  %s2252_s4 = inlined_call_operand.vmem [shape: f32[1,16], index: 4, kind: input, shape index: {}]   ;;  %s2253_s5 = inlined_call_operand.vmem [shape: f32[1,16], index: 5, kind: input, shape index: {}]   ;;  %s2254_s2 = inlined_call_operand.vmem [shape: f32[1,16], index: 2, kind: input, shape index: {}]   ;;  %s2255_s6 = inlined_call_operand.vmem [shape: bf16[512,16], index: 6, kind: output, shape index: {}]  }
   0x1   :  { %v1149_v0 = vld [vmem:[%s2251_s3] sm:$0xff]   ;;  %v1404_v9 = vld [vmem:[%s2251_s3 + $0x8] sm:$0xff]   ;;  %v1405_v20 = vld [vmem:[%s2251_s3 + $0x10] sm:$0xff]  }
   0x2   :  { %v1511_v1 = vld [vmem:[%s2252_s4] ss:$0 sm:$0xff]  ;;  %v1150_v2 = vunpack.c.l.bf16 %v1149_v0  ;;  %v1151_v5 = vunpack.c.h.bf16 %v1149_v0  ;;  %v1435_v10 = vld [vmem:[%s2249_s0 + $0x8] sm:$0xff]   ;;  %v1154_v14 = vunpack.c.l.bf16 %v1404_v9  ;;  %v1155_v18 = vunpack.c.h.bf16 %v1404_v9  ;;  %v1436_v21 = vld [vmem:[%s2249_s0 + $0x10] sm:$0xff]  }
   0x3   :  { %v1277_v3 = vld [vmem:[%s2249_s0] sm:$0xff]   ;;  %v1282_v15 = vunpack.c.l.bf16 %v1435_v10  ;;  %v1283_v19 = vunpack.c.h.bf16 %v1435_v10  ;;  %v1158_v32 = vunpack.c.l.bf16 %v1405_v20  ;;  %v1286_v33 = vunpack.c.l.bf16 %v1436_v21  ;;  %v1406_v46 = vld [vmem:[%s2251_s3 + $0x18] sm:$0xff]  }
   0x4   :  { %v1519_v4 = vld [vmem:[%s2250_s1] ss:$0 sm:$0xff]  ;;  %v1278_v7 = vunpack.c.l.bf16 %v1277_v3  ;;  %v1279_v8 = vunpack.c.h.bf16 %v1277_v3  ;;  %v158_v11 = vmul.f32 %v1150_v2, %v1511_v1  ;;  %v159_v13 = vmul.f32 %v1151_v5, %v1511_v1  ;;  %v1437_v51 = vld [vmem:[%s2249_s0 + $0x18] sm:$0xff]  }
   0x5   :  { %v1524_v6 = vld [vmem:[%s2253_s5] ss:$0 sm:$0xff]  ;;  %v160_v24 = vmul.f32 %v1154_v14, %v1511_v1  ;;  %v430_v25 = vmul.f32 %v1282_v15, %v1519_v4  ;;  %v161_v28 = vmul.f32 %v1155_v18, %v1511_v1  ;;  %v431_v29 = vmul.f32 %v1283_v19, %v1519_v4  ;;  %v1408_v18 = vld [vmem:[%s2251_s3 + $0x28] sm:$0xff]  }
   0x6   :  { %v1536_v12 = vld [vmem:[%s2254_s2] ss:$0 sm:$0xff]  ;;  %v428_v16 = vmul.f32 %v1278_v7, %v1519_v4  ;;  %v429_v17 = vmul.f32 %v1279_v8, %v1519_v4  ;;  %v229_v22 = vadd.f32 %v1524_v6, %v158_v11  ;;  %v230_v23 = vadd.f32 %v1524_v6, %v159_v13 }
   0x7   :  { %v231_v30 = vadd.f32 %v1524_v6, %v160_v24  ;;  %v501_v31 = vadd.f32 %v1536_v12, %v430_v25  ;;  %v232_v36 = vadd.f32 %v1524_v6, %v161_v28  ;;  %v502_v37 = vadd.f32 %v1536_v12, %v431_v29  ;;  %v1407_v56 = vld [vmem:[%s2251_s3 + $0x20] sm:$0xff]  }
   0x8   :  { %v499_v26 = vadd.f32 %v1536_v12, %v428_v16  ;;  %v500_v27 = vadd.f32 %v1536_v12, %v429_v17  ;;  %v162_v39 = vmul.f32 %v1158_v32, %v1511_v1  ;;  %v432_v40 = vmul.f32 %v1286_v33, %v1519_v4  ;;  %v1438_v61 = vld [vmem:[%s2249_s0 + $0x20] sm:$0xff]  }
   0x9   :  { %v565_v38 = vadd.f32 %v501_v31, %v231_v30  ;;  %v1159_v41 = vunpack.c.h.bf16 %v1405_v20  ;;  %v566_v44 = vadd.f32 %v502_v37, %v232_v36  ;;  %v1287_v45 = vunpack.c.h.bf16 %v1436_v21 }
   0xa   :  { %v563_v34 = vadd.f32 %v499_v26, %v229_v22  ;;  %v564_v35 = vadd.f32 %v500_v27, %v230_v23  ;;  %v233_v48 = vadd.f32 %v1524_v6, %v162_v39  ;;  %v503_v49 = vadd.f32 %v1536_v12, %v432_v40  ;;  %v1439_v23 = vld [vmem:[%s2249_s0 + $0x28] sm:$0xff]  }
   0xb   :  { %v629_v47 = vmax.f32 %v565_v38, 0.0  ;;  %v163_v50 = vmul.f32 %v1159_v41, %v1511_v1  ;;  %v630_v54 = vmax.f32 %v566_v44, 0.0  ;;  %v433_v55 = vmul.f32 %v1287_v45, %v1519_v4  ;;  %v1409_v44 = vld [vmem:[%s2251_s3 + $0x30] sm:$0xff]  }
   0xc   :  { %v627_v42 = vmax.f32 %v563_v34, 0.0  ;;  %v628_v43 = vmax.f32 %v564_v35, 0.0  ;;  %v567_v58 = vadd.f32 %v503_v49, %v233_v48  ;;  %v1162_v60 = vunpack.c.l.bf16 %v1406_v46  ;;  %v1440_v45 = vld [vmem:[%s2249_s0 + $0x30] sm:$0xff]  }
   0xd   :  { %v1086_v57 = vpack.c.bf16 %v629_v47, %v629_v47  ;;  %v234_v59 = vadd.f32 %v1524_v6, %v163_v50  ;;  %v1087_v62 = vpack.c.bf16 %v630_v54, %v630_v54  ;;  %v504_v63 = vadd.f32 %v1536_v12, %v433_v55  ;;  %v1410_v54 = vld [vmem:[%s2251_s3 + $0x38] sm:$0xff]  }
   0xe   :  { %v1084_v52 = vpack.c.bf16 %v627_v42, %v627_v42  ;;  %v1085_v53 = vpack.c.bf16 %v628_v43, %v628_v43  ;;  %v1290_v0 = vunpack.c.l.bf16 %v1437_v51  ;;  %v1163_v2 = vunpack.c.h.bf16 %v1406_v46 }
   0xf   :  { %950 = vst.msk [vmem:[%s2255_s6 + $0x8] sm:$0xf] %vm947_vm0, %v1086_v57  ;;  %v631_v3 = vmax.f32 %v567_v58, 0.0  ;;  %v164_v5 = vmul.f32 %v1162_v60, %v1511_v1  ;;  %v1291_v7 = vunpack.c.h.bf16 %v1437_v51  ;;  %v1166_v8 = vunpack.c.l.bf16 %v1407_v56  ;;  %951 = vst.msk [vmem:[%s2255_s6 + $0xc] sm:$0xf] %vm947_vm0, %v1087_v62 }
  0x10   :  { %948 = vst.msk [vmem:[%s2255_s6] sm:$0xf] %vm947_vm0, %v1084_v52  ;;  %949 = vst.msk [vmem:[%s2255_s6 + $0x4] sm:$0xf] %vm947_vm0, %v1085_v53  ;;  %v568_v9 = vadd.f32 %v504_v63, %v234_v59  ;;  %v434_v10 = vmul.f32 %v1290_v0, %v1519_v4  ;;  %v165_v11 = vmul.f32 %v1163_v2, %v1511_v1  ;;  %v1294_v13 = vunpack.c.l.bf16 %v1438_v61 }
  0x11   :  { %v1088_v14 = vpack.c.bf16 %v631_v3, %v631_v3  ;;  %v235_v15 = vadd.f32 %v1524_v6, %v164_v5  ;;  %v435_v16 = vmul.f32 %v1291_v7, %v1519_v4  ;;  %v166_v17 = vmul.f32 %v1166_v8, %v1511_v1  ;;  %v1441_v5 = vld [vmem:[%s2249_s0 + $0x38] sm:$0xff]  }
  0x12   :  { %v632_v19 = vmax.f32 %v568_v9, 0.0  ;;  %v505_v20 = vadd.f32 %v1536_v12, %v434_v10  ;;  %v236_v21 = vadd.f32 %v1524_v6, %v165_v11  ;;  %v436_v22 = vmul.f32 %v1294_v13, %v1519_v4 }
  0x13   :  { %952 = vst.msk [vmem:[%s2255_s6 + $0x10] sm:$0xf] %vm947_vm0, %v1088_v14  ;;  %v506_v24 = vadd.f32 %v1536_v12, %v435_v16  ;;  %v237_v25 = vadd.f32 %v1524_v6, %v166_v17  ;;  %v1167_v26 = vunpack.c.h.bf16 %v1407_v56  ;;  %v1295_v27 = vunpack.c.h.bf16 %v1438_v61  ;;  %v1411_v16 = vld [vmem:[%s2251_s3 + $0x40] sm:$0xff]  }
  0x14   :  { %v1089_v28 = vpack.c.bf16 %v632_v19, %v632_v19  ;;  %v569_v29 = vadd.f32 %v505_v20, %v235_v15  ;;  %v507_v30 = vadd.f32 %v1536_v12, %v436_v22  ;;  %v1170_v31 = vunpack.c.l.bf16 %v1408_v18 }
  0x15   :  { %v570_v32 = vadd.f32 %v506_v24, %v236_v21  ;;  %v167_v33 = vmul.f32 %v1167_v26, %v1511_v1  ;;  %v437_v34 = vmul.f32 %v1295_v27, %v1519_v4  ;;  %v1298_v35 = vunpack.c.l.bf16 %v1439_v23  ;;  %v1442_v21 = vld [vmem:[%s2249_s0 + $0x40] sm:$0xff]  }
  0x16   :  { %953 = vst.msk [vmem:[%s2255_s6 + $0x14] sm:$0xf] %vm947_vm0, %v1089_v28  ;;  %v633_v36 = vmax.f32 %v569_v29, 0.0  ;;  %v571_v37 = vadd.f32 %v507_v30, %v237_v25  ;;  %v168_v38 = vmul.f32 %v1170_v31, %v1511_v1  ;;  %v1171_v39 = vunpack.c.h.bf16 %v1408_v18 }
  0x17   :  { %v634_v40 = vmax.f32 %v570_v32, 0.0  ;;  %v238_v41 = vadd.f32 %v1524_v6, %v167_v33  ;;  %v508_v42 = vadd.f32 %v1536_v12, %v437_v34  ;;  %v438_v43 = vmul.f32 %v1298_v35, %v1519_v4 }
  0x18   :  { %v1090_v46 = vpack.c.bf16 %v633_v36, %v633_v36  ;;  %v635_v47 = vmax.f32 %v571_v37, 0.0  ;;  %v239_v48 = vadd.f32 %v1524_v6, %v168_v38  ;;  %v169_v49 = vmul.f32 %v1171_v39, %v1511_v1  ;;  %v1412_v38 = vld [vmem:[%s2251_s3 + $0x48] sm:$0xff]  }
  0x19   :  { %v1091_v50 = vpack.c.bf16 %v634_v40, %v634_v40  ;;  %v572_v51 = vadd.f32 %v508_v42, %v238_v41  ;;  %v509_v52 = vadd.f32 %v1536_v12, %v438_v43  ;;  %v1299_v53 = vunpack.c.h.bf16 %v1439_v23  ;;  %v1443_v43 = vld [vmem:[%s2249_s0 + $0x48] sm:$0xff]  }
  0x1a   :  { %954 = vst.msk [vmem:[%s2255_s6 + $0x18] sm:$0xf] %vm947_vm0, %v1090_v46  ;;  %v1092_v55 = vpack.c.bf16 %v635_v47, %v635_v47  ;;  %v240_v56 = vadd.f32 %v1524_v6, %v169_v49  ;;  %v1174_v57 = vunpack.c.l.bf16 %v1409_v44  ;;  %v1302_v58 = vunpack.c.l.bf16 %v1440_v45 }
  0x1b   :  { %955 = vst.msk [vmem:[%s2255_s6 + $0x1c] sm:$0xf] %vm947_vm0, %v1091_v50  ;;  %v636_v59 = vmax.f32 %v572_v51, 0.0  ;;  %v573_v60 = vadd.f32 %v509_v52, %v239_v48  ;;  %v439_v61 = vmul.f32 %v1299_v53, %v1519_v4  ;;  %v1175_v62 = vunpack.c.h.bf16 %v1409_v44 }
  0x1c   :  { %956 = vst.msk [vmem:[%s2255_s6 + $0x20] sm:$0xf] %vm947_vm0, %v1092_v55  ;;  %v170_v63 = vmul.f32 %v1174_v57, %v1511_v1  ;;  %v440_v0 = vmul.f32 %v1302_v58, %v1519_v4  ;;  %v1303_v2 = vunpack.c.h.bf16 %v1440_v45  ;;  %v1178_v3 = vunpack.c.l.bf16 %v1410_v54 }
  0x1d   :  { %v1093_v7 = vpack.c.bf16 %v636_v59, %v636_v59  ;;  %v637_v8 = vmax.f32 %v573_v60, 0.0  ;;  %v510_v9 = vadd.f32 %v1536_v12, %v439_v61  ;;  %v171_v10 = vmul.f32 %v1175_v62, %v1511_v1  ;;  %v1413_v60 = vld [vmem:[%s2251_s3 + $0x50] sm:$0xff]  }
  0x1e   :  { %v241_v11 = vadd.f32 %v1524_v6, %v170_v63  ;;  %v511_v13 = vadd.f32 %v1536_v12, %v440_v0  ;;  %v441_v14 = vmul.f32 %v1303_v2, %v1519_v4  ;;  %v172_v15 = vmul.f32 %v1178_v3, %v1511_v1  ;;  %v1444_v2 = vld [vmem:[%s2249_s0 + $0x50] sm:$0xff]  }
  0x1f   :  { %957 = vst.msk [vmem:[%s2255_s6 + $0x24] sm:$0xf] %vm947_vm0, %v1093_v7  ;;  %v1094_v17 = vpack.c.bf16 %v637_v8, %v637_v8  ;;  %v574_v18 = vadd.f32 %v510_v9, %v240_v56  ;;  %v242_v19 = vadd.f32 %v1524_v6, %v171_v10  ;;  %v1306_v20 = vunpack.c.l.bf16 %v1441_v5 }
  0x20   :  { %v575_v22 = vadd.f32 %v511_v13, %v241_v11  ;;  %v512_v23 = vadd.f32 %v1536_v12, %v441_v14  ;;  %v243_v24 = vadd.f32 %v1524_v6, %v172_v15  ;;  %v1179_v25 = vunpack.c.h.bf16 %v1410_v54  ;;  %v1414_v14 = vld [vmem:[%s2251_s3 + $0x58] sm:$0xff]  }
  0x21   :  { %958 = vst.msk [vmem:[%s2255_s6 + $0x28] sm:$0xf] %vm947_vm0, %v1094_v17  ;;  %v638_v26 = vmax.f32 %v574_v18, 0.0  ;;  %v442_v27 = vmul.f32 %v1306_v20, %v1519_v4  ;;  %v1307_v28 = vunpack.c.h.bf16 %v1441_v5  ;;  %v1182_v29 = vunpack.c.l.bf16 %v1411_v16 }
  0x22   :  { %v639_v30 = vmax.f32 %v575_v22, 0.0  ;;  %v576_v31 = vadd.f32 %v512_v23, %v242_v19  ;;  %v173_v32 = vmul.f32 %v1179_v25, %v1511_v1  ;;  %v1310_v33 = vunpack.c.l.bf16 %v1442_v21 }
  0x23   :  { %v1095_v34 = vpack.c.bf16 %v638_v26, %v638_v26  ;;  %v513_v35 = vadd.f32 %v1536_v12, %v442_v27  ;;  %v443_v36 = vmul.f32 %v1307_v28, %v1519_v4  ;;  %v174_v37 = vmul.f32 %v1182_v29, %v1511_v1  ;;  %v1445_v27 = vld [vmem:[%s2249_s0 + $0x58] sm:$0xff]  }
  0x24   :  { %v1096_v39 = vpack.c.bf16 %v639_v30, %v639_v30  ;;  %v640_v40 = vmax.f32 %v576_v31, 0.0  ;;  %v244_v41 = vadd.f32 %v1524_v6, %v173_v32  ;;  %v444_v42 = vmul.f32 %v1310_v33, %v1519_v4 }
  0x25   :  { %959 = vst.msk [vmem:[%s2255_s6 + $0x2c] sm:$0xf] %vm947_vm0, %v1095_v34  ;;  %v577_v44 = vadd.f32 %v513_v35, %v243_v24  ;;  %v514_v45 = vadd.f32 %v1536_v12, %v443_v36  ;;  %v245_v46 = vadd.f32 %v1524_v6, %v174_v37  ;;  %v1183_v47 = vunpack.c.h.bf16 %v1411_v16  ;;  %v1415_v36 = vld [vmem:[%s2251_s3 + $0x60] sm:$0xff]  }
  0x26   :  { %960 = vst.msk [vmem:[%s2255_s6 + $0x30] sm:$0xf] %vm947_vm0, %v1096_v39  ;;  %v1097_v48 = vpack.c.bf16 %v640_v40, %v640_v40  ;;  %v515_v49 = vadd.f32 %v1536_v12, %v444_v42  ;;  %v1311_v50 = vunpack.c.h.bf16 %v1442_v21  ;;  %v1186_v51 = vunpack.c.l.bf16 %v1412_v38 }
  0x27   :  { %v641_v52 = vmax.f32 %v577_v44, 0.0  ;;  %v578_v53 = vadd.f32 %v514_v45, %v244_v41  ;;  %v175_v54 = vmul.f32 %v1183_v47, %v1511_v1  ;;  %v1314_v55 = vunpack.c.l.bf16 %v1443_v43  ;;  %v1446_v41 = vld [vmem:[%s2249_s0 + $0x60] sm:$0xff]  }
  0x28   :  { %961 = vst.msk [vmem:[%s2255_s6 + $0x34] sm:$0xf] %vm947_vm0, %v1097_v48  ;;  %v579_v56 = vadd.f32 %v515_v49, %v245_v46  ;;  %v445_v57 = vmul.f32 %v1311_v50, %v1519_v4  ;;  %v176_v58 = vmul.f32 %v1186_v51, %v1511_v1  ;;  %v1187_v59 = vunpack.c.h.bf16 %v1412_v38 }
  0x29   :  { %v1098_v61 = vpack.c.bf16 %v641_v52, %v641_v52  ;;  %v642_v62 = vmax.f32 %v578_v53, 0.0  ;;  %v246_v63 = vadd.f32 %v1524_v6, %v175_v54  ;;  %v446_v0 = vmul.f32 %v1314_v55, %v1519_v4 }
  0x2a   :  { %v643_v3 = vmax.f32 %v579_v56, 0.0  ;;  %v516_v5 = vadd.f32 %v1536_v12, %v445_v57  ;;  %v247_v7 = vadd.f32 %v1524_v6, %v176_v58  ;;  %v177_v8 = vmul.f32 %v1187_v59, %v1511_v1  ;;  %v1416_v58 = vld [vmem:[%s2251_s3 + $0x68] sm:$0xff]  }
  0x2b   :  { %962 = vst.msk [vmem:[%s2255_s6 + $0x38] sm:$0xf] %vm947_vm0, %v1098_v61  ;;  %v1099_v9 = vpack.c.bf16 %v642_v62, %v642_v62  ;;  %v517_v10 = vadd.f32 %v1536_v12, %v446_v0  ;;  %v1315_v11 = vunpack.c.h.bf16 %v1443_v43  ;;  %v1190_v13 = vunpack.c.l.bf16 %v1413_v60 }
  0x2c   :  { %v1100_v15 = vpack.c.bf16 %v643_v3, %v643_v3  ;;  %v580_v16 = vadd.f32 %v516_v5, %v246_v63  ;;  %v248_v17 = vadd.f32 %v1524_v6, %v177_v8  ;;  %v1318_v18 = vunpack.c.l.bf16 %v1444_v2  ;;  %v1447_v63 = vld [vmem:[%s2249_s0 + $0x68] sm:$0xff]  }
  0x2d   :  { %963 = vst.msk [vmem:[%s2255_s6 + $0x3c] sm:$0xf] %vm947_vm0, %v1099_v9  ;;  %v581_v19 = vadd.f32 %v517_v10, %v247_v7  ;;  %v447_v20 = vmul.f32 %v1315_v11, %v1519_v4  ;;  %v178_v21 = vmul.f32 %v1190_v13, %v1511_v1  ;;  %v1191_v22 = vunpack.c.h.bf16 %v1413_v60 }
  0x2e   :  { %964 = vst.msk [vmem:[%s2255_s6 + $0x40] sm:$0xf] %vm947_vm0, %v1100_v15  ;;  %v644_v23 = vmax.f32 %v580_v16, 0.0  ;;  %v448_v24 = vmul.f32 %v1318_v18, %v1519_v4  ;;  %v1319_v25 = vunpack.c.h.bf16 %v1444_v2  ;;  %v1194_v26 = vunpack.c.l.bf16 %v1414_v14 }
  0x2f   :  { %v645_v28 = vmax.f32 %v581_v19, 0.0  ;;  %v518_v29 = vadd.f32 %v1536_v12, %v447_v20  ;;  %v249_v30 = vadd.f32 %v1524_v6, %v178_v21  ;;  %v179_v31 = vmul.f32 %v1191_v22, %v1511_v1  ;;  %v1417_v20 = vld [vmem:[%s2251_s3 + $0x70] sm:$0xff]  }
  0x30   :  { %v1101_v32 = vpack.c.bf16 %v644_v23, %v644_v23  ;;  %v519_v33 = vadd.f32 %v1536_v12, %v448_v24  ;;  %v449_v34 = vmul.f32 %v1319_v25, %v1519_v4  ;;  %v180_v35 = vmul.f32 %v1194_v26, %v1511_v1  ;;  %v1448_v25 = vld [vmem:[%s2249_s0 + $0x70] sm:$0xff]  }
  0x31   :  { %v1102_v37 = vpack.c.bf16 %v645_v28, %v645_v28  ;;  %v582_v38 = vadd.f32 %v518_v29, %v248_v17  ;;  %v250_v39 = vadd.f32 %v1524_v6, %v179_v31  ;;  %v1322_v40 = vunpack.c.l.bf16 %v1445_v27 }
  0x32   :  { %965 = vst.msk [vmem:[%s2255_s6 + $0x44] sm:$0xf] %vm947_vm0, %v1101_v32  ;;  %v583_v42 = vadd.f32 %v519_v33, %v249_v30  ;;  %v520_v43 = vadd.f32 %v1536_v12, %v449_v34  ;;  %v251_v44 = vadd.f32 %v1524_v6, %v180_v35  ;;  %v1195_v45 = vunpack.c.h.bf16 %v1414_v14  ;;  %v1418_v34 = vld [vmem:[%s2251_s3 + $0x78] sm:$0xff]  }
  0x33   :  { %966 = vst.msk [vmem:[%s2255_s6 + $0x48] sm:$0xf] %vm947_vm0, %v1102_v37  ;;  %v646_v46 = vmax.f32 %v582_v38, 0.0  ;;  %v450_v47 = vmul.f32 %v1322_v40, %v1519_v4  ;;  %v1323_v48 = vunpack.c.h.bf16 %v1445_v27  ;;  %v1198_v49 = vunpack.c.l.bf16 %v1415_v36 }
  0x34   :  { %v647_v50 = vmax.f32 %v583_v42, 0.0  ;;  %v584_v51 = vadd.f32 %v520_v43, %v250_v39  ;;  %v181_v52 = vmul.f32 %v1195_v45, %v1511_v1  ;;  %v1326_v53 = vunpack.c.l.bf16 %v1446_v41 }
  0x35   :  { %v1103_v54 = vpack.c.bf16 %v646_v46, %v646_v46  ;;  %v521_v55 = vadd.f32 %v1536_v12, %v450_v47  ;;  %v451_v56 = vmul.f32 %v1323_v48, %v1519_v4  ;;  %v182_v57 = vmul.f32 %v1198_v49, %v1511_v1  ;;  %v1449_v47 = vld [vmem:[%s2249_s0 + $0x78] sm:$0xff]  }
  0x36   :  { %v1104_v59 = vpack.c.bf16 %v647_v50, %v647_v50  ;;  %v648_v60 = vmax.f32 %v584_v51, 0.0  ;;  %v252_v61 = vadd.f32 %v1524_v6, %v181_v52  ;;  %v452_v62 = vmul.f32 %v1326_v53, %v1519_v4 }
  0x37   :  { %967 = vst.msk [vmem:[%s2255_s6 + $0x4c] sm:$0xf] %vm947_vm0, %v1103_v54  ;;  %v585_v0 = vadd.f32 %v521_v55, %v251_v44  ;;  %v522_v2 = vadd.f32 %v1536_v12, %v451_v56  ;;  %v253_v3 = vadd.f32 %v1524_v6, %v182_v57  ;;  %v1199_v5 = vunpack.c.h.bf16 %v1415_v36  ;;  %v1419_v56 = vld [vmem:[%s2251_s3 + $0x80] sm:$0xff]  }
  0x38   :  { %968 = vst.msk [vmem:[%s2255_s6 + $0x50] sm:$0xf] %vm947_vm0, %v1104_v59  ;;  %v1105_v7 = vpack.c.bf16 %v648_v60, %v648_v60  ;;  %v523_v8 = vadd.f32 %v1536_v12, %v452_v62  ;;  %v1327_v9 = vunpack.c.h.bf16 %v1446_v41  ;;  %v1202_v10 = vunpack.c.l.bf16 %v1416_v58 }
  0x39   :  { %v649_v11 = vmax.f32 %v585_v0, 0.0  ;;  %v586_v13 = vadd.f32 %v522_v2, %v252_v61  ;;  %v183_v14 = vmul.f32 %v1199_v5, %v1511_v1  ;;  %v1330_v15 = vunpack.c.l.bf16 %v1447_v63  ;;  %v1450_v61 = vld [vmem:[%s2249_s0 + $0x80] sm:$0xff]  }
  0x3a   :  { %969 = vst.msk [vmem:[%s2255_s6 + $0x54] sm:$0xf] %vm947_vm0, %v1105_v7  ;;  %v587_v16 = vadd.f32 %v523_v8, %v253_v3  ;;  %v453_v17 = vmul.f32 %v1327_v9, %v1519_v4  ;;  %v184_v18 = vmul.f32 %v1202_v10, %v1511_v1  ;;  %v1203_v19 = vunpack.c.h.bf16 %v1416_v58 }
  0x3b   :  { %v1106_v21 = vpack.c.bf16 %v649_v11, %v649_v11  ;;  %v650_v22 = vmax.f32 %v586_v13, 0.0  ;;  %v254_v23 = vadd.f32 %v1524_v6, %v183_v14  ;;  %v454_v24 = vmul.f32 %v1330_v15, %v1519_v4 }
  0x3c   :  { %v651_v26 = vmax.f32 %v587_v16, 0.0  ;;  %v524_v27 = vadd.f32 %v1536_v12, %v453_v17  ;;  %v255_v28 = vadd.f32 %v1524_v6, %v184_v18  ;;  %v185_v29 = vmul.f32 %v1203_v19, %v1511_v1  ;;  %v1420_v18 = vld [vmem:[%s2251_s3 + $0x88] sm:$0xff]  }
  0x3d   :  { %970 = vst.msk [vmem:[%s2255_s6 + $0x58] sm:$0xf] %vm947_vm0, %v1106_v21  ;;  %v1107_v30 = vpack.c.bf16 %v650_v22, %v650_v22  ;;  %v525_v31 = vadd.f32 %v1536_v12, %v454_v24  ;;  %v1331_v32 = vunpack.c.h.bf16 %v1447_v63  ;;  %v1206_v33 = vunpack.c.l.bf16 %v1417_v20 }
  0x3e   :  { %v1108_v35 = vpack.c.bf16 %v651_v26, %v651_v26  ;;  %v588_v36 = vadd.f32 %v524_v27, %v254_v23  ;;  %v256_v37 = vadd.f32 %v1524_v6, %v185_v29  ;;  %v1334_v38 = vunpack.c.l.bf16 %v1448_v25  ;;  %v1451_v23 = vld [vmem:[%s2249_s0 + $0x88] sm:$0xff]  }
  0x3f   :  { %971 = vst.msk [vmem:[%s2255_s6 + $0x5c] sm:$0xf] %vm947_vm0, %v1107_v30  ;;  %v589_v39 = vadd.f32 %v525_v31, %v255_v28  ;;  %v455_v40 = vmul.f32 %v1331_v32, %v1519_v4  ;;  %v186_v41 = vmul.f32 %v1206_v33, %v1511_v1  ;;  %v1207_v42 = vunpack.c.h.bf16 %v1417_v20 }
  0x40   :  { %972 = vst.msk [vmem:[%s2255_s6 + $0x60] sm:$0xf] %vm947_vm0, %v1108_v35  ;;  %v652_v43 = vmax.f32 %v588_v36, 0.0  ;;  %v456_v44 = vmul.f32 %v1334_v38, %v1519_v4  ;;  %v1335_v45 = vunpack.c.h.bf16 %v1448_v25  ;;  %v1210_v46 = vunpack.c.l.bf16 %v1418_v34 }
  0x41   :  { %v653_v48 = vmax.f32 %v589_v39, 0.0  ;;  %v526_v49 = vadd.f32 %v1536_v12, %v455_v40  ;;  %v257_v50 = vadd.f32 %v1524_v6, %v186_v41  ;;  %v187_v51 = vmul.f32 %v1207_v42, %v1511_v1  ;;  %v1421_v40 = vld [vmem:[%s2251_s3 + $0x90] sm:$0xff]  }
  0x42   :  { %v1109_v52 = vpack.c.bf16 %v652_v43, %v652_v43  ;;  %v527_v53 = vadd.f32 %v1536_v12, %v456_v44  ;;  %v457_v54 = vmul.f32 %v1335_v45, %v1519_v4  ;;  %v188_v55 = vmul.f32 %v1210_v46, %v1511_v1  ;;  %v1452_v45 = vld [vmem:[%s2249_s0 + $0x90] sm:$0xff]  }
  0x43   :  { %v1110_v57 = vpack.c.bf16 %v653_v48, %v653_v48  ;;  %v590_v58 = vadd.f32 %v526_v49, %v256_v37  ;;  %v258_v59 = vadd.f32 %v1524_v6, %v187_v51  ;;  %v1338_v60 = vunpack.c.l.bf16 %v1449_v47 }
  0x44   :  { %973 = vst.msk [vmem:[%s2255_s6 + $0x64] sm:$0xf] %vm947_vm0, %v1109_v52  ;;  %v591_v62 = vadd.f32 %v527_v53, %v257_v50  ;;  %v528_v63 = vadd.f32 %v1536_v12, %v457_v54  ;;  %v259_v0 = vadd.f32 %v1524_v6, %v188_v55  ;;  %v1211_v2 = vunpack.c.h.bf16 %v1418_v34  ;;  %v1422_v54 = vld [vmem:[%s2251_s3 + $0x98] sm:$0xff]  }
  0x45   :  { %974 = vst.msk [vmem:[%s2255_s6 + $0x68] sm:$0xf] %vm947_vm0, %v1110_v57  ;;  %v654_v3 = vmax.f32 %v590_v58, 0.0  ;;  %v458_v5 = vmul.f32 %v1338_v60, %v1519_v4  ;;  %v1339_v7 = vunpack.c.h.bf16 %v1449_v47  ;;  %v1214_v8 = vunpack.c.l.bf16 %v1419_v56 }
  0x46   :  { %v655_v9 = vmax.f32 %v591_v62, 0.0  ;;  %v592_v10 = vadd.f32 %v528_v63, %v258_v59  ;;  %v189_v11 = vmul.f32 %v1211_v2, %v1511_v1  ;;  %v1342_v13 = vunpack.c.l.bf16 %v1450_v61 }
  0x47   :  { %v1111_v14 = vpack.c.bf16 %v654_v3, %v654_v3  ;;  %v529_v15 = vadd.f32 %v1536_v12, %v458_v5  ;;  %v459_v16 = vmul.f32 %v1339_v7, %v1519_v4  ;;  %v190_v17 = vmul.f32 %v1214_v8, %v1511_v1  ;;  %v1453_v5 = vld [vmem:[%s2249_s0 + $0x98] sm:$0xff]  }
  0x48   :  { %v1112_v19 = vpack.c.bf16 %v655_v9, %v655_v9  ;;  %v656_v20 = vmax.f32 %v592_v10, 0.0  ;;  %v260_v21 = vadd.f32 %v1524_v6, %v189_v11  ;;  %v460_v22 = vmul.f32 %v1342_v13, %v1519_v4 }
  0x49   :  { %975 = vst.msk [vmem:[%s2255_s6 + $0x6c] sm:$0xf] %vm947_vm0, %v1111_v14  ;;  %v593_v24 = vadd.f32 %v529_v15, %v259_v0  ;;  %v530_v25 = vadd.f32 %v1536_v12, %v459_v16  ;;  %v261_v26 = vadd.f32 %v1524_v6, %v190_v17  ;;  %v1215_v27 = vunpack.c.h.bf16 %v1419_v56  ;;  %v1423_v16 = vld [vmem:[%s2251_s3 + $0xa0] sm:$0xff]  }
  0x4a   :  { %976 = vst.msk [vmem:[%s2255_s6 + $0x70] sm:$0xf] %vm947_vm0, %v1112_v19  ;;  %v1113_v28 = vpack.c.bf16 %v656_v20, %v656_v20  ;;  %v531_v29 = vadd.f32 %v1536_v12, %v460_v22  ;;  %v1343_v30 = vunpack.c.h.bf16 %v1450_v61  ;;  %v1218_v31 = vunpack.c.l.bf16 %v1420_v18 }
  0x4b   :  { %v657_v32 = vmax.f32 %v593_v24, 0.0  ;;  %v594_v33 = vadd.f32 %v530_v25, %v260_v21  ;;  %v191_v34 = vmul.f32 %v1215_v27, %v1511_v1  ;;  %v1346_v35 = vunpack.c.l.bf16 %v1451_v23  ;;  %v1454_v21 = vld [vmem:[%s2249_s0 + $0xa0] sm:$0xff]  }
  0x4c   :  { %977 = vst.msk [vmem:[%s2255_s6 + $0x74] sm:$0xf] %vm947_vm0, %v1113_v28  ;;  %v595_v36 = vadd.f32 %v531_v29, %v261_v26  ;;  %v461_v37 = vmul.f32 %v1343_v30, %v1519_v4  ;;  %v192_v38 = vmul.f32 %v1218_v31, %v1511_v1  ;;  %v1219_v39 = vunpack.c.h.bf16 %v1420_v18 }
  0x4d   :  { %v1114_v41 = vpack.c.bf16 %v657_v32, %v657_v32  ;;  %v658_v42 = vmax.f32 %v594_v33, 0.0  ;;  %v262_v43 = vadd.f32 %v1524_v6, %v191_v34  ;;  %v462_v44 = vmul.f32 %v1346_v35, %v1519_v4 }
  0x4e   :  { %v659_v46 = vmax.f32 %v595_v36, 0.0  ;;  %v532_v47 = vadd.f32 %v1536_v12, %v461_v37  ;;  %v263_v48 = vadd.f32 %v1524_v6, %v192_v38  ;;  %v193_v49 = vmul.f32 %v1219_v39, %v1511_v1  ;;  %v1424_v38 = vld [vmem:[%s2251_s3 + $0xa8] sm:$0xff]  }
  0x4f   :  { %978 = vst.msk [vmem:[%s2255_s6 + $0x78] sm:$0xf] %vm947_vm0, %v1114_v41  ;;  %v1115_v50 = vpack.c.bf16 %v658_v42, %v658_v42  ;;  %v533_v51 = vadd.f32 %v1536_v12, %v462_v44  ;;  %v1347_v52 = vunpack.c.h.bf16 %v1451_v23  ;;  %v1222_v53 = vunpack.c.l.bf16 %v1421_v40 }
  0x50   :  { %v1116_v55 = vpack.c.bf16 %v659_v46, %v659_v46  ;;  %v596_v56 = vadd.f32 %v532_v47, %v262_v43  ;;  %v264_v57 = vadd.f32 %v1524_v6, %v193_v49  ;;  %v1350_v58 = vunpack.c.l.bf16 %v1452_v45  ;;  %v1455_v43 = vld [vmem:[%s2249_s0 + $0xa8] sm:$0xff]  }
  0x51   :  { %979 = vst.msk [vmem:[%s2255_s6 + $0x7c] sm:$0xf] %vm947_vm0, %v1115_v50  ;;  %v597_v59 = vadd.f32 %v533_v51, %v263_v48  ;;  %v463_v60 = vmul.f32 %v1347_v52, %v1519_v4  ;;  %v194_v61 = vmul.f32 %v1222_v53, %v1511_v1  ;;  %v1223_v62 = vunpack.c.h.bf16 %v1421_v40 }
  0x52   :  { %980 = vst.msk [vmem:[%s2255_s6 + $0x80] sm:$0xf] %vm947_vm0, %v1116_v55  ;;  %v660_v63 = vmax.f32 %v596_v56, 0.0  ;;  %v464_v0 = vmul.f32 %v1350_v58, %v1519_v4  ;;  %v1351_v2 = vunpack.c.h.bf16 %v1452_v45  ;;  %v1226_v3 = vunpack.c.l.bf16 %v1422_v54 }
  0x53   :  { %v661_v7 = vmax.f32 %v597_v59, 0.0  ;;  %v534_v8 = vadd.f32 %v1536_v12, %v463_v60  ;;  %v265_v9 = vadd.f32 %v1524_v6, %v194_v61  ;;  %v195_v10 = vmul.f32 %v1223_v62, %v1511_v1  ;;  %v1425_v60 = vld [vmem:[%s2251_s3 + $0xb0] sm:$0xff]  }
  0x54   :  { %v1117_v11 = vpack.c.bf16 %v660_v63, %v660_v63  ;;  %v535_v13 = vadd.f32 %v1536_v12, %v464_v0  ;;  %v465_v14 = vmul.f32 %v1351_v2, %v1519_v4  ;;  %v196_v15 = vmul.f32 %v1226_v3, %v1511_v1  ;;  %v1456_v2 = vld [vmem:[%s2249_s0 + $0xb0] sm:$0xff]  }
  0x55   :  { %v1118_v17 = vpack.c.bf16 %v661_v7, %v661_v7  ;;  %v598_v18 = vadd.f32 %v534_v8, %v264_v57  ;;  %v266_v19 = vadd.f32 %v1524_v6, %v195_v10  ;;  %v1354_v20 = vunpack.c.l.bf16 %v1453_v5 }
  0x56   :  { %981 = vst.msk [vmem:[%s2255_s6 + $0x84] sm:$0xf] %vm947_vm0, %v1117_v11  ;;  %v599_v22 = vadd.f32 %v535_v13, %v265_v9  ;;  %v536_v23 = vadd.f32 %v1536_v12, %v465_v14  ;;  %v267_v24 = vadd.f32 %v1524_v6, %v196_v15  ;;  %v1227_v25 = vunpack.c.h.bf16 %v1422_v54  ;;  %v1426_v14 = vld [vmem:[%s2251_s3 + $0xb8] sm:$0xff]  }
  0x57   :  { %982 = vst.msk [vmem:[%s2255_s6 + $0x88] sm:$0xf] %vm947_vm0, %v1118_v17  ;;  %v662_v26 = vmax.f32 %v598_v18, 0.0  ;;  %v466_v27 = vmul.f32 %v1354_v20, %v1519_v4  ;;  %v1355_v28 = vunpack.c.h.bf16 %v1453_v5  ;;  %v1230_v29 = vunpack.c.l.bf16 %v1423_v16 }
  0x58   :  { %v663_v30 = vmax.f32 %v599_v22, 0.0  ;;  %v600_v31 = vadd.f32 %v536_v23, %v266_v19  ;;  %v197_v32 = vmul.f32 %v1227_v25, %v1511_v1  ;;  %v1358_v33 = vunpack.c.l.bf16 %v1454_v21 }
  0x59   :  { %v1119_v34 = vpack.c.bf16 %v662_v26, %v662_v26  ;;  %v537_v35 = vadd.f32 %v1536_v12, %v466_v27  ;;  %v467_v36 = vmul.f32 %v1355_v28, %v1519_v4  ;;  %v198_v37 = vmul.f32 %v1230_v29, %v1511_v1  ;;  %v1457_v27 = vld [vmem:[%s2249_s0 + $0xb8] sm:$0xff]  }
  0x5a   :  { %v1120_v39 = vpack.c.bf16 %v663_v30, %v663_v30  ;;  %v664_v40 = vmax.f32 %v600_v31, 0.0  ;;  %v268_v41 = vadd.f32 %v1524_v6, %v197_v32  ;;  %v468_v42 = vmul.f32 %v1358_v33, %v1519_v4 }
  0x5b   :  { %983 = vst.msk [vmem:[%s2255_s6 + $0x8c] sm:$0xf] %vm947_vm0, %v1119_v34  ;;  %v601_v44 = vadd.f32 %v537_v35, %v267_v24  ;;  %v538_v45 = vadd.f32 %v1536_v12, %v467_v36  ;;  %v269_v46 = vadd.f32 %v1524_v6, %v198_v37  ;;  %v1231_v47 = vunpack.c.h.bf16 %v1423_v16  ;;  %v1427_v36 = vld [vmem:[%s2251_s3 + $0xc0] sm:$0xff]  }
  0x5c   :  { %984 = vst.msk [vmem:[%s2255_s6 + $0x90] sm:$0xf] %vm947_vm0, %v1120_v39  ;;  %v1121_v48 = vpack.c.bf16 %v664_v40, %v664_v40  ;;  %v539_v49 = vadd.f32 %v1536_v12, %v468_v42  ;;  %v1359_v50 = vunpack.c.h.bf16 %v1454_v21  ;;  %v1234_v51 = vunpack.c.l.bf16 %v1424_v38 }
  0x5d   :  { %v665_v52 = vmax.f32 %v601_v44, 0.0  ;;  %v602_v53 = vadd.f32 %v538_v45, %v268_v41  ;;  %v199_v54 = vmul.f32 %v1231_v47, %v1511_v1  ;;  %v1362_v55 = vunpack.c.l.bf16 %v1455_v43  ;;  %v1458_v41 = vld [vmem:[%s2249_s0 + $0xc0] sm:$0xff]  }
  0x5e   :  { %985 = vst.msk [vmem:[%s2255_s6 + $0x94] sm:$0xf] %vm947_vm0, %v1121_v48  ;;  %v603_v56 = vadd.f32 %v539_v49, %v269_v46  ;;  %v469_v57 = vmul.f32 %v1359_v50, %v1519_v4  ;;  %v200_v58 = vmul.f32 %v1234_v51, %v1511_v1  ;;  %v1235_v59 = vunpack.c.h.bf16 %v1424_v38  ;;  %v2037_v51 = vld [vmem:[%s2252_s4] ss:$0 sm:$0xff] }
  0x5f   :  { %v1122_v61 = vpack.c.bf16 %v665_v52, %v665_v52  ;;  %v666_v62 = vmax.f32 %v602_v53, 0.0  ;;  %v270_v63 = vadd.f32 %v1524_v6, %v199_v54  ;;  %v470_v0 = vmul.f32 %v1362_v55, %v1519_v4  ;;  %v2044_v55 = vld [vmem:[%s2250_s1] ss:$0 sm:$0xff] }
  0x60   :  { %v667_v3 = vmax.f32 %v603_v56, 0.0  ;;  %v540_v5 = vadd.f32 %v1536_v12, %v469_v57  ;;  %v271_v7 = vadd.f32 %v1524_v6, %v200_v58  ;;  %v201_v8 = vmul.f32 %v1235_v59, %v1511_v1  ;;  %v1428_v57 = vld [vmem:[%s2251_s3 + $0xc8] sm:$0xff]  }
  0x61   :  { %986 = vst.msk [vmem:[%s2255_s6 + $0x98] sm:$0xf] %vm947_vm0, %v1122_v61  ;;  %v1123_v9 = vpack.c.bf16 %v666_v62, %v666_v62  ;;  %v541_v10 = vadd.f32 %v1536_v12, %v470_v0  ;;  %v1363_v11 = vunpack.c.h.bf16 %v1455_v43  ;;  %v1238_v13 = vunpack.c.l.bf16 %v1425_v60  ;;  %v1459_v62 = vld [vmem:[%s2249_s0 + $0xc8] sm:$0xff]   ;;  %v2068_v0 = vld [vmem:[%s2254_s2] ss:$0 sm:$0xff] }
  0x62   :  { %v1124_v15 = vpack.c.bf16 %v667_v3, %v667_v3  ;;  %v604_v16 = vadd.f32 %v540_v5, %v270_v63  ;;  %v272_v17 = vadd.f32 %v1524_v6, %v201_v8  ;;  %v1366_v18 = vunpack.c.l.bf16 %v1456_v2 }
  0x63   :  { %987 = vst.msk [vmem:[%s2255_s6 + $0x9c] sm:$0xf] %vm947_vm0, %v1123_v9  ;;  %v605_v19 = vadd.f32 %v541_v10, %v271_v7  ;;  %v471_v20 = vmul.f32 %v1363_v11, %v1519_v4  ;;  %v202_v21 = vmul.f32 %v1238_v13, %v1511_v1  ;;  %v1239_v22 = vunpack.c.h.bf16 %v1425_v60  ;;  %v2054_v60 = vld [vmem:[%s2253_s5] ss:$0 sm:$0xff] }
  0x64   :  { %988 = vst.msk [vmem:[%s2255_s6 + $0xa0] sm:$0xf] %vm947_vm0, %v1124_v15  ;;  %v668_v23 = vmax.f32 %v604_v16, 0.0  ;;  %v472_v24 = vmul.f32 %v1366_v18, %v1519_v4  ;;  %v1367_v25 = vunpack.c.h.bf16 %v1456_v2  ;;  %v1242_v26 = vunpack.c.l.bf16 %v1426_v14 }
  0x65   :  { %v669_v28 = vmax.f32 %v605_v19, 0.0  ;;  %v542_v29 = vadd.f32 %v1536_v12, %v471_v20  ;;  %v273_v30 = vadd.f32 %v1524_v6, %v202_v21  ;;  %v203_v31 = vmul.f32 %v1239_v22, %v1511_v1  ;;  %v1429_v20 = vld [vmem:[%s2251_s3 + $0xd0] sm:$0xff]  }
  0x66   :  { %v1125_v32 = vpack.c.bf16 %v668_v23, %v668_v23  ;;  %v543_v33 = vadd.f32 %v1536_v12, %v472_v24  ;;  %v473_v34 = vmul.f32 %v1367_v25, %v1519_v4  ;;  %v204_v35 = vmul.f32 %v1242_v26, %v1511_v1  ;;  %v1460_v25 = vld [vmem:[%s2249_s0 + $0xd0] sm:$0xff]  }
  0x67   :  { %v1126_v37 = vpack.c.bf16 %v669_v28, %v669_v28  ;;  %v606_v38 = vadd.f32 %v542_v29, %v272_v17  ;;  %v274_v39 = vadd.f32 %v1524_v6, %v203_v31  ;;  %v1370_v40 = vunpack.c.l.bf16 %v1457_v27 }
  0x68   :  { %989 = vst.msk [vmem:[%s2255_s6 + $0xa4] sm:$0xf] %vm947_vm0, %v1125_v32  ;;  %v607_v42 = vadd.f32 %v543_v33, %v273_v30  ;;  %v544_v1 = vadd.f32 %v1536_v12, %v473_v34  ;;  %v275_v43 = vadd.f32 %v1524_v6, %v204_v35  ;;  %v1243_v44 = vunpack.c.h.bf16 %v1426_v14  ;;  %v1430_v34 = vld [vmem:[%s2251_s3 + $0xd8] sm:$0xff]  }
  0x69   :  { %990 = vst.msk [vmem:[%s2255_s6 + $0xa8] sm:$0xf] %vm947_vm0, %v1126_v37  ;;  %v670_v45 = vmax.f32 %v606_v38, 0.0  ;;  %v474_v46 = vmul.f32 %v1370_v40, %v1519_v4  ;;  %v1371_v47 = vunpack.c.h.bf16 %v1457_v27  ;;  %v1246_v48 = vunpack.c.l.bf16 %v1427_v36 }
  0x6a   :  { %v671_v49 = vmax.f32 %v607_v42, 0.0  ;;  %v608_v50 = vadd.f32 %v544_v1, %v274_v39  ;;  %v205_v6 = vmul.f32 %v2037_v51, %v1243_v44  ;;  %v1374_v52 = vunpack.c.l.bf16 %v1458_v41 }
  0x6b   :  { %v1127_v53 = vpack.c.bf16 %v670_v45, %v670_v45  ;;  %v545_v54 = vadd.f32 %v1536_v12, %v474_v46  ;;  %v475_v4 = vmul.f32 %v2044_v55, %v1371_v47  ;;  %v206_v56 = vmul.f32 %v2037_v51, %v1246_v48  ;;  %v1461_v46 = vld [vmem:[%s2249_s0 + $0xd8] sm:$0xff]  }
  0x6c   :  { %v1128_v58 = vpack.c.bf16 %v671_v49, %v671_v49  ;;  %v672_v59 = vmax.f32 %v608_v50, 0.0  ;;  %v276_v12 = vadd.f32 %v2054_v60, %v205_v6  ;;  %v476_v61 = vmul.f32 %v2044_v55, %v1374_v52 }
  0x6d   :  { %991 = vst.msk [vmem:[%s2255_s6 + $0xac] sm:$0xf] %vm947_vm0, %v1127_v53  ;;  %v609_v63 = vadd.f32 %v545_v54, %v275_v43  ;;  %v546_v2 = vadd.f32 %v2068_v0, %v475_v4  ;;  %v277_v3 = vadd.f32 %v2054_v60, %v206_v56  ;;  %v1247_v5 = vunpack.c.h.bf16 %v1427_v36  ;;  %v1431_v4 = vld [vmem:[%s2251_s3 + $0xe0] sm:$0xff]  }
  0x6e   :  { %992 = vst.msk [vmem:[%s2255_s6 + $0xb0] sm:$0xf] %vm947_vm0, %v1128_v58  ;;  %v1129_v7 = vpack.c.bf16 %v672_v59, %v672_v59  ;;  %v547_v8 = vadd.f32 %v2068_v0, %v476_v61  ;;  %v1375_v9 = vunpack.c.h.bf16 %v1458_v41  ;;  %v1250_v10 = vunpack.c.l.bf16 %v1428_v57 }
  0x6f   :  { %v673_v11 = vmax.f32 %v609_v63, 0.0  ;;  %v610_v13 = vadd.f32 %v546_v2, %v276_v12  ;;  %v207_v14 = vmul.f32 %v2037_v51, %v1247_v5  ;;  %v1378_v15 = vunpack.c.l.bf16 %v1459_v62  ;;  %v1462_v12 = vld [vmem:[%s2249_s0 + $0xe0] sm:$0xff]  }
  0x70   :  { %993 = vst.msk [vmem:[%s2255_s6 + $0xb4] sm:$0xf] %vm947_vm0, %v1129_v7  ;;  %v611_v16 = vadd.f32 %v547_v8, %v277_v3  ;;  %v477_v17 = vmul.f32 %v2044_v55, %v1375_v9  ;;  %v208_v18 = vmul.f32 %v2037_v51, %v1250_v10  ;;  %v1251_v19 = vunpack.c.h.bf16 %v1428_v57 }
  0x71   :  { %v1130_v21 = vpack.c.bf16 %v673_v11, %v673_v11  ;;  %v674_v22 = vmax.f32 %v610_v13, 0.0  ;;  %v278_v23 = vadd.f32 %v2054_v60, %v207_v14  ;;  %v478_v24 = vmul.f32 %v2044_v55, %v1378_v15 }
  0x72   :  { %v675_v26 = vmax.f32 %v611_v16, 0.0  ;;  %v548_v27 = vadd.f32 %v2068_v0, %v477_v17  ;;  %v279_v28 = vadd.f32 %v2054_v60, %v208_v18  ;;  %v209_v29 = vmul.f32 %v2037_v51, %v1251_v19  ;;  %v1432_v18 = vld [vmem:[%s2251_s3 + $0xe8] sm:$0xff]  }
  0x73   :  { %994 = vst.msk [vmem:[%s2255_s6 + $0xb8] sm:$0xf] %vm947_vm0, %v1130_v21  ;;  %v1131_v30 = vpack.c.bf16 %v674_v22, %v674_v22  ;;  %v549_v31 = vadd.f32 %v2068_v0, %v478_v24  ;;  %v1379_v32 = vunpack.c.h.bf16 %v1459_v62  ;;  %v1254_v33 = vunpack.c.l.bf16 %v1429_v20 }
  0x74   :  { %v1132_v35 = vpack.c.bf16 %v675_v26, %v675_v26  ;;  %v612_v36 = vadd.f32 %v548_v27, %v278_v23  ;;  %v280_v37 = vadd.f32 %v2054_v60, %v209_v29  ;;  %v1382_v38 = vunpack.c.l.bf16 %v1460_v25  ;;  %v1463_v23 = vld [vmem:[%s2249_s0 + $0xe8] sm:$0xff]  }
  0x75   :  { %995 = vst.msk [vmem:[%s2255_s6 + $0xbc] sm:$0xf] %vm947_vm0, %v1131_v30  ;;  %v613_v39 = vadd.f32 %v549_v31, %v279_v28  ;;  %v479_v40 = vmul.f32 %v2044_v55, %v1379_v32  ;;  %v210_v41 = vmul.f32 %v2037_v51, %v1254_v33  ;;  %v1255_v42 = vunpack.c.h.bf16 %v1429_v20 }
  0x76   :  { %996 = vst.msk [vmem:[%s2255_s6 + $0xc0] sm:$0xf] %vm947_vm0, %v1132_v35  ;;  %v676_v1 = vmax.f32 %v612_v36, 0.0  ;;  %v480_v43 = vmul.f32 %v2044_v55, %v1382_v38  ;;  %v1383_v44 = vunpack.c.h.bf16 %v1460_v25  ;;  %v1258_v45 = vunpack.c.l.bf16 %v1430_v34 }
  0x77   :  { %v677_v47 = vmax.f32 %v613_v39, 0.0  ;;  %v550_v48 = vadd.f32 %v2068_v0, %v479_v40  ;;  %v281_v49 = vadd.f32 %v2054_v60, %v210_v41  ;;  %v211_v50 = vmul.f32 %v2037_v51, %v1255_v42  ;;  %v1433_v40 = vld [vmem:[%s2251_s3 + $0xf0] sm:$0xff]  }
  0x78   :  { %v1133_v6 = vpack.c.bf16 %v676_v1, %v676_v1  ;;  %v551_v52 = vadd.f32 %v2068_v0, %v480_v43  ;;  %v481_v53 = vmul.f32 %v2044_v55, %v1383_v44  ;;  %v212_v54 = vmul.f32 %v2037_v51, %v1258_v45  ;;  %v1464_v44 = vld [vmem:[%s2249_s0 + $0xf0] sm:$0xff]  }
  0x79   :  { %v1134_v56 = vpack.c.bf16 %v677_v47, %v677_v47  ;;  %v614_v57 = vadd.f32 %v550_v48, %v280_v37  ;;  %v282_v58 = vadd.f32 %v2054_v60, %v211_v50  ;;  %v1386_v59 = vunpack.c.l.bf16 %v1461_v46 }
  0x7a   :  { %997 = vst.msk [vmem:[%s2255_s6 + $0xc4] sm:$0xf] %vm947_vm0, %v1133_v6  ;;  %v615_v61 = vadd.f32 %v551_v52, %v281_v49  ;;  %v552_v62 = vadd.f32 %v2068_v0, %v481_v53  ;;  %v283_v63 = vadd.f32 %v2054_v60, %v212_v54  ;;  %v1259_v2 = vunpack.c.h.bf16 %v1430_v34  ;;  %v1434_v53 = vld [vmem:[%s2251_s3 + $0xf8] sm:$0xff]  }
  0x7b   :  { %998 = vst.msk [vmem:[%s2255_s6 + $0xc8] sm:$0xf] %vm947_vm0, %v1134_v56  ;;  %v678_v3 = vmax.f32 %v614_v57, 0.0  ;;  %v482_v5 = vmul.f32 %v2044_v55, %v1386_v59  ;;  %v1387_v7 = vunpack.c.h.bf16 %v1461_v46  ;;  %v1262_v8 = vunpack.c.l.bf16 %v1431_v4 }
  0x7c   :  { %v679_v9 = vmax.f32 %v615_v61, 0.0  ;;  %v616_v10 = vadd.f32 %v552_v62, %v282_v58  ;;  %v213_v11 = vmul.f32 %v2037_v51, %v1259_v2  ;;  %v1390_v13 = vunpack.c.l.bf16 %v1462_v12 }
  0x7d   :  { %v1135_v14 = vpack.c.bf16 %v678_v3, %v678_v3  ;;  %v553_v15 = vadd.f32 %v2068_v0, %v482_v5  ;;  %v483_v16 = vmul.f32 %v2044_v55, %v1387_v7  ;;  %v214_v17 = vmul.f32 %v2037_v51, %v1262_v8  ;;  %v1465_v5 = vld [vmem:[%s2249_s0 + $0xf8] sm:$0xff]  }
  0x7e   :  { %v1136_v19 = vpack.c.bf16 %v679_v9, %v679_v9  ;;  %v680_v20 = vmax.f32 %v616_v10, 0.0  ;;  %v284_v21 = vadd.f32 %v2054_v60, %v213_v11  ;;  %v484_v22 = vmul.f32 %v2044_v55, %v1390_v13 }
  0x7f   :  { %999 = vst.msk [vmem:[%s2255_s6 + $0xcc] sm:$0xf] %vm947_vm0, %v1135_v14  ;;  %v617_v24 = vadd.f32 %v553_v15, %v283_v63  ;;  %v554_v25 = vadd.f32 %v2068_v0, %v483_v16  ;;  %v285_v26 = vadd.f32 %v2054_v60, %v214_v17  ;;  %v1263_v27 = vunpack.c.h.bf16 %v1431_v4 }
  0x80   :  { %1000 = vst.msk [vmem:[%s2255_s6 + $0xd0] sm:$0xf] %vm947_vm0, %v1136_v19  ;;  %v1137_v28 = vpack.c.bf16 %v680_v20, %v680_v20  ;;  %v555_v29 = vadd.f32 %v2068_v0, %v484_v22  ;;  %v1391_v30 = vunpack.c.h.bf16 %v1462_v12  ;;  %v1266_v31 = vunpack.c.l.bf16 %v1432_v18 }
  0x81   :  { %v681_v32 = vmax.f32 %v617_v24, 0.0  ;;  %v618_v33 = vadd.f32 %v554_v25, %v284_v21  ;;  %v215_v34 = vmul.f32 %v2037_v51, %v1263_v27  ;;  %v1394_v35 = vunpack.c.l.bf16 %v1463_v23 }
  0x82   :  { %1001 = vst.msk [vmem:[%s2255_s6 + $0xd4] sm:$0xf] %vm947_vm0, %v1137_v28  ;;  %v619_v36 = vadd.f32 %v555_v29, %v285_v26  ;;  %v485_v37 = vmul.f32 %v2044_v55, %v1391_v30  ;;  %v216_v38 = vmul.f32 %v2037_v51, %v1266_v31  ;;  %v1267_v39 = vunpack.c.h.bf16 %v1432_v18 }
  0x83   :  { %v1138_v41 = vpack.c.bf16 %v681_v32, %v681_v32  ;;  %v682_v42 = vmax.f32 %v618_v33, 0.0  ;;  %v286_v1 = vadd.f32 %v2054_v60, %v215_v34  ;;  %v486_v43 = vmul.f32 %v2044_v55, %v1394_v35 }
  0x84   :  { %v683_v45 = vmax.f32 %v619_v36, 0.0  ;;  %v556_v46 = vadd.f32 %v2068_v0, %v485_v37  ;;  %v287_v47 = vadd.f32 %v2054_v60, %v216_v38  ;;  %v217_v48 = vmul.f32 %v2037_v51, %v1267_v39 }
  0x85   :  { %1002 = vst.msk [vmem:[%s2255_s6 + $0xd8] sm:$0xf] %vm947_vm0, %v1138_v41  ;;  %v1139_v49 = vpack.c.bf16 %v682_v42, %v682_v42  ;;  %v557_v50 = vadd.f32 %v2068_v0, %v486_v43  ;;  %v1395_v6 = vunpack.c.h.bf16 %v1463_v23  ;;  %v1270_v52 = vunpack.c.l.bf16 %v1433_v40 }
  0x86   :  { %v1140_v54 = vpack.c.bf16 %v683_v45, %v683_v45  ;;  %v620_v4 = vadd.f32 %v556_v46, %v286_v1  ;;  %v288_v56 = vadd.f32 %v2054_v60, %v217_v48  ;;  %v1398_v57 = vunpack.c.l.bf16 %v1464_v44 }
  0x87   :  { %1003 = vst.msk [vmem:[%s2255_s6 + $0xdc] sm:$0xf] %vm947_vm0, %v1139_v49  ;;  %v621_v58 = vadd.f32 %v557_v50, %v287_v47  ;;  %v487_v59 = vmul.f32 %v2044_v55, %v1395_v6  ;;  %v218_v12 = vmul.f32 %v2037_v51, %v1270_v52  ;;  %v1271_v61 = vunpack.c.h.bf16 %v1433_v40 }
  0x88   :  { %1004 = vst.msk [vmem:[%s2255_s6 + $0xe0] sm:$0xf] %vm947_vm0, %v1140_v54  ;;  %v684_v62 = vmax.f32 %v620_v4, 0.0  ;;  %v488_v63 = vmul.f32 %v2044_v55, %v1398_v57  ;;  %v1399_v2 = vunpack.c.h.bf16 %v1464_v44  ;;  %v1274_v3 = vunpack.c.l.bf16 %v1434_v53 }
  0x89   :  { %v685_v7 = vmax.f32 %v621_v58, 0.0  ;;  %v558_v8 = vadd.f32 %v2068_v0, %v487_v59  ;;  %v289_v9 = vadd.f32 %v2054_v60, %v218_v12  ;;  %v219_v10 = vmul.f32 %v2037_v51, %v1271_v61 }
  0x8a   :  { %v1141_v11 = vpack.c.bf16 %v684_v62, %v684_v62  ;;  %v559_v13 = vadd.f32 %v2068_v0, %v488_v63  ;;  %v489_v14 = vmul.f32 %v2044_v55, %v1399_v2  ;;  %v220_v15 = vmul.f32 %v2037_v51, %v1274_v3 }
  0x8b   :  { %v1142_v16 = vpack.c.bf16 %v685_v7, %v685_v7  ;;  %v622_v17 = vadd.f32 %v558_v8, %v288_v56  ;;  %v290_v18 = vadd.f32 %v2054_v60, %v219_v10  ;;  %v1402_v19 = vunpack.c.l.bf16 %v1465_v5 }
  0x8c   :  { %1005 = vst.msk [vmem:[%s2255_s6 + $0xe4] sm:$0xf] %vm947_vm0, %v1141_v11  ;;  %v623_v20 = vadd.f32 %v559_v13, %v289_v9  ;;  %v560_v21 = vadd.f32 %v2068_v0, %v489_v14  ;;  %v1275_v22 = vunpack.c.h.bf16 %v1434_v53  ;;  %v291_v24 = vadd.f32 %v2054_v60, %v220_v15 }
  0x8d   :  { %1006 = vst.msk [vmem:[%s2255_s6 + $0xe8] sm:$0xf] %vm947_vm0, %v1142_v16  ;;  %v686_v23 = vmax.f32 %v622_v17, 0.0  ;;  %v490_v25 = vmul.f32 %v2044_v55, %v1402_v19  ;;  %v1403_v26 = vunpack.c.h.bf16 %v1465_v5 }
  0x8e   :  { %v687_v27 = vmax.f32 %v623_v20, 0.0  ;;  %v624_v28 = vadd.f32 %v560_v21, %v290_v18  ;;  %v221_v29 = vmul.f32 %v2037_v51, %v1275_v22 }
  0x8f   :  { %v1143_v30 = vpack.c.bf16 %v686_v23, %v686_v23  ;;  %v561_v31 = vadd.f32 %v2068_v0, %v490_v25  ;;  %v491_v32 = vmul.f32 %v2044_v55, %v1403_v26 }
  0x90   :  { %v1144_v33 = vpack.c.bf16 %v687_v27, %v687_v27  ;;  %v688_v34 = vmax.f32 %v624_v28, 0.0  ;;  %v292_v35 = vadd.f32 %v2054_v60, %v221_v29 }
  0x91   :  { %1007 = vst.msk [vmem:[%s2255_s6 + $0xec] sm:$0xf] %vm947_vm0, %v1143_v30  ;;  %v625_v36 = vadd.f32 %v561_v31, %v291_v24  ;;  %v562_v37 = vadd.f32 %v2068_v0, %v491_v32 }
  0x92   :  { %1008 = vst.msk [vmem:[%s2255_s6 + $0xf0] sm:$0xf] %vm947_vm0, %v1144_v33  ;;  %v1145_v51 = vpack.c.bf16 %v688_v34, %v688_v34 }
  0x93   :  { %v689_v38 = vmax.f32 %v625_v36, 0.0  ;;  %v626_v55 = vadd.f32 %v562_v37, %v292_v35 }
  0x94   :  { %1009 = vst.msk [vmem:[%s2255_s6 + $0xf4] sm:$0xf] %vm947_vm0, %v1145_v51 }
  0x95   :  { %v1146_v60 = vpack.c.bf16 %v689_v38, %v689_v38  ;;  %v690_v39 = vmax.f32 %v626_v55, 0.0 }
  0x97   :  { %1010 = vst.msk [vmem:[%s2255_s6 + $0xf8] sm:$0xf] %vm947_vm0, %v1146_v60  ;;  %v1147_v0 = vpack.c.bf16 %v690_v39, %v690_v39 }
  0x99   :  { %1011 = vst.msk [vmem:[%s2255_s6 + $0xfc] sm:$0xf] %vm947_vm0, %v1147_v0 }

// kernel: bottleneck_forward.5
= control target key start
LH: loop header
LB: loop body
LE: loop exit
PB: predicated region body
PF: predicated region fallthrough
CT: control target
= control target key end

     0   :  { %s3942_s18 = smov 0   ;;  %s5763_s0 = inlined_call_operand.vmem [shape: bf16[2,16,16,4], index: 0, kind: input, shape index: {}]   ;;  %s5764_s1 = inlined_call_operand.vmem [shape: f32[1,4], index: 1, kind: input, shape index: {}]   ;;  %s5765_s2 = inlined_call_operand.vmem [shape: f32[1,4], index: 2, kind: input, shape index: {}]   ;;  %s5766_s3 = inlined_call_operand.vmem [shape: bf16[36,4], index: 3, kind: input, shape index: {}]   ;;  %s5767_s4 = inlined_call_operand.vmem [shape: bf16[2,16,16,4], index: 4, kind: output, shape index: {0}]   ;;  %s5768_s5 = inlined_call_operand.vmem [shape: f32[2,2,4], index: 5, kind: output, shape index: {1}]  }
   0x1 LB: > { %s3507_s19 = sadd.s32 4294967295, %s3901_s18   ;;  %p3511_p0 = scmp.ge.s32.totalorder %s3901_s18, 1  ;;  %s3901_s18 = sphi %s3942_s18, %s16_s18  }
   0x2   : > { %p190_p1 = scmp.lt.s32.totalorder %s3901_s18, 3 }
   0x4   : > { %p191_p2 = pnand %p3511_p0, %p190_p1 }
   0x6   : > { %194 = sbr.rel (%p191_p2) target bundleno = 990 (0x3de), region = 36 }
   0xb   : > { %vm237_vm0 = vcmask 27648   ;;  %v3903_v0 = vmov 0   ;;  %vm240_vm1 = vcmask 24576   ;;  %p3988_p3 = scmp.lt.s32.totalorder %s3507_s19, 1  ;;  %vm1090_vm2 = vsmask.f32 3328 }
   0xc   : > { %238 = vst.msk [vmem:[#allocation2] sm:$0xf] %vm237_vm0, %v3903_v0  ;;  %239 = vst.msk [vmem:[#allocation2 + $0x4] sm:$0xf] %vm237_vm0, %v3903_v0  ;;  %vm1091_vm3 = vsmask.f32 7440 }
   0xd   : > { %242 = vst.msk [vmem:[#allocation2 + $0xc] sm:$0xf] %vm237_vm0, %v3903_v0  ;;  %243 = vst.msk [vmem:[#allocation2 + $0x10] sm:$0xf] %vm237_vm0, %v3903_v0  ;;  %s5936_s19 = smov (!%p3988_p3, %s3507_s19), 1  ;;  %v5845_v33 = vmov 0 }
   0xe   : > { %245 = vst.msk [vmem:[#allocation2 + $0x18] sm:$0xf] %vm237_vm0, %v3903_v0  ;;  %246 = vst.msk [vmem:[#allocation2 + $0x1c] sm:$0xf] %vm237_vm0, %v3903_v0  ;;  %s3638_s21 = sshll.u32 %s5936_s19, 7  ;;  %s3904_s29 = smov 4  }
   0xf   : > { %248 = vst.msk [vmem:[#allocation2 + $0x24] sm:$0xf] %vm237_vm0, %v3903_v0  ;;  %249 = vst.msk [vmem:[#allocation2 + $0x28] sm:$0xf] %vm237_vm0, %v3903_v0  ;;  %s4022_s24 = scalar_lea.vmem %s5763_s0, %s3638_s21  ;;  %v4028_v2 = vld [vmem:[%s5764_s1] ss:$0 sm:$0xff]  ;;  %s5565_s6 = scalar_lea.vmem %s5767_s4, %s3638_s21 }
  0x10   : > { %251 = vst.msk [vmem:[#allocation2 + $0x30] sm:$0xf] %vm237_vm0, %v3903_v0  ;;  %252 = vst.msk [vmem:[#allocation2 + $0x34] sm:$0xf] %vm237_vm0, %v3903_v0  ;;  %v3705_v1 = vld [vmem:[%s4022_s24] sm:$0xff]   ;;  %v3768_v3 = vld [vmem:[%s4022_s24 + $0x8] sm:$0xff]  }
  0x11   : > { %254 = vst.msk [vmem:[#allocation2 + $0x3c] sm:$0xf] %vm237_vm0, %v3903_v0  ;;  %255 = vst.msk [vmem:[#allocation2 + $0x40] sm:$0xf] %vm237_vm0, %v3903_v0  ;;  %v3706_v6 = vunpack.c.l.bf16 %v3705_v1  ;;  %v3707_v7 = vunpack.c.h.bf16 %v3705_v1  ;;  %v4038_v8 = vld [vmem:[%s5765_s2] ss:$0 sm:$0xff]  ;;  %v3710_v9 = vunpack.c.l.bf16 %v3768_v3  ;;  %v3711_v10 = vunpack.c.h.bf16 %v3768_v3 }
  0x12   : > { %257 = vst.msk [vmem:[#allocation2 + $0x48] sm:$0xf] %vm237_vm0, %v3903_v0  ;;  %258 = vst.msk [vmem:[#allocation2 + $0x4c] sm:$0xf] %vm237_vm0, %v3903_v0  ;;  %vm563_vm4 = vsmask.f32 256 }
  0x13   : > { %260 = vst.msk [vmem:[#allocation2 + $0x54] sm:$0xf] %vm237_vm0, %v3903_v0  ;;  %261 = vst.msk [vmem:[#allocation2 + $0x58] sm:$0xf] %vm237_vm0, %v3903_v0  ;;  %v4031_v4 = vld [vmem:[#allocation2] sm:$0xf]  ;;  %v364_v17 = vmul.f32 %v3706_v6, %v4028_v2  ;;  %v365_v18 = vmul.f32 %v3707_v7, %v4028_v2  ;;  %v366_v19 = vmul.f32 %v3710_v9, %v4028_v2 }
  0x14   : > { %263 = vst.msk [vmem:[#allocation2 + $0x60] sm:$0xf] %vm237_vm0, %v3903_v0  ;;  %264 = vst.msk [vmem:[#allocation2 + $0x64] sm:$0xf] %vm237_vm0, %v3903_v0  ;;  %v4033_v5 = vld [vmem:[#allocation2 + $0x4] sm:$0xf]  ;;  %v367_v28 = vmul.f32 %v3711_v10, %v4028_v2 }
  0x15   : > { %266 = vst.msk [vmem:[#allocation2 + $0x6c] sm:$0xf] %vm237_vm0, %v3903_v0  ;;  %267 = vst.msk [vmem:[#allocation2 + $0x70] sm:$0xf] %vm237_vm0, %v3903_v0  ;;  %vm564_vm5 = vsmask.f32 4368  ;;  %v403_v26 = vadd.f32 %v4038_v8, %v364_v17  ;;  %v404_v27 = vadd.f32 %v4038_v8, %v365_v18  ;;  %v405_v31 = vadd.f32 %v4038_v8, %v366_v19 }
  0x16   : > { %269 = vst.msk [vmem:[#allocation2 + $0x78] sm:$0xf] %vm237_vm0, %v3903_v0  ;;  %270 = vst.msk [vmem:[#allocation2 + $0x7c] sm:$0xf] %vm237_vm0, %v3903_v0  ;;  %v1094_v11 = vshrl.u32 %v4031_v4, 16  ;;  %v1097_v12 = vshll.u32 %v4031_v4, 16  ;;  %v406_v36 = vadd.f32 %v4038_v8, %v367_v28 }
  0x17   : > { %272 = vst.msk [vmem:[#allocation2 + $0x84] sm:$0xf] %vm237_vm0, %v3903_v0  ;;  %273 = vst.msk [vmem:[#allocation2 + $0x88] sm:$0xf] %vm237_vm0, %v3903_v0  ;;  %v1103_v13 = vshll.u32 %v4033_v5, 16  ;;  %v1107_v15 = vshrl.u32 %v4033_v5, 16 }
  0x18   : > { %275 = vst.msk [vmem:[#allocation2 + $0x90] sm:$0xf] %vm237_vm0, %v3903_v0  ;;  %276 = vst.msk [vmem:[#allocation2 + $0x94] sm:$0xf] %vm237_vm0, %v3903_v0  ;;  %vm888_vm6 = vsmask.f32 7938 }
  0x19   : > { %278 = vst.msk [vmem:[#allocation2 + $0x9c] sm:$0xf] %vm237_vm0, %v3903_v0  ;;  %279 = vst.msk [vmem:[#allocation2 + $0xa0] sm:$0xf] %vm237_vm0, %v3903_v0  ;;  %v3769_v20 = vld [vmem:[%s4022_s24 + $0x10] sm:$0xff]   ;;  %v1096_v21 = vrot.slane %v1094_v11, 4 }
  0x1a   : > { %281 = vst.msk [vmem:[#allocation2 + $0xa8] sm:$0xf] %vm237_vm0, %v3903_v0  ;;  %282 = vst.msk [vmem:[#allocation2 + $0xac] sm:$0xf] %vm237_vm0, %v3903_v0  ;;  %v1099_v22 = vrot.slane %v1097_v12, 5  ;;  %v1105_v23 = vrot.slane %v1103_v13, 5  ;;  %v3714_v32 = vunpack.c.l.bf16 %v3769_v20  ;;  %v3715_v37 = vunpack.c.h.bf16 %v3769_v20 }
  0x1b   : > { %284 = vst.msk [vmem:[#allocation2 + $0xb4] sm:$0xf] %vm237_vm0, %v3903_v0  ;;  %285 = vst.msk [vmem:[#allocation2 + $0xb8] sm:$0xf] %vm237_vm0, %v3903_v0  ;;  %v1109_v24 = vrot.slane %v1107_v15, 4  ;;  %v435_v34 = vmax.f32 %v403_v26, 0.0 }
  0x1c   : > { %287 = vst.msk [vmem:[#allocation2 + $0xc0] sm:$0xf] %vm237_vm0, %v3903_v0  ;;  %288 = vst.msk [vmem:[#allocation2 + $0xc4] sm:$0xf] %vm237_vm0, %v3903_v0  ;;  %v1100_v29 = vor.u32 %v1099_v22, %v1096_v21  ;;  %v436_v35 = vmax.f32 %v404_v27, 0.0  ;;  %v437_v40 = vmax.f32 %v405_v31, 0.0  ;;  %v368_v41 = vmul.f32 %v3714_v32, %v4028_v2 }
  0x1d   : > { %290 = vst.msk [vmem:[#allocation2 + $0xcc] sm:$0xf] %vm237_vm0, %v3903_v0  ;;  %291 = vst.msk [vmem:[#allocation2 + $0xd0] sm:$0xf] %vm237_vm0, %v3903_v0  ;;  %v1110_v30 = vor.u32 %v1109_v24, %v1105_v23  ;;  %v3640_v42 = vpack.c.bf16 %v435_v34, %v435_v34  ;;  %v438_v44 = vmax.f32 %v406_v36, 0.0  ;;  %v369_v45 = vmul.f32 %v3715_v37, %v4028_v2  ;;  %v3770_v50 = vld [vmem:[%s4022_s24 + $0x18] sm:$0xff]  }
  0x1e   : > { %241 = vst.msk [vmem:[#allocation2 + $0x8] sm:$0x1] %vm240_vm1, %v3903_v0  ;;  %244 = vst.msk [vmem:[#allocation2 + $0x14] sm:$0x1] %vm240_vm1, %v3903_v0  ;;  %v1101_v38 = vrot.slane %v1100_v29, 4  ;;  %v3641_v43 = vpack.c.bf16 %v436_v35, %v436_v35  ;;  %v3642_v48 = vpack.c.bf16 %v437_v40, %v437_v40  ;;  %v407_v49 = vadd.f32 %v4038_v8, %v368_v41  ;;  %s3905_s9 = smov 8  }
  0x1f   : > { %247 = vst.msk [vmem:[#allocation2 + $0x20] sm:$0x1] %vm240_vm1, %v3903_v0  ;;  %250 = vst.msk [vmem:[#allocation2 + $0x2c] sm:$0x1] %vm240_vm1, %v3903_v0  ;;  %v1111_v39 = vrot.slane %v1110_v30, 4  ;;  %v567_v51 = vshrl.u32 %v3640_v42, 16  ;;  %v3643_v56 = vpack.c.bf16 %v438_v44, %v438_v44  ;;  %v408_v59 = vadd.f32 %v4038_v8, %v369_v45 }
  0x20   : > { %253 = vst.msk [vmem:[#allocation2 + $0x38] sm:$0x1] %vm240_vm1, %v3903_v0  ;;  %256 = vst.msk [vmem:[#allocation2 + $0x44] sm:$0x1] %vm240_vm1, %v3903_v0  ;;  %v570_v52 = vshll.u32 %v3640_v42, 16  ;;  %v575_v53 = vshrl.u32 %v3641_v43, 16  ;;  %v3718_v1 = vunpack.c.l.bf16 %v3770_v50  ;;  %v3719_v35 = vunpack.c.h.bf16 %v3770_v50 }
  0x21   : > { %259 = vst.msk [vmem:[#allocation2 + $0x50] sm:$0x1] %vm240_vm1, %v3903_v0  ;;  %262 = vst.msk [vmem:[#allocation2 + $0x5c] sm:$0x1] %vm240_vm1, %v3903_v0  ;;  %v578_v54 = vshll.u32 %v3641_v43, 16  ;;  %v5848_v55 = vmov 0 }
  0x22   : > { %265 = vst.msk [vmem:[#allocation2 + $0x68] sm:$0x1] %vm240_vm1, %v3903_v0  ;;  %268 = vst.msk [vmem:[#allocation2 + $0x74] sm:$0x1] %vm240_vm1, %v3903_v0  ;;  %v584_v57 = vshrl.u32 %v3642_v48, 16  ;;  %v587_v58 = vshll.u32 %v3642_v48, 16  ;;  %v371_v43 = vmul.f32 %v3719_v35, %v4028_v2 }
  0x23   : > { %271 = vst.msk [vmem:[#allocation2 + $0x80] sm:$0x1] %vm240_vm1, %v3903_v0  ;;  %274 = vst.msk [vmem:[#allocation2 + $0x8c] sm:$0x1] %vm240_vm1, %v3903_v0  ;;  %v569_v60 = vrot.slane %v567_v51, 7  ;;  %v577_v61 = vrot.slane %v575_v53, 7 }
  0x24   : > { %277 = vst.msk [vmem:[#allocation2 + $0x98] sm:$0x1] %vm240_vm1, %v3903_v0  ;;  %280 = vst.msk [vmem:[#allocation2 + $0xa4] sm:$0x1] %vm240_vm1, %v3903_v0  ;;  %v5851_v62 = vmov 0  ;;  %v586_v3 = vrot.slane %v584_v57, 7 }
  0x25   : > { %283 = vst.msk [vmem:[#allocation2 + $0xb0] sm:$0x1] %vm240_vm1, %v3903_v0  ;;  %286 = vst.msk [vmem:[#allocation2 + $0xbc] sm:$0x1] %vm240_vm1, %v3903_v0  ;;  %v1006_v14 = vld [vmem:[#allocation2 + $0x8] sm:$0x1]  ;;  %v572_v12 = vor.u32 %v570_v52, %v569_v60  ;;  %v410_v52 = vadd.f32 %v4038_v8, %v371_v43 }
  0x26   : > { %289 = vst.msk [vmem:[#allocation2 + $0xc8] sm:$0x1] %vm240_vm1, %v3903_v0  ;;  %292 = vst.msk [vmem:[#allocation2 + $0xd4] sm:$0x1] %vm240_vm1, %v3903_v0  ;;  %v1113_v16 = vshll.u32 %v1006_v14, 16  ;;  %v439_v0 = vmax.f32 %v407_v49, 0.0  ;;  %v580_v14 = vor.u32 %v578_v54, %v577_v61  ;;  %v589_v17 = vor.u32 %v587_v58, %v586_v3 }
  0x27   : > { %1058 = vst.msk [vmem:[#allocation3] sm:$0xf] %vm237_vm0, %v4031_v4  ;;  %1059 = vst.msk [vmem:[#allocation3 + $0x4] sm:$0xf] %vm237_vm0, %v4033_v5  ;;  %v890_v63 = vld [vmem:[#allocation2 + $0xc] sm:$0xf] }
  0x28   : > { %v1115_v25 = vrot.slane %v1113_v16, 5  ;;  %vm4058_vm7 = vmor %vm1090_vm2, %vm1091_vm3  ;;  %v592_v6 = vshrl.u32 %v3643_v56, 16  ;;  %v595_v7 = vshll.u32 %v3643_v56, 16  ;;  %v5854_v9 = vmov 0  ;;  %v896_v10 = vld [vmem:[#allocation2 + $0x14] sm:$0x1] }
  0x29   : > { %v5846_v33 = vsel %vm4058_vm7, 4294967295, %v5845_v33  ;;  %v1106_v46 = vsel %vm4058_vm7, %v1101_v38, %v1105_v23  ;;  %vm4074_vm8 = vmor %vm563_vm4, %vm564_vm5  ;;  %v440_v11 = vmax.f32 %v408_v59, 0.0  ;;  %v573_v13 = vrot.slane %v569_v60, 4  ;;  %v899_v15 = vld [vmem:[#allocation2 + $0x18] sm:$0xf]  ;;  %v4110_v45 = vld [vmem:[%s4022_s24 + $0x28] sm:$0xff]  }
  0x2a   : > { %5847 = vst [vmem:[#allocation4_spill] sm:$0xff] %v5846_v33  ;;  %v1116_v47 = vsel %vm4058_vm7, %v1111_v39, %v1115_v25  ;;  %1477 = vrot.lane.b32.xlu0 %v1106_v46, %s3904_s29  ;;  %v5849_v55 = vsel %vm4074_vm8, 4294967295, %v5848_v55  ;;  %vm4081_vm9 = vmand %vm237_vm0, %vm888_vm6  ;;  %v582_v16 = vrot.slane %v577_v61, 4  ;;  %v590_v18 = vrot.slane %v586_v3, 4  ;;  %v3771_v25 = vld [vmem:[%s4022_s24 + $0x20] sm:$0xff]   ;;  %s3906_s10 = smov 12  }
  0x2b   : > { %5850 = vst [vmem:[#allocation5_spill] sm:$0xff] %v5849_v55  ;;  %v5852_v62 = vsel %vm4081_vm9, 4294967295, %v5851_v62  ;;  %vm4087_vm10 = vmand %vm240_vm1, %vm563_vm4  ;;  %v594_v19 = vrot.slane %v592_v6, 7  ;;  %v3644_v20 = vpack.c.bf16 %v439_v0, %v439_v0  ;;  %v581_v21 = vsel %vm4074_vm8, %v573_v13, %v580_v14  ;;  %v903_v30 = vld [vmem:[#allocation2 + $0x20] sm:$0x1]  ;;  %s3907_s11 = smov 16  }
  0x2c   : > { %5853 = vst [vmem:[#allocation6_spill] sm:$0xff] %v5852_v62  ;;  %v5855_v9 = vsel %vm4087_vm10, 4294967295, %v5854_v9  ;;  %v891_v22 = vsel %vm4081_vm9, %v572_v12, %v890_v63  ;;  %v897_v23 = vsel %vm4087_vm10, %v582_v16, %v896_v10  ;;  %v3645_v24 = vpack.c.bf16 %v440_v11, %v440_v11  ;;  %893 = vst.msk [vmem:[#allocation2 + $0x10] sm:$0xf] %vm237_vm0, %v581_v21  ;;  %v906_v41 = vld [vmem:[#allocation2 + $0x24] sm:$0xf] }
  0x2d   : > { %5856 = vst [vmem:[#allocation7_spill] sm:$0xff] %v5855_v9  ;;  %892 = vst [vmem:[#allocation2 + $0xc] sm:$0xf] %v891_v22  ;;  %v597_v26 = vor.u32 %v595_v7, %v594_v19  ;;  %v900_v27 = vsel %vm4081_vm9, %v589_v17, %v899_v15  ;;  %v601_v28 = vshrl.u32 %v3644_v20, 16  ;;  %v604_v29 = vshll.u32 %v3644_v20, 16  ;;  %s3908_s12 = smov 20  }
  0x2e   : > { %1479 = vrot.lane.b32.xlu0 %v1116_v47, %s3904_s29  ;;  %898 = vst [vmem:[#allocation2 + $0x14] sm:$0x1] %v897_v23  ;;  %901 = vst [vmem:[#allocation2 + $0x18] sm:$0xf] %v900_v27  ;;  %v609_v31 = vshrl.u32 %v3645_v24, 16  ;;  %v612_v32 = vshll.u32 %v3645_v24, 16  ;;  %v370_v38 = vmul.f32 %v3718_v1, %v4028_v2  ;;  %v3722_v39 = vunpack.c.l.bf16 %v3771_v25 }
  0x2f   : > { %v599_v34 = vrot.slane %v594_v19, 4  ;;  %v598_v36 = vsel %vm4074_vm8, %v590_v18, %v597_v26  ;;  %v603_v37 = vrot.slane %v601_v28, 7  ;;  %v3723_v44 = vunpack.c.h.bf16 %v3771_v25  ;;  %v910_v49 = vld [vmem:[#allocation2 + $0x2c] sm:$0x1]  ;;  %s3909_s13 = smov 24   ;;  %s3910_s20 = smov 28  }
  0x30   : > { %902 = vst.msk [vmem:[#allocation2 + $0x1c] sm:$0xf] %vm237_vm0, %v598_v36  ;;  %v611_v40 = vrot.slane %v609_v31, 7  ;;  %v409_v48 = vadd.f32 %v4038_v8, %v370_v38  ;;  %v372_v50 = vmul.f32 %v3722_v39, %v4028_v2  ;;  %v3726_v59 = vunpack.c.l.bf16 %v4110_v45  ;;  %s3911_s25 = smov 32   ;;  %s3516_s21 = sshll.u32 %s5936_s19, 1 }
  0x31   : > { %v904_v42 = vsel %vm4087_vm10, %v599_v34, %v903_v30  ;;  %v606_v46 = vor.u32 %v604_v29, %v603_v37  ;;  %v607_v47 = vrot.slane %v603_v37, 4  ;;  %v373_v54 = vmul.f32 %v3723_v44, %v4028_v2 }
  0x32   : > { %905 = vst [vmem:[#allocation2 + $0x20] sm:$0x1] %v904_v42  ;;  %v614_v51 = vor.u32 %v612_v32, %v611_v40  ;;  %v616_v53 = vrot.slane %v611_v40, 4  ;;  %v441_v57 = vmax.f32 %v409_v48, 0.0  ;;  %v4119_v58 = vadd.f32 %v4038_v8, %v372_v50 }
  0x33   : > { %v907_v56 = vsel %vm4081_vm9, %v606_v46, %v906_v41  ;;  %v4124_v61 = vld [vmem:[#allocation2 + $0x10] sm:$0xf]  ;;  %v4131_v3 = vadd.f32 %v4038_v8, %v373_v54  ;;  %v3727_v6 = vunpack.c.h.bf16 %v4110_v45  ;;  %v442_v17 = vmax.f32 %v410_v52, 0.0 }
  0x34   : > { %v4122_v60 = vld [vmem:[#allocation2 + $0xc] sm:$0xf]  ;;  %v615_v0 = vsel %vm4074_vm8, %v607_v47, %v614_v51  ;;  %908 = vst [vmem:[#allocation2 + $0x24] sm:$0xf] %v907_v56  ;;  %v911_v1 = vsel %vm4087_vm10, %v616_v53, %v910_v49  ;;  %v1127_v11 = vshll.u32 %v4124_v61, 16  ;;  %v1131_v13 = vshrl.u32 %v4124_v61, 16 }
  0x35   : > { %v1009_v63 = vld [vmem:[#allocation2 + $0x14] sm:$0x1]  ;;  %v1118_v7 = vshrl.u32 %v4122_v60, 16  ;;  %v1121_v10 = vshll.u32 %v4122_v60, 16  ;;  %1060 = vst.msk [vmem:[#allocation3 + $0x8] sm:$0xf] %vm237_vm0, %v4122_v60  ;;  %v3646_v35 = vpack.c.bf16 %v441_v57, %v441_v57  ;;  %v3647_v36 = vpack.c.bf16 %v442_v17, %v442_v17 }
  0x36   : > { %1061 = vst.msk [vmem:[#allocation3 + $0xc] sm:$0xf] %vm237_vm0, %v4124_v61  ;;  %v4141_v12 = vld [vmem:[#allocation2 + $0x18] sm:$0xf]  ;;  %909 = vst.msk [vmem:[#allocation2 + $0x28] sm:$0xf] %vm237_vm0, %v615_v0 }
  0x37   : > { %912 = vst [vmem:[#allocation2 + $0x2c] sm:$0x1] %v911_v1  ;;  %v1142_v14 = vshrl.u32 %v4141_v12, 16  ;;  %v1145_v15 = vshll.u32 %v4141_v12, 16  ;;  %1062 = vst.msk [vmem:[#allocation3 + $0x10] sm:$0xf] %vm237_vm0, %v4141_v12 }
  0x38   : > { %v1137_v16 = vshll.u32 %v1009_v63, 16  ;;  %v1120_v18 = vrot.slane %v1118_v7, 4  ;;  %v1123_v19 = vrot.slane %v1121_v10, 5  ;;  %v1129_v20 = vrot.slane %v1127_v11, 5  ;;  %v4149_v21 = vld [vmem:[#allocation2 + $0x1c] sm:$0xf] }
  0x39   : > { %v1133_v22 = vrot.slane %v1131_v13, 4  ;;  %v1144_v23 = vrot.slane %v1142_v14, 4  ;;  %v1147_v24 = vrot.slane %v1145_v15, 5  ;;  %v1151_v25 = vshll.u32 %v4149_v21, 16  ;;  %1063 = vst.msk [vmem:[#allocation3 + $0x14] sm:$0xf] %vm237_vm0, %v4149_v21 }
  0x3a   : > { %v1139_v26 = vrot.slane %v1137_v16, 5  ;;  %v1012_v27 = vld [vmem:[#allocation2 + $0x20] sm:$0x1]  ;;  %v1124_v28 = vor.u32 %v1123_v19, %v1120_v18  ;;  %v1155_v30 = vshrl.u32 %v4149_v21, 16  ;;  %v618_v47 = vshrl.u32 %v3646_v35, 16 }
  0x3b   : > { %v1134_v29 = vor.u32 %v1133_v22, %v1129_v20  ;;  %v1161_v31 = vshll.u32 %v1012_v27, 16  ;;  %v1148_v32 = vor.u32 %v1147_v24, %v1144_v23  ;;  %v1153_v34 = vrot.slane %v1151_v25, 5  ;;  %v4155_v39 = vld [vmem:[#allocation2 + $0x24] sm:$0xf]  ;;  %v913_v14 = vld [vmem:[#allocation2 + $0x30] sm:$0xf] }
  0x3c   : > { %v1125_v37 = vrot.slane %v1124_v28, 4  ;;  %v1157_v40 = vrot.slane %v1155_v30, 4  ;;  %v1166_v44 = vshrl.u32 %v4155_v39, 16  ;;  %v1169_v46 = vshll.u32 %v4155_v39, 16  ;;  %1064 = vst.msk [vmem:[#allocation3 + $0x18] sm:$0xf] %vm237_vm0, %v4155_v39 }
  0x3d   : > { %v1135_v38 = vrot.slane %v1134_v29, 4  ;;  %v1163_v41 = vrot.slane %v1161_v31, 5  ;;  %v1149_v42 = vrot.slane %v1148_v32, 4  ;;  %v4157_v43 = vld [vmem:[#allocation2 + $0x28] sm:$0xf]  ;;  %v620_v56 = vrot.slane %v618_v47, 7 }
  0x3e   : > { %v4165_v48 = vsel %vm4058_vm7, %v1125_v37, %v1129_v20  ;;  %v1175_v50 = vshll.u32 %v4157_v43, 16  ;;  %1065 = vst.msk [vmem:[#allocation3 + $0x1c] sm:$0xf] %vm237_vm0, %v4157_v43  ;;  %v1158_v51 = vor.u32 %v1157_v40, %v1153_v34  ;;  %v1168_v53 = vrot.slane %v1166_v44, 4  ;;  %v1015_v57 = vld [vmem:[#allocation2 + $0x2c] sm:$0x1] }
  0x3f   : > { %5857 = vst [vmem:[#allocation8_spill] sm:$0xff] %v4165_v48  ;;  %v4169_v49 = vsel %vm4058_vm7, %v1135_v38, %v1139_v26  ;;  %1481 = vrot.lane.b32.xlu1 %v4165_v48, %s3904_s29  ;;  %v4178_v52 = vsel %vm4058_vm7, %v1149_v42, %v1153_v34  ;;  %v1171_v54 = vrot.slane %v1169_v46, 5  ;;  %v621_v1 = vshll.u32 %v3646_v35, 16  ;;  %v917_v25 = vld [vmem:[#allocation2 + $0x38] sm:$0x1]  ;;  %v3773_v35 = vld [vmem:[%s4022_s24 + $0x30] sm:$0xff]  }
  0x40   : > { %5858 = vst [vmem:[#allocation9_spill] sm:$0xff] %v4169_v49  ;;  %5859 = vst [vmem:[#allocation10_spill] sm:$0xff] %v4178_v52  ;;  %1485 = vrot.lane.b32.xlu0 %v4178_v52, %s3904_s29  ;;  %v1177_v63 = vrot.slane %v1175_v50, 5  ;;  %v1159_v0 = vrot.slane %v1158_v51, 4  ;;  %v626_v7 = vshrl.u32 %v3647_v36, 16  ;;  %v624_v11 = vrot.slane %v620_v56, 4 }
  0x41   : > { %v1172_v10 = vor.u32 %v1171_v54, %v1168_v53  ;;  %v629_v13 = vshll.u32 %v3647_v36, 16  ;;  %v1179_v15 = vshrl.u32 %v4157_v43, 16  ;;  %v623_v17 = vor.u32 %v621_v1, %v620_v56  ;;  %v4214_v44 = vld [vmem:[%s4022_s24 + $0x38] sm:$0xff]  }
  0x42   : > { %v4185_v16 = vsel %vm4058_vm7, %v1159_v0, %v1163_v41  ;;  %v628_v18 = vrot.slane %v626_v7, 7  ;;  %v1185_v19 = vshll.u32 %v1015_v57, 16  ;;  %v443_v23 = vmax.f32 %v4119_v58, 0.0  ;;  %v920_v54 = vld [vmem:[#allocation2 + $0x3c] sm:$0xf] }
  0x43   : > { %5860 = vst [vmem:[#allocation11_spill] sm:$0xff] %v4185_v16  ;;  %1483 = vrot.lane.b32.xlu1 %v4169_v49, %s3904_s29  ;;  %v1173_v20 = vrot.slane %v1172_v10, 4  ;;  %v1181_v22 = vrot.slane %v1179_v15, 4  ;;  %v444_v24 = vmax.f32 %v4131_v3, 0.0  ;;  %v914_v27 = vsel %vm4081_vm9, %v623_v17, %v913_v14 }
  0x44   : > { %v631_v26 = vor.u32 %v629_v13, %v628_v18  ;;  %v1187_v28 = vrot.slane %v1185_v19, 5  ;;  %v633_v29 = vrot.slane %v628_v18, 4  ;;  %915 = vst [vmem:[#allocation2 + $0x30] sm:$0xf] %v914_v27  ;;  %v3648_v32 = vpack.c.bf16 %v443_v23, %v443_v23  ;;  %v924_v13 = vld [vmem:[#allocation2 + $0x44] sm:$0x1] }
  0x45   : > { %v4195_v30 = vsel %vm4058_vm7, %v1173_v20, %v1177_v63  ;;  %v1182_v31 = vor.u32 %v1181_v22, %v1177_v63  ;;  %v3649_v34 = vpack.c.bf16 %v444_v24, %v444_v24  ;;  %v374_v36 = vmul.f32 %v3726_v59, %v4028_v2 }
  0x46   : > { %5861 = vst [vmem:[#allocation12_spill] sm:$0xff] %v4195_v30  ;;  %1489 = vrot.lane.b32.xlu0 %v4195_v30, %s3904_s29  ;;  %v632_v58 = vsel %vm4074_vm8, %v624_v11, %v631_v26  ;;  %v918_v3 = vsel %vm4087_vm10, %v633_v29, %v917_v25  ;;  %v375_v37 = vmul.f32 %v3727_v6, %v4028_v2  ;;  %v635_v40 = vshrl.u32 %v3648_v32, 16 }
  0x47   : > { %1487 = vrot.lane.b32.xlu1 %v4185_v16, %s3904_s29  ;;  %916 = vst.msk [vmem:[#allocation2 + $0x34] sm:$0xf] %vm237_vm0, %v632_v58  ;;  %v1183_v38 = vrot.slane %v1182_v31, 4  ;;  %v638_v41 = vshll.u32 %v3648_v32, 16  ;;  %v643_v42 = vshrl.u32 %v3649_v34, 16  ;;  %v646_v46 = vshll.u32 %v3649_v34, 16 }
  0x48   : > { %919 = vst [vmem:[#allocation2 + $0x38] sm:$0x1] %v918_v3  ;;  %v413_v47 = vadd.f32 %v4038_v8, %v374_v36  ;;  %v414_v59 = vadd.f32 %v4038_v8, %v375_v37  ;;  %v3730_v50 = vunpack.c.l.bf16 %v3773_v35  ;;  %v637_v6 = vrot.slane %v635_v40, 7 }
  0x49   : > { %v4220_v45 = vsel %vm4058_vm7, %v1183_v38, %v1187_v28  ;;  %v645_v51 = vrot.slane %v643_v42, 7  ;;  %v3731_v53 = vunpack.c.h.bf16 %v3773_v35  ;;  %v3734_v0 = vunpack.c.l.bf16 %v4214_v44 }
  0x4a   : > { %5862 = vst [vmem:[#allocation13_spill] sm:$0xff] %v4220_v45  ;;  %v445_v56 = vmax.f32 %v413_v47, 0.0  ;;  %v446_v57 = vmax.f32 %v414_v59, 0.0  ;;  %v376_v63 = vmul.f32 %v3730_v50, %v4028_v2  ;;  %v640_v1 = vor.u32 %v638_v41, %v637_v6 }
  0x4b   : > { %1491 = vrot.lane.b32.xlu1 %v4220_v45, %s3904_s29  ;;  %v641_v7 = vrot.slane %v637_v6, 4  ;;  %v648_v10 = vor.u32 %v646_v46, %v645_v51  ;;  %v650_v11 = vrot.slane %v645_v51, 4  ;;  %v4226_v14 = vld [vmem:[#allocation2 + $0x30] sm:$0xf]  ;;  %v377_v18 = vmul.f32 %v3731_v53, %v4028_v2  ;;  %v927_v46 = vld [vmem:[#allocation2 + $0x48] sm:$0xf] }
  0x4c   : > { %v3650_v15 = vpack.c.bf16 %v445_v56, %v445_v56  ;;  %v3651_v17 = vpack.c.bf16 %v446_v57, %v446_v57  ;;  %v415_v19 = vadd.f32 %v4038_v8, %v376_v63  ;;  %v1190_v20 = vshrl.u32 %v4226_v14, 16  ;;  %1066 = vst.msk [vmem:[#allocation3 + $0x20] sm:$0xf] %vm237_vm0, %v4226_v14 }
  0x4d   : > { %v1193_v22 = vshll.u32 %v4226_v14, 16  ;;  %v649_v23 = vsel %vm4074_vm8, %v641_v7, %v648_v10  ;;  %v921_v24 = vsel %vm4081_vm9, %v640_v1, %v920_v54  ;;  %v925_v29 = vsel %vm4087_vm10, %v650_v11, %v924_v13 }
  0x4e   : > { %v4238_v25 = vld [vmem:[#allocation2 + $0x34] sm:$0xf]  ;;  %922 = vst [vmem:[#allocation2 + $0x3c] sm:$0xf] %v921_v24  ;;  %923 = vst.msk [vmem:[#allocation2 + $0x40] sm:$0xf] %vm237_vm0, %v649_v23  ;;  %v416_v31 = vadd.f32 %v4038_v8, %v377_v18  ;;  %v3735_v10 = vunpack.c.h.bf16 %v4214_v44 }
  0x4f   : > { %v1018_v26 = vld [vmem:[#allocation2 + $0x38] sm:$0x1]  ;;  %v652_v27 = vshrl.u32 %v3650_v15, 16  ;;  %v655_v28 = vshll.u32 %v3650_v15, 16  ;;  %v1192_v32 = vrot.slane %v1190_v20, 4  ;;  %v1195_v34 = vrot.slane %v1193_v22, 5 }
  0x50   : > { %v1199_v35 = vshll.u32 %v4238_v25, 16  ;;  %1067 = vst.msk [vmem:[#allocation3 + $0x24] sm:$0xf] %vm237_vm0, %v4238_v25  ;;  %v1203_v58 = vshrl.u32 %v4238_v25, 16  ;;  %926 = vst [vmem:[#allocation2 + $0x44] sm:$0x1] %v925_v29 }
  0x51   : > { %v1209_v3 = vshll.u32 %v1018_v26, 16  ;;  %v654_v36 = vrot.slane %v652_v27, 7  ;;  %v660_v37 = vshrl.u32 %v3651_v17, 16  ;;  %v663_v38 = vshll.u32 %v3651_v17, 16 }
  0x52   : > { %v1196_v40 = vor.u32 %v1195_v34, %v1192_v32  ;;  %v1201_v41 = vrot.slane %v1199_v35, 5  ;;  %v1205_v42 = vrot.slane %v1203_v58, 4  ;;  %v447_v47 = vmax.f32 %v415_v19, 0.0  ;;  %v931_v32 = vld [vmem:[#allocation2 + $0x50] sm:$0x1] }
  0x53   : > { %v1211_v59 = vrot.slane %v1209_v3, 5  ;;  %v657_v50 = vor.u32 %v655_v28, %v654_v36  ;;  %v658_v6 = vrot.slane %v654_v36, 4  ;;  %v662_v51 = vrot.slane %v660_v37, 7  ;;  %v934_v36 = vld [vmem:[#allocation2 + $0x54] sm:$0xf] }
  0x54   : > { %v1197_v53 = vrot.slane %v1196_v40, 4  ;;  %v1206_v54 = vor.u32 %v1205_v42, %v1201_v41  ;;  %v448_v56 = vmax.f32 %v416_v31, 0.0  ;;  %v3652_v57 = vpack.c.bf16 %v447_v47, %v447_v47  ;;  %v3775_v42 = vld [vmem:[%s4022_s24 + $0x40] sm:$0xff]  }
  0x55   : > { %v665_v63 = vor.u32 %v663_v38, %v662_v51  ;;  %v928_v1 = vsel %vm4081_vm9, %v657_v50, %v927_v46  ;;  %v667_v7 = vrot.slane %v662_v51, 4  ;;  %v4255_v13 = vld [vmem:[#allocation2 + $0x3c] sm:$0xf]  ;;  %v4257_v15 = vld [vmem:[#allocation2 + $0x40] sm:$0xf]  ;;  %vm1654_vm11 = vcmask 1042432  }
  0x56   : > { %v4253_v11 = vsel %vm4058_vm7, %v1197_v53, %v1201_v41  ;;  %v1207_v17 = vrot.slane %v1206_v54, 4  ;;  %929 = vst [vmem:[#allocation2 + $0x48] sm:$0xf] %v928_v1  ;;  %v3653_v18 = vpack.c.bf16 %v448_v56, %v448_v56  ;;  %v669_v19 = vshrl.u32 %v3652_v57, 16  ;;  %1068 = vst.msk [vmem:[#allocation3 + $0x28] sm:$0xf] %vm237_vm0, %v4255_v13 }
  0x57   : > { %5863 = vst [vmem:[#allocation14_spill] sm:$0xff] %v4253_v11  ;;  %1493 = vrot.lane.b32.xlu0 %v4253_v11, %s3904_s29  ;;  %v1214_v20 = vshrl.u32 %v4255_v13, 16  ;;  %v1217_v22 = vshll.u32 %v4255_v13, 16  ;;  %v1223_v23 = vshll.u32 %v4257_v15, 16  ;;  %1069 = vst.msk [vmem:[#allocation3 + $0x2c] sm:$0xf] %vm237_vm0, %v4257_v15  ;;  %v666_v24 = vsel %vm4074_vm8, %v658_v6, %v665_v63 }
  0x58   : > { %v1021_v26 = vld [vmem:[#allocation2 + $0x44] sm:$0x1]  ;;  %v4272_v27 = vsel %vm4058_vm7, %v1207_v17, %v1211_v59  ;;  %930 = vst.msk [vmem:[#allocation2 + $0x4c] sm:$0xf] %vm237_vm0, %v666_v24  ;;  %v1227_v28 = vshrl.u32 %v4257_v15, 16  ;;  %v671_v31 = vrot.slane %v669_v19, 7  ;;  %v932_v50 = vsel %vm4087_vm10, %v667_v7, %v931_v32 }
  0x59   : > { %5864 = vst [vmem:[#allocation15_spill] sm:$0xff] %v4272_v27  ;;  %v1233_v29 = vshll.u32 %v1021_v26, 16  ;;  %v1216_v34 = vrot.slane %v1214_v20, 4  ;;  %v1219_v35 = vrot.slane %v1217_v22, 5  ;;  %v1225_v58 = vrot.slane %v1223_v23, 5  ;;  %1495 = vrot.lane.b32.xlu1 %v4272_v27, %s3904_s29 }
  0x5a   : > { %v672_v3 = vshll.u32 %v3652_v57, 16  ;;  %v1229_v37 = vrot.slane %v1227_v28, 4  ;;  %v675_v40 = vrot.slane %v671_v31, 4  ;;  %v677_v41 = vshrl.u32 %v3653_v18, 16  ;;  %933 = vst [vmem:[#allocation2 + $0x50] sm:$0x1] %v932_v50 }
  0x5b   : > { %v1235_v38 = vrot.slane %v1233_v29, 5  ;;  %v1220_v46 = vor.u32 %v1219_v35, %v1216_v34  ;;  %v680_v59 = vshll.u32 %v3653_v18, 16  ;;  %v378_v53 = vmul.f32 %v3734_v0, %v4028_v2  ;;  %v938_v24 = vld [vmem:[#allocation2 + $0x5c] sm:$0x1] }
  0x5c   : > { %v674_v47 = vor.u32 %v672_v3, %v671_v31  ;;  %v1230_v6 = vor.u32 %v1229_v37, %v1225_v58  ;;  %v679_v51 = vrot.slane %v677_v41, 7  ;;  %v379_v54 = vmul.f32 %v3735_v10, %v4028_v2  ;;  %v4316_v3 = vld [vmem:[%s4022_s24 + $0x48] sm:$0xff]  }
  0x5d   : > { %v1221_v56 = vrot.slane %v1220_v46, 4  ;;  %v4285_v57 = vld [vmem:[#allocation2 + $0x48] sm:$0xf]  ;;  %v3738_v1 = vunpack.c.l.bf16 %v3775_v42  ;;  %v3739_v17 = vunpack.c.h.bf16 %v3775_v42  ;;  %v417_v20 = vadd.f32 %v4038_v8, %v378_v53 }
  0x5e   : > { %v935_v63 = vsel %vm4081_vm9, %v674_v47, %v934_v36  ;;  %v1238_v18 = vshrl.u32 %v4285_v57, 16  ;;  %v1241_v7 = vshll.u32 %v4285_v57, 16  ;;  %1070 = vst.msk [vmem:[#allocation3 + $0x30] sm:$0xf] %vm237_vm0, %v4285_v57  ;;  %v1231_v19 = vrot.slane %v1230_v6, 4 }
  0x5f   : > { %v682_v44 = vor.u32 %v680_v59, %v679_v51  ;;  %936 = vst [vmem:[#allocation2 + $0x54] sm:$0xf] %v935_v63  ;;  %v4295_v0 = vsel %vm4058_vm7, %v1221_v56, %v1225_v58  ;;  %v4297_v10 = vld [vmem:[#allocation2 + $0x4c] sm:$0xf]  ;;  %v418_v22 = vadd.f32 %v4038_v8, %v379_v54  ;;  %v684_v23 = vrot.slane %v679_v51, 4 }
  0x60   : > { %5865 = vst [vmem:[#allocation16_spill] sm:$0xff] %v4295_v0  ;;  %1497 = vrot.lane.b32.xlu0 %v4295_v0, %s3904_s29  ;;  %v1240_v26 = vrot.slane %v1238_v18, 4  ;;  %v1243_v28 = vrot.slane %v1241_v7, 5  ;;  %v1247_v29 = vshll.u32 %v4297_v10, 16  ;;  %1071 = vst.msk [vmem:[#allocation3 + $0x34] sm:$0xf] %vm237_vm0, %v4297_v10  ;;  %v4308_v31 = vsel %vm4058_vm7, %v1231_v19, %v1235_v38 }
  0x61   : > { %5866 = vst [vmem:[#allocation17_spill] sm:$0xff] %v4308_v31  ;;  %1499 = vrot.lane.b32.xlu1 %v4308_v31, %s3904_s29  ;;  %v683_v32 = vsel %vm4074_vm8, %v675_v40, %v682_v44  ;;  %v1251_v34 = vshrl.u32 %v4297_v10, 16  ;;  %v449_v35 = vmax.f32 %v417_v20, 0.0  ;;  %v450_v58 = vmax.f32 %v418_v22, 0.0  ;;  %v1024_v42 = vld [vmem:[#allocation2 + $0x50] sm:$0x1] }
  0x62   : > { %v1244_v36 = vor.u32 %v1243_v28, %v1240_v26  ;;  %v1249_v37 = vrot.slane %v1247_v29, 5  ;;  %937 = vst.msk [vmem:[#allocation2 + $0x58] sm:$0xf] %vm237_vm0, %v683_v32  ;;  %v939_v38 = vsel %vm4087_vm10, %v684_v23, %v938_v24  ;;  %v380_v41 = vmul.f32 %v3738_v1, %v4028_v2  ;;  %v941_v29 = vld [vmem:[#allocation2 + $0x60] sm:$0xf] }
  0x63   : > { %v1253_v46 = vrot.slane %v1251_v34, 4  ;;  %v3654_v47 = vpack.c.bf16 %v449_v35, %v449_v35  ;;  %v3655_v59 = vpack.c.bf16 %v450_v58, %v450_v58  ;;  %940 = vst [vmem:[#allocation2 + $0x5c] sm:$0x1] %v939_v38  ;;  %v381_v40 = vmul.f32 %v3739_v17, %v4028_v2 }
  0x64   : > { %v1245_v50 = vrot.slane %v1244_v36, 4  ;;  %v1257_v6 = vshll.u32 %v1024_v42, 16  ;;  %v419_v51 = vadd.f32 %v4038_v8, %v380_v41  ;;  %v3742_v53 = vunpack.c.l.bf16 %v4316_v3 }
  0x65   : > { %v1254_v56 = vor.u32 %v1253_v46, %v1249_v37  ;;  %v686_v63 = vshrl.u32 %v3654_v47, 16  ;;  %v689_v18 = vshll.u32 %v3654_v47, 16  ;;  %v694_v7 = vshrl.u32 %v3655_v59, 16 }
  0x66   : > { %v4325_v54 = vld [vmem:[#allocation2 + $0x54] sm:$0xf]  ;;  %v4329_v1 = vsel %vm4058_vm7, %v1245_v50, %v1249_v37  ;;  %v1259_v44 = vrot.slane %v1257_v6, 5  ;;  %v697_v24 = vshll.u32 %v3655_v59, 16  ;;  %v420_v32 = vadd.f32 %v4038_v8, %v381_v40 }
  0x67   : > { %5867 = vst [vmem:[#allocation18_spill] sm:$0xff] %v4329_v1  ;;  %v1262_v19 = vshrl.u32 %v4325_v54, 16  ;;  %v1265_v17 = vshll.u32 %v4325_v54, 16  ;;  %1072 = vst.msk [vmem:[#allocation3 + $0x38] sm:$0xf] %vm237_vm0, %v4325_v54  ;;  %1501 = vrot.lane.b32.xlu0 %v4329_v1, %s3904_s29  ;;  %v1255_v20 = vrot.slane %v1254_v56, 4 }
  0x68   : > { %v688_v22 = vrot.slane %v686_v63, 7  ;;  %v696_v23 = vrot.slane %v694_v7, 7  ;;  %v451_v34 = vmax.f32 %v419_v51, 0.0  ;;  %v452_v59 = vmax.f32 %v420_v32, 0.0  ;;  %v962_v1 = vld [vmem:[#allocation2 + $0x84] sm:$0xf] }
  0x69   : > { %v1264_v26 = vrot.slane %v1262_v19, 4  ;;  %v1267_v28 = vrot.slane %v1265_v17, 5  ;;  %v4338_v35 = vld [vmem:[#allocation2 + $0x58] sm:$0xf]  ;;  %v4342_v58 = vsel %vm4058_vm7, %v1255_v20, %v1259_v44  ;;  %v945_v19 = vld [vmem:[#allocation2 + $0x68] sm:$0x1] }
  0x6a   : > { %5868 = vst [vmem:[#allocation19_spill] sm:$0xff] %v4342_v58  ;;  %v691_v36 = vor.u32 %v689_v18, %v688_v22  ;;  %v692_v37 = vrot.slane %v688_v22, 4  ;;  %v699_v38 = vor.u32 %v697_v24, %v696_v23  ;;  %v1271_v42 = vshll.u32 %v4338_v35, 16  ;;  %1073 = vst.msk [vmem:[#allocation3 + $0x3c] sm:$0xf] %vm237_vm0, %v4338_v35  ;;  %1503 = vrot.lane.b32.xlu1 %v4342_v58, %s3904_s29  ;;  %v3777_v24 = vld [vmem:[%s4022_s24 + $0x50] sm:$0xff]  }
  0x6b   : > { %v1268_v41 = vor.u32 %v1267_v28, %v1264_v26  ;;  %v4349_v46 = vld [vmem:[#allocation2 + $0x5c] sm:$0x1]  ;;  %v1275_v47 = vshrl.u32 %v4338_v35, 16  ;;  %v3656_v51 = vpack.c.bf16 %v451_v34, %v451_v34  ;;  %v3657_v7 = vpack.c.bf16 %v452_v59, %v452_v59 }
  0x6c   : > { %v700_v40 = vsel %vm4074_vm8, %v692_v37, %v699_v38  ;;  %v942_v50 = vsel %vm4081_vm9, %v691_v36, %v941_v29  ;;  %v1281_v6 = vshll.u32 %v4349_v46, 16  ;;  %v1273_v63 = vrot.slane %v1271_v42, 5  ;;  %v948_v42 = vld [vmem:[#allocation2 + $0x6c] sm:$0xf] }
  0x6d   : > { %v1269_v56 = vrot.slane %v1268_v41, 4  ;;  %943 = vst [vmem:[#allocation2 + $0x60] sm:$0xf] %v942_v50  ;;  %944 = vst.msk [vmem:[#allocation2 + $0x64] sm:$0xf] %vm237_vm0, %v700_v40  ;;  %v1277_v18 = vrot.slane %v1275_v47, 4  ;;  %v3743_v37 = vunpack.c.h.bf16 %v4316_v3  ;;  %v382_v38 = vmul.f32 %v3742_v53, %v4028_v2 }
  0x6e   : > { %v1283_v17 = vrot.slane %v1281_v6, 5  ;;  %v703_v44 = vshrl.u32 %v3656_v51, 16  ;;  %v706_v20 = vshll.u32 %v3656_v51, 16  ;;  %v701_v22 = vrot.slane %v696_v23, 4 }
  0x6f   : > { %v4361_v26 = vsel %vm4058_vm7, %v1269_v56, %v1273_v63  ;;  %v1278_v28 = vor.u32 %v1277_v18, %v1273_v63  ;;  %v711_v29 = vshrl.u32 %v3657_v7, 16  ;;  %v714_v32 = vshll.u32 %v3657_v7, 16  ;;  %v952_v18 = vld [vmem:[#allocation2 + $0x74] sm:$0x1] }
  0x70   : > { %5869 = vst [vmem:[#allocation20_spill] sm:$0xff] %v4361_v26  ;;  %1505 = vrot.lane.b32.xlu0 %v4361_v26, %s3904_s29  ;;  %v705_v34 = vrot.slane %v703_v44, 7  ;;  %v946_v36 = vsel %vm4087_vm10, %v701_v22, %v945_v19  ;;  %v3746_v47 = vunpack.c.l.bf16 %v3777_v24  ;;  %v3747_v59 = vunpack.c.h.bf16 %v3777_v24 }
  0x71   : > { %v1279_v23 = vrot.slane %v1278_v28, 4  ;;  %v713_v41 = vrot.slane %v711_v29, 7  ;;  %947 = vst [vmem:[#allocation2 + $0x68] sm:$0x1] %v946_v36  ;;  %v383_v6 = vmul.f32 %v3743_v37, %v4028_v2  ;;  %v421_v51 = vadd.f32 %v4038_v8, %v382_v38 }
  0x72   : > { %v708_v40 = vor.u32 %v706_v20, %v705_v34  ;;  %v709_v50 = vrot.slane %v705_v34, 4  ;;  %v384_v53 = vmul.f32 %v3746_v47, %v4028_v2  ;;  %vm1655_vm12 = vcmask 1046532  }
  0x73   : > { %v4373_v56 = vsel %vm4058_vm7, %v1279_v23, %v1283_v17  ;;  %v716_v63 = vor.u32 %v714_v32, %v713_v41  ;;  %v718_v3 = vrot.slane %v713_v41, 4  ;;  %v422_v20 = vadd.f32 %v4038_v8, %v383_v6  ;;  %vm4675_vm13 = vmor %vm1654_vm11, %vm1655_vm12 }
  0x74   : > { %5870 = vst [vmem:[#allocation21_spill] sm:$0xff] %v4373_v56  ;;  %v4376_v7 = vld [vmem:[#allocation2 + $0x60] sm:$0xf]  ;;  %v4378_v19 = vld [vmem:[#allocation2 + $0x64] sm:$0xf]  ;;  %1507 = vrot.lane.b32.xlu1 %v4373_v56, %s3904_s29  ;;  %v949_v44 = vsel %vm4081_vm9, %v708_v40, %v948_v42  ;;  %v453_v22 = vmax.f32 %v421_v51, 0.0  ;;  %v385_v17 = vmul.f32 %v3747_v59, %v4028_v2  ;;  %v423_v42 = vadd.f32 %v4038_v8, %v384_v53 }
  0x75   : > { %v1286_v24 = vshrl.u32 %v4376_v7, 16  ;;  %v1289_v28 = vshll.u32 %v4376_v7, 16  ;;  %v1295_v29 = vshll.u32 %v4378_v19, 16  ;;  %1074 = vst.msk [vmem:[#allocation3 + $0x40] sm:$0xf] %vm237_vm0, %v4376_v7  ;;  %v717_v32 = vsel %vm4074_vm8, %v709_v50, %v716_v63 }
  0x76   : > { %1075 = vst.msk [vmem:[#allocation3 + $0x44] sm:$0xf] %vm237_vm0, %v4378_v19  ;;  %950 = vst [vmem:[#allocation2 + $0x6c] sm:$0xf] %v949_v44  ;;  %v1299_v2 = vshrl.u32 %v4378_v19, 16  ;;  %v454_v34 = vmax.f32 %v422_v20, 0.0  ;;  %v3658_v36 = vpack.c.bf16 %v453_v22, %v453_v22  ;;  %v953_v37 = vsel %vm4087_vm10, %v718_v3, %v952_v18 }
  0x77   : > { %951 = vst.msk [vmem:[#allocation2 + $0x70] sm:$0xf] %vm237_vm0, %v717_v32  ;;  %v1288_v38 = vrot.slane %v1286_v24, 4  ;;  %v1291_v23 = vrot.slane %v1289_v28, 5  ;;  %v1297_v41 = vrot.slane %v1295_v29, 5  ;;  %v424_v44 = vadd.f32 %v4038_v8, %v385_v17 }
  0x78   : > { %954 = vst [vmem:[#allocation2 + $0x74] sm:$0x1] %v953_v37  ;;  %v4400_v47 = vld [vmem:[#allocation2 + $0x68] sm:$0x1]  ;;  %v1301_v59 = vrot.slane %v1299_v2, 4  ;;  %v3659_v40 = vpack.c.bf16 %v454_v34, %v454_v34  ;;  %v720_v50 = vshrl.u32 %v3658_v36, 16 }
  0x79   : > { %v723_v6 = vshll.u32 %v3658_v36, 16  ;;  %v1292_v51 = vor.u32 %v1291_v23, %v1288_v38  ;;  %v1305_v63 = vshll.u32 %v4400_v47, 16  ;;  %v455_v20 = vmax.f32 %v423_v42, 0.0  ;;  %v955_v32 = vld [vmem:[#allocation2 + $0x78] sm:$0xf] }
  0x7a   : > { %v1302_v22 = vor.u32 %v1301_v59, %v1297_v41  ;;  %v722_v3 = vrot.slane %v720_v50, 7  ;;  %v728_v18 = vshrl.u32 %v3659_v40, 16  ;;  %v731_v24 = vshll.u32 %v3659_v40, 16 }
  0x7b   : > { %v1293_v28 = vrot.slane %v1292_v51, 4  ;;  %v1307_v29 = vrot.slane %v1305_v63, 5  ;;  %v456_v53 = vmax.f32 %v424_v44, 0.0  ;;  %v3660_v37 = vpack.c.bf16 %v455_v20, %v455_v20 }
  0x7c   : > { %v1303_v2 = vrot.slane %v1302_v22, 4  ;;  %v725_v34 = vor.u32 %v723_v6, %v722_v3  ;;  %v726_v36 = vrot.slane %v722_v3, 4  ;;  %v730_v38 = vrot.slane %v728_v18, 7  ;;  %v3778_v3 = vld [vmem:[%s4022_s24 + $0x58] sm:$0xff]  }
  0x7d   : > { %v4404_v56 = vld [vmem:[#allocation2 + $0x6c] sm:$0xf]  ;;  %v4408_v23 = vsel %vm4058_vm7, %v1293_v28, %v1297_v41  ;;  %v3661_v59 = vpack.c.bf16 %v456_v53, %v456_v53  ;;  %v737_v28 = vshrl.u32 %v3660_v37, 16  ;;  %v3751_v31 = vunpack.c.h.bf16 %v3778_v3 }
  0x7e   : > { %5871 = vst [vmem:[#allocation22_spill] sm:$0xff] %v4408_v23  ;;  %v4410_v8 = vld [vmem:[#allocation2 + $0x70] sm:$0xf]  ;;  %v1310_v17 = vshrl.u32 %v4404_v56, 16  ;;  %v1313_v42 = vshll.u32 %v4404_v56, 16  ;;  %1509 = vrot.lane.b32.xlu0 %v4408_v23, %s3904_s29  ;;  %v4423_v41 = vsel %vm4058_vm7, %v1303_v2, %v1307_v29  ;;  %v733_v50 = vor.u32 %v731_v24, %v730_v38 }
  0x7f   : > { %5872 = vst [vmem:[#allocation23_spill] sm:$0xff] %v4410_v8  ;;  %1076 = vst.msk [vmem:[#allocation3 + $0x48] sm:$0xf] %vm237_vm0, %v4404_v56  ;;  %v1319_v40 = vshll.u32 %v4410_v8, 16  ;;  %v956_v6 = vsel %vm4081_vm9, %v725_v34, %v955_v32  ;;  %v4427_v51 = vld [vmem:[#allocation2 + $0x74] sm:$0x1]  ;;  %1511 = vrot.lane.b32.xlu1 %v4423_v41, %s3904_s29  ;;  %v3750_v23 = vunpack.c.l.bf16 %v3778_v3 }
  0x80   : > { %1077 = vst.msk [vmem:[#allocation3 + $0x4c] sm:$0xf] %vm237_vm0, %v4410_v8  ;;  %5873 = vst [vmem:[#allocation24_spill] sm:$0xff] %v4423_v41  ;;  %v1312_v63 = vrot.slane %v1310_v17, 4  ;;  %v1315_v44 = vrot.slane %v1313_v42, 5  ;;  %v1323_v20 = vshrl.u32 %v4410_v8, 16  ;;  %v734_v24 = vsel %vm4074_vm8, %v726_v36, %v733_v50 }
  0x81   : > { %957 = vst [vmem:[#allocation2 + $0x78] sm:$0xf] %v956_v6  ;;  %v1329_v22 = vshll.u32 %v4427_v51, 16  ;;  %v1321_v18 = vrot.slane %v1319_v40, 5  ;;  %v740_v29 = vshll.u32 %v3660_v37, 16  ;;  %v745_v34 = vshrl.u32 %v3661_v59, 16 }
  0x82   : > { %v1316_v32 = vor.u32 %v1315_v44, %v1312_v63  ;;  %958 = vst.msk [vmem:[#allocation2 + $0x7c] sm:$0xf] %vm237_vm0, %v734_v24  ;;  %v1325_v53 = vrot.slane %v1323_v20, 4  ;;  %v959_v17 = vld [vmem:[#allocation2 + $0x80] sm:$0x1]  ;;  %v739_v42 = vrot.slane %v737_v28, 7 }
  0x83   : > { %v1331_v2 = vrot.slane %v1329_v22, 5  ;;  %v748_v6 = vshll.u32 %v3661_v59, 16  ;;  %v735_v41 = vrot.slane %v730_v38, 4  ;;  %v747_v40 = vrot.slane %v745_v34, 7  ;;  %v3779_v36 = vld [vmem:[%s4022_s24 + $0x60] sm:$0xff]  }
  0x84   : > { %v1317_v26 = vrot.slane %v1316_v32, 4  ;;  %v1326_v58 = vor.u32 %v1325_v53, %v1321_v18  ;;  %v742_v50 = vor.u32 %v740_v29, %v739_v42  ;;  %v743_v37 = vrot.slane %v739_v42, 4  ;;  %v4443_v44 = vld [vmem:[%s5764_s1] ss:$0 sm:$0xff]  ;;  %v966_v24 = vld [vmem:[#allocation2 + $0x8c] sm:$0x1] }
  0x85   : > { %v960_v63 = vsel %vm4087_vm10, %v735_v41, %v959_v17  ;;  %v386_v59 = vmul.f32 %v4443_v44, %v3750_v23  ;;  %v750_v22 = vor.u32 %v748_v6, %v747_v40  ;;  %v387_v3 = vmul.f32 %v4443_v44, %v3751_v31  ;;  %v4460_v23 = vld [vmem:[%s5765_s2] ss:$0 sm:$0xff] }
  0x86   : > { %v4448_v38 = vsel %vm4058_vm7, %v1317_v26, %v1321_v18  ;;  %v1327_v20 = vrot.slane %v1326_v58, 4  ;;  %961 = vst [vmem:[#allocation2 + $0x80] sm:$0x1] %v960_v63  ;;  %v963_v28 = vsel %vm4081_vm9, %v742_v50, %v962_v1  ;;  %v752_v26 = vrot.slane %v747_v40, 4 }
  0x87   : > { %5874 = vst [vmem:[#allocation25_spill] sm:$0xff] %v4448_v38  ;;  %1513 = vrot.lane.b32.xlu0 %v4448_v38, %s3904_s29  ;;  %v425_v58 = vadd.f32 %v4460_v23, %v386_v59  ;;  %v3754_v18 = vunpack.c.l.bf16 %v3779_v36  ;;  %v751_v32 = vsel %vm4074_vm8, %v743_v37, %v750_v22  ;;  %964 = vst [vmem:[#allocation2 + $0x84] sm:$0xf] %v963_v28  ;;  %v3755_v6 = vunpack.c.h.bf16 %v3779_v36 }
  0x88   : > { %v4453_v41 = vld [vmem:[#allocation2 + $0x78] sm:$0xf]  ;;  %v4469_v1 = vsel %vm4058_vm7, %v1327_v20, %v1331_v2  ;;  %965 = vst.msk [vmem:[#allocation2 + $0x88] sm:$0xf] %vm237_vm0, %v751_v32  ;;  %v426_v34 = vadd.f32 %v4460_v23, %v387_v3  ;;  %v967_v42 = vsel %vm4087_vm10, %v752_v26, %v966_v24  ;;  %v4482_v2 = vld [vmem:[%s4022_s24 + $0x68] sm:$0xff]   ;;  %v3552_v9 = vrot.slane %v4122_v60, 9 }
  0x89   : > { %v1334_v31 = vshrl.u32 %v4453_v41, 16  ;;  %v1337_v29 = vshll.u32 %v4453_v41, 16  ;;  %1078 = vst.msk [vmem:[#allocation3 + $0x50] sm:$0xf] %vm237_vm0, %v4453_v41  ;;  %5875 = vst [vmem:[#allocation26_spill] sm:$0xff] %v4469_v1  ;;  %1515 = vrot.lane.b32.xlu1 %v4469_v1, %s3904_s29  ;;  %v457_v17 = vmax.f32 %v425_v58, 0.0  ;;  %v388_v22 = vmul.f32 %v4443_v44, %v3754_v18 }
  0x8a   : > { %v4473_v53 = vld [vmem:[#allocation2 + $0x7c] sm:$0xf]  ;;  %968 = vst [vmem:[#allocation2 + $0x8c] sm:$0x1] %v967_v42  ;;  %v458_v59 = vmax.f32 %v426_v34, 0.0  ;;  %v389_v3 = vmul.f32 %v4443_v44, %v3755_v6  ;;  %v3758_v58 = vunpack.c.l.bf16 %v4482_v2  ;;  %vm1573_vm14 = vcmask 60448  }
  0x8b   : > { %v1336_v40 = vrot.slane %v1334_v31, 4  ;;  %v1339_v50 = vrot.slane %v1337_v29, 5  ;;  %v1343_v37 = vshll.u32 %v4473_v53, 16  ;;  %1079 = vst.msk [vmem:[#allocation3 + $0x54] sm:$0xf] %vm237_vm0, %v4473_v53  ;;  %v1347_v63 = vshrl.u32 %v4473_v53, 16 }
  0x8c   : > { %v3662_v20 = vpack.c.bf16 %v457_v17, %v457_v17  ;;  %v3663_v31 = vpack.c.bf16 %v458_v59, %v458_v59  ;;  %v427_v1 = vadd.f32 %v4460_v23, %v388_v22  ;;  %v969_v17 = vld [vmem:[#allocation2 + $0x90] sm:$0xf]  ;;  %v428_v18 = vadd.f32 %v4460_v23, %v389_v3 }
  0x8d   : > { %v1340_v24 = vor.u32 %v1339_v50, %v1336_v40  ;;  %v1345_v36 = vrot.slane %v1343_v37, 5  ;;  %v1349_v28 = vrot.slane %v1347_v63, 4  ;;  %v4491_v26 = vld [vmem:[#allocation2 + $0x80] sm:$0x1]  ;;  %v1729_v62 = vrot.slane %v4473_v53, 5 }
  0x8e   : > { %v754_v29 = vshrl.u32 %v3662_v20, 16  ;;  %v757_v32 = vshll.u32 %v3662_v20, 16  ;;  %v1353_v34 = vshll.u32 %v4491_v26, 16  ;;  %v4496_v6 = vld [vmem:[#allocation2 + $0x84] sm:$0xf]  ;;  %v762_v50 = vshrl.u32 %v3663_v31, 16 }
  0x8f   : > { %v1341_v38 = vrot.slane %v1340_v24, 4  ;;  %v1350_v42 = vor.u32 %v1349_v28, %v1345_v36  ;;  %v765_v37 = vshll.u32 %v3663_v31, 16  ;;  %v459_v63 = vmax.f32 %v427_v1, 0.0  ;;  %v4502_v20 = vld [vmem:[#allocation2 + $0x88] sm:$0xf] }
  0x90   : > { %v756_v40 = vrot.slane %v754_v29, 7  ;;  %5877 = vst [vmem:[#allocation28_spill] sm:$0xff] %v4502_v20  ;;  %v1358_v22 = vshrl.u32 %v4496_v6, 16  ;;  %v1361_v24 = vshll.u32 %v4496_v6, 16  ;;  %1080 = vst.msk [vmem:[#allocation3 + $0x58] sm:$0xf] %vm237_vm0, %v4496_v6 }
  0x91   : > { %v4500_v59 = vsel %vm4058_vm7, %v1341_v38, %v1345_v36  ;;  %v1351_v3 = vrot.slane %v1350_v42, 4  ;;  %v1367_v28 = vshll.u32 %v4502_v20, 16  ;;  %1081 = vst.msk [vmem:[#allocation3 + $0x5c] sm:$0xf] %vm237_vm0, %v4502_v20  ;;  %v1355_v38 = vrot.slane %v1353_v34, 5 }
  0x92   : > { %5876 = vst [vmem:[#allocation27_spill] sm:$0xff] %v4500_v59  ;;  %1517 = vrot.lane.b32.xlu0 %v4500_v59, %s3904_s29  ;;  %v759_v1 = vor.u32 %v757_v32, %v756_v40  ;;  %v760_v36 = vrot.slane %v756_v40, 4  ;;  %v4513_v31 = vld [vmem:[#allocation2 + $0x8c] sm:$0x1]  ;;  %v1360_v29 = vrot.slane %v1358_v22, 4  ;;  %v1363_v0 = vrot.slane %v1361_v24, 5 }
  0x93   : > { %v764_v27 = vrot.slane %v762_v50, 7  ;;  %v1371_v11 = vshrl.u32 %v4502_v20, 16  ;;  %v1369_v45 = vrot.slane %v1367_v28, 5  ;;  %v4518_v42 = vsel %vm4058_vm7, %v1351_v3, %v1355_v38  ;;  %v973_v22 = vld [vmem:[#allocation2 + $0x98] sm:$0x1] }
  0x94   : > { %5878 = vst [vmem:[#allocation29_spill] sm:$0xff] %v4518_v42  ;;  %v970_v59 = vsel %vm4081_vm9, %v759_v1, %v969_v17  ;;  %v1377_v30 = vshll.u32 %v4513_v31, 16  ;;  %v1364_v32 = vor.u32 %v1363_v0, %v1360_v29  ;;  %1519 = vrot.lane.b32.xlu1 %v4518_v42, %s3904_s29  ;;  %v460_v50 = vmax.f32 %v428_v18, 0.0  ;;  %v3781_v0 = vld [vmem:[%s4022_s24 + $0x70] sm:$0xff]  }
  0x95   : > { %v767_v34 = vor.u32 %v765_v37, %v764_v27  ;;  %971 = vst [vmem:[#allocation2 + $0x90] sm:$0xf] %v970_v59  ;;  %v1373_v40 = vrot.slane %v1371_v11, 4  ;;  %v3664_v28 = vpack.c.bf16 %v459_v63, %v459_v63  ;;  %v769_v16 = vrot.slane %v764_v27, 4 }
  0x96   : > { %v1379_v24 = vrot.slane %v1377_v30, 5  ;;  %v3759_v3 = vunpack.c.h.bf16 %v4482_v2  ;;  %v1365_v38 = vrot.slane %v1364_v32, 4  ;;  %v3665_v52 = vpack.c.bf16 %v460_v50, %v460_v50 }
  0x97   : > { %v768_v17 = vsel %vm4074_vm8, %v760_v36, %v767_v34  ;;  %v1374_v1 = vor.u32 %v1373_v40, %v1369_v45  ;;  %v771_v29 = vshrl.u32 %v3664_v28, 16  ;;  %v774_v37 = vshll.u32 %v3664_v28, 16 }
  0x98   : > { %972 = vst.msk [vmem:[#allocation2 + $0x94] sm:$0xf] %vm237_vm0, %v768_v17  ;;  %v974_v11 = vsel %vm4087_vm10, %v769_v16, %v973_v22  ;;  %v390_v30 = vmul.f32 %v4443_v44, %v3758_v58  ;;  %v4535_v27 = vsel %vm4058_vm7, %v1365_v38, %v1369_v45  ;;  %v779_v18 = vshrl.u32 %v3665_v52, 16  ;;  %v976_v45 = vld [vmem:[#allocation2 + $0x9c] sm:$0xf] }
  0x99   : > { %5879 = vst [vmem:[#allocation30_spill] sm:$0xff] %v4535_v27  ;;  %v1375_v2 = vrot.slane %v1374_v1, 4  ;;  %v782_v63 = vshll.u32 %v3665_v52, 16  ;;  %975 = vst [vmem:[#allocation2 + $0x98] sm:$0x1] %v974_v11  ;;  %1521 = vrot.lane.b32.xlu0 %v4535_v27, %s3904_s29  ;;  %v773_v59 = vrot.slane %v771_v29, 7  ;;  %v391_v36 = vmul.f32 %v4443_v44, %v3759_v3 }
  0x9a   : > { %v429_v32 = vadd.f32 %v4460_v23, %v390_v30  ;;  %v3762_v34 = vunpack.c.l.bf16 %v3781_v0  ;;  %v781_v58 = vrot.slane %v779_v18, 7  ;;  %v3763_v40 = vunpack.c.h.bf16 %v3781_v0  ;;  %v980_v38 = vld [vmem:[#allocation2 + $0xa4] sm:$0x1]  ;;  %v983_v27 = vld [vmem:[#allocation2 + $0xa8] sm:$0xf] }
  0x9b   : > { %v4543_v16 = vsel %vm4058_vm7, %v1375_v2, %v1379_v24  ;;  %v776_v52 = vor.u32 %v774_v37, %v773_v59  ;;  %v777_v22 = vrot.slane %v773_v59, 4  ;;  %v430_v28 = vadd.f32 %v4460_v23, %v391_v36 }
  0x9c   : > { %5880 = vst [vmem:[#allocation31_spill] sm:$0xff] %v4543_v16  ;;  %v4545_v50 = vld [vmem:[#allocation2 + $0x90] sm:$0xf]  ;;  %1523 = vrot.lane.b32.xlu1 %v4543_v16, %s3904_s29  ;;  %v461_v3 = vmax.f32 %v429_v32, 0.0  ;;  %v784_v24 = vor.u32 %v782_v63, %v781_v58  ;;  %v786_v0 = vrot.slane %v781_v58, 4  ;;  %v392_v37 = vmul.f32 %v4443_v44, %v3762_v34 }
  0x9d   : > { %5881 = vst [vmem:[#allocation32_spill] sm:$0xff] %v4545_v50  ;;  %v1382_v17 = vshrl.u32 %v4545_v50, 16  ;;  %v1385_v1 = vshll.u32 %v4545_v50, 16  ;;  %1082 = vst.msk [vmem:[#allocation3 + $0x60] sm:$0xf] %vm237_vm0, %v4545_v50  ;;  %v977_v29 = vsel %vm4081_vm9, %v776_v52, %v976_v45  ;;  %v462_v11 = vmax.f32 %v430_v28, 0.0 }
  0x9e   : > { %v3666_v30 = vpack.c.bf16 %v461_v3, %v461_v3  ;;  %v785_v36 = vsel %vm4074_vm8, %v777_v22, %v784_v24  ;;  %978 = vst [vmem:[#allocation2 + $0x9c] sm:$0xf] %v977_v29  ;;  %v981_v32 = vsel %vm4087_vm10, %v786_v0, %v980_v38  ;;  %v393_v38 = vmul.f32 %v4443_v44, %v3763_v40 }
  0x9f   : > { %v4557_v2 = vld [vmem:[#allocation2 + $0x94] sm:$0xf]  ;;  %v1384_v18 = vrot.slane %v1382_v17, 4  ;;  %v1387_v59 = vrot.slane %v1385_v1, 5  ;;  %979 = vst.msk [vmem:[#allocation2 + $0xa0] sm:$0xf] %vm237_vm0, %v785_v36  ;;  %v3667_v45 = vpack.c.bf16 %v462_v11, %v462_v11  ;;  %v431_v42 = vadd.f32 %v4460_v23, %v392_v37 }
  0xa0   : > { %5882 = vst [vmem:[#allocation33_spill] sm:$0xff] %v4557_v2  ;;  %v1391_v63 = vshll.u32 %v4557_v2, 16  ;;  %1083 = vst.msk [vmem:[#allocation3 + $0x64] sm:$0xf] %vm237_vm0, %v4557_v2  ;;  %v4567_v58 = vld [vmem:[#allocation2 + $0x98] sm:$0x1]  ;;  %v432_v44 = vadd.f32 %v4460_v23, %v393_v38 }
  0xa1   : > { %v1395_v34 = vshrl.u32 %v4557_v2, 16  ;;  %v788_v52 = vshrl.u32 %v3666_v30, 16  ;;  %982 = vst [vmem:[#allocation2 + $0xa4] sm:$0x1] %v981_v32  ;;  %v1388_v28 = vor.u32 %v1387_v59, %v1384_v18  ;;  %v1401_v22 = vshll.u32 %v4567_v58, 16 }
  0xa2   : > { %v791_v3 = vshll.u32 %v3666_v30, 16  ;;  %v1393_v17 = vrot.slane %v1391_v63, 5  ;;  %v796_v0 = vshrl.u32 %v3667_v45, 16  ;;  %v799_v36 = vshll.u32 %v3667_v45, 16  ;;  %v987_v38 = vld [vmem:[#allocation2 + $0xb0] sm:$0x1] }
  0xa3   : > { %v1397_v1 = vrot.slane %v1395_v34, 4  ;;  %v790_v24 = vrot.slane %v788_v52, 7  ;;  %v1389_v29 = vrot.slane %v1388_v28, 4  ;;  %v1403_v16 = vrot.slane %v1401_v22, 5 }
  0xa4   : > { %v798_v32 = vrot.slane %v796_v0, 7  ;;  %v463_v40 = vmax.f32 %v431_v42, 0.0  ;;  %v464_v0 = vmax.f32 %v432_v44, 0.0  ;;  %vm1865_vm15 = vcmask 93248  }
  0xa5   : > { %v1398_v49 = vor.u32 %v1397_v1, %v1393_v17  ;;  %v793_v11 = vor.u32 %v791_v3, %v790_v24  ;;  %v794_v48 = vrot.slane %v790_v24, 4  ;;  %v4575_v18 = vsel %vm4058_vm7, %v1389_v29, %v1393_v17  ;;  %v4580_v30 = vld [vmem:[#allocation2 + $0x9c] sm:$0xf] }
  0xa6   : > { %5883 = vst [vmem:[#allocation34_spill] sm:$0xff] %v4575_v18  ;;  %1525 = vrot.lane.b32.xlu0 %v4575_v18, %s3904_s29  ;;  %v801_v63 = vor.u32 %v799_v36, %v798_v32  ;;  %v803_v34 = vrot.slane %v798_v32, 4  ;;  %v4584_v45 = vld [vmem:[#allocation2 + $0xa0] sm:$0xf]  ;;  %v1406_v52 = vshrl.u32 %v4580_v30, 16  ;;  %v1409_v28 = vshll.u32 %v4580_v30, 16 }
  0xa7   : > { %v1399_v59 = vrot.slane %v1398_v49, 4  ;;  %v984_v37 = vsel %vm4081_vm9, %v793_v11, %v983_v27  ;;  %1084 = vst.msk [vmem:[#allocation3 + $0x68] sm:$0xf] %vm237_vm0, %v4580_v30  ;;  %v3668_v42 = vpack.c.bf16 %v463_v40, %v463_v40  ;;  %v1415_v49 = vshll.u32 %v4584_v45, 16  ;;  %1085 = vst.msk [vmem:[#allocation3 + $0x6c] sm:$0xf] %vm237_vm0, %v4584_v45 }
  0xa8   : > { %985 = vst [vmem:[#allocation2 + $0xa8] sm:$0xf] %v984_v37  ;;  %v4590_v23 = vld [vmem:[#allocation2 + $0xa4] sm:$0x1]  ;;  %v802_v22 = vsel %vm4074_vm8, %v794_v48, %v801_v63  ;;  %v1419_v3 = vshrl.u32 %v4584_v45, 16  ;;  %v1408_v17 = vrot.slane %v1406_v52, 4  ;;  %v3669_v40 = vpack.c.bf16 %v464_v0, %v464_v0 }
  0xa9   : > { %v4597_v27 = vsel %vm4058_vm7, %v1399_v59, %v1403_v16  ;;  %v1411_v1 = vrot.slane %v1409_v28, 5  ;;  %986 = vst.msk [vmem:[#allocation2 + $0xac] sm:$0xf] %vm237_vm0, %v802_v22  ;;  %v1425_v24 = vshll.u32 %v4590_v23, 16  ;;  %v1417_v29 = vrot.slane %v1415_v49, 5 }
  0xaa   : > { %5884 = vst [vmem:[#allocation35_spill] sm:$0xff] %v4597_v27  ;;  %1527 = vrot.lane.b32.xlu1 %v4597_v27, %s3904_s29  ;;  %v1421_v36 = vrot.slane %v1419_v3, 4  ;;  %v805_v16 = vshrl.u32 %v3668_v42, 16  ;;  %v808_v11 = vshll.u32 %v3668_v42, 16  ;;  %v988_v48 = vsel %vm4087_vm10, %v803_v34, %v987_v38  ;;  %v990_v22 = vld [vmem:[#allocation2 + $0xb4] sm:$0xf] }
  0xab   : > { %v1412_v32 = vor.u32 %v1411_v1, %v1408_v17  ;;  %v1427_v63 = vrot.slane %v1425_v24, 5  ;;  %989 = vst [vmem:[#allocation2 + $0xb0] sm:$0x1] %v988_v48  ;;  %v813_v28 = vshrl.u32 %v3669_v40, 16  ;;  %v816_v27 = vshll.u32 %v3669_v40, 16 }
  0xac   : > { %v1422_v59 = vor.u32 %v1421_v36, %v1417_v29  ;;  %v807_v37 = vrot.slane %v805_v16, 7  ;;  %vm2921_vm1 = vcmask 1041408   ;;  %vm1996_vm2 = vcmask 126048  }
  0xad   : > { %v1413_v52 = vrot.slane %v1412_v32, 4  ;;  %v815_v38 = vrot.slane %v813_v28, 7  ;;  %v994_v32 = vld [vmem:[#allocation2 + $0xbc] sm:$0x1]  ;;  %vm2149_vm3 = vcmask 158848   ;;  %vm2286_vm4 = vcmask 191648  }
  0xae   : > { %v1423_v44 = vrot.slane %v1422_v59, 4  ;;  %v810_v49 = vor.u32 %v808_v11, %v807_v37  ;;  %v811_v3 = vrot.slane %v807_v37, 4  ;;  %vm2417_vm5 = vcmask 224448  }
  0xaf   : > { %v4608_v18 = vld [vmem:[#allocation2 + $0xa8] sm:$0xf]  ;;  %v4612_v42 = vsel %vm4058_vm7, %v1413_v52, %v1417_v29  ;;  %v818_v11 = vor.u32 %v816_v27, %v815_v38  ;;  %v820_v48 = vrot.slane %v815_v38, 4  ;;  %vm2570_vm6 = vcmask 257248  }
  0xb0   : > { %5885 = vst [vmem:[#allocation36_spill] sm:$0xff] %v4608_v18  ;;  %5886 = vst [vmem:[#allocation37_spill] sm:$0xff] %v4612_v42  ;;  %v1430_v17 = vshrl.u32 %v4608_v18, 16  ;;  %v1433_v34 = vshll.u32 %v4608_v18, 16  ;;  %1529 = vrot.lane.b32.xlu0 %v4612_v42, %s3904_s29  ;;  %v4620_v1 = vld [vmem:[#allocation2 + $0xac] sm:$0xf]  ;;  %v4624_v24 = vsel %vm4058_vm7, %v1423_v44, %v1427_v63  ;;  %v991_v0 = vsel %vm4081_vm9, %v810_v49, %v990_v22  ;;  %v4642_v44 = vpop.permute.xlu0 %1477 }
  0xb1   : > { %1086 = vst.msk [vmem:[#allocation3 + $0x70] sm:$0xf] %vm237_vm0, %v4608_v18  ;;  %5887 = vst [vmem:[#allocation38_spill] sm:$0xff] %v4620_v1  ;;  %v1439_v16 = vshll.u32 %v4620_v1, 16  ;;  %1531 = vrot.lane.b32.xlu1 %v4624_v24, %s3904_s29  ;;  %v1443_v40 = vshrl.u32 %v4620_v1, 16  ;;  %v819_v37 = vsel %vm4074_vm8, %v811_v3, %v818_v11  ;;  %v995_v27 = vsel %vm4087_vm10, %v820_v48, %v994_v32  ;;  %v4644_v38 = vpop.permute.xlu1 %1481 }
  0xb2   : > { %5888 = vst [vmem:[#allocation39_spill] sm:$0xff] %v4624_v24  ;;  %v1432_v29 = vrot.slane %v1430_v17, 4  ;;  %v1435_v36 = vrot.slane %v1433_v34, 5  ;;  %1087 = vst.msk [vmem:[#allocation3 + $0x74] sm:$0xf] %vm237_vm0, %v4620_v1  ;;  %vm2707_vm11 = vcmask 290048  }
  0xb3   : > { %992 = vst [vmem:[#allocation2 + $0xb4] sm:$0xf] %v991_v0  ;;  %v1441_v63 = vrot.slane %v1439_v16, 5  ;;  %v4636_v52 = vld [vmem:[#allocation2 + $0xb0] sm:$0x1]  ;;  %v1445_v28 = vrot.slane %v1443_v40, 4 }
  0xb4   : > { %v1436_v59 = vor.u32 %v1435_v36, %v1432_v29  ;;  %993 = vst.msk [vmem:[#allocation2 + $0xb8] sm:$0xf] %vm237_vm0, %v819_v37  ;;  %v1449_v22 = vshll.u32 %v4636_v52, 16  ;;  %996 = vst [vmem:[#allocation2 + $0xbc] sm:$0x1] %v995_v27  ;;  %v1480_v32 = vpop.permute.xlu0 %1479  ;;  %vm2872_vm12 = vcmask 293888  }
  0xb5   : > { %v1446_v17 = vor.u32 %v1445_v28, %v1441_v63  ;;  %1574 = vst.msk [vmem:[#allocation3] sm:$0xf] %vm1573_vm14, %v4642_v44  ;;  %1575 = vst.msk [vmem:[#allocation3 + $0x4] sm:$0xf] %vm1573_vm14, %v1480_v32 }
  0xb6   : > { %v1437_v49 = vrot.slane %v1436_v59, 4  ;;  %v1451_v34 = vrot.slane %v1449_v22, 5  ;;  %v1484_v22 = vpop.permute.xlu1 %1483  ;;  %1576 = vst.msk [vmem:[#allocation3 + $0x8] sm:$0xf] %vm1573_vm14, %v4644_v38  ;;  %v3889_v38 = vld [vmem:[#allocation2 + $0x2c] sm:$0x1] }
  0xb7   : > { %v1447_v29 = vrot.slane %v1446_v17, 4  ;;  %1577 = vst.msk [vmem:[#allocation3 + $0xc] sm:$0xf] %vm1573_vm14, %v1484_v22  ;;  %v1683_v32 = vrot.slane %v3889_v38, 5 }
  0xb8   : > { %v4648_v3 = vsel %vm4058_vm7, %v1437_v49, %v1441_v63  ;;  %v1486_v42 = vpop.permute.xlu0 %1485 }
  0xb9   : > { %5889 = vst [vmem:[#allocation40_spill] sm:$0xff] %v4648_v3  ;;  %1533 = vrot.lane.b32.xlu0 %v4648_v3, %s3904_s29  ;;  %v4660_v11 = vsel %vm4058_vm7, %v1447_v29, %v1451_v34  ;;  %1578 = vst.msk [vmem:[#allocation3 + $0x10] sm:$0xf] %vm1573_vm14, %v1486_v42 }
  0xba   : > { %v4652_v0 = vld [vmem:[#allocation2 + $0xb4] sm:$0xf]  ;;  %5890 = vst [vmem:[#allocation41_spill] sm:$0xff] %v4660_v11  ;;  %1535 = vrot.lane.b32.xlu1 %v4660_v11, %s3904_s29 }
  0xbb   : > { %v1454_v36 = vshrl.u32 %v4652_v0, 16  ;;  %v1457_v16 = vshll.u32 %v4652_v0, 16  ;;  %1088 = vst.msk [vmem:[#allocation3 + $0x78] sm:$0xf] %vm237_vm0, %v4652_v0  ;;  %v4662_v40 = vld [vmem:[#allocation2 + $0xb8] sm:$0xf] }
  0xbc   : > { %v1463_v63 = vshll.u32 %v4662_v40, 16  ;;  %1089 = vst.msk [vmem:[#allocation3 + $0x7c] sm:$0xf] %vm237_vm0, %v4662_v40  ;;  %v4669_v37 = vld [vmem:[#allocation2 + $0xbc] sm:$0x1]  ;;  %v1467_v28 = vshrl.u32 %v4662_v40, 16 }
  0xbd   : > { %v1456_v48 = vrot.slane %v1454_v36, 4  ;;  %v1459_v59 = vrot.slane %v1457_v16, 5  ;;  %v1473_v49 = vshll.u32 %v4669_v37, 16  ;;  %v3551_v36 = vrot.slane %v4031_v4, 9 }
  0xbe   : > { %v1465_v17 = vrot.slane %v1463_v63, 5  ;;  %v1469_v34 = vrot.slane %v1467_v28, 4  ;;  %v1659_v16 = vrot.slane %v4033_v5, 5  ;;  %v3886_v28 = vld [vmem:[#allocation2 + $0x8] sm:$0x1] }
  0xbf   : > { %v1460_v27 = vor.u32 %v1459_v59, %v1456_v48  ;;  %v1475_v24 = vrot.slane %v1473_v49, 5  ;;  %v1662_v4 = vrot.slane %v3886_v28, 5  ;;  %v1666_v49 = vrot.slane %v4124_v61, 5 }
  0xc0   : > { %v1470_v3 = vor.u32 %v1469_v34, %v1465_v17  ;;  %v1661_v63 = vrot.slane %v1659_v16, 4  ;;  %v1660_v5 = vsel %vm4675_vm13, %v3551_v36, %v1659_v16  ;;  %v1490_v16 = vpop.permute.xlu0 %1489 }
  0xc1   : > { %v1461_v29 = vrot.slane %v1460_v27, 4  ;;  %v1488_v27 = vpop.permute.xlu1 %1487  ;;  %v4700_v28 = vsel %vm4675_vm13, %v3552_v9, %v1666_v49  ;;  %1580 = vst.msk [vmem:[#allocation3 + $0x18] sm:$0xf] %vm1573_vm14, %v1490_v16 }
  0xc2   : > { %v1471_v59 = vrot.slane %v1470_v3, 4  ;;  %v1663_v3 = vsel %vm4675_vm13, %v1661_v63, %v1662_v4  ;;  %1579 = vst.msk [vmem:[#allocation3 + $0x14] sm:$0xf] %vm1573_vm14, %v1488_v27  ;;  %v3555_v27 = vrot.slane %v4226_v14, 9 }
  0xc3   : > { %v4681_v48 = vsel %vm4058_vm7, %v1461_v29, %v1465_v17  ;;  %v1668_v17 = vrot.slane %v1666_v49, 4  ;;  %v3887_v29 = vld [vmem:[#allocation2 + $0x14] sm:$0x1]  ;;  %v3554_v49 = vrot.slane %v4155_v39, 9 }
  0xc4   : > { %5893 = vst [vmem:[#allocation42_spill] sm:$0xff] %v4681_v48  ;;  %1537 = vrot.lane.b32.xlu0 %v4681_v48, %s3904_s29  ;;  %v4691_v34 = vsel %vm4058_vm7, %v1471_v59, %v1475_v24  ;;  %v1669_v36 = vrot.slane %v3887_v29, 5  ;;  %v3553_v24 = vrot.slane %v4141_v12, 9  ;;  %v1673_v59 = vrot.slane %v4149_v21, 5 }
  0xc5   : > { %5894 = vst [vmem:[#allocation43_spill] sm:$0xff] %v4691_v34  ;;  %1539 = vrot.lane.b32.xlu1 %v4691_v34, %s3904_s29  ;;  %v1492_v33 = vpop.permute.xlu1 %1491  ;;  %v1680_v34 = vrot.slane %v4157_v43, 5  ;;  %v1715_v48 = vrot.slane %v4378_v19, 5 }
  0xc6   : > { %v4709_v63 = vsel %vm4675_vm13, %v1668_v17, %v1669_v36  ;;  %v1675_v4 = vrot.slane %v1673_v59, 4  ;;  %v4713_v9 = vsel %vm4675_vm13, %v3553_v24, %v1673_v59  ;;  %1581 = vst.msk [vmem:[#allocation3 + $0x1c] sm:$0xf] %vm1573_vm14, %v1492_v33  ;;  %v1687_v17 = vrot.slane %v4238_v25, 5  ;;  %v3890_v24 = vld [vmem:[#allocation2 + $0x38] sm:$0x1] }
  0xc7   : > { %v1682_v44 = vrot.slane %v1680_v34, 4  ;;  %v4738_v33 = vsel %vm4675_vm13, %v3554_v49, %v1680_v34  ;;  %v1690_v34 = vrot.slane %v3890_v24, 5 }
  0xc8   : > { %1769 = vrot.lane.b32.xlu0 %v1660_v5, %s3905_s9  ;;  %v3888_v5 = vld [vmem:[#allocation2 + $0x20] sm:$0x1]  ;;  %v1689_v16 = vrot.slane %v1687_v17, 4  ;;  %v4753_v59 = vsel %vm4675_vm13, %v3555_v27, %v1687_v17  ;;  %v3557_v27 = vrot.slane %v4285_v57, 9  ;;  %v1701_v17 = vrot.slane %v4297_v10, 5 }
  0xc9   : > { %1771 = vrot.lane.b32.xlu1 %v1663_v3, %s3905_s9  ;;  %v1676_v29 = vrot.slane %v3888_v5, 5  ;;  %v1494_v3 = vpop.permute.xlu0 %1493  ;;  %v4749_v36 = vsel %vm4675_vm13, %v1682_v44, %v1683_v32  ;;  %v1694_v5 = vrot.slane %v4257_v15, 5  ;;  %v3891_v44 = vld [vmem:[#allocation2 + $0x44] sm:$0x1] }
  0xca   : > { %1582 = vst.msk [vmem:[#allocation3 + $0x20] sm:$0xf] %vm1573_vm14, %v1494_v3  ;;  %v4763_v49 = vsel %vm4675_vm13, %v1689_v16, %v1690_v34  ;;  %v1697_v38 = vrot.slane %v3891_v44, 5  ;;  %v1703_v24 = vrot.slane %v1701_v17, 4  ;;  %v3892_v34 = vld [vmem:[#allocation2 + $0x50] sm:$0x1] }
  0xcb   : > { %v4734_v42 = vsel %vm4675_vm13, %v1675_v4, %v1676_v29  ;;  %v1496_v22 = vpop.permute.xlu1 %1495  ;;  %v3556_v4 = vrot.slane %v4255_v13, 9  ;;  %v1696_v3 = vrot.slane %v1694_v5, 4  ;;  %v1708_v44 = vrot.slane %v4338_v35, 5 }
  0xcc   : > { %1773 = vrot.lane.b32.xlu0 %v4700_v28, %s3905_s9  ;;  %1583 = vst.msk [vmem:[#allocation3 + $0x24] sm:$0xf] %vm1573_vm14, %v1496_v22 }
  0xcd   : > { %1775 = vrot.lane.b32.xlu1 %v4709_v63, %s3905_s9  ;;  %v4768_v22 = vsel %vm4675_vm13, %v3556_v4, %v1694_v5  ;;  %v4779_v16 = vsel %vm4675_vm13, %v1696_v3, %v1697_v38  ;;  %v1704_v4 = vrot.slane %v3892_v34, 5  ;;  %v4783_v5 = vsel %vm4675_vm13, %v3557_v27, %v1701_v17 }
  0xce   : > { %v1710_v38 = vrot.slane %v1708_v44, 4  ;;  %v1711_v27 = vrot.slane %v4349_v46, 5  ;;  %v3559_v34 = vrot.slane %v4376_v7, 9 }
  0xcf   : > { %v4794_v3 = vsel %vm4675_vm13, %v1703_v24, %v1704_v4  ;;  %v1717_v24 = vrot.slane %v1715_v48, 4  ;;  %v1718_v4 = vrot.slane %v4400_v47, 5 }
  0xd0   : > { %1777 = vrot.lane.b32.xlu0 %v4713_v9, %s3905_s9  ;;  %v4810_v46 = vsel %vm4675_vm13, %v1710_v38, %v1711_v27 }
  0xd1   : > { %1779 = vrot.lane.b32.xlu1 %v4734_v42, %s3905_s9  ;;  %v4826_v47 = vsel %vm4675_vm13, %v1717_v24, %v1718_v4  ;;  %v1731_v24 = vrot.slane %v1729_v62, 4  ;;  %v1732_v4 = vrot.slane %v4491_v26, 5  ;;  %v1739_v26 = vrot.slane %v4513_v31, 5 }
  0xd2   : > { %v1498_v29 = vpop.permute.xlu0 %1497  ;;  %v1746_v31 = vrot.slane %v4567_v58, 5 }
  0xd3   : > { %1584 = vst.msk [vmem:[#allocation3 + $0x28] sm:$0xf] %vm1573_vm14, %v1498_v29  ;;  %v1500_v32 = vpop.permute.xlu1 %1499  ;;  %v3558_v29 = vrot.slane %v4325_v54, 9 }
  0xd4   : > { %1781 = vrot.lane.b32.xlu0 %v4738_v33, %s3905_s9  ;;  %1585 = vst.msk [vmem:[#allocation3 + $0x2c] sm:$0xf] %vm1573_vm14, %v1500_v32 }
  0xd5   : > { %1783 = vrot.lane.b32.xlu1 %v4749_v36, %s3905_s9  ;;  %v4799_v17 = vsel %vm4675_vm13, %v3558_v29, %v1708_v44  ;;  %v4815_v29 = vsel %vm4675_vm13, %v3559_v34, %v1715_v48  ;;  %v3560_v44 = vrot.slane %v4404_v56, 9  ;;  %v1725_v48 = vrot.slane %v4427_v51, 5 }
  0xd6   : > { %v3561_v34 = vrot.slane %v4453_v41, 9 }
  0xd8   : > { %1785 = vrot.lane.b32.xlu0 %v4753_v59, %s3905_s9 }
  0xd9   : > { %1787 = vrot.lane.b32.xlu1 %v4763_v49, %s3905_s9  ;;  %v1502_v32 = vpop.permute.xlu0 %1501 }
  0xda   : > { %1586 = vst.msk [vmem:[#allocation3 + $0x30] sm:$0xf] %vm1573_vm14, %v1502_v32 }
  0xdc   : > { %1789 = vrot.lane.b32.xlu0 %v4768_v22, %s3905_s9  ;;  %v1504_v55 = vpop.permute.xlu1 %1503 }
  0xdd   : > { %1791 = vrot.lane.b32.xlu1 %v4779_v16, %s3905_s9  ;;  %1587 = vst.msk [vmem:[#allocation3 + $0x34] sm:$0xf] %vm1573_vm14, %v1504_v55  ;;  %v1722_v55 = vrot.slane %v4410_v8, 5 }
  0xdf   : > { %v1724_v38 = vrot.slane %v1722_v55, 4  ;;  %v4831_v27 = vsel %vm4675_vm13, %v3560_v44, %v1722_v55  ;;  %v4847_v44 = vsel %vm4675_vm13, %v3561_v34, %v1729_v62  ;;  %v3562_v55 = vrot.slane %v4496_v6, 9 }
  0xe0   : > { %1793 = vrot.lane.b32.xlu0 %v4783_v5, %s3905_s9  ;;  %v1743_v34 = vrot.slane %v4557_v2, 5  ;;  %v1750_v2 = vrot.slane %v4584_v45, 5 }
  0xe1   : > { %1795 = vrot.lane.b32.xlu1 %v4794_v3, %s3905_s9  ;;  %v4842_v51 = vsel %vm4675_vm13, %v1724_v38, %v1725_v48  ;;  %v3563_v48 = vrot.slane %v4545_v50, 9 }
  0xe2   : > { %v1506_v32 = vpop.permute.xlu0 %1505 }
  0xe3   : > { %1588 = vst.msk [vmem:[#allocation3 + $0x38] sm:$0xf] %vm1573_vm14, %v1506_v32  ;;  %v1736_v32 = vrot.slane %v4502_v20, 5 }
  0xe4   : > { %1797 = vrot.lane.b32.xlu0 %v4799_v17, %s3905_s9 }
  0xe5   : > { %1799 = vrot.lane.b32.xlu1 %v4810_v46, %s3905_s9  ;;  %v1738_v38 = vrot.slane %v1736_v32, 4  ;;  %v4862_v62 = vsel %vm4675_vm13, %v3562_v55, %v1736_v32  ;;  %v4877_v55 = vsel %vm4675_vm13, %v3563_v48, %v1743_v34  ;;  %v3564_v32 = vrot.slane %v4580_v30, 9 }
  0xe6   : > { %v1508_v8 = vpop.permute.xlu1 %1507 }
  0xe7   : > { %1589 = vst.msk [vmem:[#allocation3 + $0x3c] sm:$0xf] %vm1573_vm14, %v1508_v8  ;;  %v4857_v8 = vsel %vm4675_vm13, %v1731_v24, %v1732_v4  ;;  %v4872_v24 = vsel %vm4675_vm13, %v1738_v38, %v1739_v26  ;;  %v1745_v4 = vrot.slane %v1743_v34, 4  ;;  %v1752_v38 = vrot.slane %v1750_v2, 4 }
  0xe8   : > { %1801 = vrot.lane.b32.xlu0 %v4815_v29, %s3905_s9  ;;  %v1753_v26 = vrot.slane %v4590_v23, 5  ;;  %v4894_v48 = vsel %vm4675_vm13, %v3564_v32, %v1750_v2  ;;  %v1760_v23 = vrot.slane %v4636_v52, 5  ;;  %v3566_v32 = vrot.slane %v4652_v0, 9 }
  0xe9   : > { %1803 = vrot.lane.b32.xlu1 %v4826_v47, %s3905_s9  ;;  %v4889_v58 = vsel %vm4675_vm13, %v1745_v4, %v1746_v31 }
  0xea   : > { %v4904_v34 = vsel %vm4675_vm13, %v1752_v38, %v1753_v26  ;;  %v1767_v26 = vrot.slane %v4669_v37, 5 }
  0xec   : > { %1805 = vrot.lane.b32.xlu0 %v4831_v27, %s3905_s9 }
  0xed   : > { %1807 = vrot.lane.b32.xlu1 %v4842_v51, %s3905_s9 }
  0xf0   : > { %1809 = vrot.lane.b32.xlu0 %v4847_v44, %s3905_s9  ;;  %v1510_v20 = vpop.permute.xlu0 %1509 }
  0xf1   : > { %1811 = vrot.lane.b32.xlu1 %v4857_v8, %s3905_s9  ;;  %1590 = vst.msk [vmem:[#allocation3 + $0x40] sm:$0xf] %vm1573_vm14, %v1510_v20  ;;  %v1512_v50 = vpop.permute.xlu1 %1511  ;;  %v3565_v20 = vrot.slane %v4608_v18, 9 }
  0xf2   : > { %1591 = vst.msk [vmem:[#allocation3 + $0x44] sm:$0xf] %vm1573_vm14, %v1512_v50  ;;  %v1757_v50 = vrot.slane %v4620_v1, 5  ;;  %v1764_v1 = vrot.slane %v4662_v40, 5 }
  0xf4   : > { %1813 = vrot.lane.b32.xlu0 %v4862_v62, %s3905_s9  ;;  %v1759_v4 = vrot.slane %v1757_v50, 4  ;;  %v4909_v2 = vsel %vm4675_vm13, %v3565_v20, %v1757_v50  ;;  %v1766_v38 = vrot.slane %v1764_v1, 4  ;;  %v4926_v20 = vsel %vm4675_vm13, %v3566_v32, %v1764_v1  ;;  %v5895_v32 = vld [vmem:[#allocation8_spill] sm:$0xff] }
  0xf5   : > { %1815 = vrot.lane.b32.xlu1 %v4872_v24, %s3905_s9 }
  0xf6   : > { %v4921_v52 = vsel %vm4675_vm13, %v1759_v4, %v1760_v23 }
  0xf8   : > { %1817 = vrot.lane.b32.xlu0 %v4877_v55, %s3905_s9 }
  0xf9   : > { %1819 = vrot.lane.b32.xlu1 %v4889_v58, %s3905_s9  ;;  %v1514_v31 = vpop.permute.xlu0 %1513 }
  0xfa   : > { %1592 = vst.msk [vmem:[#allocation3 + $0x48] sm:$0xf] %vm1573_vm14, %v1514_v31 }
  0xfb   : > { %v1516_v18 = vpop.permute.xlu1 %1515 }
  0xfc   : > { %1821 = vrot.lane.b32.xlu0 %v4894_v48, %s3905_s9  ;;  %1593 = vst.msk [vmem:[#allocation3 + $0x4c] sm:$0xf] %vm1573_vm14, %v1516_v18  ;;  %v4934_v18 = vsel %vm4675_vm13, %v1766_v38, %v1767_v26  ;;  %v5896_v38 = vld [vmem:[#allocation9_spill] sm:$0xff] }
  0xfd   : > { %1823 = vrot.lane.b32.xlu1 %v4904_v34, %s3905_s9 }
 0x100   : > { %1825 = vrot.lane.b32.xlu0 %v4909_v2, %s3905_s9 }
 0x101   : > { %1827 = vrot.lane.b32.xlu1 %v4921_v52, %s3905_s9 }
 0x104   : > { %1829 = vrot.lane.b32.xlu0 %v4926_v20, %s3905_s9  ;;  %v1518_v50 = vpop.permute.xlu0 %1517 }
 0x105   : > { %1831 = vrot.lane.b32.xlu1 %v4934_v18, %s3905_s9  ;;  %1594 = vst.msk [vmem:[#allocation3 + $0x50] sm:$0xf] %vm1573_vm14, %v1518_v50  ;;  %v5897_v50 = vld [vmem:[#allocation10_spill] sm:$0xff]  ;;  %s235_s9 = scalar_lea.vmem %s5768_s5, %s3516_s21 }
 0x106   : > { %v1520_v1 = vpop.permute.xlu1 %1519 }
 0x107   : > { %1595 = vst.msk [vmem:[#allocation3 + $0x54] sm:$0xf] %vm1573_vm14, %v1520_v1 }
 0x108   : > { %1900 = vrot.lane.b32.xlu0 %v4122_v60, %s3906_s10 }
 0x109   : > { %1902 = vrot.lane.b32.xlu1 %v4124_v61, %s3906_s10 }
 0x10b   : > { %v1522_v37 = vpop.permute.xlu0 %1521 }
 0x10c   : > { %1904 = vrot.lane.b32.xlu0 %v4141_v12, %s3906_s10  ;;  %1596 = vst.msk [vmem:[#allocation3 + $0x58] sm:$0xf] %vm1573_vm14, %v1522_v37  ;;  %v5898_v37 = vld [vmem:[#allocation11_spill] sm:$0xff] }
 0x10d   : > { %1906 = vrot.lane.b32.xlu1 %v4149_v21, %s3906_s10 }
 0x10e   : > { %v1524_v4 = vpop.permute.xlu1 %1523 }
 0x10f   : > { %1597 = vst.msk [vmem:[#allocation3 + $0x5c] sm:$0xf] %vm1573_vm14, %v1524_v4 }
 0x110   : > { %1908 = vrot.lane.b32.xlu0 %v4155_v39, %s3906_s10 }
 0x111   : > { %1910 = vrot.lane.b32.xlu1 %v4157_v43, %s3906_s10 }
 0x114   : > { %1912 = vrot.lane.b32.xlu0 %v4226_v14, %s3906_s10 }
 0x115   : > { %1914 = vrot.lane.b32.xlu1 %v4238_v25, %s3906_s10 }
 0x118   : > { %1916 = vrot.lane.b32.xlu0 %v4255_v13, %s3906_s10  ;;  %v1526_v60 = vpop.permute.xlu0 %1525 }
 0x119   : > { %1918 = vrot.lane.b32.xlu1 %v4257_v15, %s3906_s10  ;;  %1598 = vst.msk [vmem:[#allocation3 + $0x60] sm:$0xf] %vm1573_vm14, %v1526_v60 }
 0x11c   : > { %1920 = vrot.lane.b32.xlu0 %v4285_v57, %s3906_s10  ;;  %v1528_v61 = vpop.permute.xlu1 %1527 }
 0x11d   : > { %1599 = vst.msk [vmem:[#allocation3 + $0x64] sm:$0xf] %vm1573_vm14, %v1528_v61  ;;  %1922 = vrot.lane.b32.xlu1 %v4297_v10, %s3906_s10 }
 0x120   : > { %1924 = vrot.lane.b32.xlu0 %v4325_v54, %s3906_s10 }
 0x121   : > { %1926 = vrot.lane.b32.xlu1 %v4338_v35, %s3906_s10 }
 0x122   : > { %v1530_v23 = vpop.permute.xlu0 %1529 }
 0x123   : > { %1600 = vst.msk [vmem:[#allocation3 + $0x68] sm:$0xf] %vm1573_vm14, %v1530_v23  ;;  %v1532_v31 = vpop.permute.xlu1 %1531  ;;  %v3865_v23 = vld [vmem:[%s5766_s3 + $0x10] ss:$0 sps:$4 sm:$0x33]  }
 0x124   : > { %1928 = vrot.lane.b32.xlu0 %v4376_v7, %s3906_s10  ;;  %1601 = vst.msk [vmem:[#allocation3 + $0x6c] sm:$0xf] %vm1573_vm14, %v1532_v31  ;;  %3846 = vmatprep.subr.msk.bf16.mxu0 %vm2921_vm1, %v3865_v23 }
 0x125   : > { %1930 = vrot.lane.b32.xlu1 %v4378_v19, %s3906_s10  ;;  %3847 = vmatprep.subr.msk.bf16.mxu1 %vm2921_vm1, %v3865_v23 }
 0x128   : > { %1932 = vrot.lane.b32.xlu0 %v4404_v56, %s3906_s10 }
 0x129   : > { %2053 = vrot.lane.b32.xlu1 %v5895_v32, %s3907_s11  ;;  %v3866_v32 = vld [vmem:[%s5766_s3 + $0x8] sm:$0xff]  }
 0x12b   : > { %v1534_v26 = vpop.permute.xlu0 %1533 }
 0x12c   : > { %2055 = vrot.lane.b32.xlu0 %v5896_v38, %s3907_s11  ;;  %1602 = vst.msk [vmem:[#allocation3 + $0x70] sm:$0xf] %vm1573_vm14, %v1534_v26  ;;  %v1536_v1 = vpop.permute.xlu1 %1535  ;;  %v3867_v38 = vld [vmem:[%s5766_s3] sm:$0xff]   ;;  %v5899_v26 = vld [vmem:[#allocation12_spill] sm:$0xff] }
 0x12d   : > { %2057 = vrot.lane.b32.xlu1 %v5897_v50, %s3907_s11  ;;  %1603 = vst.msk [vmem:[#allocation3 + $0x74] sm:$0xf] %vm1573_vm14, %v1536_v1 }
 0x130   : > { %2059 = vrot.lane.b32.xlu0 %v5898_v37, %s3907_s11 }
 0x131   : > { %2190 = vrot.lane.b32.xlu1 %v4700_v28, %s3908_s12 }
 0x134   : > { %2192 = vrot.lane.b32.xlu0 %v4709_v63, %s3908_s12 }
 0x135   : > { %2194 = vrot.lane.b32.xlu1 %v4713_v9, %s3908_s12 }
 0x136   : > { %v1538_v4 = vpop.permute.xlu0 %1537 }
 0x137   : > { %1604 = vst.msk [vmem:[#allocation3 + $0x78] sm:$0xf] %vm1573_vm14, %v1538_v4  ;;  %v1540_v60 = vpop.permute.xlu1 %1539 }
 0x138   : > { %2196 = vrot.lane.b32.xlu0 %v4734_v42, %s3908_s12  ;;  %1605 = vst.msk [vmem:[#allocation3 + $0x7c] sm:$0xf] %vm1573_vm14, %v1540_v60 }
 0x139   : > { %2321 = vrot.lane.b32.xlu1 %v4141_v12, %s3909_s13  ;;  %v2923_v12 = vsel %vm2921_vm1, %v3865_v23, 0  ;;  %v5902_v23 = vld [vmem:[#allocation15_spill] sm:$0xff] }
 0x13a   : > { %v1770_v61 = vpop.permute.xlu0 %1769  ;;  %3803 = vmatpush3.bf16.msra.mxu0 %v2923_v12  ;;  %3843 = vmatpush3.bf16.msra.mxu1 %v2923_v12 }
 0x13b   : > { %1866 = vst.msk [vmem:[#allocation3] sm:$0xf] %vm1865_vm15, %v1770_v61  ;;  %v1772_v28 = vpop.permute.xlu1 %1771  ;;  %3804 = vmatprep.subr.bf16.mxu0 %v3866_v32  ;;  %3841 = vmatprep.subr.bf16.mxu1 %v3866_v32 }
 0x13c   : > { %2323 = vrot.lane.b32.xlu0 %v4149_v21, %s3909_s13  ;;  %1867 = vst.msk [vmem:[#allocation3 + $0x4] sm:$0xf] %vm1865_vm15, %v1772_v28 }
 0x13d   : > { %2325 = vrot.lane.b32.xlu1 %v4155_v39, %s3909_s13 }
 0x13e   : > { %v1774_v63 = vpop.permute.xlu0 %1773  ;;  %3805 = vmatpush3.bf16.msra.mxu0 %v3866_v32  ;;  %3844 = vmatpush3.bf16.msra.mxu1 %v3866_v32 }
 0x13f   : > { %1868 = vst.msk [vmem:[#allocation3 + $0x8] sm:$0xf] %vm1865_vm15, %v1774_v63  ;;  %v1776_v21 = vpop.permute.xlu1 %1775  ;;  %3806 = vmatprep.subr.bf16.mxu0 %v3867_v38  ;;  %3842 = vmatprep.subr.bf16.mxu1 %v3867_v38  ;;  %v5901_v63 = vld [vmem:[#allocation14_spill] sm:$0xff] }
 0x140   : > { %2327 = vrot.lane.b32.xlu0 %v4157_v43, %s3909_s13  ;;  %1869 = vst.msk [vmem:[#allocation3 + $0xc] sm:$0xf] %vm1865_vm15, %v1776_v21 }
 0x141   : > { %2474 = vrot.lane.b32.xlu1 %v5897_v50, %s3910_s20  ;;  %v5900_v50 = vld [vmem:[#allocation13_spill] sm:$0xff] }
 0x142   : > { %v1778_v31 = vpop.permute.xlu0 %1777  ;;  %3807 = vmatpush3.bf16.msra.mxu0 %v3867_v38  ;;  %3845 = vmatpush3.bf16.msra.mxu1 %v3867_v38 }
 0x143   : > { %1870 = vst.msk [vmem:[#allocation3 + $0x10] sm:$0xf] %vm1865_vm15, %v1778_v31  ;;  %v1780_v39 = vpop.permute.xlu1 %1779 }
 0x144   : > { %2476 = vrot.lane.b32.xlu0 %v5898_v37, %s3910_s20  ;;  %1871 = vst.msk [vmem:[#allocation3 + $0x14] sm:$0xf] %vm1865_vm15, %v1780_v39 }
 0x145   : > { %2478 = vrot.lane.b32.xlu1 %v5899_v26, %s3910_s20 }
 0x146   : > { %v1782_v43 = vpop.permute.xlu0 %1781 }
 0x147   : > { %1872 = vst.msk [vmem:[#allocation3 + $0x18] sm:$0xf] %vm1865_vm15, %v1782_v43  ;;  %v1784_v1 = vpop.permute.xlu1 %1783 }
 0x148   : > { %2480 = vrot.lane.b32.xlu0 %v5900_v50, %s3910_s20  ;;  %1873 = vst.msk [vmem:[#allocation3 + $0x1c] sm:$0xf] %vm1865_vm15, %v1784_v1 }
 0x149   : > { %2611 = vrot.lane.b32.xlu1 %v4713_v9, %s3911_s25 }
 0x14a   : > { %v1786_v37 = vpop.permute.xlu0 %1785 }
 0x14b   : > { %1874 = vst.msk [vmem:[#allocation3 + $0x20] sm:$0xf] %vm1865_vm15, %v1786_v37  ;;  %v1788_v4 = vpop.permute.xlu1 %1787 }
 0x14c   : > { %2613 = vrot.lane.b32.xlu0 %v4734_v42, %s3911_s25  ;;  %1875 = vst.msk [vmem:[#allocation3 + $0x24] sm:$0xf] %vm1865_vm15, %v1788_v4 }
 0x14d   : > { %2615 = vrot.lane.b32.xlu1 %v4738_v33, %s3911_s25 }
 0x14e   : > { %v1790_v60 = vpop.permute.xlu0 %1789 }
 0x14f   : > { %1876 = vst.msk [vmem:[#allocation3 + $0x28] sm:$0xf] %vm1865_vm15, %v1790_v60  ;;  %v1792_v61 = vpop.permute.xlu1 %1791 }
 0x150   : > { %2617 = vrot.lane.b32.xlu0 %v4749_v36, %s3911_s25  ;;  %1877 = vst.msk [vmem:[#allocation3 + $0x2c] sm:$0xf] %vm1865_vm15, %v1792_v61 }
 0x151   : > { %2061 = vrot.lane.b32.xlu1 %v5899_v26, %s3907_s11 }
 0x152   : > { %v1794_v28 = vpop.permute.xlu0 %1793 }
 0x153   : > { %1878 = vst.msk [vmem:[#allocation3 + $0x30] sm:$0xf] %vm1865_vm15, %v1794_v28  ;;  %v1796_v9 = vpop.permute.xlu1 %1795  ;;  %v5905_v28 = vld [vmem:[#allocation18_spill] sm:$0xff] }
 0x154   : > { %2063 = vrot.lane.b32.xlu0 %v5900_v50, %s3907_s11  ;;  %1879 = vst.msk [vmem:[#allocation3 + $0x34] sm:$0xf] %vm1865_vm15, %v1796_v9  ;;  %v5906_v9 = vld [vmem:[#allocation19_spill] sm:$0xff] }
 0x155   : > { %2065 = vrot.lane.b32.xlu1 %v5901_v63, %s3907_s11 }
 0x156   : > { %v1798_v42 = vpop.permute.xlu0 %1797 }
 0x157   : > { %1880 = vst.msk [vmem:[#allocation3 + $0x38] sm:$0xf] %vm1865_vm15, %v1798_v42  ;;  %v1800_v12 = vpop.permute.xlu1 %1799 }
 0x158   : > { %2067 = vrot.lane.b32.xlu0 %v5902_v23, %s3907_s11  ;;  %1881 = vst.msk [vmem:[#allocation3 + $0x3c] sm:$0xf] %vm1865_vm15, %v1800_v12 }
 0x159   : > { %2198 = vrot.lane.b32.xlu1 %v4738_v33, %s3908_s12 }
 0x15a   : > { %v1802_v21 = vpop.permute.xlu0 %1801 }
 0x15b   : > { %1882 = vst.msk [vmem:[#allocation3 + $0x40] sm:$0xf] %vm1865_vm15, %v1802_v21  ;;  %v1804_v31 = vpop.permute.xlu1 %1803 }
 0x15c   : > { %2200 = vrot.lane.b32.xlu0 %v4749_v36, %s3908_s12  ;;  %1883 = vst.msk [vmem:[#allocation3 + $0x44] sm:$0xf] %vm1865_vm15, %v1804_v31 }
 0x15d   : > { %2202 = vrot.lane.b32.xlu1 %v4753_v59, %s3908_s12 }
 0x15e   : > { %v1806_v32 = vpop.permute.xlu0 %1805 }
 0x15f   : > { %1884 = vst.msk [vmem:[#allocation3 + $0x48] sm:$0xf] %vm1865_vm15, %v1806_v32  ;;  %v1808_v39 = vpop.permute.xlu1 %1807 }
 0x160   : > { %2204 = vrot.lane.b32.xlu0 %v4763_v49, %s3908_s12  ;;  %1885 = vst.msk [vmem:[#allocation3 + $0x4c] sm:$0xf] %vm1865_vm15, %v1808_v39 }
 0x161   : > { %2329 = vrot.lane.b32.xlu1 %v4226_v14, %s3909_s13 }
 0x162   : > { %v1810_v43 = vpop.permute.xlu0 %1809 }
 0x163   : > { %1886 = vst.msk [vmem:[#allocation3 + $0x50] sm:$0xf] %vm1865_vm15, %v1810_v43  ;;  %v1812_v33 = vpop.permute.xlu1 %1811 }
 0x164   : > { %2331 = vrot.lane.b32.xlu0 %v4238_v25, %s3909_s13  ;;  %1887 = vst.msk [vmem:[#allocation3 + $0x54] sm:$0xf] %vm1865_vm15, %v1812_v33 }
 0x165   : > { %2333 = vrot.lane.b32.xlu1 %v4255_v13, %s3909_s13  ;;  %v5903_v13 = vld [vmem:[#allocation16_spill] sm:$0xff] }
 0x166   : > { %v1814_v36 = vpop.permute.xlu0 %1813 }
 0x167   : > { %1888 = vst.msk [vmem:[#allocation3 + $0x58] sm:$0xf] %vm1865_vm15, %v1814_v36  ;;  %v1816_v38 = vpop.permute.xlu1 %1815 }
 0x168   : > { %2335 = vrot.lane.b32.xlu0 %v4257_v15, %s3909_s13  ;;  %1889 = vst.msk [vmem:[#allocation3 + $0x5c] sm:$0xf] %vm1865_vm15, %v1816_v38  ;;  %v5904_v15 = vld [vmem:[#allocation17_spill] sm:$0xff] }
 0x169   : > { %2482 = vrot.lane.b32.xlu1 %v5901_v63, %s3910_s20 }
 0x16a   : > { %v1818_v26 = vpop.permute.xlu0 %1817 }
 0x16b   : > { %1890 = vst.msk [vmem:[#allocation3 + $0x60] sm:$0xf] %vm1865_vm15, %v1818_v26  ;;  %v1820_v14 = vpop.permute.xlu1 %1819 }
 0x16c   : > { %2484 = vrot.lane.b32.xlu0 %v5902_v23, %s3910_s20  ;;  %1891 = vst.msk [vmem:[#allocation3 + $0x64] sm:$0xf] %vm1865_vm15, %v1820_v14 }
 0x16d   : > { %2486 = vrot.lane.b32.xlu1 %v5903_v13, %s3910_s20 }
 0x16e   : > { %v1822_v25 = vpop.permute.xlu0 %1821 }
 0x16f   : > { %1892 = vst.msk [vmem:[#allocation3 + $0x68] sm:$0xf] %vm1865_vm15, %v1822_v25  ;;  %v1824_v50 = vpop.permute.xlu1 %1823  ;;  %v5909_v25 = vld [vmem:[#allocation22_spill] sm:$0xff] }
 0x170   : > { %2488 = vrot.lane.b32.xlu0 %v5904_v15, %s3910_s20  ;;  %1893 = vst.msk [vmem:[#allocation3 + $0x6c] sm:$0xf] %vm1865_vm15, %v1824_v50 }
 0x171   : > { %2619 = vrot.lane.b32.xlu1 %v4753_v59, %s3911_s25 }
 0x172   : > { %v1826_v1 = vpop.permute.xlu0 %1825 }
 0x173   : > { %1894 = vst.msk [vmem:[#allocation3 + $0x70] sm:$0xf] %vm1865_vm15, %v1826_v1  ;;  %v1828_v37 = vpop.permute.xlu1 %1827 }
 0x174   : > { %2621 = vrot.lane.b32.xlu0 %v4763_v49, %s3911_s25  ;;  %1895 = vst.msk [vmem:[#allocation3 + $0x74] sm:$0xf] %vm1865_vm15, %v1828_v37 }
 0x175   : > { %2623 = vrot.lane.b32.xlu1 %v4768_v22, %s3911_s25 }
 0x176   : > { %v1830_v4 = vpop.permute.xlu0 %1829 }
 0x177   : > { %1896 = vst.msk [vmem:[#allocation3 + $0x78] sm:$0xf] %vm1865_vm15, %v1830_v4  ;;  %v1832_v60 = vpop.permute.xlu1 %1831 }
 0x178   : > { %2625 = vrot.lane.b32.xlu0 %v4779_v16, %s3911_s25  ;;  %1897 = vst.msk [vmem:[#allocation3 + $0x7c] sm:$0xf] %vm1865_vm15, %v1832_v60 }
 0x179   : > { %2069 = vrot.lane.b32.xlu1 %v5903_v13, %s3907_s11  ;;  %v5910_v13 = vld [vmem:[#allocation24_spill] sm:$0xff] }
 0x17a   : > { %v1901_v61 = vpop.permute.xlu0 %1900 }
 0x17b   : > { %1997 = vst.msk [vmem:[#allocation3] sm:$0xf] %vm1996_vm2, %v1901_v61  ;;  %v1903_v59 = vpop.permute.xlu1 %1902  ;;  %v5911_v61 = vld [vmem:[#allocation23_spill] sm:$0xff] }
 0x17c   : > { %2071 = vrot.lane.b32.xlu0 %v5904_v15, %s3907_s11  ;;  %1998 = vst.msk [vmem:[#allocation3 + $0x4] sm:$0xf] %vm1996_vm2, %v1903_v59 }
 0x17d   : > { %2073 = vrot.lane.b32.xlu1 %v5905_v28, %s3907_s11 }
 0x17e   : > { %v1905_v49 = vpop.permute.xlu0 %1904 }
 0x17f   : > { %1999 = vst.msk [vmem:[#allocation3 + $0x8] sm:$0xf] %vm1996_vm2, %v1905_v49  ;;  %v1907_v42 = vpop.permute.xlu1 %1906 }
 0x180   : > { %2075 = vrot.lane.b32.xlu0 %v5906_v9, %s3907_s11  ;;  %2000 = vst.msk [vmem:[#allocation3 + $0xc] sm:$0xf] %vm1996_vm2, %v1907_v42 }
 0x181   : > { %2206 = vrot.lane.b32.xlu1 %v4768_v22, %s3908_s12 }
 0x182   : > { %v1909_v63 = vpop.permute.xlu0 %1908 }
 0x183   : > { %2001 = vst.msk [vmem:[#allocation3 + $0x10] sm:$0xf] %vm1996_vm2, %v1909_v63  ;;  %v1911_v23 = vpop.permute.xlu1 %1910 }
 0x184   : > { %2208 = vrot.lane.b32.xlu0 %v4779_v16, %s3908_s12  ;;  %2002 = vst.msk [vmem:[#allocation3 + $0x14] sm:$0xf] %vm1996_vm2, %v1911_v23  ;;  %v3782_v23 = vld [vmem:[%s4022_s24 + $0x78] sm:$0xff]  }
 0x185   : > { %2210 = vrot.lane.b32.xlu1 %v4783_v5, %s3908_s12 }
 0x186   : > { %v1913_v12 = vpop.permute.xlu0 %1912 }
 0x187   : > { %2003 = vst.msk [vmem:[#allocation3 + $0x18] sm:$0xf] %vm1996_vm2, %v1913_v12  ;;  %v1915_v21 = vpop.permute.xlu1 %1914 }
 0x188   : > { %2212 = vrot.lane.b32.xlu0 %v4794_v3, %s3908_s12  ;;  %2004 = vst.msk [vmem:[#allocation3 + $0x1c] sm:$0xf] %vm1996_vm2, %v1915_v21 }
 0x189   : > { %2337 = vrot.lane.b32.xlu1 %v4285_v57, %s3909_s13 }
 0x18a   : > { %v1917_v31 = vpop.permute.xlu0 %1916 }
 0x18b   : > { %2005 = vst.msk [vmem:[#allocation3 + $0x20] sm:$0xf] %vm1996_vm2, %v1917_v31  ;;  %v1919_v22 = vpop.permute.xlu1 %1918  ;;  %v3766_v31 = vunpack.c.l.bf16 %v3782_v23 }
 0x18c   : > { %2339 = vrot.lane.b32.xlu0 %v4297_v10, %s3909_s13  ;;  %2006 = vst.msk [vmem:[#allocation3 + $0x24] sm:$0xf] %vm1996_vm2, %v1919_v22  ;;  %v3767_v22 = vunpack.c.h.bf16 %v3782_v23  ;;  %v1001_v23 = vld [vmem:[#allocation2 + $0xc8] sm:$0x1] }
 0x18d   : > { %2341 = vrot.lane.b32.xlu1 %v4325_v54, %s3909_s13  ;;  %v5907_v54 = vld [vmem:[#allocation20_spill] sm:$0xff] }
 0x18e   : > { %v1921_v16 = vpop.permute.xlu0 %1920 }
 0x18f   : > { %2007 = vst.msk [vmem:[#allocation3 + $0x28] sm:$0xf] %vm1996_vm2, %v1921_v16  ;;  %v1923_v32 = vpop.permute.xlu1 %1922 }
 0x190   : > { %2343 = vrot.lane.b32.xlu0 %v4338_v35, %s3909_s13  ;;  %2008 = vst.msk [vmem:[#allocation3 + $0x2c] sm:$0xf] %vm1996_vm2, %v1923_v32  ;;  %v5908_v35 = vld [vmem:[#allocation21_spill] sm:$0xff] }
 0x191   : > { %2490 = vrot.lane.b32.xlu1 %v5905_v28, %s3910_s20  ;;  %v5913_v28 = vld [vmem:[#allocation26_spill] sm:$0xff] }
 0x192   : > { %v1925_v39 = vpop.permute.xlu0 %1924 }
 0x193   : > { %2009 = vst.msk [vmem:[#allocation3 + $0x30] sm:$0xf] %vm1996_vm2, %v1925_v39  ;;  %v1927_v57 = vpop.permute.xlu1 %1926 }
 0x194   : > { %2492 = vrot.lane.b32.xlu0 %v5906_v9, %s3910_s20  ;;  %2010 = vst.msk [vmem:[#allocation3 + $0x34] sm:$0xf] %vm1996_vm2, %v1927_v57 }
 0x195   : > { %2494 = vrot.lane.b32.xlu1 %v5907_v54, %s3910_s20 }
 0x196   : > { %v1929_v10 = vpop.permute.xlu0 %1928 }
 0x197   : > { %2011 = vst.msk [vmem:[#allocation3 + $0x38] sm:$0xf] %vm1996_vm2, %v1929_v10  ;;  %v1931_v43 = vpop.permute.xlu1 %1930  ;;  %v3894_v10 = vld [vmem:[%s5765_s2] ss:$0 sm:$0xff] }
 0x198   : > { %2496 = vrot.lane.b32.xlu0 %v5908_v35, %s3910_s20  ;;  %2012 = vst.msk [vmem:[#allocation3 + $0x3c] sm:$0xf] %vm1996_vm2, %v1931_v43 }
 0x199   : > { %2627 = vrot.lane.b32.xlu1 %v4783_v5, %s3911_s25 }
 0x19a   : > { %v1933_v33 = vpop.permute.xlu0 %1932 }
 0x19b   : > { %2013 = vst.msk [vmem:[#allocation3 + $0x40] sm:$0xf] %vm1996_vm2, %v1933_v33  ;;  %v2054_v36 = vpop.permute.xlu1 %2053 }
 0x19c   : > { %2629 = vrot.lane.b32.xlu0 %v4794_v3, %s3911_s25  ;;  %2150 = vst.msk [vmem:[#allocation3] sm:$0xf] %vm2149_vm3, %v2054_v36 }
 0x19d   : > { %2631 = vrot.lane.b32.xlu1 %v4799_v17, %s3911_s25 }
 0x19e   : > { %v2056_v38 = vpop.permute.xlu0 %2055 }
 0x19f   : > { %2151 = vst.msk [vmem:[#allocation3 + $0x4] sm:$0xf] %vm2149_vm3, %v2056_v38  ;;  %v2058_v26 = vpop.permute.xlu1 %2057 }
 0x1a0   : > { %2633 = vrot.lane.b32.xlu0 %v4810_v46, %s3911_s25  ;;  %2152 = vst.msk [vmem:[#allocation3 + $0x8] sm:$0xf] %vm2149_vm3, %v2058_v26 }
 0x1a1   : > { %2077 = vrot.lane.b32.xlu1 %v5907_v54, %s3907_s11 }
 0x1a2   : > { %v2060_v14 = vpop.permute.xlu0 %2059 }
 0x1a3   : > { %2153 = vst.msk [vmem:[#allocation3 + $0xc] sm:$0xf] %vm2149_vm3, %v2060_v14  ;;  %v2191_v5 = vpop.permute.xlu1 %2190 }
 0x1a4   : > { %2079 = vrot.lane.b32.xlu0 %v5908_v35, %s3907_s11  ;;  %2287 = vst.msk [vmem:[#allocation3] sm:$0xf] %vm2286_vm4, %v2191_v5 }
 0x1a5   : > { %2081 = vrot.lane.b32.xlu1 %v5909_v25, %s3907_s11 }
 0x1a6   : > { %v2193_v3 = vpop.permute.xlu0 %2192 }
 0x1a7   : > { %2288 = vst.msk [vmem:[#allocation3 + $0x4] sm:$0xf] %vm2286_vm4, %v2193_v3  ;;  %v2195_v15 = vpop.permute.xlu1 %2194 }
 0x1a8   : > { %2083 = vrot.lane.b32.xlu0 %v5910_v13, %s3907_s11  ;;  %2289 = vst.msk [vmem:[#allocation3 + $0x8] sm:$0xf] %vm2286_vm4, %v2195_v15 }
 0x1a9   : > { %2214 = vrot.lane.b32.xlu1 %v4799_v17, %s3908_s12 }
 0x1aa   : > { %v2197_v50 = vpop.permute.xlu0 %2196 }
 0x1ab   : > { %2290 = vst.msk [vmem:[#allocation3 + $0xc] sm:$0xf] %vm2286_vm4, %v2197_v50  ;;  %v2322_v1 = vpop.permute.xlu1 %2321 }
 0x1ac   : > { %2216 = vrot.lane.b32.xlu0 %v4810_v46, %s3908_s12  ;;  %2418 = vst.msk [vmem:[#allocation3] sm:$0xf] %vm2417_vm5, %v2322_v1 }
 0x1ad   : > { %2218 = vrot.lane.b32.xlu1 %v4815_v29, %s3908_s12 }
 0x1ae   : > { %v2324_v37 = vpop.permute.xlu0 %2323 }
 0x1af   : > { %2419 = vst.msk [vmem:[#allocation3 + $0x4] sm:$0xf] %vm2417_vm5, %v2324_v37  ;;  %v2326_v4 = vpop.permute.xlu1 %2325 }
 0x1b0   : > { %2220 = vrot.lane.b32.xlu0 %v4826_v47, %s3908_s12  ;;  %2420 = vst.msk [vmem:[#allocation3 + $0x8] sm:$0xf] %vm2417_vm5, %v2326_v4  ;;  %v5914_v4 = vld [vmem:[#allocation27_spill] sm:$0xff] }
 0x1b1   : > { %2345 = vrot.lane.b32.xlu1 %v4376_v7, %s3909_s13 }
 0x1b2   : > { %v2328_v60 = vpop.permute.xlu0 %2327 }
 0x1b3   : > { %2421 = vst.msk [vmem:[#allocation3 + $0xc] sm:$0xf] %vm2417_vm5, %v2328_v60  ;;  %v2475_v17 = vpop.permute.xlu1 %2474 }
 0x1b4   : > { %2347 = vrot.lane.b32.xlu0 %v4378_v19, %s3909_s13  ;;  %2571 = vst.msk [vmem:[#allocation3] sm:$0xf] %vm2570_vm6, %v2475_v17 }
 0x1b5   : > { %2349 = vrot.lane.b32.xlu1 %v4404_v56, %s3909_s13  ;;  %v5912_v56 = vld [vmem:[#allocation25_spill] sm:$0xff] }
 0x1b6   : > { %v2477_v46 = vpop.permute.xlu0 %2476 }
 0x1b7   : > { %2572 = vst.msk [vmem:[#allocation3 + $0x4] sm:$0xf] %vm2570_vm6, %v2477_v46  ;;  %v2479_v59 = vpop.permute.xlu1 %2478 }
 0x1b8   : > { %2351 = vrot.lane.b32.xlu0 %v5911_v61, %s3909_s13  ;;  %2573 = vst.msk [vmem:[#allocation3 + $0x8] sm:$0xf] %vm2570_vm6, %v2479_v59  ;;  %v997_v59 = vld [vmem:[#allocation2 + $0xc0] sm:$0xf] }
 0x1b9   : > { %2498 = vrot.lane.b32.xlu1 %v5909_v25, %s3910_s20 }
 0x1ba   : > { %v2481_v49 = vpop.permute.xlu0 %2480 }
 0x1bb   : > { %2574 = vst.msk [vmem:[#allocation3 + $0xc] sm:$0xf] %vm2570_vm6, %v2481_v49  ;;  %v2612_v7 = vpop.permute.xlu1 %2611 }
 0x1bc   : > { %2500 = vrot.lane.b32.xlu0 %v5910_v13, %s3910_s20  ;;  %2708 = vst.msk [vmem:[#allocation3] sm:$0xf] %vm2707_vm11, %v2612_v7 }
 0x1bd   : > { %2502 = vrot.lane.b32.xlu1 %v5912_v56, %s3910_s20 }
 0x1be   : > { %v2614_v19 = vpop.permute.xlu0 %2613 }
 0x1bf   : > { %2709 = vst.msk [vmem:[#allocation3 + $0x4] sm:$0xf] %vm2707_vm11, %v2614_v19  ;;  %v2616_v9 = vpop.permute.xlu1 %2615 }
 0x1c0   : > { %2504 = vrot.lane.b32.xlu0 %v5913_v28, %s3910_s20  ;;  %2710 = vst.msk [vmem:[#allocation3 + $0x8] sm:$0xf] %vm2707_vm11, %v2616_v9 }
 0x1c1   : > { %2635 = vrot.lane.b32.xlu1 %v4815_v29, %s3911_s25  ;;  %v3893_v29 = vld [vmem:[%s5764_s1] ss:$0 sm:$0xff] }
 0x1c2   : > { %v2618_v42 = vpop.permute.xlu0 %2617  ;;  %v395_v16 = vmul.f32 %v3893_v29, %v3767_v22 }
 0x1c3   : > { %2711 = vst.msk [vmem:[#allocation3 + $0xc] sm:$0xf] %vm2707_vm11, %v2618_v42  ;;  %v2062_v63 = vpop.permute.xlu1 %2061 }
 0x1c4   : > { %2637 = vrot.lane.b32.xlu0 %v4826_v47, %s3911_s25  ;;  %2154 = vst.msk [vmem:[#allocation3 + $0x10] sm:$0xf] %vm2149_vm3, %v2062_v63  ;;  %v394_v47 = vmul.f32 %v3893_v29, %v3766_v31  ;;  %v434_v35 = vadd.f32 %v3894_v10, %v395_v16 }
 0x1c5   : > { %2639 = vrot.lane.b32.xlu1 %v4831_v27, %s3911_s25 }
 0x1c6   : > { %v2064_v12 = vpop.permute.xlu0 %2063  ;;  %v3868_v21 = vld [vmem:[#allocation3] sm:$0xff]   ;;  %v433_v54 = vadd.f32 %v3894_v10, %v394_v47  ;;  %v466_v33 = vmax.f32 %v434_v35, 0.0  ;;  %v5921_v35 = vld [vmem:[#allocation31_spill] sm:$0xff] }
 0x1c7   : > { %2155 = vst.msk [vmem:[#allocation3 + $0x14] sm:$0xf] %vm2149_vm3, %v2064_v12  ;;  %3808 = vmatprep.mubr.msk.bf16.mxu0 %vm2872_vm12, %v3868_v21  ;;  %v2066_v32 = vpop.permute.xlu1 %2065 }
 0x1c8   : > { %2641 = vrot.lane.b32.xlu0 %v4842_v51, %s3911_s25  ;;  %2156 = vst.msk [vmem:[#allocation3 + $0x18] sm:$0xf] %vm2149_vm3, %v2066_v32  ;;  %v465_v43 = vmax.f32 %v433_v54, 0.0  ;;  %v3671_v14 = vpack.c.bf16 %v466_v33, %v466_v33 }
 0x1c9   : > { %1934 = vrot.lane.b32.xlu1 %v5911_v61, %s3906_s10 }
 0x1ca   : > { %v2068_v39 = vpop.permute.xlu0 %2067  ;;  %v3869_v57 = vld [vmem:[#allocation3 + $0x8] sm:$0xff]   ;;  %v3670_v26 = vpack.c.bf16 %v465_v43, %v465_v43  ;;  %v830_v3 = vshrl.u32 %v3671_v14, 16  ;;  %v833_v37 = vshll.u32 %v3671_v14, 16 }
 0x1cb   : > { %2157 = vst.msk [vmem:[#allocation3 + $0x1c] sm:$0xf] %vm2149_vm3, %v2068_v39  ;;  %3809 = vmatmul.mubr.msk.bf16.vlgmr.msra.gmra.mxu0 %vm2872_vm12, %v3869_v57  ;;  %v2199_v36 = vpop.permute.xlu1 %2198 }
 0x1cc   : > { %1936 = vrot.lane.b32.xlu0 %v4453_v41, %s3906_s10  ;;  %2291 = vst.msk [vmem:[#allocation3 + $0x10] sm:$0xf] %vm2286_vm4, %v2199_v36  ;;  %v822_v5 = vshrl.u32 %v3670_v26, 16  ;;  %v825_v50 = vshll.u32 %v3670_v26, 16  ;;  %v832_v1 = vrot.slane %v830_v3, 7 }
 0x1cd   : > { %1938 = vrot.lane.b32.xlu1 %v4473_v53, %s3906_s10 }
 0x1ce   : > { %v2201_v38 = vpop.permute.xlu0 %2200  ;;  %v824_v15 = vrot.slane %v822_v5, 7  ;;  %v835_v46 = vor.u32 %v833_v37, %v832_v1  ;;  %v837_v42 = vrot.slane %v832_v1, 4  ;;  %v5925_v37 = vld [vmem:[#allocation35_spill] sm:$0xff] }
 0x1cf   : > { %2292 = vst.msk [vmem:[#allocation3 + $0x14] sm:$0xf] %vm2286_vm4, %v2201_v38  ;;  %v2203_v25 = vpop.permute.xlu1 %2202 }
 0x1d0   : > { %2085 = vrot.lane.b32.xlu0 %v5912_v56, %s3907_s11  ;;  %2293 = vst.msk [vmem:[#allocation3 + $0x18] sm:$0xf] %vm2286_vm4, %v2203_v25  ;;  %v827_v60 = vor.u32 %v825_v50, %v824_v15  ;;  %v828_v17 = vrot.slane %v824_v15, 4  ;;  %v1002_v31 = vsel %vm4087_vm10, %v837_v42, %v1001_v23  ;;  %v5924_v15 = vld [vmem:[#allocation34_spill] sm:$0xff] }
 0x1d1   : > { %2087 = vrot.lane.b32.xlu1 %v5913_v28, %s3907_s11  ;;  %v5917_v28 = vld [vmem:[#allocation29_spill] sm:$0xff]  ;;  %1003 = vst [vmem:[#allocation2 + $0xc8] sm:$0x1] %v1002_v31 }
 0x1d2   : > { %v2205_v13 = vpop.permute.xlu0 %2204  ;;  %v998_v19 = vsel %vm4081_vm9, %v827_v60, %v997_v59  ;;  %v836_v9 = vsel %vm4074_vm8, %v828_v17, %v835_v46  ;;  %vm3419_vm8 = vcmask 25600  }
 0x1d3   : > { %2294 = vst.msk [vmem:[#allocation3 + $0x1c] sm:$0xf] %vm2286_vm4, %v2205_v13  ;;  %v2330_v61 = vpop.permute.xlu1 %2329  ;;  %999 = vst [vmem:[#allocation2 + $0xc0] sm:$0xf] %v998_v19 }
 0x1d4   : > { %2089 = vrot.lane.b32.xlu0 %v5914_v4, %s3907_s11  ;;  %2422 = vst.msk [vmem:[#allocation3 + $0x10] sm:$0xf] %vm2417_vm5, %v2330_v61 }
 0x1d5   : > { %2091 = vrot.lane.b32.xlu1 %v5917_v28, %s3907_s11  ;;  %1000 = vst.msk [vmem:[#allocation2 + $0xc4] sm:$0xf] %vm237_vm0, %v836_v9  ;;  %v5926_v9 = vld [vmem:[#allocation37_spill] sm:$0xff] }
 0x1d6   : > { %v2332_v49 = vpop.permute.xlu0 %2331 }
 0x1d7   : > { %2423 = vst.msk [vmem:[#allocation3 + $0x14] sm:$0xf] %vm2417_vm5, %v2332_v49  ;;  %v2334_v63 = vpop.permute.xlu1 %2333 }
 0x1d8   : > { %2222 = vrot.lane.b32.xlu0 %v4831_v27, %s3908_s12  ;;  %2424 = vst.msk [vmem:[#allocation3 + $0x18] sm:$0xf] %vm2417_vm5, %v2334_v63  ;;  %v5927_v63 = vld [vmem:[#allocation39_spill] sm:$0xff] }
 0x1d9   : > { %2224 = vrot.lane.b32.xlu1 %v4842_v51, %s3908_s12 }
 0x1da   : > { %v2336_v12 = vpop.permute.xlu0 %2335 }
 0x1db   : > { %2425 = vst.msk [vmem:[#allocation3 + $0x1c] sm:$0xf] %vm2417_vm5, %v2336_v12  ;;  %v2483_v22 = vpop.permute.xlu1 %2482 }
 0x1dc   : > { %2226 = vrot.lane.b32.xlu0 %v4847_v44, %s3908_s12  ;;  %2575 = vst.msk [vmem:[#allocation3 + $0x10] sm:$0xf] %vm2570_vm6, %v2483_v22 }
 0x1dd   : > { %2228 = vrot.lane.b32.xlu1 %v4857_v8, %s3908_s12 }
 0x1de   : > { %v2485_v27 = vpop.permute.xlu0 %2484 }
 0x1df   : > { %2576 = vst.msk [vmem:[#allocation3 + $0x14] sm:$0xf] %vm2570_vm6, %v2485_v27  ;;  %v2487_v29 = vpop.permute.xlu1 %2486 }
 0x1e0   : > { %2353 = vrot.lane.b32.xlu0 %v4453_v41, %s3909_s13  ;;  %2577 = vst.msk [vmem:[#allocation3 + $0x18] sm:$0xf] %vm2570_vm6, %v2487_v29  ;;  %v5919_v41 = vld [vmem:[#allocation28_spill] sm:$0xff] }
 0x1e1   : > { %2355 = vrot.lane.b32.xlu1 %v4473_v53, %s3909_s13  ;;  %v5920_v53 = vld [vmem:[#allocation30_spill] sm:$0xff] }
 0x1e2   : > { %v2489_v47 = vpop.permute.xlu0 %2488 }
 0x1e3   : > { %2578 = vst.msk [vmem:[#allocation3 + $0x1c] sm:$0xf] %vm2570_vm6, %v2489_v47  ;;  %v2620_v51 = vpop.permute.xlu1 %2619 }
 0x1e4   : > { %2357 = vrot.lane.b32.xlu0 %v4496_v6, %s3909_s13  ;;  %2712 = vst.msk [vmem:[#allocation3 + $0x10] sm:$0xf] %vm2707_vm11, %v2620_v51 }
 0x1e5   : > { %2359 = vrot.lane.b32.xlu1 %v5919_v41, %s3909_s13 }
 0x1e6   : > { %v2622_v16 = vpop.permute.xlu0 %2621 }
 0x1e7   : > { %2713 = vst.msk [vmem:[#allocation3 + $0x14] sm:$0xf] %vm2707_vm11, %v2622_v16  ;;  %v2624_v32 = vpop.permute.xlu1 %2623 }
 0x1e8   : > { %2506 = vrot.lane.b32.xlu0 %v5914_v4, %s3910_s20  ;;  %2714 = vst.msk [vmem:[#allocation3 + $0x18] sm:$0xf] %vm2707_vm11, %v2624_v32  ;;  %v5931_v32 = vld [vmem:[#allocation41_spill] sm:$0xff] }
 0x1e9   : > { %2508 = vrot.lane.b32.xlu1 %v5917_v28, %s3910_s20 }
 0x1ea   : > { %v2626_v39 = vpop.permute.xlu0 %2625 }
 0x1eb   : > { %2715 = vst.msk [vmem:[#allocation3 + $0x1c] sm:$0xf] %vm2707_vm11, %v2626_v39  ;;  %v2070_v57 = vpop.permute.xlu1 %2069 }
 0x1ec   : > { %2510 = vrot.lane.b32.xlu0 %v5920_v53, %s3910_s20  ;;  %2158 = vst.msk [vmem:[#allocation3 + $0x20] sm:$0xf] %vm2149_vm3, %v2070_v57 }
 0x1ed   : > { %2512 = vrot.lane.b32.xlu1 %v5921_v35, %s3910_s20 }
 0x1ee   : > { %v2072_v10 = vpop.permute.xlu0 %2071  ;;  %v3870_v54 = vld [vmem:[#allocation3 + $0x10] sm:$0xff]  }
 0x1ef   : > { %2159 = vst.msk [vmem:[#allocation3 + $0x24] sm:$0xf] %vm2149_vm3, %v2072_v10  ;;  %3812 = vmatprep.mubr.msk.bf16.mxu0 %vm2872_vm12, %v3870_v54  ;;  %v2074_v43 = vpop.permute.xlu1 %2073 }
 0x1f0   : > { %2643 = vrot.lane.b32.xlu0 %v4847_v44, %s3911_s25  ;;  %2160 = vst.msk [vmem:[#allocation3 + $0x28] sm:$0xf] %vm2149_vm3, %v2074_v43 }
 0x1f1   : > { %2645 = vrot.lane.b32.xlu1 %v4857_v8, %s3911_s25  ;;  %v5922_v8 = vld [vmem:[#allocation32_spill] sm:$0xff] }
 0x1f2   : > { %v2076_v33 = vpop.permute.xlu0 %2075  ;;  %v3871_v36 = vld [vmem:[#allocation3 + $0x18] sm:$0xff]  }
 0x1f3   : > { %2161 = vst.msk [vmem:[#allocation3 + $0x2c] sm:$0xf] %vm2149_vm3, %v2076_v33  ;;  %3813 = vmatmul.mubr.msk.bf16.gmra.mxu0 %vm2872_vm12, %v3871_v36  ;;  %v2207_v38 = vpop.permute.xlu1 %2206 }
 0x1f4   : > { %2647 = vrot.lane.b32.xlu0 %v4862_v62, %s3911_s25  ;;  %2295 = vst.msk [vmem:[#allocation3 + $0x20] sm:$0xf] %vm2286_vm4, %v2207_v38 }
 0x1f5   : > { %2649 = vrot.lane.b32.xlu1 %v4872_v24, %s3911_s25 }
 0x1f6   : > { %v2209_v26 = vpop.permute.xlu0 %2208 }
 0x1f7   : > { %2296 = vst.msk [vmem:[#allocation3 + $0x24] sm:$0xf] %vm2286_vm4, %v2209_v26  ;;  %v2211_v44 = vpop.permute.xlu1 %2210  ;;  %v5932_v26 = vld [vmem:[#allocation42_spill] sm:$0xff] }
 0x1f8   : > { %1940 = vrot.lane.b32.xlu0 %v4496_v6, %s3906_s10  ;;  %2297 = vst.msk [vmem:[#allocation3 + $0x28] sm:$0xf] %vm2286_vm4, %v2211_v44  ;;  %v5923_v6 = vld [vmem:[#allocation33_spill] sm:$0xff] }
 0x1f9   : > { %1942 = vrot.lane.b32.xlu1 %v5919_v41, %s3906_s10 }
 0x1fa   : > { %v2213_v14 = vpop.permute.xlu0 %2212 }
 0x1fb   : > { %2298 = vst.msk [vmem:[#allocation3 + $0x2c] sm:$0xf] %vm2286_vm4, %v2213_v14  ;;  %v2338_v5 = vpop.permute.xlu1 %2337 }
 0x1fc   : > { %1944 = vrot.lane.b32.xlu0 %v5922_v8, %s3906_s10  ;;  %2426 = vst.msk [vmem:[#allocation3 + $0x20] sm:$0xf] %vm2417_vm5, %v2338_v5  ;;  %v5933_v5 = vld [vmem:[#allocation43_spill] sm:$0xff] }
 0x1fd   : > { %1946 = vrot.lane.b32.xlu1 %v5923_v6, %s3906_s10 }
 0x1fe   : > { %v2340_v3 = vpop.permute.xlu0 %2339 }
 0x1ff   : > { %2427 = vst.msk [vmem:[#allocation3 + $0x24] sm:$0xf] %vm2417_vm5, %v2340_v3  ;;  %v2342_v25 = vpop.permute.xlu1 %2341 }
 0x200   : > { %2093 = vrot.lane.b32.xlu0 %v5920_v53, %s3907_s11  ;;  %2428 = vst.msk [vmem:[#allocation3 + $0x28] sm:$0xf] %vm2417_vm5, %v2342_v25 }
 0x201   : > { %2095 = vrot.lane.b32.xlu1 %v5921_v35, %s3907_s11 }
 0x202   : > { %v2344_v13 = vpop.permute.xlu0 %2343 }
 0x203   : > { %2429 = vst.msk [vmem:[#allocation3 + $0x2c] sm:$0xf] %vm2417_vm5, %v2344_v13  ;;  %v2491_v50 = vpop.permute.xlu1 %2490 }
 0x204   : > { %2097 = vrot.lane.b32.xlu0 %v5924_v15, %s3907_s11  ;;  %2579 = vst.msk [vmem:[#allocation3 + $0x20] sm:$0xf] %vm2570_vm6, %v2491_v50 }
 0x205   : > { %2099 = vrot.lane.b32.xlu1 %v5925_v37, %s3907_s11 }
 0x206   : > { %v2493_v1 = vpop.permute.xlu0 %2492 }
 0x207   : > { %2580 = vst.msk [vmem:[#allocation3 + $0x24] sm:$0xf] %vm2570_vm6, %v2493_v1  ;;  %v2495_v4 = vpop.permute.xlu1 %2494 }
 0x208   : > { %2230 = vrot.lane.b32.xlu0 %v4862_v62, %s3908_s12  ;;  %2581 = vst.msk [vmem:[#allocation3 + $0x28] sm:$0xf] %vm2570_vm6, %v2495_v4 }
 0x209   : > { %2232 = vrot.lane.b32.xlu1 %v4872_v24, %s3908_s12 }
 0x20a   : > { %v2497_v60 = vpop.permute.xlu0 %2496 }
 0x20b   : > { %2582 = vst.msk [vmem:[#allocation3 + $0x2c] sm:$0xf] %vm2570_vm6, %v2497_v60  ;;  %v2628_v17 = vpop.permute.xlu1 %2627 }
 0x20c   : > { %2234 = vrot.lane.b32.xlu0 %v4877_v55, %s3908_s12  ;;  %2716 = vst.msk [vmem:[#allocation3 + $0x20] sm:$0xf] %vm2707_vm11, %v2628_v17 }
 0x20d   : > { %2236 = vrot.lane.b32.xlu1 %v4889_v58, %s3908_s12 }
 0x20e   : > { %v2630_v46 = vpop.permute.xlu0 %2629 }
 0x20f   : > { %2717 = vst.msk [vmem:[#allocation3 + $0x24] sm:$0xf] %vm2707_vm11, %v2630_v46  ;;  %v2632_v62 = vpop.permute.xlu1 %2631 }
 0x210   : > { %2361 = vrot.lane.b32.xlu0 %v5922_v8, %s3909_s13  ;;  %2718 = vst.msk [vmem:[#allocation3 + $0x28] sm:$0xf] %vm2707_vm11, %v2632_v62  ;;  %v5445_v8 = vld [vmem:[#allocation2 + $0xc0] sm:$0xf] }
 0x211   : > { %2363 = vrot.lane.b32.xlu1 %v5923_v6, %s3909_s13  ;;  %v5452_v6 = vld [vmem:[#allocation2 + $0xc4] sm:$0xf]  ;;  %v2030_v25 = vshrl.u32 %v5445_v8, 16  ;;  %v2033_v13 = vshll.u32 %v5445_v8, 16 }
 0x212   : > { %v2634_v61 = vpop.permute.xlu0 %2633  ;;  %v2043_v50 = vshrl.u32 %v5452_v6, 16 }
 0x213   : > { %2719 = vst.msk [vmem:[#allocation3 + $0x2c] sm:$0xf] %vm2707_vm11, %v2634_v61  ;;  %v2078_v24 = vpop.permute.xlu1 %2077  ;;  %v2035_v4 = vrot.slane %v2033_v13, 5  ;;  %v1054_v61 = vld [vmem:[#allocation2 + $0xc8] sm:$0x1] }
 0x214   : > { %2365 = vrot.lane.b32.xlu0 %v4580_v30, %s3909_s13  ;;  %2162 = vst.msk [vmem:[#allocation3 + $0x30] sm:$0xf] %vm2149_vm3, %v2078_v24  ;;  %v2045_v17 = vrot.slane %v2043_v50, 4 }
 0x215   : > { %2367 = vrot.lane.b32.xlu1 %v4584_v45, %s3909_s13 }
 0x216   : > { %v2080_v59 = vpop.permute.xlu0 %2079  ;;  %v3872_v49 = vld [vmem:[#allocation3 + $0x20] sm:$0xff]  }
 0x217   : > { %2163 = vst.msk [vmem:[#allocation3 + $0x34] sm:$0xf] %vm2149_vm3, %v2080_v59  ;;  %3816 = vmatprep.mubr.msk.bf16.mxu0 %vm2872_vm12, %v3872_v49  ;;  %v2082_v7 = vpop.permute.xlu1 %2081  ;;  %v2049_v49 = vshll.u32 %v1054_v61, 16 }
 0x218   : > { %2514 = vrot.lane.b32.xlu0 %v5924_v15, %s3910_s20  ;;  %2164 = vst.msk [vmem:[#allocation3 + $0x38] sm:$0xf] %vm2149_vm3, %v2082_v7 }
 0x219   : > { %2516 = vrot.lane.b32.xlu1 %v5925_v37, %s3910_s20  ;;  %v2032_v37 = vrot.slane %v2030_v25, 4 }
 0x21a   : > { %v2084_v19 = vpop.permute.xlu0 %2083  ;;  %v3873_v56 = vld [vmem:[#allocation3 + $0x28] sm:$0xff]  }
 0x21b   : > { %2165 = vst.msk [vmem:[#allocation3 + $0x3c] sm:$0xf] %vm2149_vm3, %v2084_v19  ;;  %3817 = vmatmul.mubr.msk.bf16.gmra.mxu0 %vm2872_vm12, %v3873_v56  ;;  %v2215_v28 = vpop.permute.xlu1 %2214  ;;  %v2036_v62 = vor.u32 %v2035_v4, %v2032_v37  ;;  %v2051_v56 = vrot.slane %v2049_v49, 5 }
 0x21c   : > { %2518 = vrot.lane.b32.xlu0 %v5926_v9, %s3910_s20  ;;  %2299 = vst.msk [vmem:[#allocation3 + $0x30] sm:$0xf] %vm2286_vm4, %v2215_v28 }
 0x21d   : > { %2520 = vrot.lane.b32.xlu1 %v5927_v63, %s3910_s20 }
 0x21e   : > { %v2217_v42 = vpop.permute.xlu0 %2216 }
 0x21f   : > { %2300 = vst.msk [vmem:[#allocation3 + $0x34] sm:$0xf] %vm2286_vm4, %v2217_v42  ;;  %v2219_v23 = vpop.permute.xlu1 %2218 }
 0x220   : > { %2651 = vrot.lane.b32.xlu0 %v4877_v55, %s3911_s25  ;;  %2301 = vst.msk [vmem:[#allocation3 + $0x38] sm:$0xf] %vm2286_vm4, %v2219_v23 }
 0x221   : > { %2653 = vrot.lane.b32.xlu1 %v4889_v58, %s3911_s25  ;;  %v5928_v58 = vld [vmem:[#allocation36_spill] sm:$0xff] }
 0x222   : > { %v2221_v12 = vpop.permute.xlu0 %2220 }
 0x223   : > { %2302 = vst.msk [vmem:[#allocation3 + $0x3c] sm:$0xf] %vm2286_vm4, %v2221_v12  ;;  %v2346_v21 = vpop.permute.xlu1 %2345  ;;  %v2185_v12 = vrot.slane %v5452_v6, 5 }
 0x224   : > { %2655 = vrot.lane.b32.xlu0 %v4894_v48, %s3911_s25  ;;  %2430 = vst.msk [vmem:[#allocation3 + $0x30] sm:$0xf] %vm2417_vm5, %v2346_v21 }
 0x225   : > { %2657 = vrot.lane.b32.xlu1 %v4904_v34, %s3911_s25 }
 0x226   : > { %v2348_v31 = vpop.permute.xlu0 %2347 }
 0x227   : > { %2431 = vst.msk [vmem:[#allocation3 + $0x34] sm:$0xf] %vm2417_vm5, %v2348_v31  ;;  %v2350_v55 = vpop.permute.xlu1 %2349  ;;  %v3567_v31 = vrot.slane %v5445_v8, 9 }
 0x228   : > { %1948 = vrot.lane.b32.xlu0 %v4580_v30, %s3906_s10  ;;  %2432 = vst.msk [vmem:[#allocation3 + $0x38] sm:$0xf] %vm2417_vm5, %v2350_v55  ;;  %v5929_v30 = vld [vmem:[#allocation38_spill] sm:$0xff] }
 0x229   : > { %1950 = vrot.lane.b32.xlu1 %v4584_v45, %s3906_s10  ;;  %v5930_v45 = vld [vmem:[#allocation40_spill] sm:$0xff] }
 0x22a   : > { %v2352_v22 = vpop.permute.xlu0 %2351 }
 0x22b   : > { %2433 = vst.msk [vmem:[#allocation3 + $0x3c] sm:$0xf] %vm2417_vm5, %v2352_v22  ;;  %v2499_v27 = vpop.permute.xlu1 %2498  ;;  %v5494_v22 = vld [vmem:[#allocation2 + $0xcc] sm:$0xf] }
 0x22c   : > { %1952 = vrot.lane.b32.xlu0 %v5928_v58, %s3906_s10  ;;  %2583 = vst.msk [vmem:[#allocation3 + $0x30] sm:$0xf] %vm2570_vm6, %v2499_v27  ;;  %v2188_v27 = vrot.slane %v1054_v61, 5  ;;  %v3568_v50 = vrot.slane %v5494_v22, 9 }
 0x22d   : > { %1954 = vrot.lane.b32.xlu1 %v5929_v30, %s3906_s10 }
 0x22e   : > { %v2501_v29 = vpop.permute.xlu0 %2500 }
 0x22f   : > { %2584 = vst.msk [vmem:[#allocation3 + $0x34] sm:$0xf] %vm2570_vm6, %v2501_v29  ;;  %v2503_v47 = vpop.permute.xlu1 %2502 }
 0x230   : > { %2101 = vrot.lane.b32.xlu0 %v5926_v9, %s3907_s11  ;;  %2585 = vst.msk [vmem:[#allocation3 + $0x38] sm:$0xf] %vm2570_vm6, %v2503_v47  ;;  %v2451_v47 = vshrl.u32 %v5494_v22, 16 }
 0x231   : > { %2103 = vrot.lane.b32.xlu1 %v5927_v63, %s3907_s11 }
 0x232   : > { %v2505_v51 = vpop.permute.xlu0 %2504 }
 0x233   : > { %2586 = vst.msk [vmem:[#allocation3 + $0x3c] sm:$0xf] %vm2570_vm6, %v2505_v51  ;;  %v2636_v16 = vpop.permute.xlu1 %2635  ;;  %v2454_v51 = vshll.u32 %v5494_v22, 16 }
 0x234   : > { %2105 = vrot.lane.b32.xlu0 %v5930_v45, %s3907_s11  ;;  %2720 = vst.msk [vmem:[#allocation3 + $0x30] sm:$0xf] %vm2707_vm11, %v2636_v16 }
 0x235   : > { %2107 = vrot.lane.b32.xlu1 %v5931_v32, %s3907_s11 }
 0x236   : > { %v2638_v41 = vpop.permute.xlu0 %2637 }
 0x237   : > { %2721 = vst.msk [vmem:[#allocation3 + $0x34] sm:$0xf] %vm2707_vm11, %v2638_v41  ;;  %v2640_v39 = vpop.permute.xlu1 %2639 }
 0x238   : > { %2238 = vrot.lane.b32.xlu0 %v4894_v48, %s3908_s12  ;;  %2722 = vst.msk [vmem:[#allocation3 + $0x38] sm:$0xf] %vm2707_vm11, %v2640_v39 }
 0x239   : > { %2240 = vrot.lane.b32.xlu1 %v4904_v34, %s3908_s12 }
 0x23a   : > { %v2642_v53 = vpop.permute.xlu0 %2641 }
 0x23b   : > { %2723 = vst.msk [vmem:[#allocation3 + $0x3c] sm:$0xf] %vm2707_vm11, %v2642_v53  ;;  %v1935_v57 = vpop.permute.xlu1 %1934 }
 0x23c   : > { %2242 = vrot.lane.b32.xlu0 %v4909_v2, %s3908_s12  ;;  %2014 = vst.msk [vmem:[#allocation3 + $0x44] sm:$0xf] %vm1996_vm2, %v1935_v57  ;;  %v2453_v57 = vrot.slane %v2451_v47, 4 }
 0x23d   : > { %2244 = vrot.lane.b32.xlu1 %v4921_v52, %s3908_s12 }
 0x23e   : > { %v3874_v10 = vld [vmem:[#allocation3 + $0x30] sm:$0xff]   ;;  %v1937_v54 = vpop.permute.xlu0 %1936 }
 0x23f   : > { %2015 = vst.msk [vmem:[#allocation3 + $0x48] sm:$0xf] %vm1996_vm2, %v1937_v54  ;;  %3820 = vmatprep.mubr.msk.bf16.mxu0 %vm2872_vm12, %v3874_v10  ;;  %v1939_v48 = vpop.permute.xlu1 %1938  ;;  %v2456_v10 = vrot.slane %v2454_v51, 5 }
 0x240   : > { %2369 = vrot.lane.b32.xlu0 %v5928_v58, %s3909_s13  ;;  %2016 = vst.msk [vmem:[#allocation3 + $0x4c] sm:$0xf] %vm1996_vm2, %v1939_v48  ;;  %v2187_v58 = vrot.slane %v2185_v12, 4 }
 0x241   : > { %2371 = vrot.lane.b32.xlu1 %v5929_v30, %s3909_s13  ;;  %v2186_v30 = vsel %vm4675_vm13, %v3567_v31, %v2185_v12 }
 0x242   : > { %v3875_v34 = vld [vmem:[#allocation3 + $0x38] sm:$0xff]   ;;  %v2086_v35 = vpop.permute.xlu0 %2085 }
 0x243   : > { %2166 = vst.msk [vmem:[#allocation3 + $0x40] sm:$0xf] %vm2149_vm3, %v2086_v35  ;;  %3821 = vmatmul.mubr.msk.bf16.gmra.mxu0 %vm2872_vm12, %v3875_v34  ;;  %v2088_v43 = vpop.permute.xlu1 %2087 }
 0x244   : > { %2373 = vrot.lane.b32.xlu0 %v4652_v0, %s3909_s13  ;;  %2167 = vst.msk [vmem:[#allocation3 + $0x44] sm:$0xf] %vm2149_vm3, %v2088_v43  ;;  %v2457_v43 = vor.u32 %v2456_v10, %v2453_v57 }
 0x245   : > { %2375 = vrot.lane.b32.xlu1 %v4662_v40, %s3909_s13 }
 0x246   : > { %v2090_v33 = vpop.permute.xlu0 %2089 }
 0x247   : > { %2168 = vst.msk [vmem:[#allocation3 + $0x48] sm:$0xf] %vm2149_vm3, %v2090_v33  ;;  %v2092_v36 = vpop.permute.xlu1 %2091  ;;  %v1057_v33 = vld [vmem:[#allocation2 + $0xd4] sm:$0x1] }
 0x248   : > { %2522 = vrot.lane.b32.xlu0 %v5930_v45, %s3910_s20  ;;  %2169 = vst.msk [vmem:[#allocation3 + $0x4c] sm:$0xf] %vm2149_vm3, %v2092_v36  ;;  %v5504_v45 = vld [vmem:[#allocation2 + $0xd0] sm:$0xf] }
 0x249   : > { %2524 = vrot.lane.b32.xlu1 %v5931_v32, %s3910_s20  ;;  %v2460_v41 = vshll.u32 %v5504_v45, 16  ;;  %v2464_v32 = vshrl.u32 %v5504_v45, 16 }
 0x24a   : > { %v2223_v38 = vpop.permute.xlu0 %2222 }
 0x24b   : > { %2303 = vst.msk [vmem:[#allocation3 + $0x40] sm:$0xf] %vm2286_vm4, %v2223_v38  ;;  %v2225_v44 = vpop.permute.xlu1 %2224  ;;  %v2462_v48 = vrot.slane %v2460_v41, 5 }
 0x24c   : > { %2526 = vrot.lane.b32.xlu0 %v5932_v26, %s3910_s20  ;;  %2304 = vst.msk [vmem:[#allocation3 + $0x44] sm:$0xf] %vm2286_vm4, %v2225_v44 }
 0x24d   : > { %2528 = vrot.lane.b32.xlu1 %v5933_v5, %s3910_s20 }
 0x24e   : > { %v2227_v14 = vpop.permute.xlu0 %2226 }
 0x24f   : > { %2305 = vst.msk [vmem:[#allocation3 + $0x48] sm:$0xf] %vm2286_vm4, %v2227_v14  ;;  %v2229_v3 = vpop.permute.xlu1 %2228  ;;  %v2458_v14 = vrot.slane %v2457_v43, 4 }
 0x250   : > { %2659 = vrot.lane.b32.xlu0 %v4909_v2, %s3911_s25  ;;  %2306 = vst.msk [vmem:[#allocation3 + $0x4c] sm:$0xf] %vm2286_vm4, %v2229_v3  ;;  %v2039_v2 = vshll.u32 %v5452_v6, 16 }
 0x251   : > { %2661 = vrot.lane.b32.xlu1 %v4921_v52, %s3911_s25  ;;  %v2463_v25 = vsel %vm4058_vm7, %v2458_v14, %v2462_v48 }
 0x252   : > { %v2354_v15 = vpop.permute.xlu0 %2353  ;;  %v2041_v52 = vrot.slane %v2039_v2, 5 }
 0x253   : > { %2434 = vst.msk [vmem:[#allocation3 + $0x40] sm:$0xf] %vm2417_vm5, %v2354_v15  ;;  %v2356_v1 = vpop.permute.xlu1 %2355  ;;  %v2606_v15 = vrot.slane %v5504_v45, 5 }
 0x254   : > { %2663 = vrot.lane.b32.xlu0 %v4926_v20, %s3911_s25  ;;  %2435 = vst.msk [vmem:[#allocation3 + $0x44] sm:$0xf] %vm2417_vm5, %v2356_v1  ;;  %v2046_v59 = vor.u32 %v2045_v17, %v2041_v52 }
 0x255   : > { %2665 = vrot.lane.b32.xlu1 %v4934_v18, %s3911_s25  ;;  %v2608_v4 = vrot.slane %v2606_v15, 4  ;;  %v2607_v17 = vsel %vm4675_vm13, %v3568_v50, %v2606_v15 }
 0x256   : > { %v2358_v60 = vpop.permute.xlu0 %2357 }
 0x257   : > { %2436 = vst.msk [vmem:[#allocation3 + $0x48] sm:$0xf] %vm2417_vm5, %v2358_v60  ;;  %v2360_v46 = vpop.permute.xlu1 %2359  ;;  %v2609_v60 = vrot.slane %v1057_v33, 5 }
 0x258   : > { %1956 = vrot.lane.b32.xlu0 %v4652_v0, %s3906_s10  ;;  %2437 = vst.msk [vmem:[#allocation3 + $0x4c] sm:$0xf] %vm2417_vm5, %v2360_v46  ;;  %v2037_v0 = vrot.slane %v2036_v62, 4 }
 0x259   : > { %1958 = vrot.lane.b32.xlu1 %v4662_v40, %s3906_s10  ;;  %v2047_v40 = vrot.slane %v2046_v59, 4  ;;  %v2610_v62 = vsel %vm4675_vm13, %v2608_v4, %v2609_v60 }
 0x25a   : > { %v2507_v24 = vpop.permute.xlu0 %2506  ;;  %v2042_v42 = vsel %vm4058_vm7, %v2037_v0, %v2041_v52 }
 0x25b   : > { %2587 = vst.msk [vmem:[#allocation3 + $0x40] sm:$0xf] %vm2570_vm6, %v2507_v24  ;;  %v2509_v7 = vpop.permute.xlu1 %2508  ;;  %v2052_v23 = vsel %vm4058_vm7, %v2047_v40, %v2051_v56 }
 0x25c   : > { %1960 = vrot.lane.b32.xlu0 %v5445_v8, %s3906_s10  ;;  %2588 = vst.msk [vmem:[#allocation3 + $0x44] sm:$0xf] %vm2570_vm6, %v2509_v7 }
 0x25d   : > { %1962 = vrot.lane.b32.xlu1 %v5452_v6, %s3906_s10 }
 0x25e   : > { %v2511_v19 = vpop.permute.xlu0 %2510 }
 0x25f   : > { %2589 = vst.msk [vmem:[#allocation3 + $0x48] sm:$0xf] %vm2570_vm6, %v2511_v19  ;;  %v2513_v9 = vpop.permute.xlu1 %2512 }
 0x260   : > { %2109 = vrot.lane.b32.xlu0 %v5932_v26, %s3907_s11  ;;  %2590 = vst.msk [vmem:[#allocation3 + $0x4c] sm:$0xf] %vm2570_vm6, %v2513_v9  ;;  %v2470_v26 = vshll.u32 %v1057_v33, 16 }
 0x261   : > { %2111 = vrot.lane.b32.xlu1 %v5933_v5, %s3907_s11 }
 0x262   : > { %v2644_v63 = vpop.permute.xlu0 %2643  ;;  %v2472_v3 = vrot.slane %v2470_v26, 5 }
 0x263   : > { %2724 = vst.msk [vmem:[#allocation3 + $0x40] sm:$0xf] %vm2707_vm11, %v2644_v63  ;;  %v2646_v21 = vpop.permute.xlu1 %2645 }
 0x264   : > { %2113 = vrot.lane.b32.xlu0 %v2042_v42, %s3907_s11  ;;  %2725 = vst.msk [vmem:[#allocation3 + $0x44] sm:$0xf] %vm2707_vm11, %v2646_v21 }
 0x265   : > { %2115 = vrot.lane.b32.xlu1 %v2052_v23, %s3907_s11 }
 0x266   : > { %v2648_v55 = vpop.permute.xlu0 %2647 }
 0x267   : > { %2726 = vst.msk [vmem:[#allocation3 + $0x48] sm:$0xf] %vm2707_vm11, %v2648_v55  ;;  %v2650_v29 = vpop.permute.xlu1 %2649 }
 0x268   : > { %2246 = vrot.lane.b32.xlu0 %v4926_v20, %s3908_s12  ;;  %2727 = vst.msk [vmem:[#allocation3 + $0x4c] sm:$0xf] %vm2707_vm11, %v2650_v29  ;;  %v2189_v20 = vsel %vm4675_vm13, %v2187_v58, %v2188_v27 }
 0x269   : > { %2248 = vrot.lane.b32.xlu1 %v4934_v18, %s3908_s12  ;;  %v2466_v18 = vrot.slane %v2464_v32, 4 }
 0x26a   : > { %v1941_v16 = vpop.permute.xlu0 %1940 }
 0x26b   : > { %2017 = vst.msk [vmem:[#allocation3 + $0x50] sm:$0xf] %vm1996_vm2, %v1941_v16  ;;  %v1943_v39 = vpop.permute.xlu1 %1942  ;;  %v3876_v53 = vld [vmem:[#allocation3 + $0x40] sm:$0xff]   ;;  %v2467_v38 = vor.u32 %v2466_v18, %v2462_v48 }
 0x26c   : > { %2250 = vrot.lane.b32.xlu0 %v2186_v30, %s3908_s12  ;;  %2018 = vst.msk [vmem:[#allocation3 + $0x54] sm:$0xf] %vm1996_vm2, %v1943_v39  ;;  %3824 = vmatprep.mubr.msk.bf16.mxu1 %vm2872_vm12, %v3876_v53 }
 0x26d   : > { %2252 = vrot.lane.b32.xlu1 %v2189_v20, %s3908_s12  ;;  %v2468_v5 = vrot.slane %v2467_v38, 4 }
 0x26e   : > { %v1945_v54 = vpop.permute.xlu0 %1944 }
 0x26f   : > { %2019 = vst.msk [vmem:[#allocation3 + $0x58] sm:$0xf] %vm1996_vm2, %v1945_v54  ;;  %v1947_v34 = vpop.permute.xlu1 %1946  ;;  %v3877_v35 = vld [vmem:[#allocation3 + $0x48] sm:$0xff]   ;;  %v2473_v2 = vsel %vm4058_vm7, %v2468_v5, %v2472_v3  ;;  %vm3246_vm7 = vcmask 31744  }
 0x270   : > { %2377 = vrot.lane.b32.xlu0 %v5445_v8, %s3909_s13  ;;  %2020 = vst.msk [vmem:[#allocation3 + $0x5c] sm:$0xf] %vm1996_vm2, %v1947_v34  ;;  %3825 = vmatmul.mubr.msk.bf16.vlgmr.msra.gmra.mxu1 %vm2872_vm12, %v3877_v35 }
 0x271   : > { %2379 = vrot.lane.b32.xlu1 %v5452_v6, %s3909_s13 }
 0x272   : > { %v2094_v36 = vpop.permute.xlu0 %2093 }
 0x273   : > { %2170 = vst.msk [vmem:[#allocation3 + $0x50] sm:$0xf] %vm2149_vm3, %v2094_v36  ;;  %v2096_v44 = vpop.permute.xlu1 %2095 }
 0x274   : > { %2381 = vrot.lane.b32.xlu0 %v5494_v22, %s3909_s13  ;;  %2171 = vst.msk [vmem:[#allocation3 + $0x54] sm:$0xf] %vm2149_vm3, %v2096_v44 }
 0x275   : > { %2383 = vrot.lane.b32.xlu1 %v5504_v45, %s3909_s13 }
 0x276   : > { %v2098_v8 = vpop.permute.xlu0 %2097 }
 0x277   : > { %2172 = vst.msk [vmem:[#allocation3 + $0x58] sm:$0xf] %vm2149_vm3, %v2098_v8  ;;  %v2100_v6 = vpop.permute.xlu1 %2099 }
 0x278   : > { %2530 = vrot.lane.b32.xlu0 %v2042_v42, %s3910_s20  ;;  %2173 = vst.msk [vmem:[#allocation3 + $0x5c] sm:$0xf] %vm2149_vm3, %v2100_v6 }
 0x279   : > { %2532 = vrot.lane.b32.xlu1 %v2052_v23, %s3910_s20 }
 0x27a   : > { %v2231_v13 = vpop.permute.xlu0 %2230 }
 0x27b   : > { %2307 = vst.msk [vmem:[#allocation3 + $0x50] sm:$0xf] %vm2286_vm4, %v2231_v13  ;;  %v2233_v1 = vpop.permute.xlu1 %2232 }
 0x27c   : > { %2534 = vrot.lane.b32.xlu0 %v2463_v25, %s3910_s20  ;;  %2308 = vst.msk [vmem:[#allocation3 + $0x54] sm:$0xf] %vm2286_vm4, %v2233_v1 }
 0x27d   : > { %2536 = vrot.lane.b32.xlu1 %v2473_v2, %s3910_s20 }
 0x27e   : > { %v2235_v37 = vpop.permute.xlu0 %2234 }
 0x27f   : > { %2309 = vst.msk [vmem:[#allocation3 + $0x58] sm:$0xf] %vm2286_vm4, %v2235_v37  ;;  %v2237_v52 = vpop.permute.xlu1 %2236 }
 0x280   : > { %2667 = vrot.lane.b32.xlu0 %v2186_v30, %s3911_s25  ;;  %2310 = vst.msk [vmem:[#allocation3 + $0x5c] sm:$0xf] %vm2286_vm4, %v2237_v52 }
 0x281   : > { %2669 = vrot.lane.b32.xlu1 %v2189_v20, %s3911_s25 }
 0x282   : > { %v2362_v46 = vpop.permute.xlu0 %2361 }
 0x283   : > { %2438 = vst.msk [vmem:[#allocation3 + $0x50] sm:$0xf] %vm2417_vm5, %v2362_v46  ;;  %v2364_v61 = vpop.permute.xlu1 %2363 }
 0x284   : > { %2671 = vrot.lane.b32.xlu0 %v2607_v17, %s3911_s25  ;;  %2439 = vst.msk [vmem:[#allocation3 + $0x54] sm:$0xf] %vm2417_vm5, %v2364_v61 }
 0x285   : > { %2673 = vrot.lane.b32.xlu1 %v2610_v62, %s3911_s25 }
 0x286   : > { %v2366_v24 = vpop.permute.xlu0 %2365 }
 0x287   : > { %2440 = vst.msk [vmem:[#allocation3 + $0x58] sm:$0xf] %vm2417_vm5, %v2366_v24  ;;  %v2368_v59 = vpop.permute.xlu1 %2367 }
 0x288   : > { %2441 = vst.msk [vmem:[#allocation3 + $0x5c] sm:$0xf] %vm2417_vm5, %v2368_v59 }
 0x28a   : > { %v2515_v49 = vpop.permute.xlu0 %2514 }
 0x28b   : > { %2591 = vst.msk [vmem:[#allocation3 + $0x50] sm:$0xf] %vm2570_vm6, %v2515_v49  ;;  %v3810_v11 = vpop.f32.mrf.mxu0  ;;  %v2517_v0 = vpop.permute.xlu1 %2516 }
 0x28c   : > { %v3674_v7 = vpack.c.bf16 %v3810_v11, %v3810_v11  ;;  %2592 = vst.msk [vmem:[#allocation3 + $0x54] sm:$0xf] %vm2570_vm6, %v2517_v0  ;;  %v3318_v23 = vmul.f32 %v3810_v11, %v3810_v11  ;;  %v3250_v29 = vsel %vm3246_vm7, %v3810_v11, 0.0 }
 0x28d   : > { %v2959_v19 = vpop.f32.mrf.mxu0 }
 0x28e   : > { %v2519_v40 = vpop.permute.xlu0 %2518  ;;  %3216 = vst.msk [vmem:[%s5565_s6 + $0x8] sm:$0xf] %vm237_vm0, %v3674_v7  ;;  %v3672_v56 = vpack.c.bf16 %v2959_v19, %v2959_v19  ;;  %v3316_v28 = vmul.f32 %v2959_v19, %v2959_v19  ;;  %v3247_v31 = vsel %vm3246_vm7, %v2959_v19, 0.0  ;;  %v3351_v32 = vsel %vm3246_vm7, %v3318_v23, 0.0 }
 0x28f   : > { %2593 = vst.msk [vmem:[#allocation3 + $0x58] sm:$0xf] %vm2570_vm6, %v2519_v40  ;;  %v3811_v9 = vpop.f32.mrf.mxu0  ;;  %v2521_v63 = vpop.permute.xlu1 %2520 }
 0x290   : > { %3214 = vst.msk [vmem:[%s5565_s6] sm:$0xf] %vm237_vm0, %v3672_v56  ;;  %v3675_v42 = vpack.c.bf16 %v3811_v9, %v3811_v9  ;;  %v3348_v30 = vsel %vm3246_vm7, %v3316_v28, 0.0  ;;  %v3319_v47 = vmul.f32 %v3811_v9, %v3811_v9  ;;  %v3252_v39 = vsel %vm3246_vm7, %v3811_v9, 0.0 }
 0x291   : > { %2594 = vst.msk [vmem:[#allocation3 + $0x5c] sm:$0xf] %vm2570_vm6, %v2521_v63  ;;  %v2962_v12 = vpop.f32.mrf.mxu0 }
 0x292   : > { %v2652_v21 = vpop.permute.xlu0 %2651  ;;  %3217 = vst.msk [vmem:[%s5565_s6 + $0xc] sm:$0xf] %vm237_vm0, %v3675_v42  ;;  %v3673_v55 = vpack.c.bf16 %v2962_v12, %v2962_v12  ;;  %v3248_v22 = vsel %vm3246_vm7, %v2962_v12, 0.0  ;;  %v3317_v58 = vmul.f32 %v2962_v12, %v2962_v12  ;;  %v3353_v10 = vsel %vm3246_vm7, %v3319_v47, 0.0 }
 0x293   : > { %2728 = vst.msk [vmem:[#allocation3 + $0x50] sm:$0xf] %vm2707_vm11, %v2652_v21  ;;  %v3249_v27 = vadd.f32 %v3248_v22, %v3247_v31  ;;  %v2654_v45 = vpop.permute.xlu1 %2653 }
 0x294   : > { %3215 = vst.msk [vmem:[%s5565_s6 + $0x4] sm:$0xf] %vm237_vm0, %v3673_v55  ;;  %v3349_v51 = vsel %vm3246_vm7, %v3317_v58, 0.0 }
 0x295   : > { %v3251_v16 = vadd.f32 %v3250_v29, %v3249_v27  ;;  %v3350_v20 = vadd.f32 %v3349_v51, %v3348_v30  ;;  %2729 = vst.msk [vmem:[#allocation3 + $0x54] sm:$0xf] %vm2707_vm11, %v2654_v45 }
 0x296   : > { %v2656_v41 = vpop.permute.xlu0 %2655 }
 0x297   : > { %2730 = vst.msk [vmem:[#allocation3 + $0x58] sm:$0xf] %vm2707_vm11, %v2656_v41  ;;  %v3352_v53 = vadd.f32 %v3351_v32, %v3350_v20  ;;  %v3253_v57 = vadd.f32 %v3252_v39, %v3251_v16  ;;  %v2658_v54 = vpop.permute.xlu1 %2657 }
 0x298   : > { %2731 = vst.msk [vmem:[#allocation3 + $0x5c] sm:$0xf] %vm2707_vm11, %v2658_v54 }
 0x299   : > { %v3354_v48 = vadd.f32 %v3353_v10, %v3352_v53 }
 0x29a   : > { %v1949_v18 = vpop.permute.xlu0 %1948 }
 0x29b   : > { %2021 = vst.msk [vmem:[#allocation3 + $0x60] sm:$0xf] %vm1996_vm2, %v1949_v18  ;;  %v1951_v34 = vpop.permute.xlu1 %1950 }
 0x29c   : > { %v3878_v35 = vld [vmem:[#allocation3 + $0x50] sm:$0xff]   ;;  %2022 = vst.msk [vmem:[#allocation3 + $0x64] sm:$0xf] %vm1996_vm2, %v1951_v34 }
 0x29d   : > { %3828 = vmatprep.mubr.msk.bf16.mxu1 %vm2872_vm12, %v3878_v35 }
 0x29e   : > { %v1953_v43 = vpop.permute.xlu0 %1952 }
 0x29f   : > { %2023 = vst.msk [vmem:[#allocation3 + $0x68] sm:$0xf] %vm1996_vm2, %v1953_v43  ;;  %v1955_v33 = vpop.permute.xlu1 %1954  ;;  %v3879_v36 = vld [vmem:[#allocation3 + $0x58] sm:$0xff]  }
 0x2a0   : > { %2024 = vst.msk [vmem:[#allocation3 + $0x6c] sm:$0xf] %vm1996_vm2, %v1955_v33  ;;  %3829 = vmatmul.mubr.msk.bf16.gmra.mxu1 %vm2872_vm12, %v3879_v36 }
 0x2a2   : > { %v2102_v38 = vpop.permute.xlu0 %2101 }
 0x2a3   : > { %2174 = vst.msk [vmem:[#allocation3 + $0x60] sm:$0xf] %vm2149_vm3, %v2102_v38  ;;  %v2104_v26 = vpop.permute.xlu1 %2103 }
 0x2a4   : > { %2175 = vst.msk [vmem:[#allocation3 + $0x64] sm:$0xf] %vm2149_vm3, %v2104_v26 }
 0x2a6   : > { %v2106_v44 = vpop.permute.xlu0 %2105 }
 0x2a7   : > { %2176 = vst.msk [vmem:[#allocation3 + $0x68] sm:$0xf] %vm2149_vm3, %v2106_v44  ;;  %v2108_v14 = vpop.permute.xlu1 %2107 }
 0x2a8   : > { %2177 = vst.msk [vmem:[#allocation3 + $0x6c] sm:$0xf] %vm2149_vm3, %v2108_v14 }
 0x2aa   : > { %v2239_v8 = vpop.permute.xlu0 %2238 }
 0x2ab   : > { %2311 = vst.msk [vmem:[#allocation3 + $0x60] sm:$0xf] %vm2286_vm4, %v2239_v8  ;;  %v2241_v5 = vpop.permute.xlu1 %2240 }
 0x2ac   : > { %2312 = vst.msk [vmem:[#allocation3 + $0x64] sm:$0xf] %vm2286_vm4, %v2241_v5 }
 0x2ae   : > { %v2243_v3 = vpop.permute.xlu0 %2242 }
 0x2af   : > { %2313 = vst.msk [vmem:[#allocation3 + $0x68] sm:$0xf] %vm2286_vm4, %v2243_v3  ;;  %v2245_v6 = vpop.permute.xlu1 %2244 }
 0x2b0   : > { %2314 = vst.msk [vmem:[#allocation3 + $0x6c] sm:$0xf] %vm2286_vm4, %v2245_v6 }
 0x2b2   : > { %v2370_v25 = vpop.permute.xlu0 %2369 }
 0x2b3   : > { %2442 = vst.msk [vmem:[#allocation3 + $0x60] sm:$0xf] %vm2417_vm5, %v2370_v25  ;;  %v3814_v13 = vpop.f32.mrf.mxu0  ;;  %v2372_v2 = vpop.permute.xlu1 %2371 }
 0x2b4   : > { %v3678_v15 = vpack.c.bf16 %v3814_v13, %v3814_v13  ;;  %2443 = vst.msk [vmem:[#allocation3 + $0x64] sm:$0xf] %vm2417_vm5, %v2372_v2  ;;  %v3322_v11 = vmul.f32 %v3814_v13, %v3814_v13  ;;  %v3258_v56 = vsel %vm3246_vm7, %v3814_v13, 0.0 }
 0x2b5   : > { %v2975_v50 = vpop.f32.mrf.mxu0 }
 0x2b6   : > { %v2374_v1 = vpop.permute.xlu0 %2373  ;;  %3220 = vst.msk [vmem:[%s5565_s6 + $0x18] sm:$0xf] %vm237_vm0, %v3678_v15  ;;  %v3676_v37 = vpack.c.bf16 %v2975_v50, %v2975_v50  ;;  %v3254_v4 = vsel %vm3246_vm7, %v2975_v50, 0.0  ;;  %v3320_v60 = vmul.f32 %v2975_v50, %v2975_v50  ;;  %v3359_v21 = vsel %vm3246_vm7, %v3322_v11, 0.0 }
 0x2b7   : > { %2444 = vst.msk [vmem:[#allocation3 + $0x68] sm:$0xf] %vm2417_vm5, %v2374_v1  ;;  %v3255_v52 = vadd.f32 %v3254_v4, %v3253_v57  ;;  %v3815_v17 = vpop.f32.mrf.mxu0  ;;  %v2376_v61 = vpop.permute.xlu1 %2375 }
 0x2b8   : > { %3218 = vst.msk [vmem:[%s5565_s6 + $0x10] sm:$0xf] %vm237_vm0, %v3676_v37  ;;  %v3355_v46 = vsel %vm3246_vm7, %v3320_v60, 0.0  ;;  %v3679_v62 = vpack.c.bf16 %v3815_v17, %v3815_v17  ;;  %v3323_v9 = vmul.f32 %v3815_v17, %v3815_v17  ;;  %v3260_v31 = vsel %vm3246_vm7, %v3815_v17, 0.0 }
 0x2b9   : > { %v3356_v24 = vadd.f32 %v3355_v46, %v3354_v48  ;;  %2445 = vst.msk [vmem:[#allocation3 + $0x6c] sm:$0xf] %vm2417_vm5, %v2376_v61  ;;  %v2978_v59 = vpop.f32.mrf.mxu0 }
 0x2ba   : > { %v2523_v49 = vpop.permute.xlu0 %2522  ;;  %3221 = vst.msk [vmem:[%s5565_s6 + $0x1c] sm:$0xf] %vm237_vm0, %v3679_v62  ;;  %v3677_v7 = vpack.c.bf16 %v2978_v59, %v2978_v59  ;;  %v3256_v0 = vsel %vm3246_vm7, %v2978_v59, 0.0  ;;  %v3321_v19 = vmul.f32 %v2978_v59, %v2978_v59  ;;  %v3361_v58 = vsel %vm3246_vm7, %v3323_v9, 0.0 }
 0x2bb   : > { %2595 = vst.msk [vmem:[#allocation3 + $0x60] sm:$0xf] %vm2570_vm6, %v2523_v49  ;;  %v3257_v40 = vadd.f32 %v3256_v0, %v3255_v52  ;;  %v2525_v42 = vpop.permute.xlu1 %2524 }
 0x2bc   : > { %3219 = vst.msk [vmem:[%s5565_s6 + $0x14] sm:$0xf] %vm237_vm0, %v3677_v7  ;;  %v3357_v28 = vsel %vm3246_vm7, %v3321_v19, 0.0 }
 0x2bd   : > { %v3259_v63 = vadd.f32 %v3258_v56, %v3257_v40  ;;  %v3358_v23 = vadd.f32 %v3357_v28, %v3356_v24  ;;  %2596 = vst.msk [vmem:[#allocation3 + $0x64] sm:$0xf] %vm2570_vm6, %v2525_v42 }
 0x2be   : > { %v2527_v12 = vpop.permute.xlu0 %2526 }
 0x2bf   : > { %2597 = vst.msk [vmem:[#allocation3 + $0x68] sm:$0xf] %vm2570_vm6, %v2527_v12  ;;  %v3360_v55 = vadd.f32 %v3359_v21, %v3358_v23  ;;  %v3261_v22 = vadd.f32 %v3260_v31, %v3259_v63  ;;  %v2529_v27 = vpop.permute.xlu1 %2528 }
 0x2c0   : > { %2598 = vst.msk [vmem:[#allocation3 + $0x6c] sm:$0xf] %vm2570_vm6, %v2529_v27 }
 0x2c1   : > { %v3362_v30 = vadd.f32 %v3361_v58, %v3360_v55 }
 0x2c2   : > { %v2660_v29 = vpop.permute.xlu0 %2659 }
 0x2c3   : > { %2732 = vst.msk [vmem:[#allocation3 + $0x60] sm:$0xf] %vm2707_vm11, %v2660_v29  ;;  %v2662_v47 = vpop.permute.xlu1 %2661 }
 0x2c4   : > { %2733 = vst.msk [vmem:[#allocation3 + $0x64] sm:$0xf] %vm2707_vm11, %v2662_v47 }
 0x2c6   : > { %v2664_v51 = vpop.permute.xlu0 %2663 }
 0x2c7   : > { %2734 = vst.msk [vmem:[#allocation3 + $0x68] sm:$0xf] %vm2707_vm11, %v2664_v51  ;;  %v2666_v45 = vpop.permute.xlu1 %2665 }
 0x2c8   : > { %2735 = vst.msk [vmem:[#allocation3 + $0x6c] sm:$0xf] %vm2707_vm11, %v2666_v45 }
 0x2ca   : > { %v1957_v16 = vpop.permute.xlu0 %1956 }
 0x2cb   : > { %2025 = vst.msk [vmem:[#allocation3 + $0x70] sm:$0xf] %vm1996_vm2, %v1957_v16  ;;  %v1959_v20 = vpop.permute.xlu1 %1958  ;;  %v3880_v41 = vld [vmem:[#allocation3 + $0x60] sm:$0xff]  }
 0x2cc   : > { %2026 = vst.msk [vmem:[#allocation3 + $0x74] sm:$0xf] %vm1996_vm2, %v1959_v20  ;;  %3832 = vmatprep.mubr.msk.bf16.mxu1 %vm2872_vm12, %v3880_v41 }
 0x2ce   : > { %v1961_v32 = vpop.permute.xlu0 %1960 }
 0x2cf   : > { %2027 = vst.msk [vmem:[#allocation3 + $0x78] sm:$0xf] %vm1996_vm2, %v1961_v32  ;;  %v1963_v39 = vpop.permute.xlu1 %1962  ;;  %v3881_v53 = vld [vmem:[#allocation3 + $0x68] sm:$0xff]  }
 0x2d0   : > { %2028 = vst.msk [vmem:[#allocation3 + $0x7c] sm:$0xf] %vm1996_vm2, %v1963_v39  ;;  %3833 = vmatmul.mubr.msk.bf16.gmra.mxu1 %vm2872_vm12, %v3881_v53 }
 0x2d2   : > { %v2110_v57 = vpop.permute.xlu0 %2109 }
 0x2d3   : > { %2178 = vst.msk [vmem:[#allocation3 + $0x70] sm:$0xf] %vm2149_vm3, %v2110_v57  ;;  %v2112_v10 = vpop.permute.xlu1 %2111 }
 0x2d4   : > { %2179 = vst.msk [vmem:[#allocation3 + $0x74] sm:$0xf] %vm2149_vm3, %v2112_v10 }
 0x2d6   : > { %v2114_v54 = vpop.permute.xlu0 %2113 }
 0x2d7   : > { %2180 = vst.msk [vmem:[#allocation3 + $0x78] sm:$0xf] %vm2149_vm3, %v2114_v54  ;;  %v2116_v18 = vpop.permute.xlu1 %2115 }
 0x2d8   : > { %2181 = vst.msk [vmem:[#allocation3 + $0x7c] sm:$0xf] %vm2149_vm3, %v2116_v18 }
 0x2da   : > { %v2247_v48 = vpop.permute.xlu0 %2246 }
 0x2db   : > { %2315 = vst.msk [vmem:[#allocation3 + $0x70] sm:$0xf] %vm2286_vm4, %v2247_v48  ;;  %v3818_v34 = vpop.f32.mrf.mxu0  ;;  %v2249_v43 = vpop.permute.xlu1 %2248 }
 0x2dc   : > { %v3682_v35 = vpack.c.bf16 %v3818_v34, %v3818_v34  ;;  %2316 = vst.msk [vmem:[#allocation3 + $0x74] sm:$0xf] %vm2286_vm4, %v2249_v43  ;;  %v3326_v2 = vmul.f32 %v3818_v34, %v3818_v34  ;;  %v3266_v60 = vsel %vm3246_vm7, %v3818_v34, 0.0 }
 0x2dd   : > { %v2991_v33 = vpop.f32.mrf.mxu0 }
 0x2de   : > { %v2251_v36 = vpop.permute.xlu0 %2250  ;;  %3224 = vst.msk [vmem:[%s5565_s6 + $0x28] sm:$0xf] %vm237_vm0, %v3682_v35  ;;  %v3680_v38 = vpack.c.bf16 %v2991_v33, %v2991_v33  ;;  %v3262_v26 = vsel %vm3246_vm7, %v2991_v33, 0.0  ;;  %v3324_v44 = vmul.f32 %v2991_v33, %v2991_v33  ;;  %v3367_v59 = vsel %vm3246_vm7, %v3326_v2, 0.0 }
 0x2df   : > { %2317 = vst.msk [vmem:[#allocation3 + $0x78] sm:$0xf] %vm2286_vm4, %v2251_v36  ;;  %v3263_v14 = vadd.f32 %v3262_v26, %v3261_v22  ;;  %v3819_v8 = vpop.f32.mrf.mxu0  ;;  %v2253_v6 = vpop.permute.xlu1 %2252 }
 0x2e0   : > { %3222 = vst.msk [vmem:[%s5565_s6 + $0x20] sm:$0xf] %vm237_vm0, %v3680_v38  ;;  %v3363_v5 = vsel %vm3246_vm7, %v3324_v44, 0.0  ;;  %v3683_v3 = vpack.c.bf16 %v3819_v8, %v3819_v8  ;;  %v3327_v52 = vmul.f32 %v3819_v8, %v3819_v8  ;;  %v3268_v49 = vsel %vm3246_vm7, %v3819_v8, 0.0 }
 0x2e1   : > { %v3364_v25 = vadd.f32 %v3363_v5, %v3362_v30  ;;  %2318 = vst.msk [vmem:[#allocation3 + $0x7c] sm:$0xf] %vm2286_vm4, %v2253_v6  ;;  %v2994_v13 = vpop.f32.mrf.mxu0 }
 0x2e2   : > { %v2378_v15 = vpop.permute.xlu0 %2377  ;;  %3225 = vst.msk [vmem:[%s5565_s6 + $0x2c] sm:$0xf] %vm237_vm0, %v3683_v3  ;;  %v3681_v50 = vpack.c.bf16 %v2994_v13, %v2994_v13  ;;  %v3264_v1 = vsel %vm3246_vm7, %v2994_v13, 0.0  ;;  %v3325_v37 = vmul.f32 %v2994_v13, %v2994_v13  ;;  %v3369_v0 = vsel %vm3246_vm7, %v3327_v52, 0.0 }
 0x2e3   : > { %2446 = vst.msk [vmem:[#allocation3 + $0x70] sm:$0xf] %vm2417_vm5, %v2378_v15  ;;  %v3265_v4 = vadd.f32 %v3264_v1, %v3263_v14  ;;  %v2380_v46 = vpop.permute.xlu1 %2379 }
 0x2e4   : > { %3223 = vst.msk [vmem:[%s5565_s6 + $0x24] sm:$0xf] %vm237_vm0, %v3681_v50  ;;  %v3365_v17 = vsel %vm3246_vm7, %v3325_v37, 0.0 }
 0x2e5   : > { %v3267_v62 = vadd.f32 %v3266_v60, %v3265_v4  ;;  %v3366_v61 = vadd.f32 %v3365_v17, %v3364_v25  ;;  %2447 = vst.msk [vmem:[#allocation3 + $0x74] sm:$0xf] %vm2417_vm5, %v2380_v46 }
 0x2e6   : > { %v2382_v24 = vpop.permute.xlu0 %2381 }
 0x2e7   : > { %2448 = vst.msk [vmem:[#allocation3 + $0x78] sm:$0xf] %vm2417_vm5, %v2382_v24  ;;  %v3368_v11 = vadd.f32 %v3367_v59, %v3366_v61  ;;  %v3269_v7 = vadd.f32 %v3268_v49, %v3267_v62  ;;  %v2384_v19 = vpop.permute.xlu1 %2383 }
 0x2e8   : > { %2449 = vst.msk [vmem:[#allocation3 + $0x7c] sm:$0xf] %vm2417_vm5, %v2384_v19 }
 0x2e9   : > { %v3370_v56 = vadd.f32 %v3369_v0, %v3368_v11 }
 0x2ea   : > { %v2531_v40 = vpop.permute.xlu0 %2530 }
 0x2eb   : > { %2599 = vst.msk [vmem:[#allocation3 + $0x70] sm:$0xf] %vm2570_vm6, %v2531_v40  ;;  %v2533_v9 = vpop.permute.xlu1 %2532 }
 0x2ec   : > { %2600 = vst.msk [vmem:[#allocation3 + $0x74] sm:$0xf] %vm2570_vm6, %v2533_v9 }
 0x2ee   : > { %v2535_v28 = vpop.permute.xlu0 %2534 }
 0x2ef   : > { %2601 = vst.msk [vmem:[#allocation3 + $0x78] sm:$0xf] %vm2570_vm6, %v2535_v28  ;;  %v2537_v42 = vpop.permute.xlu1 %2536 }
 0x2f0   : > { %2602 = vst.msk [vmem:[#allocation3 + $0x7c] sm:$0xf] %vm2570_vm6, %v2537_v42 }
 0x2f2   : > { %v2668_v63 = vpop.permute.xlu0 %2667 }
 0x2f3   : > { %2736 = vst.msk [vmem:[#allocation3 + $0x70] sm:$0xf] %vm2707_vm11, %v2668_v63  ;;  %v2670_v23 = vpop.permute.xlu1 %2669 }
 0x2f4   : > { %2737 = vst.msk [vmem:[#allocation3 + $0x74] sm:$0xf] %vm2707_vm11, %v2670_v23 }
 0x2f6   : > { %v2672_v12 = vpop.permute.xlu0 %2671 }
 0x2f7   : > { %2738 = vst.msk [vmem:[#allocation3 + $0x78] sm:$0xf] %vm2707_vm11, %v2672_v12  ;;  %v2674_v21 = vpop.permute.xlu1 %2673 }
 0x2f8   : > { %2739 = vst.msk [vmem:[#allocation3 + $0x7c] sm:$0xf] %vm2707_vm11, %v2674_v21 }
 0x2fb   : > { %v3882_v31 = vld [vmem:[#allocation3 + $0x70] sm:$0xff]  }
 0x2fc   : > { %3836 = vmatprep.mubr.msk.bf16.mxu1 %vm2872_vm12, %v3882_v31 }
 0x2ff   : > { %v3883_v55 = vld [vmem:[#allocation3 + $0x78] sm:$0xff]  }
 0x300   : > { %3837 = vmatmul.mubr.msk.bf16.gmra.mxu1 %vm2872_vm12, %v3883_v55 }
 0x303   : > { %v3822_v22 = vpop.f32.mrf.mxu0 }
 0x304   : > { %v3686_v58 = vpack.c.bf16 %v3822_v22, %v3822_v22  ;;  %v3330_v39 = vmul.f32 %v3822_v22, %v3822_v22  ;;  %v3274_v18 = vsel %vm3246_vm7, %v3822_v22, 0.0 }
 0x305   : > { %v3007_v27 = vpop.f32.mrf.mxu0 }
 0x306   : > { %3228 = vst.msk [vmem:[%s5565_s6 + $0x38] sm:$0xf] %vm237_vm0, %v3686_v58  ;;  %v3684_v29 = vpack.c.bf16 %v3007_v27, %v3007_v27  ;;  %v3270_v30 = vsel %vm3246_vm7, %v3007_v27, 0.0  ;;  %v3328_v47 = vmul.f32 %v3007_v27, %v3007_v27  ;;  %v3375_v33 = vsel %vm3246_vm7, %v3330_v39, 0.0 }
 0x307   : > { %v3271_v51 = vadd.f32 %v3270_v30, %v3269_v7  ;;  %v3823_v45 = vpop.f32.mrf.mxu0 }
 0x308   : > { %3226 = vst.msk [vmem:[%s5565_s6 + $0x30] sm:$0xf] %vm237_vm0, %v3684_v29  ;;  %v3371_v16 = vsel %vm3246_vm7, %v3328_v47, 0.0  ;;  %v3687_v20 = vpack.c.bf16 %v3823_v45, %v3823_v45  ;;  %v3331_v48 = vmul.f32 %v3823_v45, %v3823_v45  ;;  %v3276_v36 = vsel %vm3246_vm7, %v3823_v45, 0.0 }
 0x309   : > { %v3372_v41 = vadd.f32 %v3371_v16, %v3370_v56  ;;  %v3010_v32 = vpop.f32.mrf.mxu0 }
 0x30a   : > { %3229 = vst.msk [vmem:[%s5565_s6 + $0x3c] sm:$0xf] %vm237_vm0, %v3687_v20  ;;  %v3685_v53 = vpack.c.bf16 %v3010_v32, %v3010_v32  ;;  %v3272_v57 = vsel %vm3246_vm7, %v3010_v32, 0.0  ;;  %v3329_v10 = vmul.f32 %v3010_v32, %v3010_v32  ;;  %v3377_v44 = vsel %vm3246_vm7, %v3331_v48, 0.0 }
 0x30b   : > { %v3273_v54 = vadd.f32 %v3272_v57, %v3271_v51 }
 0x30c   : > { %3227 = vst.msk [vmem:[%s5565_s6 + $0x34] sm:$0xf] %vm237_vm0, %v3685_v53  ;;  %v3373_v34 = vsel %vm3246_vm7, %v3329_v10, 0.0 }
 0x30d   : > { %v3275_v35 = vadd.f32 %v3274_v18, %v3273_v54  ;;  %v3374_v43 = vadd.f32 %v3373_v34, %v3372_v41 }
 0x30f   : > { %v3376_v38 = vadd.f32 %v3375_v33, %v3374_v43  ;;  %v3277_v26 = vadd.f32 %v3276_v36, %v3275_v35 }
 0x311   : > { %v3378_v14 = vadd.f32 %v3377_v44, %v3376_v38 }
 0x330   : > { %v3826_v8 = vpop.f32.mrf.mxu1 }
 0x331   : > { %v3690_v5 = vpack.c.bf16 %v3826_v8, %v3826_v8  ;;  %v3334_v60 = vmul.f32 %v3826_v8, %v3826_v8  ;;  %v3282_v61 = vsel %vm3246_vm7, %v3826_v8, 0.0 }
 0x332   : > { %v3023_v3 = vpop.f32.mrf.mxu1 }
 0x333   : > { %3232 = vst.msk [vmem:[%s5565_s6 + $0x48] sm:$0xf] %vm237_vm0, %v3690_v5  ;;  %v3688_v6 = vpack.c.bf16 %v3023_v3, %v3023_v3  ;;  %v3278_v25 = vsel %vm3246_vm7, %v3023_v3, 0.0  ;;  %v3332_v13 = vmul.f32 %v3023_v3, %v3023_v3  ;;  %v3383_v7 = vsel %vm3246_vm7, %v3334_v60, 0.0 }
 0x334   : > { %v3279_v15 = vadd.f32 %v3278_v25, %v3277_v26  ;;  %v3827_v2 = vpop.f32.mrf.mxu1 }
 0x335   : > { %3230 = vst.msk [vmem:[%s5565_s6 + $0x40] sm:$0xf] %vm237_vm0, %v3688_v6  ;;  %v3379_v50 = vsel %vm3246_vm7, %v3332_v13, 0.0  ;;  %v3691_v1 = vpack.c.bf16 %v3827_v2, %v3827_v2  ;;  %v3335_v24 = vmul.f32 %v3827_v2, %v3827_v2  ;;  %v3284_v0 = vsel %vm3246_vm7, %v3827_v2, 0.0 }
 0x336   : > { %v3380_v37 = vadd.f32 %v3379_v50, %v3378_v14  ;;  %v3026_v4 = vpop.f32.mrf.mxu1 }
 0x337   : > { %3233 = vst.msk [vmem:[%s5565_s6 + $0x4c] sm:$0xf] %vm237_vm0, %v3691_v1  ;;  %v3689_v52 = vpack.c.bf16 %v3026_v4, %v3026_v4  ;;  %v3280_v17 = vsel %vm3246_vm7, %v3026_v4, 0.0  ;;  %v3333_v46 = vmul.f32 %v3026_v4, %v3026_v4  ;;  %v3385_v56 = vsel %vm3246_vm7, %v3335_v24, 0.0 }
 0x338   : > { %v3281_v62 = vadd.f32 %v3280_v17, %v3279_v15 }
 0x339   : > { %3231 = vst.msk [vmem:[%s5565_s6 + $0x44] sm:$0xf] %vm237_vm0, %v3689_v52  ;;  %v3381_v59 = vsel %vm3246_vm7, %v3333_v46, 0.0 }
 0x33a   : > { %v3283_v49 = vadd.f32 %v3282_v61, %v3281_v62  ;;  %v3382_v11 = vadd.f32 %v3381_v59, %v3380_v37 }
 0x33c   : > { %v3384_v19 = vadd.f32 %v3383_v7, %v3382_v11  ;;  %v3285_v40 = vadd.f32 %v3284_v0, %v3283_v49 }
 0x33e   : > { %v3386_v9 = vadd.f32 %v3385_v56, %v3384_v19 }
 0x360   : > { %v3830_v28 = vpop.f32.mrf.mxu1 }
 0x361   : > { %v3694_v42 = vpack.c.bf16 %v3830_v28, %v3830_v28  ;;  %v3338_v30 = vmul.f32 %v3830_v28, %v3830_v28  ;;  %v3290_v20 = vsel %vm3246_vm7, %v3830_v28, 0.0 }
 0x362   : > { %v3039_v63 = vpop.f32.mrf.mxu1 }
 0x363   : > { %3236 = vst.msk [vmem:[%s5565_s6 + $0x58] sm:$0xf] %vm237_vm0, %v3694_v42  ;;  %v3692_v23 = vpack.c.bf16 %v3039_v63, %v3039_v63  ;;  %v3286_v12 = vsel %vm3246_vm7, %v3039_v63, 0.0  ;;  %v3336_v21 = vmul.f32 %v3039_v63, %v3039_v63  ;;  %v3391_v57 = vsel %vm3246_vm7, %v3338_v30, 0.0 }
 0x364   : > { %v3287_v31 = vadd.f32 %v3286_v12, %v3285_v40  ;;  %v3831_v55 = vpop.f32.mrf.mxu1 }
 0x365   : > { %3234 = vst.msk [vmem:[%s5565_s6 + $0x50] sm:$0xf] %vm237_vm0, %v3692_v23  ;;  %v3387_v22 = vsel %vm3246_vm7, %v3336_v21, 0.0  ;;  %v3695_v58 = vpack.c.bf16 %v3831_v55, %v3831_v55  ;;  %v3339_v41 = vmul.f32 %v3831_v55, %v3831_v55  ;;  %v3292_v10 = vsel %vm3246_vm7, %v3831_v55, 0.0 }
 0x366   : > { %v3388_v27 = vadd.f32 %v3387_v22, %v3386_v9  ;;  %v3042_v29 = vpop.f32.mrf.mxu1 }
 0x367   : > { %3237 = vst.msk [vmem:[%s5565_s6 + $0x5c] sm:$0xf] %vm237_vm0, %v3695_v58  ;;  %v3693_v47 = vpack.c.bf16 %v3042_v29, %v3042_v29  ;;  %v3288_v51 = vsel %vm3246_vm7, %v3042_v29, 0.0  ;;  %v3337_v45 = vmul.f32 %v3042_v29, %v3042_v29  ;;  %v3393_v48 = vsel %vm3246_vm7, %v3339_v41, 0.0 }
 0x368   : > { %v3289_v16 = vadd.f32 %v3288_v51, %v3287_v31 }
 0x369   : > { %3235 = vst.msk [vmem:[%s5565_s6 + $0x54] sm:$0xf] %vm237_vm0, %v3693_v47  ;;  %v3389_v32 = vsel %vm3246_vm7, %v3337_v45, 0.0 }
 0x36a   : > { %v3291_v39 = vadd.f32 %v3290_v20, %v3289_v16  ;;  %v3390_v53 = vadd.f32 %v3389_v32, %v3388_v27 }
 0x36c   : > { %v3392_v54 = vadd.f32 %v3391_v57, %v3390_v53  ;;  %v3293_v18 = vadd.f32 %v3292_v10, %v3291_v39 }
 0x36e   : > { %v3394_v34 = vadd.f32 %v3393_v48, %v3392_v54 }
 0x390   : > { %v3834_v35 = vpop.f32.mrf.mxu1 }
 0x391   : > { %v3698_v43 = vpack.c.bf16 %v3834_v35, %v3834_v35  ;;  %v3342_v1 = vmul.f32 %v3834_v35, %v3834_v35  ;;  %v3298_v4 = vsel %vm3246_vm7, %v3834_v35, 0.0 }
 0x392   : > { %v3055_v33 = vpop.f32.mrf.mxu1 }
 0x393   : > { %3240 = vst.msk [vmem:[%s5565_s6 + $0x68] sm:$0xf] %vm237_vm0, %v3698_v43  ;;  %v3696_v36 = vpack.c.bf16 %v3055_v33, %v3055_v33  ;;  %v3340_v8 = vmul.f32 %v3055_v33, %v3055_v33  ;;  %v3294_v5 = vsel %vm3246_vm7, %v3055_v33, 0.0  ;;  %v3399_v17 = vsel %vm3246_vm7, %v3342_v1, 0.0 }
 0x394   : > { %v3835_v38 = vpop.f32.mrf.mxu1  ;;  %v3295_v13 = vadd.f32 %v3294_v5, %v3293_v18 }
 0x395   : > { %3238 = vst.msk [vmem:[%s5565_s6 + $0x60] sm:$0xf] %vm237_vm0, %v3696_v36  ;;  %v3699_v26 = vpack.c.bf16 %v3835_v38, %v3835_v38  ;;  %v3395_v6 = vsel %vm3246_vm7, %v3340_v8, 0.0  ;;  %v3343_v46 = vmul.f32 %v3835_v38, %v3835_v38  ;;  %v3300_v59 = vsel %vm3246_vm7, %v3835_v38, 0.0 }
 0x396   : > { %v3058_v44 = vpop.f32.mrf.mxu1  ;;  %v3396_v2 = vadd.f32 %v3395_v6, %v3394_v34 }
 0x397   : > { %3241 = vst.msk [vmem:[%s5565_s6 + $0x6c] sm:$0xf] %vm237_vm0, %v3699_v26  ;;  %v3697_v14 = vpack.c.bf16 %v3058_v44, %v3058_v44  ;;  %v3341_v3 = vmul.f32 %v3058_v44, %v3058_v44  ;;  %v3296_v25 = vsel %vm3246_vm7, %v3058_v44, 0.0  ;;  %v3401_v40 = vsel %vm3246_vm7, %v3343_v46, 0.0 }
 0x398   : > { %v3297_v50 = vadd.f32 %v3296_v25, %v3295_v13 }
 0x399   : > { %3239 = vst.msk [vmem:[%s5565_s6 + $0x64] sm:$0xf] %vm237_vm0, %v3697_v14  ;;  %v3397_v15 = vsel %vm3246_vm7, %v3341_v3, 0.0 }
 0x39a   : > { %v3398_v37 = vadd.f32 %v3397_v15, %v3396_v2  ;;  %v3299_v60 = vadd.f32 %v3298_v4, %v3297_v50 }
 0x39c   : > { %v3400_v61 = vadd.f32 %v3399_v17, %v3398_v37  ;;  %v3301_v0 = vadd.f32 %v3300_v59, %v3299_v60 }
 0x39e   : > { %v3402_v42 = vadd.f32 %v3401_v40, %v3400_v61 }
 0x3c0   : > { %v3838_v52 = vpop.f32.mrf.mxu1 }
 0x3c1   : > { %v3702_v62 = vpack.c.bf16 %v3838_v52, %v3838_v52  ;;  %v3346_v23 = vmul.f32 %v3838_v52, %v3838_v52  ;;  %v3306_v58 = vsel %vm3246_vm7, %v3838_v52, 0.0 }
 0x3c2   : > { %v3071_v24 = vpop.f32.mrf.mxu1 }
 0x3c3   : > { %3244 = vst.msk [vmem:[%s5565_s6 + $0x78] sm:$0xf] %vm237_vm0, %v3702_v62  ;;  %v3700_v49 = vpack.c.bf16 %v3071_v24, %v3071_v24  ;;  %v3302_v11 = vsel %vm3246_vm7, %v3071_v24, 0.0  ;;  %v3344_v7 = vmul.f32 %v3071_v24, %v3071_v24  ;;  %v3407_v51 = vsel %vm3246_vm7, %v3346_v23, 0.0 }
 0x3c4   : > { %v3839_v19 = vpop.f32.mrf.mxu1  ;;  %v3303_v28 = vadd.f32 %v3302_v11, %v3301_v0 }
 0x3c5   : > { %3242 = vst.msk [vmem:[%s5565_s6 + $0x70] sm:$0xf] %vm237_vm0, %v3700_v49  ;;  %v3403_v56 = vsel %vm3246_vm7, %v3344_v7, 0.0  ;;  %v3703_v9 = vpack.c.bf16 %v3839_v19, %v3839_v19  ;;  %v3347_v27 = vmul.f32 %v3839_v19, %v3839_v19  ;;  %v3308_v45 = vsel %vm3246_vm7, %v3839_v19, 0.0 }
 0x3c6   : > { %v3074_v63 = vpop.f32.mrf.mxu1  ;;  %v3404_v55 = vadd.f32 %v3403_v56, %v3402_v42 }
 0x3c7   : > { %3245 = vst.msk [vmem:[%s5565_s6 + $0x7c] sm:$0xf] %vm237_vm0, %v3703_v9  ;;  %v3701_v12 = vpack.c.bf16 %v3074_v63, %v3074_v63  ;;  %v3304_v21 = vsel %vm3246_vm7, %v3074_v63, 0.0  ;;  %v3345_v31 = vmul.f32 %v3074_v63, %v3074_v63  ;;  %v3409_v41 = vsel %vm3246_vm7, %v3347_v27, 0.0 }
 0x3c8   : > { %v3305_v22 = vadd.f32 %v3304_v21, %v3303_v28 }
 0x3c9   : > { %3243 = vst.msk [vmem:[%s5565_s6 + $0x74] sm:$0xf] %vm237_vm0, %v3701_v12  ;;  %v3405_v29 = vsel %vm3246_vm7, %v3345_v31, 0.0  ;;  %vm3417_vm0 = vcmask 1040384  }
 0x3ca   : > { %v3307_v30 = vadd.f32 %v3306_v58, %v3305_v22  ;;  %v3406_v47 = vadd.f32 %v3405_v29, %v3404_v55 }
 0x3cc   : > { %v3309_v16 = vadd.f32 %v3308_v45, %v3307_v30  ;;  %v3408_v20 = vadd.f32 %v3407_v51, %v3406_v47 }
 0x3ce   : > { %v3310_v32 = vrot.slane %v3309_v16, 4  ;;  %v3410_v39 = vadd.f32 %v3409_v41, %v3408_v20 }
 0x3d0   : > { %v3311_v53 = vadd.f32 %v3310_v32, %v3309_v16  ;;  %v3411_v57 = vrot.slane %v3410_v39, 4 }
 0x3d2   : > { %v3312_v10 = vrot.slane %v3311_v53, 2  ;;  %v3412_v54 = vadd.f32 %v3411_v57, %v3410_v39 }
 0x3d4   : > { %v3313_v18 = vadd.f32 %v3312_v10, %v3311_v53  ;;  %v3413_v48 = vrot.slane %v3412_v54, 2 }
 0x3d6   : > { %v3314_v34 = vrot.slane %v3313_v18, 1  ;;  %v3414_v35 = vadd.f32 %v3413_v48, %v3412_v54 }
 0x3d8   : > { %v3415_v43 = vrot.slane %v3414_v35, 1  ;;  %v3315_v33 = vadd.f32 %v3314_v34, %v3313_v18 }
 0x3da   : > { %v3416_v36 = vadd.f32 %v3415_v43, %v3414_v35 }
 0x3dc   : > { %v3418_v38 = vsel %vm3417_vm0, %v3315_v33, %v3416_v36 }
 0x3dd   : > { %3420 = vst.msk [vmem:[%s235_s9] sm:$0x3] %vm3419_vm8, %v3418_v38 }
 0x3de PF: > { %s16_s18 = sadd.s32 1, %s3901_s18  }
 0x3df   : > { %p13_p4 = scmp.ge.s32.totalorder %s16_s18, 4  }
 0x3e1   :  { %15 = sbr.rel (!%p13_p4) target bundleno = 1 (0x1), region = 79 }

</bundles_post_ra>
